<compile_context>
chip_gen: v6e
topology: v6e:2x2x1
jax: 0.10.0
libtpu: 0.0.40
codegen_flags: <defaults>
</compile_context>

<pallas_src>
import functools

import jax
import jax.numpy as jnp
from jax.experimental import pallas as pl
from jax.experimental.pallas import tpu as pltpu

EPS = 1e-5
STEM_C = 8
STAGE_CHANNELS = (8, 16, 32, 64)
STAGE_BLOCKS = (3, 4, 6, 3)          # ResNet34 block counts
FC_H1, FC_H2, EMB = 2048, 512, 8     # head: Linear->BN->ReLU->Linear->Dropout->PReLU->Linear


def _round_up(x, m):
    return (x + m - 1) // m * m


# ---------------------------------------------------------------------------
# Pallas kernels
# ---------------------------------------------------------------------------
def _conv_gemm_kernel(*refs, act, has_identity):
    """out = act( (Wt @ patches) * scale + shift [+ identity] )  -- lane dim = B*Ho*Wo."""
    if has_identity:
        w_ref, p_ref, s_ref, b_ref, id_ref, o_ref = refs
    else:
        w_ref, p_ref, s_ref, b_ref, o_ref = refs
        id_ref = None
    y = jnp.dot(w_ref[...], p_ref[...], preferred_element_type=jnp.float32)
    y = y * s_ref[...] + b_ref[...]                     # per-Cout scale/shift (sublane bcast)
    if id_ref is not None:
        y = y + id_ref[...].astype(jnp.float32)         # fused residual add
    if act == "relu":
        y = jnp.maximum(y, 0.0)
    o_ref[...] = y.astype(o_ref.dtype)


def conv_gemm(wt, patches, scale, shift, identity=None, act="none", tn=512):
    """wt: (Cout, K) bf16; patches: (K, M) bf16; scale/shift: (Cout, 1) f32.

    Full-dim K and Cout blocks (no K-accumulation axis); grid only over lane tiles.
    """
    Cout, K = wt.shape
    K2, M = patches.shape
    assert K == K2
    if M % tn != 0:
        tn = M                                           # full-dim lane block for small M
    grid = (M // tn,)

    in_specs = [
        pl.BlockSpec((Cout, K), lambda j: (0, 0)),
        pl.BlockSpec((K, tn), lambda j: (0, j)),
        pl.BlockSpec((Cout, 1), lambda j: (0, 0)),
        pl.BlockSpec((Cout, 1), lambda j: (0, 0)),
    ]
    args = [wt, patches, scale, shift]
    if identity is not None:
        in_specs.append(pl.BlockSpec((Cout, tn), lambda j: (0, j)))
        args.append(identity)

    return pl.pallas_call(
        functools.partial(_conv_gemm_kernel, act=act,
                          has_identity=identity is not None),
        out_shape=jax.ShapeDtypeStruct((Cout, M), jnp.bfloat16),
        grid_spec=pltpu.PrefetchScalarGridSpec(
            num_scalar_prefetch=0,
            grid=grid,
            in_specs=in_specs,
            out_specs=pl.BlockSpec((Cout, tn), lambda j: (0, j)),
        ),
        compiler_params=pltpu.CompilerParams(
            dimension_semantics=("parallel",)),
    )(*args)


def _fc_gemm_kernel(x_ref, w_ref, s_ref, b_ref, a_ref, o_ref, *, act):
    """out = act( (x @ w) * scale + shift );  act in {none, relu, prelu(scalar a)}."""
    y = jnp.dot(x_ref[...], w_ref[...], preferred_element_type=jnp.float32)
    y = y * s_ref[...] + b_ref[...]
    if act == "relu":
        y = jnp.maximum(y, 0.0)
    elif act == "prelu":
        a = a_ref[...]                                   # (1,1) broadcast -- fused PReLU
        y = jnp.where(y >= 0.0, y, a * y)
    o_ref[...] = y.astype(o_ref.dtype)


def fc_gemm(x, w, scale, shift, alpha, act="none", tn=256):
    """x: (M, K); w: (K, N) bf16; scale/shift: (1, N) f32; alpha: (1,1) f32."""
    M, K = x.shape
    K2, N = w.shape
    assert K == K2
    if N % tn != 0:
        tn = N
    grid = (N // tn,)

    return pl.pallas_call(
        functools.partial(_fc_gemm_kernel, act=act),
        out_shape=jax.ShapeDtypeStruct((M, N), jnp.float32),
        grid_spec=pltpu.PrefetchScalarGridSpec(
            num_scalar_prefetch=0,
            grid=grid,
            in_specs=[
                pl.BlockSpec((M, K), lambda j: (0, 0)),
                pl.BlockSpec((K, tn), lambda j: (0, j)),
                pl.BlockSpec((1, tn), lambda j: (0, j)),
                pl.BlockSpec((1, tn), lambda j: (0, j)),
                pl.BlockSpec((1, 1), lambda j: (0, 0)),
            ],
            out_specs=pl.BlockSpec((M, tn), lambda j: (0, j)),
        ),
        compiler_params=pltpu.CompilerParams(
            dimension_semantics=("parallel",)),
    )(x.astype(jnp.bfloat16), w, scale, shift, alpha)


# ---------------------------------------------------------------------------
# Conv = bf16 im2col (XLA glue, transposed layout) + Pallas GEMM with fused epilogue
# ---------------------------------------------------------------------------
def conv_bn_act(x, cp, stride, pad, act, identity=None):
    """x: (Cin, B, H, W) bf16; cp: prepared conv params; returns (Cout, B, Ho, Wo) bf16."""
    Cin, B, H, W = x.shape
    k = cp["k"]
    Cout, Kpad = cp["wt"].shape
    Ho = (H + 2 * pad - k) // stride + 1
    Wo = (W + 2 * pad - k) // stride + 1
    x = x.astype(jnp.bfloat16)
    xp = jnp.pad(x, ((0, 0), (0, 0), (pad, pad), (pad, pad))) if pad else x

    taps = []
    for i in range(k):
        for j in range(k):
            taps.append(xp[:, :, i:i + stride * (Ho - 1) + 1:stride,
                           j:j + stride * (Wo - 1) + 1:stride])
    K = k * k * Cin
    if Kpad > K:  # zero rows to match the (once-padded) weight's K -- contributes 0
        taps.append(jnp.zeros((Kpad - K, B, Ho, Wo), jnp.bfloat16))
    patches = jnp.concatenate(taps, axis=0).reshape(Kpad, B * Ho * Wo)

    out = conv_gemm(cp["wt"], patches, cp["scale"], cp["shift"],
                    identity=identity, act=act)
    return out.reshape(Cout, B, Ho, Wo)


def maxpool_3x3_s2(x):
    """MaxPool2d(kernel=3, stride=2, padding=1) on (C, B, H, W).

    Elementwise max over 9 shifted views; left to XLA fusion (no 9x materialization,
    no cross-sublane reduce) per perf review.
    """
    C, B, H, W = x.shape
    Ho = (H + 2 - 3) // 2 + 1
    Wo = (W + 2 - 3) // 2 + 1
    xp = jnp.pad(x, ((0, 0), (0, 0), (1, 1), (1, 1)), constant_values=-jnp.inf)
    out = None
    for i in range(3):
        for j in range(3):
            win = xp[:, :, i:i + 2 * (Ho - 1) + 1:2, j:j + 2 * (Wo - 1) + 1:2]
            out = win if out is None else jnp.maximum(out, win)
    return out


def basic_block(x, bp, stride):
    """ResNet BasicBlock with the residual add + final ReLU fused into conv2's GEMM."""
    out = conv_bn_act(x, bp["conv1"], stride, 1, "relu")
    if "down" in bp:
        idn = conv_bn_act(x, bp["down"], stride, 0, "none")
    else:
        idn = x
    Cout, B, Ho, Wo = out.shape
    identity_flat = idn.reshape(Cout, B * Ho * Wo)
    out = conv_bn_act(out, bp["conv2"], 1, 1, "relu", identity=identity_flat)
    return out


# ---------------------------------------------------------------------------
# Model
# ---------------------------------------------------------------------------
def forward_once(params, x_nchw):
    # NCHW -> (C, B, H, W): channels on sublanes, batch*spatial on lanes (lane-dense GEMM N)
    x = jnp.transpose(x_nchw, (1, 0, 2, 3)).astype(jnp.bfloat16)
    x = conv_bn_act(x, params["stem"], 2, 3, "relu")
    x = maxpool_3x3_s2(x)
    for si, blocks in enumerate(params["stages"]):
        for bi, bp in enumerate(blocks):
            stride = 2 if (si > 0 and bi == 0) else 1
            x = basic_block(x, bp, stride)

    # Adaptive avgpool to (1,1) + flatten: tiny reduce, left to XLA (per perf review).
    feat = jnp.mean(x.astype(jnp.float32), axis=(2, 3))   # (C, B)
    flat = jnp.transpose(feat, (1, 0))                    # (B, C)

    fc = params["fc"]
    # Linear(C, 2048) + BatchNorm1d(2048) (eval, folded) + ReLU   -> fused epilogue
    h = fc_gemm(flat, fc["w1"], fc["s1"], fc["sh1"], fc["alpha"], act="relu")
    # Linear(2048, 512) + Dropout(0.2) [eval: identity] + PReLU(1) -> fused epilogue
    h = fc_gemm(h, fc["w2"], fc["s2"], fc["sh2"], fc["alpha"], act="prelu")
    # Linear(512, 8)
    out = fc_gemm(h, fc["w3"], fc["s3"], fc["sh3"], fc["alpha"], act="none")
    return out


def siamese_forward(params, input1, input2):
    # Shared weights -> run both branches as one batched pass (perf review #8).
    b = input1.shape[0]
    x = jnp.concatenate([input1, input2], axis=0)
    out = forward_once(params, x)
    return out[:b], out[b:]


# ---------------------------------------------------------------------------
# Parameters: raw (PyTorch-like) init  +  one-time prep (fold BN, transpose, cast bf16)
# ---------------------------------------------------------------------------
def init_params(key):
    keys = iter(jax.random.split(key, 256))

    def nrm(shape, scale):
        return scale * jax.random.normal(next(keys), shape, jnp.float32)

    def conv_bn_p(cin, cout, k):
        fan_in = cin * k * k
        return dict(
            w=nrm((k, k, cin, cout), (2.0 / fan_in) ** 0.5),
            gamma=1.0 + 0.05 * jax.random.normal(next(keys), (cout,), jnp.float32),
            beta=0.05 * jax.random.normal(next(keys), (cout,), jnp.float32),
            mean=0.05 * jax.random.normal(next(keys), (cout,), jnp.float32),
            var=jnp.abs(1.0 + 0.05 * jax.random.normal(next(keys), (cout,), jnp.float32)),
        )

    params = {"stem": conv_bn_p(3, STEM_C, 7), "stages": []}
    cin = STEM_C
    for si, (cout, nblocks) in enumerate(zip(STAGE_CHANNELS, STAGE_BLOCKS)):
        blocks = []
        for bi in range(nblocks):
            stride = 2 if (si > 0 and bi == 0) else 1
            bp = {"conv1": conv_bn_p(cin, cout, 3), "conv2": conv_bn_p(cout, cout, 3)}
            if stride != 1 or cin != cout:
                bp["down"] = conv_bn_p(cin, cout, 1)
            blocks.append(bp)
            cin = cout
        params["stages"].append(blocks)

    # TODO(synk): prod(config.RES34_960x720_SHAPE) unknown; with the adaptive-pool
    # path the flattened feature dim is simply the final channel count.
    feat_dim = STAGE_CHANNELS[-1]
    params["fc"] = dict(
        w1=nrm((feat_dim, FC_H1), feat_dim ** -0.5),
        b1=nrm((FC_H1,), 0.05),
        bn_gamma=1.0 + 0.05 * jax.random.normal(next(keys), (FC_H1,), jnp.float32),
        bn_beta=0.05 * jax.random.normal(next(keys), (FC_H1,), jnp.float32),
        bn_mean=0.05 * jax.random.normal(next(keys), (FC_H1,), jnp.float32),
        bn_var=jnp.abs(1.0 + 0.05 * jax.random.normal(next(keys), (FC_H1,), jnp.float32)),
        w2=nrm((FC_H1, FC_H2), FC_H1 ** -0.5),
        b2=nrm((FC_H2,), 0.05),
        w3=nrm((FC_H2, EMB), FC_H2 ** -0.5),
        b3=nrm((EMB,), 0.05),
        prelu_a=jnp.array([0.25], jnp.float32),   # nn.PReLU(1) default init
    )
    return params


def _prep_conv(p):
    """Fold BN, transpose weight to (Cout, K), pad K to a multiple of 16, cast bf16."""
    w = p["w"]                               # (k, k, Cin, Cout)
    k, _, cin, cout = w.shape
    scale = p["gamma"] / jnp.sqrt(p["var"] + EPS)
    shift = p["beta"] - p["mean"] * scale
    wt = jnp.transpose(w, (3, 0, 1, 2)).reshape(cout, k * k * cin)
    K = k * k * cin
    Kpad = _round_up(K, 16)
    if Kpad > K:
        wt = jnp.concatenate([wt, jnp.zeros((cout, Kpad - K), wt.dtype)], axis=1)
    return dict(k=k,
                wt=wt.astype(jnp.bfloat16),
                scale=scale.reshape(cout, 1).astype(jnp.float32),
                shift=shift.reshape(cout, 1).astype(jnp.float32))


def prepare_params(raw):
    prep = {"stem": _prep_conv(raw["stem"]), "stages": []}
    for blocks in raw["stages"]:
        pblocks = []
        for bp in blocks:
            pb = {"conv1": _prep_conv(bp["conv1"]), "conv2": _prep_conv(bp["conv2"])}
            if "down" in bp:
                pb["down"] = _prep_conv(bp["down"])
            pblocks.append(pb)
        prep["stages"].append(pblocks)

    fc = raw["fc"]
    s1 = fc["bn_gamma"] / jnp.sqrt(fc["bn_var"] + EPS)
    sh1 = fc["bn_beta"] + (fc["b1"] - fc["bn_mean"]) * s1
    prep["fc"] = dict(
        w1=fc["w1"].astype(jnp.bfloat16),
        s1=s1.reshape(1, FC_H1).astype(jnp.float32),
        sh1=sh1.reshape(1, FC_H1).astype(jnp.float32),
        w2=fc["w2"].astype(jnp.bfloat16),
        s2=jnp.ones((1, FC_H2), jnp.float32),
        sh2=fc["b2"].reshape(1, FC_H2).astype(jnp.float32),
        w3=fc["w3"].astype(jnp.bfloat16),
        s3=jnp.ones((1, EMB), jnp.float32),
        sh3=fc["b3"].reshape(1, EMB).astype(jnp.float32),
        alpha=fc["prelu_a"].reshape(1, 1).astype(jnp.float32),
    )
    return prep


if __name__ == "__main__":
    key = jax.random.PRNGKey(0)
    pkey, k1, k2 = jax.random.split(key, 3)
    raw_params = init_params(pkey)
    params = prepare_params(raw_params)     # BN fold / transpose / bf16 cast: once, offline

    x1 = jax.random.normal(k1, (2, 3, 64, 64), jnp.float32)   # NCHW, like PyTorch
    x2 = jax.random.normal(k2, (2, 3, 64, 64), jnp.float32)

    fwd = jax.jit(lambda a, b: siamese_forward(params, a, b))
    o1, o2 = fwd(x1, x2)
    jax.block_until_ready((o1, o2))

    assert o1.shape == (2, EMB) and o2.shape == (2, EMB)
    assert o1.dtype == jnp.float32 and o2.dtype == jnp.float32
    assert bool(jnp.all(jnp.isfinite(o1))) and bool(jnp.all(jnp.isfinite(o2)))
    print("KERNEL_OK")
</pallas_src>

<mosaic_0001>
module attributes {stable_mosaic.version = 11 : i64} {
  func.func @_conv_gemm_kernel(%arg0: i32, %arg1: memref<8x160xbf16, #tpu.memory_space<vmem>>, %arg2: memref<160x512xbf16, #tpu.memory_space<vmem>>, %arg3: memref<8x1xf32, #tpu.memory_space<vmem>>, %arg4: memref<8x1xf32, #tpu.memory_space<vmem>>, %arg5: memref<8x512xbf16, #tpu.memory_space<vmem>>) attributes {dimension_semantics = [#tpu.dimension_semantics<parallel>], iteration_bounds = array<i64: 8>, scalar_prefetch = 0 : i64, scratch_operands = 0 : i64, tpu.core_type = #tpu.core_type<tc>, window_params = [{pipeline_mode = #tpu.pipeline_mode<synchronous>, transform_indices = @transform_0, window_bounds = array<i64: 8, 160>}, {transform_indices = @transform_1, window_bounds = array<i64: 160, 512>}, {pipeline_mode = #tpu.pipeline_mode<synchronous>, transform_indices = @transform_2, window_bounds = array<i64: 8, 1>}, {pipeline_mode = #tpu.pipeline_mode<synchronous>, transform_indices = @transform_3, window_bounds = array<i64: 8, 1>}, {transform_indices = @transform_4, window_bounds = array<i64: 8, 512>}]} {
    %c0 = arith.constant 0 : index
    %c0_0 = arith.constant 0 : index
    %0 = vector.load %arg1[%c0, %c0_0] : memref<8x160xbf16, #tpu.memory_space<vmem>>, vector<8x160xbf16>
    %c0_1 = arith.constant 0 : index
    %c0_2 = arith.constant 0 : index
    %1 = vector.load %arg2[%c0_1, %c0_2] : memref<160x512xbf16, #tpu.memory_space<vmem>>, vector<160x512xbf16>
    %cst = arith.constant dense<0.000000e+00> : vector<8x512xf32>
    %2 = tpu.matmul %0, %1, %cst {dimension_numbers = #tpu.dot_dimension_numbers<[1], [0], [0], [1], [0, 0, 1, 1], [], []>} : vector<8x160xbf16>, vector<160x512xbf16>, vector<8x512xf32> -> vector<8x512xf32>
    %c0_3 = arith.constant 0 : index
    %c0_4 = arith.constant 0 : index
    %3 = vector.load %arg3[%c0_3, %c0_4] : memref<8x1xf32, #tpu.memory_space<vmem>>, vector<8x1xf32>
    %4 = vector.broadcast %3 : vector<8x1xf32> to vector<8x512xf32>
    %5 = arith.mulf %2, %4 : vector<8x512xf32>
    %c0_5 = arith.constant 0 : index
    %c0_6 = arith.constant 0 : index
    %6 = vector.load %arg4[%c0_5, %c0_6] : memref<8x1xf32, #tpu.memory_space<vmem>>, vector<8x1xf32>
    %7 = vector.broadcast %6 : vector<8x1xf32> to vector<8x512xf32>
    %8 = arith.addf %5, %7 : vector<8x512xf32>
    %cst_7 = arith.constant 0.000000e+00 : f32
    %9 = vector.broadcast %cst_7 : f32 to vector<8x512xf32>
    %10 = arith.maximumf %8, %9 : vector<8x512xf32>
    %11 = arith.truncf %10 : vector<8x512xf32> to vector<8x512xbf16>
    %c0_8 = arith.constant 0 : index
    %c0_9 = arith.constant 0 : index
    %12 = vector.load %arg5[%c0_8, %c0_9] : memref<8x512xbf16, #tpu.memory_space<vmem>>, vector<8x512xbf16>
    tpu.vector_store %arg5[%c0_8, %c0_9], %11 {strides = array<i32>} : memref<8x512xbf16, #tpu.memory_space<vmem>>, vector<8x512xbf16>,
    return
  }
  func.func @transform_0(%arg0: i32) -> (i32, i32) {
    %c0_i32 = arith.constant 0 : i32
    %c0_i32_0 = arith.constant 0 : i32
    %c0_i32_1 = arith.constant 0 : i32
    return %c0_i32, %c0_i32_0 : i32, i32
  }
  func.func @transform_1(%arg0: i32) -> (i32, i32) {
    %c0_i32 = arith.constant 0 : i32
    %c0_i32_0 = arith.constant 0 : i32
    return %c0_i32, %arg0 : i32, i32
  }
  func.func @transform_2(%arg0: i32) -> (i32, i32) {
    %c0_i32 = arith.constant 0 : i32
    %c0_i32_0 = arith.constant 0 : i32
    %c0_i32_1 = arith.constant 0 : i32
    return %c0_i32, %c0_i32_0 : i32, i32
  }
  func.func @transform_3(%arg0: i32) -> (i32, i32) {
    %c0_i32 = arith.constant 0 : i32
    %c0_i32_0 = arith.constant 0 : i32
    %c0_i32_1 = arith.constant 0 : i32
    return %c0_i32, %c0_i32_0 : i32, i32
  }
  func.func @transform_4(%arg0: i32) -> (i32, i32) {
    %c0_i32 = arith.constant 0 : i32
    %c0_i32_0 = arith.constant 0 : i32
    return %c0_i32, %arg0 : i32, i32
  }
}

module attributes {stable_mosaic.version = 11 : i64} {
  func.func @_conv_gemm_kernel(%arg0: i32, %arg1: memref<8x80xbf16, #tpu.memory_space<vmem>>, %arg2: memref<80x512xbf16, #tpu.memory_space<vmem>>, %arg3: memref<8x1xf32, #tpu.memory_space<vmem>>, %arg4: memref<8x1xf32, #tpu.memory_space<vmem>>, %arg5: memref<8x512xbf16, #tpu.memory_space<vmem>>) attributes {dimension_semantics = [#tpu.dimension_semantics<parallel>], iteration_bounds = array<i64: 2>, scalar_prefetch = 0 : i64, scratch_operands = 0 : i64, tpu.core_type = #tpu.core_type<tc>, window_params = [{pipeline_mode = #tpu.pipeline_mode<synchronous>, transform_indices = @transform_0, window_bounds = array<i64: 8, 80>}, {transform_indices = @transform_1, window_bounds = array<i64: 80, 512>}, {pipeline_mode = #tpu.pipeline_mode<synchronous>, transform_indices = @transform_2, window_bounds = array<i64: 8, 1>}, {pipeline_mode = #tpu.pipeline_mode<synchronous>, transform_indices = @transform_3, window_bounds = array<i64: 8, 1>}, {transform_indices = @transform_4, window_bounds = array<i64: 8, 512>}]} {
    %c0 = arith.constant 0 : index
    %c0_0 = arith.constant 0 : index
    %0 = vector.load %arg1[%c0, %c0_0] : memref<8x80xbf16, #tpu.memory_space<vmem>>, vector<8x80xbf16>
    %c0_1 = arith.constant 0 : index
    %c0_2 = arith.constant 0 : index
    %1 = vector.load %arg2[%c0_1, %c0_2] : memref<80x512xbf16, #tpu.memory_space<vmem>>, vector<80x512xbf16>
    %cst = arith.constant dense<0.000000e+00> : vector<8x512xf32>
    %2 = tpu.matmul %0, %1, %cst {dimension_numbers = #tpu.dot_dimension_numbers<[1], [0], [0], [1], [0, 0, 1, 1], [], []>} : vector<8x80xbf16>, vector<80x512xbf16>, vector<8x512xf32> -> vector<8x512xf32>
    %c0_3 = arith.constant 0 : index
    %c0_4 = arith.constant 0 : index
    %3 = vector.load %arg3[%c0_3, %c0_4] : memref<8x1xf32, #tpu.memory_space<vmem>>, vector<8x1xf32>
    %4 = vector.broadcast %3 : vector<8x1xf32> to vector<8x512xf32>
    %5 = arith.mulf %2, %4 : vector<8x512xf32>
    %c0_5 = arith.constant 0 : index
    %c0_6 = arith.constant 0 : index
    %6 = vector.load %arg4[%c0_5, %c0_6] : memref<8x1xf32, #tpu.memory_space<vmem>>, vector<8x1xf32>
    %7 = vector.broadcast %6 : vector<8x1xf32> to vector<8x512xf32>
    %8 = arith.addf %5, %7 : vector<8x512xf32>
    %cst_7 = arith.constant 0.000000e+00 : f32
    %9 = vector.broadcast %cst_7 : f32 to vector<8x512xf32>
    %10 = arith.maximumf %8, %9 : vector<8x512xf32>
    %11 = arith.truncf %10 : vector<8x512xf32> to vector<8x512xbf16>
    %c0_8 = arith.constant 0 : index
    %c0_9 = arith.constant 0 : index
    %12 = vector.load %arg5[%c0_8, %c0_9] : memref<8x512xbf16, #tpu.memory_space<vmem>>, vector<8x512xbf16>
    tpu.vector_store %arg5[%c0_8, %c0_9], %11 {strides = array<i32>} : memref<8x512xbf16, #tpu.memory_space<vmem>>, vector<8x512xbf16>,
    return
  }
  func.func @transform_0(%arg0: i32) -> (i32, i32) {
    %c0_i32 = arith.constant 0 : i32
    %c0_i32_0 = arith.constant 0 : i32
    %c0_i32_1 = arith.constant 0 : i32
    return %c0_i32, %c0_i32_0 : i32, i32
  }
  func.func @transform_1(%arg0: i32) -> (i32, i32) {
    %c0_i32 = arith.constant 0 : i32
    %c0_i32_0 = arith.constant 0 : i32
    return %c0_i32, %arg0 : i32, i32
  }
  func.func @transform_2(%arg0: i32) -> (i32, i32) {
    %c0_i32 = arith.constant 0 : i32
    %c0_i32_0 = arith.constant 0 : i32
    %c0_i32_1 = arith.constant 0 : i32
    return %c0_i32, %c0_i32_0 : i32, i32
  }
  func.func @transform_3(%arg0: i32) -> (i32, i32) {
    %c0_i32 = arith.constant 0 : i32
    %c0_i32_0 = arith.constant 0 : i32
    %c0_i32_1 = arith.constant 0 : i32
    return %c0_i32, %c0_i32_0 : i32, i32
  }
  func.func @transform_4(%arg0: i32) -> (i32, i32) {
    %c0_i32 = arith.constant 0 : i32
    %c0_i32_0 = arith.constant 0 : i32
    return %c0_i32, %arg0 : i32, i32
  }
}

module attributes {stable_mosaic.version = 11 : i64} {
  func.func @_conv_gemm_kernel(%arg0: i32, %arg1: memref<8x80xbf16, #tpu.memory_space<vmem>>, %arg2: memref<80x512xbf16, #tpu.memory_space<vmem>>, %arg3: memref<8x1xf32, #tpu.memory_space<vmem>>, %arg4: memref<8x1xf32, #tpu.memory_space<vmem>>, %arg5: memref<8x512xbf16, #tpu.memory_space<vmem>>, %arg6: memref<8x512xbf16, #tpu.memory_space<vmem>>) attributes {dimension_semantics = [#tpu.dimension_semantics<parallel>], iteration_bounds = array<i64: 2>, scalar_prefetch = 0 : i64, scratch_operands = 0 : i64, tpu.core_type = #tpu.core_type<tc>, window_params = [{pipeline_mode = #tpu.pipeline_mode<synchronous>, transform_indices = @transform_0, window_bounds = array<i64: 8, 80>}, {transform_indices = @transform_1, window_bounds = array<i64: 80, 512>}, {pipeline_mode = #tpu.pipeline_mode<synchronous>, transform_indices = @transform_2, window_bounds = array<i64: 8, 1>}, {pipeline_mode = #tpu.pipeline_mode<synchronous>, transform_indices = @transform_3, window_bounds = array<i64: 8, 1>}, {transform_indices = @transform_4, window_bounds = array<i64: 8, 512>}, {transform_indices = @transform_5, window_bounds = array<i64: 8, 512>}]} {
    %c0 = arith.constant 0 : index
    %c0_0 = arith.constant 0 : index
    %0 = vector.load %arg1[%c0, %c0_0] : memref<8x80xbf16, #tpu.memory_space<vmem>>, vector<8x80xbf16>
    %c0_1 = arith.constant 0 : index
    %c0_2 = arith.constant 0 : index
    %1 = vector.load %arg2[%c0_1, %c0_2] : memref<80x512xbf16, #tpu.memory_space<vmem>>, vector<80x512xbf16>
    %cst = arith.constant dense<0.000000e+00> : vector<8x512xf32>
    %2 = tpu.matmul %0, %1, %cst {dimension_numbers = #tpu.dot_dimension_numbers<[1], [0], [0], [1], [0, 0, 1, 1], [], []>} : vector<8x80xbf16>, vector<80x512xbf16>, vector<8x512xf32> -> vector<8x512xf32>
    %c0_3 = arith.constant 0 : index
    %c0_4 = arith.constant 0 : index
    %3 = vector.load %arg3[%c0_3, %c0_4] : memref<8x1xf32, #tpu.memory_space<vmem>>, vector<8x1xf32>
    %4 = vector.broadcast %3 : vector<8x1xf32> to vector<8x512xf32>
    %5 = arith.mulf %2, %4 : vector<8x512xf32>
    %c0_5 = arith.constant 0 : index
    %c0_6 = arith.constant 0 : index
    %6 = vector.load %arg4[%c0_5, %c0_6] : memref<8x1xf32, #tpu.memory_space<vmem>>, vector<8x1xf32>
    %7 = vector.broadcast %6 : vector<8x1xf32> to vector<8x512xf32>
    %8 = arith.addf %5, %7 : vector<8x512xf32>
    %c0_7 = arith.constant 0 : index
    %c0_8 = arith.constant 0 : index
    %9 = vector.load %arg5[%c0_7, %c0_8] : memref<8x512xbf16, #tpu.memory_space<vmem>>, vector<8x512xbf16>
    %10 = arith.extf %9 : vector<8x512xbf16> to vector<8x512xf32>
    %11 = arith.addf %8, %10 : vector<8x512xf32>
    %cst_9 = arith.constant 0.000000e+00 : f32
    %12 = vector.broadcast %cst_9 : f32 to vector<8x512xf32>
    %13 = arith.maximumf %11, %12 : vector<8x512xf32>
    %14 = arith.truncf %13 : vector<8x512xf32> to vector<8x512xbf16>
    %c0_10 = arith.constant 0 : index
    %c0_11 = arith.constant 0 : index
    %15 = vector.load %arg6[%c0_10, %c0_11] : memref<8x512xbf16, #tpu.memory_space<vmem>>, vector<8x512xbf16>
    tpu.vector_store %arg6[%c0_10, %c0_11], %14 {strides = array<i32>} : memref<8x512xbf16, #tpu.memory_space<vmem>>, vector<8x512xbf16>,
    return
  }
  func.func @transform_0(%arg0: i32) -> (i32, i32) {
    %c0_i32 = arith.constant 0 : i32
    %c0_i32_0 = arith.constant 0 : i32
    %c0_i32_1 = arith.constant 0 : i32
    return %c0_i32, %c0_i32_0 : i32, i32
  }
  func.func @transform_1(%arg0: i32) -> (i32, i32) {
    %c0_i32 = arith.constant 0 : i32
    %c0_i32_0 = arith.constant 0 : i32
    return %c0_i32, %arg0 : i32, i32
  }
  func.func @transform_2(%arg0: i32) -> (i32, i32) {
    %c0_i32 = arith.constant 0 : i32
    %c0_i32_0 = arith.constant 0 : i32
    %c0_i32_1 = arith.constant 0 : i32
    return %c0_i32, %c0_i32_0 : i32, i32
  }
  func.func @transform_3(%arg0: i32) -> (i32, i32) {
    %c0_i32 = arith.constant 0 : i32
    %c0_i32_0 = arith.constant 0 : i32
    %c0_i32_1 = arith.constant 0 : i32
    return %c0_i32, %c0_i32_0 : i32, i32
  }
  func.func @transform_4(%arg0: i32) -> (i32, i32) {
    %c0_i32 = arith.constant 0 : i32
    %c0_i32_0 = arith.constant 0 : i32
    return %c0_i32, %arg0 : i32, i32
  }
  func.func @transform_5(%arg0: i32) -> (i32, i32) {
    %c0_i32 = arith.constant 0 : i32
    %c0_i32_0 = arith.constant 0 : i32
    return %c0_i32, %arg0 : i32, i32
  }
}

module attributes {stable_mosaic.version = 11 : i64} {
  func.func @_conv_gemm_kernel(%arg0: i32, %arg1: memref<16x80xbf16, #tpu.memory_space<vmem>>, %arg2: memref<80x256xbf16, #tpu.memory_space<vmem>>, %arg3: memref<16x1xf32, #tpu.memory_space<vmem>>, %arg4: memref<16x1xf32, #tpu.memory_space<vmem>>, %arg5: memref<16x256xbf16, #tpu.memory_space<vmem>>) attributes {dimension_semantics = [#tpu.dimension_semantics<parallel>], iteration_bounds = array<i64: 1>, scalar_prefetch = 0 : i64, scratch_operands = 0 : i64, tpu.core_type = #tpu.core_type<tc>, window_params = [{pipeline_mode = #tpu.pipeline_mode<synchronous>, transform_indices = @transform_0, window_bounds = array<i64: 16, 80>}, {transform_indices = @transform_1, window_bounds = array<i64: 80, 256>}, {pipeline_mode = #tpu.pipeline_mode<synchronous>, transform_indices = @transform_2, window_bounds = array<i64: 16, 1>}, {pipeline_mode = #tpu.pipeline_mode<synchronous>, transform_indices = @transform_3, window_bounds = array<i64: 16, 1>}, {transform_indices = @transform_4, window_bounds = array<i64: 16, 256>}]} {
    %c0 = arith.constant 0 : index
    %c0_0 = arith.constant 0 : index
    %0 = vector.load %arg1[%c0, %c0_0] : memref<16x80xbf16, #tpu.memory_space<vmem>>, vector<16x80xbf16>
    %c0_1 = arith.constant 0 : index
    %c0_2 = arith.constant 0 : index
    %1 = vector.load %arg2[%c0_1, %c0_2] : memref<80x256xbf16, #tpu.memory_space<vmem>>, vector<80x256xbf16>
    %cst = arith.constant dense<0.000000e+00> : vector<16x256xf32>
    %2 = tpu.matmul %0, %1, %cst {dimension_numbers = #tpu.dot_dimension_numbers<[1], [0], [0], [1], [0, 0, 1, 1], [], []>} : vector<16x80xbf16>, vector<80x256xbf16>, vector<16x256xf32> -> vector<16x256xf32>
    %c0_3 = arith.constant 0 : index
    %c0_4 = arith.constant 0 : index
    %3 = vector.load %arg3[%c0_3, %c0_4] : memref<16x1xf32, #tpu.memory_space<vmem>>, vector<16x1xf32>
    %4 = vector.broadcast %3 : vector<16x1xf32> to vector<16x256xf32>
    %5 = arith.mulf %2, %4 : vector<16x256xf32>
    %c0_5 = arith.constant 0 : index
    %c0_6 = arith.constant 0 : index
    %6 = vector.load %arg4[%c0_5, %c0_6] : memref<16x1xf32, #tpu.memory_space<vmem>>, vector<16x1xf32>
    %7 = vector.broadcast %6 : vector<16x1xf32> to vector<16x256xf32>
    %8 = arith.addf %5, %7 : vector<16x256xf32>
    %cst_7 = arith.constant 0.000000e+00 : f32
    %9 = vector.broadcast %cst_7 : f32 to vector<16x256xf32>
    %10 = arith.maximumf %8, %9 : vector<16x256xf32>
    %11 = arith.truncf %10 : vector<16x256xf32> to vector<16x256xbf16>
    %c0_8 = arith.constant 0 : index
    %c0_9 = arith.constant 0 : index
    %12 = vector.load %arg5[%c0_8, %c0_9] : memref<16x256xbf16, #tpu.memory_space<vmem>>, vector<16x256xbf16>
    tpu.vector_store %arg5[%c0_8, %c0_9], %11 {strides = array<i32>} : memref<16x256xbf16, #tpu.memory_space<vmem>>, vector<16x256xbf16>,
    return
  }
  func.func @transform_0(%arg0: i32) -> (i32, i32) {
    %c0_i32 = arith.constant 0 : i32
    %c0_i32_0 = arith.constant 0 : i32
    %c0_i32_1 = arith.constant 0 : i32
    return %c0_i32, %c0_i32_0 : i32, i32
  }
  func.func @transform_1(%arg0: i32) -> (i32, i32) {
    %c0_i32 = arith.constant 0 : i32
    %c0_i32_0 = arith.constant 0 : i32
    return %c0_i32, %arg0 : i32, i32
  }
  func.func @transform_2(%arg0: i32) -> (i32, i32) {
    %c0_i32 = arith.constant 0 : i32
    %c0_i32_0 = arith.constant 0 : i32
    %c0_i32_1 = arith.constant 0 : i32
    return %c0_i32, %c0_i32_0 : i32, i32
  }
  func.func @transform_3(%arg0: i32) -> (i32, i32) {
    %c0_i32 = arith.constant 0 : i32
    %c0_i32_0 = arith.constant 0 : i32
    %c0_i32_1 = arith.constant 0 : i32
    return %c0_i32, %c0_i32_0 : i32, i32
  }
  func.func @transform_4(%arg0: i32) -> (i32, i32) {
    %c0_i32 = arith.constant 0 : i32
    %c0_i32_0 = arith.constant 0 : i32
    return %c0_i32, %arg0 : i32, i32
  }
}

module attributes {stable_mosaic.version = 11 : i64} {
  func.func @_conv_gemm_kernel(%arg0: i32, %arg1: memref<16x16xbf16, #tpu.memory_space<vmem>>, %arg2: memref<16x256xbf16, #tpu.memory_space<vmem>>, %arg3: memref<16x1xf32, #tpu.memory_space<vmem>>, %arg4: memref<16x1xf32, #tpu.memory_space<vmem>>, %arg5: memref<16x256xbf16, #tpu.memory_space<vmem>>) attributes {dimension_semantics = [#tpu.dimension_semantics<parallel>], iteration_bounds = array<i64: 1>, scalar_prefetch = 0 : i64, scratch_operands = 0 : i64, tpu.core_type = #tpu.core_type<tc>, window_params = [{pipeline_mode = #tpu.pipeline_mode<synchronous>, transform_indices = @transform_0, window_bounds = array<i64: 16, 16>}, {transform_indices = @transform_1, window_bounds = array<i64: 16, 256>}, {pipeline_mode = #tpu.pipeline_mode<synchronous>, transform_indices = @transform_2, window_bounds = array<i64: 16, 1>}, {pipeline_mode = #tpu.pipeline_mode<synchronous>, transform_indices = @transform_3, window_bounds = array<i64: 16, 1>}, {transform_indices = @transform_4, window_bounds = array<i64: 16, 256>}]} {
    %c0 = arith.constant 0 : index
    %c0_0 = arith.constant 0 : index
    %0 = vector.load %arg1[%c0, %c0_0] : memref<16x16xbf16, #tpu.memory_space<vmem>>, vector<16x16xbf16>
    %c0_1 = arith.constant 0 : index
    %c0_2 = arith.constant 0 : index
    %1 = vector.load %arg2[%c0_1, %c0_2] : memref<16x256xbf16, #tpu.memory_space<vmem>>, vector<16x256xbf16>
    %cst = arith.constant dense<0.000000e+00> : vector<16x256xf32>
    %2 = tpu.matmul %0, %1, %cst {dimension_numbers = #tpu.dot_dimension_numbers<[1], [0], [0], [1], [0, 0, 1, 1], [], []>} : vector<16x16xbf16>, vector<16x256xbf16>, vector<16x256xf32> -> vector<16x256xf32>
    %c0_3 = arith.constant 0 : index
    %c0_4 = arith.constant 0 : index
    %3 = vector.load %arg3[%c0_3, %c0_4] : memref<16x1xf32, #tpu.memory_space<vmem>>, vector<16x1xf32>
    %4 = vector.broadcast %3 : vector<16x1xf32> to vector<16x256xf32>
    %5 = arith.mulf %2, %4 : vector<16x256xf32>
    %c0_5 = arith.constant 0 : index
    %c0_6 = arith.constant 0 : index
    %6 = vector.load %arg4[%c0_5, %c0_6] : memref<16x1xf32, #tpu.memory_space<vmem>>, vector<16x1xf32>
    %7 = vector.broadcast %6 : vector<16x1xf32> to vector<16x256xf32>
    %8 = arith.addf %5, %7 : vector<16x256xf32>
    %9 = arith.truncf %8 : vector<16x256xf32> to vector<16x256xbf16>
    %c0_7 = arith.constant 0 : index
    %c0_8 = arith.constant 0 : index
    %10 = vector.load %arg5[%c0_7, %c0_8] : memref<16x256xbf16, #tpu.memory_space<vmem>>, vector<16x256xbf16>
    tpu.vector_store %arg5[%c0_7, %c0_8], %9 {strides = array<i32>} : memref<16x256xbf16, #tpu.memory_space<vmem>>, vector<16x256xbf16>,
    return
  }
  func.func @transform_0(%arg0: i32) -> (i32, i32) {
    %c0_i32 = arith.constant 0 : i32
    %c0_i32_0 = arith.constant 0 : i32
    %c0_i32_1 = arith.constant 0 : i32
    return %c0_i32, %c0_i32_0 : i32, i32
  }
  func.func @transform_1(%arg0: i32) -> (i32, i32) {
    %c0_i32 = arith.constant 0 : i32
    %c0_i32_0 = arith.constant 0 : i32
    return %c0_i32, %arg0 : i32, i32
  }
  func.func @transform_2(%arg0: i32) -> (i32, i32) {
    %c0_i32 = arith.constant 0 : i32
    %c0_i32_0 = arith.constant 0 : i32
    %c0_i32_1 = arith.constant 0 : i32
    return %c0_i32, %c0_i32_0 : i32, i32
  }
  func.func @transform_3(%arg0: i32) -> (i32, i32) {
    %c0_i32 = arith.constant 0 : i32
    %c0_i32_0 = arith.constant 0 : i32
    %c0_i32_1 = arith.constant 0 : i32
    return %c0_i32, %c0_i32_0 : i32, i32
  }
  func.func @transform_4(%arg0: i32) -> (i32, i32) {
    %c0_i32 = arith.constant 0 : i32
    %c0_i32_0 = arith.constant 0 : i32
    return %c0_i32, %arg0 : i32, i32
  }
}

module attributes {stable_mosaic.version = 11 : i64} {
  func.func @_conv_gemm_kernel(%arg0: i32, %arg1: memref<16x144xbf16, #tpu.memory_space<vmem>>, %arg2: memref<144x256xbf16, #tpu.memory_space<vmem>>, %arg3: memref<16x1xf32, #tpu.memory_space<vmem>>, %arg4: memref<16x1xf32, #tpu.memory_space<vmem>>, %arg5: memref<16x256xbf16, #tpu.memory_space<vmem>>) attributes {dimension_semantics = [#tpu.dimension_semantics<parallel>], iteration_bounds = array<i64: 1>, scalar_prefetch = 0 : i64, scratch_operands = 0 : i64, tpu.core_type = #tpu.core_type<tc>, window_params = [{pipeline_mode = #tpu.pipeline_mode<synchronous>, transform_indices = @transform_0, window_bounds = array<i64: 16, 144>}, {transform_indices = @transform_1, window_bounds = array<i64: 144, 256>}, {pipeline_mode = #tpu.pipeline_mode<synchronous>, transform_indices = @transform_2, window_bounds = array<i64: 16, 1>}, {pipeline_mode = #tpu.pipeline_mode<synchronous>, transform_indices = @transform_3, window_bounds = array<i64: 16, 1>}, {transform_indices = @transform_4, window_bounds = array<i64: 16, 256>}]} {
    %c0 = arith.constant 0 : index
    %c0_0 = arith.constant 0 : index
    %0 = vector.load %arg1[%c0, %c0_0] : memref<16x144xbf16, #tpu.memory_space<vmem>>, vector<16x144xbf16>
    %c0_1 = arith.constant 0 : index
    %c0_2 = arith.constant 0 : index
    %1 = vector.load %arg2[%c0_1, %c0_2] : memref<144x256xbf16, #tpu.memory_space<vmem>>, vector<144x256xbf16>
    %cst = arith.constant dense<0.000000e+00> : vector<16x256xf32>
    %2 = tpu.matmul %0, %1, %cst {dimension_numbers = #tpu.dot_dimension_numbers<[1], [0], [0], [1], [0, 0, 1, 1], [], []>} : vector<16x144xbf16>, vector<144x256xbf16>, vector<16x256xf32> -> vector<16x256xf32>
    %c0_3 = arith.constant 0 : index
    %c0_4 = arith.constant 0 : index
    %3 = vector.load %arg3[%c0_3, %c0_4] : memref<16x1xf32, #tpu.memory_space<vmem>>, vector<16x1xf32>
    %4 = vector.broadcast %3 : vector<16x1xf32> to vector<16x256xf32>
    %5 = arith.mulf %2, %4 : vector<16x256xf32>
    %c0_5 = arith.constant 0 : index
    %c0_6 = arith.constant 0 : index
    %6 = vector.load %arg4[%c0_5, %c0_6] : memref<16x1xf32, #tpu.memory_space<vmem>>, vector<16x1xf32>
    %7 = vector.broadcast %6 : vector<16x1xf32> to vector<16x256xf32>
    %8 = arith.addf %5, %7 : vector<16x256xf32>
    %cst_7 = arith.constant 0.000000e+00 : f32
    %9 = vector.broadcast %cst_7 : f32 to vector<16x256xf32>
    %10 = arith.maximumf %8, %9 : vector<16x256xf32>
    %11 = arith.truncf %10 : vector<16x256xf32> to vector<16x256xbf16>
    %c0_8 = arith.constant 0 : index
    %c0_9 = arith.constant 0 : index
    %12 = vector.load %arg5[%c0_8, %c0_9] : memref<16x256xbf16, #tpu.memory_space<vmem>>, vector<16x256xbf16>
    tpu.vector_store %arg5[%c0_8, %c0_9], %11 {strides = array<i32>} : memref<16x256xbf16, #tpu.memory_space<vmem>>, vector<16x256xbf16>,
    return
  }
  func.func @transform_0(%arg0: i32) -> (i32, i32) {
    %c0_i32 = arith.constant 0 : i32
    %c0_i32_0 = arith.constant 0 : i32
    %c0_i32_1 = arith.constant 0 : i32
    return %c0_i32, %c0_i32_0 : i32, i32
  }
  func.func @transform_1(%arg0: i32) -> (i32, i32) {
    %c0_i32 = arith.constant 0 : i32
    %c0_i32_0 = arith.constant 0 : i32
    return %c0_i32, %arg0 : i32, i32
  }
  func.func @transform_2(%arg0: i32) -> (i32, i32) {
    %c0_i32 = arith.constant 0 : i32
    %c0_i32_0 = arith.constant 0 : i32
    %c0_i32_1 = arith.constant 0 : i32
    return %c0_i32, %c0_i32_0 : i32, i32
  }
  func.func @transform_3(%arg0: i32) -> (i32, i32) {
    %c0_i32 = arith.constant 0 : i32
    %c0_i32_0 = arith.constant 0 : i32
    %c0_i32_1 = arith.constant 0 : i32
    return %c0_i32, %c0_i32_0 : i32, i32
  }
  func.func @transform_4(%arg0: i32) -> (i32, i32) {
    %c0_i32 = arith.constant 0 : i32
    %c0_i32_0 = arith.constant 0 : i32
    return %c0_i32, %arg0 : i32, i32
  }
}

module attributes {stable_mosaic.version = 11 : i64} {
  func.func @_conv_gemm_kernel(%arg0: i32, %arg1: memref<16x144xbf16, #tpu.memory_space<vmem>>, %arg2: memref<144x256xbf16, #tpu.memory_space<vmem>>, %arg3: memref<16x1xf32, #tpu.memory_space<vmem>>, %arg4: memref<16x1xf32, #tpu.memory_space<vmem>>, %arg5: memref<16x256xbf16, #tpu.memory_space<vmem>>, %arg6: memref<16x256xbf16, #tpu.memory_space<vmem>>) attributes {dimension_semantics = [#tpu.dimension_semantics<parallel>], iteration_bounds = array<i64: 1>, scalar_prefetch = 0 : i64, scratch_operands = 0 : i64, tpu.core_type = #tpu.core_type<tc>, window_params = [{pipeline_mode = #tpu.pipeline_mode<synchronous>, transform_indices = @transform_0, window_bounds = array<i64: 16, 144>}, {transform_indices = @transform_1, window_bounds = array<i64: 144, 256>}, {pipeline_mode = #tpu.pipeline_mode<synchronous>, transform_indices = @transform_2, window_bounds = array<i64: 16, 1>}, {pipeline_mode = #tpu.pipeline_mode<synchronous>, transform_indices = @transform_3, window_bounds = array<i64: 16, 1>}, {transform_indices = @transform_4, window_bounds = array<i64: 16, 256>}, {transform_indices = @transform_5, window_bounds = array<i64: 16, 256>}]} {
    %c0 = arith.constant 0 : index
    %c0_0 = arith.constant 0 : index
    %0 = vector.load %arg1[%c0, %c0_0] : memref<16x144xbf16, #tpu.memory_space<vmem>>, vector<16x144xbf16>
    %c0_1 = arith.constant 0 : index
    %c0_2 = arith.constant 0 : index
    %1 = vector.load %arg2[%c0_1, %c0_2] : memref<144x256xbf16, #tpu.memory_space<vmem>>, vector<144x256xbf16>
    %cst = arith.constant dense<0.000000e+00> : vector<16x256xf32>
    %2 = tpu.matmul %0, %1, %cst {dimension_numbers = #tpu.dot_dimension_numbers<[1], [0], [0], [1], [0, 0, 1, 1], [], []>} : vector<16x144xbf16>, vector<144x256xbf16>, vector<16x256xf32> -> vector<16x256xf32>
    %c0_3 = arith.constant 0 : index
    %c0_4 = arith.constant 0 : index
    %3 = vector.load %arg3[%c0_3, %c0_4] : memref<16x1xf32, #tpu.memory_space<vmem>>, vector<16x1xf32>
    %4 = vector.broadcast %3 : vector<16x1xf32> to vector<16x256xf32>
    %5 = arith.mulf %2, %4 : vector<16x256xf32>
    %c0_5 = arith.constant 0 : index
    %c0_6 = arith.constant 0 : index
    %6 = vector.load %arg4[%c0_5, %c0_6] : memref<16x1xf32, #tpu.memory_space<vmem>>, vector<16x1xf32>
    %7 = vector.broadcast %6 : vector<16x1xf32> to vector<16x256xf32>
    %8 = arith.addf %5, %7 : vector<16x256xf32>
    %c0_7 = arith.constant 0 : index
    %c0_8 = arith.constant 0 : index
    %9 = vector.load %arg5[%c0_7, %c0_8] : memref<16x256xbf16, #tpu.memory_space<vmem>>, vector<16x256xbf16>
    %10 = arith.extf %9 : vector<16x256xbf16> to vector<16x256xf32>
    %11 = arith.addf %8, %10 : vector<16x256xf32>
    %cst_9 = arith.constant 0.000000e+00 : f32
    %12 = vector.broadcast %cst_9 : f32 to vector<16x256xf32>
    %13 = arith.maximumf %11, %12 : vector<16x256xf32>
    %14 = arith.truncf %13 : vector<16x256xf32> to vector<16x256xbf16>
    %c0_10 = arith.constant 0 : index
    %c0_11 = arith.constant 0 : index
    %15 = vector.load %arg6[%c0_10, %c0_11] : memref<16x256xbf16, #tpu.memory_space<vmem>>, vector<16x256xbf16>
    tpu.vector_store %arg6[%c0_10, %c0_11], %14 {strides = array<i32>} : memref<16x256xbf16, #tpu.memory_space<vmem>>, vector<16x256xbf16>,
    return
  }
  func.func @transform_0(%arg0: i32) -> (i32, i32) {
    %c0_i32 = arith.constant 0 : i32
    %c0_i32_0 = arith.constant 0 : i32
    %c0_i32_1 = arith.constant 0 : i32
    return %c0_i32, %c0_i32_0 : i32, i32
  }
  func.func @transform_1(%arg0: i32) -> (i32, i32) {
    %c0_i32 = arith.constant 0 : i32
    %c0_i32_0 = arith.constant 0 : i32
    return %c0_i32, %arg0 : i32, i32
  }
  func.func @transform_2(%arg0: i32) -> (i32, i32) {
    %c0_i32 = arith.constant 0 : i32
    %c0_i32_0 = arith.constant 0 : i32
    %c0_i32_1 = arith.constant 0 : i32
    return %c0_i32, %c0_i32_0 : i32, i32
  }
  func.func @transform_3(%arg0: i32) -> (i32, i32) {
    %c0_i32 = arith.constant 0 : i32
    %c0_i32_0 = arith.constant 0 : i32
    %c0_i32_1 = arith.constant 0 : i32
    return %c0_i32, %c0_i32_0 : i32, i32
  }
  func.func @transform_4(%arg0: i32) -> (i32, i32) {
    %c0_i32 = arith.constant 0 : i32
    %c0_i32_0 = arith.constant 0 : i32
    return %c0_i32, %arg0 : i32, i32
  }
  func.func @transform_5(%arg0: i32) -> (i32, i32) {
    %c0_i32 = arith.constant 0 : i32
    %c0_i32_0 = arith.constant 0 : i32
    return %c0_i32, %arg0 : i32, i32
  }
}

module attributes {stable_mosaic.version = 11 : i64} {
  func.func @_conv_gemm_kernel(%arg0: i32, %arg1: memref<32x144xbf16, #tpu.memory_space<vmem>>, %arg2: memref<144x64xbf16, #tpu.memory_space<vmem>>, %arg3: memref<32x1xf32, #tpu.memory_space<vmem>>, %arg4: memref<32x1xf32, #tpu.memory_space<vmem>>, %arg5: memref<32x64xbf16, #tpu.memory_space<vmem>>) attributes {dimension_semantics = [#tpu.dimension_semantics<parallel>], iteration_bounds = array<i64: 1>, scalar_prefetch = 0 : i64, scratch_operands = 0 : i64, tpu.core_type = #tpu.core_type<tc>, window_params = [{pipeline_mode = #tpu.pipeline_mode<synchronous>, transform_indices = @transform_0, window_bounds = array<i64: 32, 144>}, {transform_indices = @transform_1, window_bounds = array<i64: 144, 64>}, {pipeline_mode = #tpu.pipeline_mode<synchronous>, transform_indices = @transform_2, window_bounds = array<i64: 32, 1>}, {pipeline_mode = #tpu.pipeline_mode<synchronous>, transform_indices = @transform_3, window_bounds = array<i64: 32, 1>}, {transform_indices = @transform_4, window_bounds = array<i64: 32, 64>}]} {
    %c0 = arith.constant 0 : index
    %c0_0 = arith.constant 0 : index
    %0 = vector.load %arg1[%c0, %c0_0] : memref<32x144xbf16, #tpu.memory_space<vmem>>, vector<32x144xbf16>
    %c0_1 = arith.constant 0 : index
    %c0_2 = arith.constant 0 : index
    %1 = vector.load %arg2[%c0_1, %c0_2] : memref<144x64xbf16, #tpu.memory_space<vmem>>, vector<144x64xbf16>
    %cst = arith.constant dense<0.000000e+00> : vector<32x64xf32>
    %2 = tpu.matmul %0, %1, %cst {dimension_numbers = #tpu.dot_dimension_numbers<[1], [0], [0], [1], [0, 0, 1, 1], [], []>} : vector<32x144xbf16>, vector<144x64xbf16>, vector<32x64xf32> -> vector<32x64xf32>
    %c0_3 = arith.constant 0 : index
    %c0_4 = arith.constant 0 : index
    %3 = vector.load %arg3[%c0_3, %c0_4] : memref<32x1xf32, #tpu.memory_space<vmem>>, vector<32x1xf32>
    %4 = vector.broadcast %3 : vector<32x1xf32> to vector<32x64xf32>
    %5 = arith.mulf %2, %4 : vector<32x64xf32>
    %c0_5 = arith.constant 0 : index
    %c0_6 = arith.constant 0 : index
    %6 = vector.load %arg4[%c0_5, %c0_6] : memref<32x1xf32, #tpu.memory_space<vmem>>, vector<32x1xf32>
    %7 = vector.broadcast %6 : vector<32x1xf32> to vector<32x64xf32>
    %8 = arith.addf %5, %7 : vector<32x64xf32>
    %cst_7 = arith.constant 0.000000e+00 : f32
    %9 = vector.broadcast %cst_7 : f32 to vector<32x64xf32>
    %10 = arith.maximumf %8, %9 : vector<32x64xf32>
    %11 = arith.truncf %10 : vector<32x64xf32> to vector<32x64xbf16>
    %c0_8 = arith.constant 0 : index
    %c0_9 = arith.constant 0 : index
    %12 = vector.load %arg5[%c0_8, %c0_9] : memref<32x64xbf16, #tpu.memory_space<vmem>>, vector<32x64xbf16>
    tpu.vector_store %arg5[%c0_8, %c0_9], %11 {strides = array<i32>} : memref<32x64xbf16, #tpu.memory_space<vmem>>, vector<32x64xbf16>,
    return
  }
  func.func @transform_0(%arg0: i32) -> (i32, i32) {
    %c0_i32 = arith.constant 0 : i32
    %c0_i32_0 = arith.constant 0 : i32
    %c0_i32_1 = arith.constant 0 : i32
    return %c0_i32, %c0_i32_0 : i32, i32
  }
  func.func @transform_1(%arg0: i32) -> (i32, i32) {
    %c0_i32 = arith.constant 0 : i32
    %c0_i32_0 = arith.constant 0 : i32
    return %c0_i32, %arg0 : i32, i32
  }
  func.func @transform_2(%arg0: i32) -> (i32, i32) {
    %c0_i32 = arith.constant 0 : i32
    %c0_i32_0 = arith.constant 0 : i32
    %c0_i32_1 = arith.constant 0 : i32
    return %c0_i32, %c0_i32_0 : i32, i32
  }
  func.func @transform_3(%arg0: i32) -> (i32, i32) {
    %c0_i32 = arith.constant 0 : i32
    %c0_i32_0 = arith.constant 0 : i32
    %c0_i32_1 = arith.constant 0 : i32
    return %c0_i32, %c0_i32_0 : i32, i32
  }
  func.func @transform_4(%arg0: i32) -> (i32, i32) {
    %c0_i32 = arith.constant 0 : i32
    %c0_i32_0 = arith.constant 0 : i32
    return %c0_i32, %arg0 : i32, i32
  }
}

module attributes {stable_mosaic.version = 11 : i64} {
  func.func @_conv_gemm_kernel(%arg0: i32, %arg1: memref<32x288xbf16, #tpu.memory_space<vmem>>, %arg2: memref<288x64xbf16, #tpu.memory_space<vmem>>, %arg3: memref<32x1xf32, #tpu.memory_space<vmem>>, %arg4: memref<32x1xf32, #tpu.memory_space<vmem>>, %arg5: memref<32x64xbf16, #tpu.memory_space<vmem>>, %arg6: memref<32x64xbf16, #tpu.memory_space<vmem>>) attributes {dimension_semantics = [#tpu.dimension_semantics<parallel>], iteration_bounds = array<i64: 1>, scalar_prefetch = 0 : i64, scratch_operands = 0 : i64, tpu.core_type = #tpu.core_type<tc>, window_params = [{pipeline_mode = #tpu.pipeline_mode<synchronous>, transform_indices = @transform_0, window_bounds = array<i64: 32, 288>}, {transform_indices = @transform_1, window_bounds = array<i64: 288, 64>}, {pipeline_mode = #tpu.pipeline_mode<synchronous>, transform_indices = @transform_2, window_bounds = array<i64: 32, 1>}, {pipeline_mode = #tpu.pipeline_mode<synchronous>, transform_indices = @transform_3, window_bounds = array<i64: 32, 1>}, {transform_indices = @transform_4, window_bounds = array<i64: 32, 64>}, {transform_indices = @transform_5, window_bounds = array<i64: 32, 64>}]} {
    %c0 = arith.constant 0 : index
    %c0_0 = arith.constant 0 : index
    %0 = vector.load %arg1[%c0, %c0_0] : memref<32x288xbf16, #tpu.memory_space<vmem>>, vector<32x288xbf16>
    %c0_1 = arith.constant 0 : index
    %c0_2 = arith.constant 0 : index
    %1 = vector.load %arg2[%c0_1, %c0_2] : memref<288x64xbf16, #tpu.memory_space<vmem>>, vector<288x64xbf16>
    %cst = arith.constant dense<0.000000e+00> : vector<32x64xf32>
    %2 = tpu.matmul %0, %1, %cst {dimension_numbers = #tpu.dot_dimension_numbers<[1], [0], [0], [1], [0, 0, 1, 1], [], []>} : vector<32x288xbf16>, vector<288x64xbf16>, vector<32x64xf32> -> vector<32x64xf32>
    %c0_3 = arith.constant 0 : index
    %c0_4 = arith.constant 0 : index
    %3 = vector.load %arg3[%c0_3, %c0_4] : memref<32x1xf32, #tpu.memory_space<vmem>>, vector<32x1xf32>
    %4 = vector.broadcast %3 : vector<32x1xf32> to vector<32x64xf32>
    %5 = arith.mulf %2, %4 : vector<32x64xf32>
    %c0_5 = arith.constant 0 : index
    %c0_6 = arith.constant 0 : index
    %6 = vector.load %arg4[%c0_5, %c0_6] : memref<32x1xf32, #tpu.memory_space<vmem>>, vector<32x1xf32>
    %7 = vector.broadcast %6 : vector<32x1xf32> to vector<32x64xf32>
    %8 = arith.addf %5, %7 : vector<32x64xf32>
    %c0_7 = arith.constant 0 : index
    %c0_8 = arith.constant 0 : index
    %9 = vector.load %arg5[%c0_7, %c0_8] : memref<32x64xbf16, #tpu.memory_space<vmem>>, vector<32x64xbf16>
    %10 = arith.extf %9 : vector<32x64xbf16> to vector<32x64xf32>
    %11 = arith.addf %8, %10 : vector<32x64xf32>
    %cst_9 = arith.constant 0.000000e+00 : f32
    %12 = vector.broadcast %cst_9 : f32 to vector<32x64xf32>
    %13 = arith.maximumf %11, %12 : vector<32x64xf32>
    %14 = arith.truncf %13 : vector<32x64xf32> to vector<32x64xbf16>
    %c0_10 = arith.constant 0 : index
    %c0_11 = arith.constant 0 : index
    %15 = vector.load %arg6[%c0_10, %c0_11] : memref<32x64xbf16, #tpu.memory_space<vmem>>, vector<32x64xbf16>
    tpu.vector_store %arg6[%c0_10, %c0_11], %14 {strides = array<i32>} : memref<32x64xbf16, #tpu.memory_space<vmem>>, vector<32x64xbf16>,
    return
  }
  func.func @transform_0(%arg0: i32) -> (i32, i32) {
    %c0_i32 = arith.constant 0 : i32
    %c0_i32_0 = arith.constant 0 : i32
    %c0_i32_1 = arith.constant 0 : i32
    return %c0_i32, %c0_i32_0 : i32, i32
  }
  func.func @transform_1(%arg0: i32) -> (i32, i32) {
    %c0_i32 = arith.constant 0 : i32
    %c0_i32_0 = arith.constant 0 : i32
    return %c0_i32, %arg0 : i32, i32
  }
  func.func @transform_2(%arg0: i32) -> (i32, i32) {
    %c0_i32 = arith.constant 0 : i32
    %c0_i32_0 = arith.constant 0 : i32
    %c0_i32_1 = arith.constant 0 : i32
    return %c0_i32, %c0_i32_0 : i32, i32
  }
  func.func @transform_3(%arg0: i32) -> (i32, i32) {
    %c0_i32 = arith.constant 0 : i32
    %c0_i32_0 = arith.constant 0 : i32
    %c0_i32_1 = arith.constant 0 : i32
    return %c0_i32, %c0_i32_0 : i32, i32
  }
  func.func @transform_4(%arg0: i32) -> (i32, i32) {
    %c0_i32 = arith.constant 0 : i32
    %c0_i32_0 = arith.constant 0 : i32
    return %c0_i32, %arg0 : i32, i32
  }
  func.func @transform_5(%arg0: i32) -> (i32, i32) {
    %c0_i32 = arith.constant 0 : i32
    %c0_i32_0 = arith.constant 0 : i32
    return %c0_i32, %arg0 : i32, i32
  }
}

module attributes {stable_mosaic.version = 11 : i64} {
  func.func @_conv_gemm_kernel(%arg0: i32, %arg1: memref<32x16xbf16, #tpu.memory_space<vmem>>, %arg2: memref<16x64xbf16, #tpu.memory_space<vmem>>, %arg3: memref<32x1xf32, #tpu.memory_space<vmem>>, %arg4: memref<32x1xf32, #tpu.memory_space<vmem>>, %arg5: memref<32x64xbf16, #tpu.memory_space<vmem>>) attributes {dimension_semantics = [#tpu.dimension_semantics<parallel>], iteration_bounds = array<i64: 1>, scalar_prefetch = 0 : i64, scratch_operands = 0 : i64, tpu.core_type = #tpu.core_type<tc>, window_params = [{pipeline_mode = #tpu.pipeline_mode<synchronous>, transform_indices = @transform_0, window_bounds = array<i64: 32, 16>}, {transform_indices = @transform_1, window_bounds = array<i64: 16, 64>}, {pipeline_mode = #tpu.pipeline_mode<synchronous>, transform_indices = @transform_2, window_bounds = array<i64: 32, 1>}, {pipeline_mode = #tpu.pipeline_mode<synchronous>, transform_indices = @transform_3, window_bounds = array<i64: 32, 1>}, {transform_indices = @transform_4, window_bounds = array<i64: 32, 64>}]} {
    %c0 = arith.constant 0 : index
    %c0_0 = arith.constant 0 : index
    %0 = vector.load %arg1[%c0, %c0_0] : memref<32x16xbf16, #tpu.memory_space<vmem>>, vector<32x16xbf16>
    %c0_1 = arith.constant 0 : index
    %c0_2 = arith.constant 0 : index
    %1 = vector.load %arg2[%c0_1, %c0_2] : memref<16x64xbf16, #tpu.memory_space<vmem>>, vector<16x64xbf16>
    %cst = arith.constant dense<0.000000e+00> : vector<32x64xf32>
    %2 = tpu.matmul %0, %1, %cst {dimension_numbers = #tpu.dot_dimension_numbers<[1], [0], [0], [1], [0, 0, 1, 1], [], []>} : vector<32x16xbf16>, vector<16x64xbf16>, vector<32x64xf32> -> vector<32x64xf32>
    %c0_3 = arith.constant 0 : index
    %c0_4 = arith.constant 0 : index
    %3 = vector.load %arg3[%c0_3, %c0_4] : memref<32x1xf32, #tpu.memory_space<vmem>>, vector<32x1xf32>
    %4 = vector.broadcast %3 : vector<32x1xf32> to vector<32x64xf32>
    %5 = arith.mulf %2, %4 : vector<32x64xf32>
    %c0_5 = arith.constant 0 : index
    %c0_6 = arith.constant 0 : index
    %6 = vector.load %arg4[%c0_5, %c0_6] : memref<32x1xf32, #tpu.memory_space<vmem>>, vector<32x1xf32>
    %7 = vector.broadcast %6 : vector<32x1xf32> to vector<32x64xf32>
    %8 = arith.addf %5, %7 : vector<32x64xf32>
    %9 = arith.truncf %8 : vector<32x64xf32> to vector<32x64xbf16>
    %c0_7 = arith.constant 0 : index
    %c0_8 = arith.constant 0 : index
    %10 = vector.load %arg5[%c0_7, %c0_8] : memref<32x64xbf16, #tpu.memory_space<vmem>>, vector<32x64xbf16>
    tpu.vector_store %arg5[%c0_7, %c0_8], %9 {strides = array<i32>} : memref<32x64xbf16, #tpu.memory_space<vmem>>, vector<32x64xbf16>,
    return
  }
  func.func @transform_0(%arg0: i32) -> (i32, i32) {
    %c0_i32 = arith.constant 0 : i32
    %c0_i32_0 = arith.constant 0 : i32
    %c0_i32_1 = arith.constant 0 : i32
    return %c0_i32, %c0_i32_0 : i32, i32
  }
  func.func @transform_1(%arg0: i32) -> (i32, i32) {
    %c0_i32 = arith.constant 0 : i32
    %c0_i32_0 = arith.constant 0 : i32
    return %c0_i32, %arg0 : i32, i32
  }
  func.func @transform_2(%arg0: i32) -> (i32, i32) {
    %c0_i32 = arith.constant 0 : i32
    %c0_i32_0 = arith.constant 0 : i32
    %c0_i32_1 = arith.constant 0 : i32
    return %c0_i32, %c0_i32_0 : i32, i32
  }
  func.func @transform_3(%arg0: i32) -> (i32, i32) {
    %c0_i32 = arith.constant 0 : i32
    %c0_i32_0 = arith.constant 0 : i32
    %c0_i32_1 = arith.constant 0 : i32
    return %c0_i32, %c0_i32_0 : i32, i32
  }
  func.func @transform_4(%arg0: i32) -> (i32, i32) {
    %c0_i32 = arith.constant 0 : i32
    %c0_i32_0 = arith.constant 0 : i32
    return %c0_i32, %arg0 : i32, i32
  }
}

module attributes {stable_mosaic.version = 11 : i64} {
  func.func @_conv_gemm_kernel(%arg0: i32, %arg1: memref<32x288xbf16, #tpu.memory_space<vmem>>, %arg2: memref<288x64xbf16, #tpu.memory_space<vmem>>, %arg3: memref<32x1xf32, #tpu.memory_space<vmem>>, %arg4: memref<32x1xf32, #tpu.memory_space<vmem>>, %arg5: memref<32x64xbf16, #tpu.memory_space<vmem>>) attributes {dimension_semantics = [#tpu.dimension_semantics<parallel>], iteration_bounds = array<i64: 1>, scalar_prefetch = 0 : i64, scratch_operands = 0 : i64, tpu.core_type = #tpu.core_type<tc>, window_params = [{pipeline_mode = #tpu.pipeline_mode<synchronous>, transform_indices = @transform_0, window_bounds = array<i64: 32, 288>}, {transform_indices = @transform_1, window_bounds = array<i64: 288, 64>}, {pipeline_mode = #tpu.pipeline_mode<synchronous>, transform_indices = @transform_2, window_bounds = array<i64: 32, 1>}, {pipeline_mode = #tpu.pipeline_mode<synchronous>, transform_indices = @transform_3, window_bounds = array<i64: 32, 1>}, {transform_indices = @transform_4, window_bounds = array<i64: 32, 64>}]} {
    %c0 = arith.constant 0 : index
    %c0_0 = arith.constant 0 : index
    %0 = vector.load %arg1[%c0, %c0_0] : memref<32x288xbf16, #tpu.memory_space<vmem>>, vector<32x288xbf16>
    %c0_1 = arith.constant 0 : index
    %c0_2 = arith.constant 0 : index
    %1 = vector.load %arg2[%c0_1, %c0_2] : memref<288x64xbf16, #tpu.memory_space<vmem>>, vector<288x64xbf16>
    %cst = arith.constant dense<0.000000e+00> : vector<32x64xf32>
    %2 = tpu.matmul %0, %1, %cst {dimension_numbers = #tpu.dot_dimension_numbers<[1], [0], [0], [1], [0, 0, 1, 1], [], []>} : vector<32x288xbf16>, vector<288x64xbf16>, vector<32x64xf32> -> vector<32x64xf32>
    %c0_3 = arith.constant 0 : index
    %c0_4 = arith.constant 0 : index
    %3 = vector.load %arg3[%c0_3, %c0_4] : memref<32x1xf32, #tpu.memory_space<vmem>>, vector<32x1xf32>
    %4 = vector.broadcast %3 : vector<32x1xf32> to vector<32x64xf32>
    %5 = arith.mulf %2, %4 : vector<32x64xf32>
    %c0_5 = arith.constant 0 : index
    %c0_6 = arith.constant 0 : index
    %6 = vector.load %arg4[%c0_5, %c0_6] : memref<32x1xf32, #tpu.memory_space<vmem>>, vector<32x1xf32>
    %7 = vector.broadcast %6 : vector<32x1xf32> to vector<32x64xf32>
    %8 = arith.addf %5, %7 : vector<32x64xf32>
    %cst_7 = arith.constant 0.000000e+00 : f32
    %9 = vector.broadcast %cst_7 : f32 to vector<32x64xf32>
    %10 = arith.maximumf %8, %9 : vector<32x64xf32>
    %11 = arith.truncf %10 : vector<32x64xf32> to vector<32x64xbf16>
    %c0_8 = arith.constant 0 : index
    %c0_9 = arith.constant 0 : index
    %12 = vector.load %arg5[%c0_8, %c0_9] : memref<32x64xbf16, #tpu.memory_space<vmem>>, vector<32x64xbf16>
    tpu.vector_store %arg5[%c0_8, %c0_9], %11 {strides = array<i32>} : memref<32x64xbf16, #tpu.memory_space<vmem>>, vector<32x64xbf16>,
    return
  }
  func.func @transform_0(%arg0: i32) -> (i32, i32) {
    %c0_i32 = arith.constant 0 : i32
    %c0_i32_0 = arith.constant 0 : i32
    %c0_i32_1 = arith.constant 0 : i32
    return %c0_i32, %c0_i32_0 : i32, i32
  }
  func.func @transform_1(%arg0: i32) -> (i32, i32) {
    %c0_i32 = arith.constant 0 : i32
    %c0_i32_0 = arith.constant 0 : i32
    return %c0_i32, %arg0 : i32, i32
  }
  func.func @transform_2(%arg0: i32) -> (i32, i32) {
    %c0_i32 = arith.constant 0 : i32
    %c0_i32_0 = arith.constant 0 : i32
    %c0_i32_1 = arith.constant 0 : i32
    return %c0_i32, %c0_i32_0 : i32, i32
  }
  func.func @transform_3(%arg0: i32) -> (i32, i32) {
    %c0_i32 = arith.constant 0 : i32
    %c0_i32_0 = arith.constant 0 : i32
    %c0_i32_1 = arith.constant 0 : i32
    return %c0_i32, %c0_i32_0 : i32, i32
  }
  func.func @transform_4(%arg0: i32) -> (i32, i32) {
    %c0_i32 = arith.constant 0 : i32
    %c0_i32_0 = arith.constant 0 : i32
    return %c0_i32, %arg0 : i32, i32
  }
}

module attributes {stable_mosaic.version = 11 : i64} {
  func.func @_conv_gemm_kernel(%arg0: i32, %arg1: memref<64x288xbf16, #tpu.memory_space<vmem>>, %arg2: memref<288x16xbf16, #tpu.memory_space<vmem>>, %arg3: memref<64x1xf32, #tpu.memory_space<vmem>>, %arg4: memref<64x1xf32, #tpu.memory_space<vmem>>, %arg5: memref<64x16xbf16, #tpu.memory_space<vmem>>) attributes {dimension_semantics = [#tpu.dimension_semantics<parallel>], iteration_bounds = array<i64: 1>, scalar_prefetch = 0 : i64, scratch_operands = 0 : i64, tpu.core_type = #tpu.core_type<tc>, window_params = [{pipeline_mode = #tpu.pipeline_mode<synchronous>, transform_indices = @transform_0, window_bounds = array<i64: 64, 288>}, {transform_indices = @transform_1, window_bounds = array<i64: 288, 16>}, {pipeline_mode = #tpu.pipeline_mode<synchronous>, transform_indices = @transform_2, window_bounds = array<i64: 64, 1>}, {pipeline_mode = #tpu.pipeline_mode<synchronous>, transform_indices = @transform_3, window_bounds = array<i64: 64, 1>}, {transform_indices = @transform_4, window_bounds = array<i64: 64, 16>}]} {
    %c0 = arith.constant 0 : index
    %c0_0 = arith.constant 0 : index
    %0 = vector.load %arg1[%c0, %c0_0] : memref<64x288xbf16, #tpu.memory_space<vmem>>, vector<64x288xbf16>
    %c0_1 = arith.constant 0 : index
    %c0_2 = arith.constant 0 : index
    %1 = vector.load %arg2[%c0_1, %c0_2] : memref<288x16xbf16, #tpu.memory_space<vmem>>, vector<288x16xbf16>
    %cst = arith.constant dense<0.000000e+00> : vector<64x16xf32>
    %2 = tpu.matmul %0, %1, %cst {dimension_numbers = #tpu.dot_dimension_numbers<[1], [0], [0], [1], [0, 0, 1, 1], [], []>} : vector<64x288xbf16>, vector<288x16xbf16>, vector<64x16xf32> -> vector<64x16xf32>
    %c0_3 = arith.constant 0 : index
    %c0_4 = arith.constant 0 : index
    %3 = vector.load %arg3[%c0_3, %c0_4] : memref<64x1xf32, #tpu.memory_space<vmem>>, vector<64x1xf32>
    %4 = vector.broadcast %3 : vector<64x1xf32> to vector<64x16xf32>
    %5 = arith.mulf %2, %4 : vector<64x16xf32>
    %c0_5 = arith.constant 0 : index
    %c0_6 = arith.constant 0 : index
    %6 = vector.load %arg4[%c0_5, %c0_6] : memref<64x1xf32, #tpu.memory_space<vmem>>, vector<64x1xf32>
    %7 = vector.broadcast %6 : vector<64x1xf32> to vector<64x16xf32>
    %8 = arith.addf %5, %7 : vector<64x16xf32>
    %cst_7 = arith.constant 0.000000e+00 : f32
    %9 = vector.broadcast %cst_7 : f32 to vector<64x16xf32>
    %10 = arith.maximumf %8, %9 : vector<64x16xf32>
    %11 = arith.truncf %10 : vector<64x16xf32> to vector<64x16xbf16>
    %c0_8 = arith.constant 0 : index
    %c0_9 = arith.constant 0 : index
    %12 = vector.load %arg5[%c0_8, %c0_9] : memref<64x16xbf16, #tpu.memory_space<vmem>>, vector<64x16xbf16>
    tpu.vector_store %arg5[%c0_8, %c0_9], %11 {strides = array<i32>} : memref<64x16xbf16, #tpu.memory_space<vmem>>, vector<64x16xbf16>,
    return
  }
  func.func @transform_0(%arg0: i32) -> (i32, i32) {
    %c0_i32 = arith.constant 0 : i32
    %c0_i32_0 = arith.constant 0 : i32
    %c0_i32_1 = arith.constant 0 : i32
    return %c0_i32, %c0_i32_0 : i32, i32
  }
  func.func @transform_1(%arg0: i32) -> (i32, i32) {
    %c0_i32 = arith.constant 0 : i32
    %c0_i32_0 = arith.constant 0 : i32
    return %c0_i32, %arg0 : i32, i32
  }
  func.func @transform_2(%arg0: i32) -> (i32, i32) {
    %c0_i32 = arith.constant 0 : i32
    %c0_i32_0 = arith.constant 0 : i32
    %c0_i32_1 = arith.constant 0 : i32
    return %c0_i32, %c0_i32_0 : i32, i32
  }
  func.func @transform_3(%arg0: i32) -> (i32, i32) {
    %c0_i32 = arith.constant 0 : i32
    %c0_i32_0 = arith.constant 0 : i32
    %c0_i32_1 = arith.constant 0 : i32
    return %c0_i32, %c0_i32_0 : i32, i32
  }
  func.func @transform_4(%arg0: i32) -> (i32, i32) {
    %c0_i32 = arith.constant 0 : i32
    %c0_i32_0 = arith.constant 0 : i32
    return %c0_i32, %arg0 : i32, i32
  }
}

module attributes {stable_mosaic.version = 11 : i64} {
  func.func @_conv_gemm_kernel(%arg0: i32, %arg1: memref<64x576xbf16, #tpu.memory_space<vmem>>, %arg2: memref<576x16xbf16, #tpu.memory_space<vmem>>, %arg3: memref<64x1xf32, #tpu.memory_space<vmem>>, %arg4: memref<64x1xf32, #tpu.memory_space<vmem>>, %arg5: memref<64x16xbf16, #tpu.memory_space<vmem>>) attributes {dimension_semantics = [#tpu.dimension_semantics<parallel>], iteration_bounds = array<i64: 1>, scalar_prefetch = 0 : i64, scratch_operands = 0 : i64, tpu.core_type = #tpu.core_type<tc>, window_params = [{pipeline_mode = #tpu.pipeline_mode<synchronous>, transform_indices = @transform_0, window_bounds = array<i64: 64, 576>}, {transform_indices = @transform_1, window_bounds = array<i64: 576, 16>}, {pipeline_mode = #tpu.pipeline_mode<synchronous>, transform_indices = @transform_2, window_bounds = array<i64: 64, 1>}, {pipeline_mode = #tpu.pipeline_mode<synchronous>, transform_indices = @transform_3, window_bounds = array<i64: 64, 1>}, {transform_indices = @transform_4, window_bounds = array<i64: 64, 16>}]} {
    %c0 = arith.constant 0 : index
    %c0_0 = arith.constant 0 : index
    %0 = vector.load %arg1[%c0, %c0_0] : memref<64x576xbf16, #tpu.memory_space<vmem>>, vector<64x576xbf16>
    %c0_1 = arith.constant 0 : index
    %c0_2 = arith.constant 0 : index
    %1 = vector.load %arg2[%c0_1, %c0_2] : memref<576x16xbf16, #tpu.memory_space<vmem>>, vector<576x16xbf16>
    %cst = arith.constant dense<0.000000e+00> : vector<64x16xf32>
    %2 = tpu.matmul %0, %1, %cst {dimension_numbers = #tpu.dot_dimension_numbers<[1], [0], [0], [1], [0, 0, 1, 1], [], []>} : vector<64x576xbf16>, vector<576x16xbf16>, vector<64x16xf32> -> vector<64x16xf32>
    %c0_3 = arith.constant 0 : index
    %c0_4 = arith.constant 0 : index
    %3 = vector.load %arg3[%c0_3, %c0_4] : memref<64x1xf32, #tpu.memory_space<vmem>>, vector<64x1xf32>
    %4 = vector.broadcast %3 : vector<64x1xf32> to vector<64x16xf32>
    %5 = arith.mulf %2, %4 : vector<64x16xf32>
    %c0_5 = arith.constant 0 : index
    %c0_6 = arith.constant 0 : index
    %6 = vector.load %arg4[%c0_5, %c0_6] : memref<64x1xf32, #tpu.memory_space<vmem>>, vector<64x1xf32>
    %7 = vector.broadcast %6 : vector<64x1xf32> to vector<64x16xf32>
    %8 = arith.addf %5, %7 : vector<64x16xf32>
    %cst_7 = arith.constant 0.000000e+00 : f32
    %9 = vector.broadcast %cst_7 : f32 to vector<64x16xf32>
    %10 = arith.maximumf %8, %9 : vector<64x16xf32>
    %11 = arith.truncf %10 : vector<64x16xf32> to vector<64x16xbf16>
    %c0_8 = arith.constant 0 : index
    %c0_9 = arith.constant 0 : index
    %12 = vector.load %arg5[%c0_8, %c0_9] : memref<64x16xbf16, #tpu.memory_space<vmem>>, vector<64x16xbf16>
    tpu.vector_store %arg5[%c0_8, %c0_9], %11 {strides = array<i32>} : memref<64x16xbf16, #tpu.memory_space<vmem>>, vector<64x16xbf16>,
    return
  }
  func.func @transform_0(%arg0: i32) -> (i32, i32) {
    %c0_i32 = arith.constant 0 : i32
    %c0_i32_0 = arith.constant 0 : i32
    %c0_i32_1 = arith.constant 0 : i32
    return %c0_i32, %c0_i32_0 : i32, i32
  }
  func.func @transform_1(%arg0: i32) -> (i32, i32) {
    %c0_i32 = arith.constant 0 : i32
    %c0_i32_0 = arith.constant 0 : i32
    return %c0_i32, %arg0 : i32, i32
  }
  func.func @transform_2(%arg0: i32) -> (i32, i32) {
    %c0_i32 = arith.constant 0 : i32
    %c0_i32_0 = arith.constant 0 : i32
    %c0_i32_1 = arith.constant 0 : i32
    return %c0_i32, %c0_i32_0 : i32, i32
  }
  func.func @transform_3(%arg0: i32) -> (i32, i32) {
    %c0_i32 = arith.constant 0 : i32
    %c0_i32_0 = arith.constant 0 : i32
    %c0_i32_1 = arith.constant 0 : i32
    return %c0_i32, %c0_i32_0 : i32, i32
  }
  func.func @transform_4(%arg0: i32) -> (i32, i32) {
    %c0_i32 = arith.constant 0 : i32
    %c0_i32_0 = arith.constant 0 : i32
    return %c0_i32, %arg0 : i32, i32
  }
}

module attributes {stable_mosaic.version = 11 : i64} {
  func.func @_conv_gemm_kernel(%arg0: i32, %arg1: memref<64x576xbf16, #tpu.memory_space<vmem>>, %arg2: memref<576x16xbf16, #tpu.memory_space<vmem>>, %arg3: memref<64x1xf32, #tpu.memory_space<vmem>>, %arg4: memref<64x1xf32, #tpu.memory_space<vmem>>, %arg5: memref<64x16xbf16, #tpu.memory_space<vmem>>, %arg6: memref<64x16xbf16, #tpu.memory_space<vmem>>) attributes {dimension_semantics = [#tpu.dimension_semantics<parallel>], iteration_bounds = array<i64: 1>, scalar_prefetch = 0 : i64, scratch_operands = 0 : i64, tpu.core_type = #tpu.core_type<tc>, window_params = [{pipeline_mode = #tpu.pipeline_mode<synchronous>, transform_indices = @transform_0, window_bounds = array<i64: 64, 576>}, {transform_indices = @transform_1, window_bounds = array<i64: 576, 16>}, {pipeline_mode = #tpu.pipeline_mode<synchronous>, transform_indices = @transform_2, window_bounds = array<i64: 64, 1>}, {pipeline_mode = #tpu.pipeline_mode<synchronous>, transform_indices = @transform_3, window_bounds = array<i64: 64, 1>}, {transform_indices = @transform_4, window_bounds = array<i64: 64, 16>}, {transform_indices = @transform_5, window_bounds = array<i64: 64, 16>}]} {
    %c0 = arith.constant 0 : index
    %c0_0 = arith.constant 0 : index
    %0 = vector.load %arg1[%c0, %c0_0] : memref<64x576xbf16, #tpu.memory_space<vmem>>, vector<64x576xbf16>
    %c0_1 = arith.constant 0 : index
    %c0_2 = arith.constant 0 : index
    %1 = vector.load %arg2[%c0_1, %c0_2] : memref<576x16xbf16, #tpu.memory_space<vmem>>, vector<576x16xbf16>
    %cst = arith.constant dense<0.000000e+00> : vector<64x16xf32>
    %2 = tpu.matmul %0, %1, %cst {dimension_numbers = #tpu.dot_dimension_numbers<[1], [0], [0], [1], [0, 0, 1, 1], [], []>} : vector<64x576xbf16>, vector<576x16xbf16>, vector<64x16xf32> -> vector<64x16xf32>
    %c0_3 = arith.constant 0 : index
    %c0_4 = arith.constant 0 : index
    %3 = vector.load %arg3[%c0_3, %c0_4] : memref<64x1xf32, #tpu.memory_space<vmem>>, vector<64x1xf32>
    %4 = vector.broadcast %3 : vector<64x1xf32> to vector<64x16xf32>
    %5 = arith.mulf %2, %4 : vector<64x16xf32>
    %c0_5 = arith.constant 0 : index
    %c0_6 = arith.constant 0 : index
    %6 = vector.load %arg4[%c0_5, %c0_6] : memref<64x1xf32, #tpu.memory_space<vmem>>, vector<64x1xf32>
    %7 = vector.broadcast %6 : vector<64x1xf32> to vector<64x16xf32>
    %8 = arith.addf %5, %7 : vector<64x16xf32>
    %c0_7 = arith.constant 0 : index
    %c0_8 = arith.constant 0 : index
    %9 = vector.load %arg5[%c0_7, %c0_8] : memref<64x16xbf16, #tpu.memory_space<vmem>>, vector<64x16xbf16>
    %10 = arith.extf %9 : vector<64x16xbf16> to vector<64x16xf32>
    %11 = arith.addf %8, %10 : vector<64x16xf32>
    %cst_9 = arith.constant 0.000000e+00 : f32
    %12 = vector.broadcast %cst_9 : f32 to vector<64x16xf32>
    %13 = arith.maximumf %11, %12 : vector<64x16xf32>
    %14 = arith.truncf %13 : vector<64x16xf32> to vector<64x16xbf16>
    %c0_10 = arith.constant 0 : index
    %c0_11 = arith.constant 0 : index
    %15 = vector.load %arg6[%c0_10, %c0_11] : memref<64x16xbf16, #tpu.memory_space<vmem>>, vector<64x16xbf16>
    tpu.vector_store %arg6[%c0_10, %c0_11], %14 {strides = array<i32>} : memref<64x16xbf16, #tpu.memory_space<vmem>>, vector<64x16xbf16>,
    return
  }
  func.func @transform_0(%arg0: i32) -> (i32, i32) {
    %c0_i32 = arith.constant 0 : i32
    %c0_i32_0 = arith.constant 0 : i32
    %c0_i32_1 = arith.constant 0 : i32
    return %c0_i32, %c0_i32_0 : i32, i32
  }
  func.func @transform_1(%arg0: i32) -> (i32, i32) {
    %c0_i32 = arith.constant 0 : i32
    %c0_i32_0 = arith.constant 0 : i32
    return %c0_i32, %arg0 : i32, i32
  }
  func.func @transform_2(%arg0: i32) -> (i32, i32) {
    %c0_i32 = arith.constant 0 : i32
    %c0_i32_0 = arith.constant 0 : i32
    %c0_i32_1 = arith.constant 0 : i32
    return %c0_i32, %c0_i32_0 : i32, i32
  }
  func.func @transform_3(%arg0: i32) -> (i32, i32) {
    %c0_i32 = arith.constant 0 : i32
    %c0_i32_0 = arith.constant 0 : i32
    %c0_i32_1 = arith.constant 0 : i32
    return %c0_i32, %c0_i32_0 : i32, i32
  }
  func.func @transform_4(%arg0: i32) -> (i32, i32) {
    %c0_i32 = arith.constant 0 : i32
    %c0_i32_0 = arith.constant 0 : i32
    return %c0_i32, %arg0 : i32, i32
  }
  func.func @transform_5(%arg0: i32) -> (i32, i32) {
    %c0_i32 = arith.constant 0 : i32
    %c0_i32_0 = arith.constant 0 : i32
    return %c0_i32, %arg0 : i32, i32
  }
}

module attributes {stable_mosaic.version = 11 : i64} {
  func.func @_conv_gemm_kernel(%arg0: i32, %arg1: memref<64x32xbf16, #tpu.memory_space<vmem>>, %arg2: memref<32x16xbf16, #tpu.memory_space<vmem>>, %arg3: memref<64x1xf32, #tpu.memory_space<vmem>>, %arg4: memref<64x1xf32, #tpu.memory_space<vmem>>, %arg5: memref<64x16xbf16, #tpu.memory_space<vmem>>) attributes {dimension_semantics = [#tpu.dimension_semantics<parallel>], iteration_bounds = array<i64: 1>, scalar_prefetch = 0 : i64, scratch_operands = 0 : i64, tpu.core_type = #tpu.core_type<tc>, window_params = [{pipeline_mode = #tpu.pipeline_mode<synchronous>, transform_indices = @transform_0, window_bounds = array<i64: 64, 32>}, {transform_indices = @transform_1, window_bounds = array<i64: 32, 16>}, {pipeline_mode = #tpu.pipeline_mode<synchronous>, transform_indices = @transform_2, window_bounds = array<i64: 64, 1>}, {pipeline_mode = #tpu.pipeline_mode<synchronous>, transform_indices = @transform_3, window_bounds = array<i64: 64, 1>}, {transform_indices = @transform_4, window_bounds = array<i64: 64, 16>}]} {
    %c0 = arith.constant 0 : index
    %c0_0 = arith.constant 0 : index
    %0 = vector.load %arg1[%c0, %c0_0] : memref<64x32xbf16, #tpu.memory_space<vmem>>, vector<64x32xbf16>
    %c0_1 = arith.constant 0 : index
    %c0_2 = arith.constant 0 : index
    %1 = vector.load %arg2[%c0_1, %c0_2] : memref<32x16xbf16, #tpu.memory_space<vmem>>, vector<32x16xbf16>
    %cst = arith.constant dense<0.000000e+00> : vector<64x16xf32>
    %2 = tpu.matmul %0, %1, %cst {dimension_numbers = #tpu.dot_dimension_numbers<[1], [0], [0], [1], [0, 0, 1, 1], [], []>} : vector<64x32xbf16>, vector<32x16xbf16>, vector<64x16xf32> -> vector<64x16xf32>
    %c0_3 = arith.constant 0 : index
    %c0_4 = arith.constant 0 : index
    %3 = vector.load %arg3[%c0_3, %c0_4] : memref<64x1xf32, #tpu.memory_space<vmem>>, vector<64x1xf32>
    %4 = vector.broadcast %3 : vector<64x1xf32> to vector<64x16xf32>
    %5 = arith.mulf %2, %4 : vector<64x16xf32>
    %c0_5 = arith.constant 0 : index
    %c0_6 = arith.constant 0 : index
    %6 = vector.load %arg4[%c0_5, %c0_6] : memref<64x1xf32, #tpu.memory_space<vmem>>, vector<64x1xf32>
    %7 = vector.broadcast %6 : vector<64x1xf32> to vector<64x16xf32>
    %8 = arith.addf %5, %7 : vector<64x16xf32>
    %9 = arith.truncf %8 : vector<64x16xf32> to vector<64x16xbf16>
    %c0_7 = arith.constant 0 : index
    %c0_8 = arith.constant 0 : index
    %10 = vector.load %arg5[%c0_7, %c0_8] : memref<64x16xbf16, #tpu.memory_space<vmem>>, vector<64x16xbf16>
    tpu.vector_store %arg5[%c0_7, %c0_8], %9 {strides = array<i32>} : memref<64x16xbf16, #tpu.memory_space<vmem>>, vector<64x16xbf16>,
    return
  }
  func.func @transform_0(%arg0: i32) -> (i32, i32) {
    %c0_i32 = arith.constant 0 : i32
    %c0_i32_0 = arith.constant 0 : i32
    %c0_i32_1 = arith.constant 0 : i32
    return %c0_i32, %c0_i32_0 : i32, i32
  }
  func.func @transform_1(%arg0: i32) -> (i32, i32) {
    %c0_i32 = arith.constant 0 : i32
    %c0_i32_0 = arith.constant 0 : i32
    return %c0_i32, %arg0 : i32, i32
  }
  func.func @transform_2(%arg0: i32) -> (i32, i32) {
    %c0_i32 = arith.constant 0 : i32
    %c0_i32_0 = arith.constant 0 : i32
    %c0_i32_1 = arith.constant 0 : i32
    return %c0_i32, %c0_i32_0 : i32, i32
  }
  func.func @transform_3(%arg0: i32) -> (i32, i32) {
    %c0_i32 = arith.constant 0 : i32
    %c0_i32_0 = arith.constant 0 : i32
    %c0_i32_1 = arith.constant 0 : i32
    return %c0_i32, %c0_i32_0 : i32, i32
  }
  func.func @transform_4(%arg0: i32) -> (i32, i32) {
    %c0_i32 = arith.constant 0 : i32
    %c0_i32_0 = arith.constant 0 : i32
    return %c0_i32, %arg0 : i32, i32
  }
}

module attributes {stable_mosaic.version = 11 : i64} {
  func.func @_fc_gemm_kernel(%arg0: i32, %arg1: memref<4x64xbf16, #tpu.memory_space<vmem>>, %arg2: memref<64x256xbf16, #tpu.memory_space<vmem>>, %arg3: memref<1x256xf32, #tpu.memory_space<vmem>>, %arg4: memref<1x256xf32, #tpu.memory_space<vmem>>, %arg5: memref<1x1xf32, #tpu.memory_space<vmem>>, %arg6: memref<4x256xf32, #tpu.memory_space<vmem>>) attributes {dimension_semantics = [#tpu.dimension_semantics<parallel>], iteration_bounds = array<i64: 8>, scalar_prefetch = 0 : i64, scratch_operands = 0 : i64, tpu.core_type = #tpu.core_type<tc>, window_params = [{pipeline_mode = #tpu.pipeline_mode<synchronous>, transform_indices = @transform_0, window_bounds = array<i64: 4, 64>}, {transform_indices = @transform_1, window_bounds = array<i64: 64, 256>}, {transform_indices = @transform_2, window_bounds = array<i64: 1, 256>}, {transform_indices = @transform_3, window_bounds = array<i64: 1, 256>}, {pipeline_mode = #tpu.pipeline_mode<synchronous>, transform_indices = @transform_4, window_bounds = array<i64: 1, 1>}, {transform_indices = @transform_5, window_bounds = array<i64: 4, 256>}]} {
    %c0 = arith.constant 0 : index
    %c0_0 = arith.constant 0 : index
    %0 = vector.load %arg1[%c0, %c0_0] : memref<4x64xbf16, #tpu.memory_space<vmem>>, vector<4x64xbf16>
    %c0_1 = arith.constant 0 : index
    %c0_2 = arith.constant 0 : index
    %1 = vector.load %arg2[%c0_1, %c0_2] : memref<64x256xbf16, #tpu.memory_space<vmem>>, vector<64x256xbf16>
    %cst = arith.constant dense<0.000000e+00> : vector<4x256xf32>
    %2 = tpu.matmul %0, %1, %cst {dimension_numbers = #tpu.dot_dimension_numbers<[1], [0], [0], [1], [0, 0, 1, 1], [], []>} : vector<4x64xbf16>, vector<64x256xbf16>, vector<4x256xf32> -> vector<4x256xf32>
    %c0_3 = arith.constant 0 : index
    %c0_4 = arith.constant 0 : index
    %3 = vector.load %arg3[%c0_3, %c0_4] : memref<1x256xf32, #tpu.memory_space<vmem>>, vector<1x256xf32>
    %4 = vector.broadcast %3 : vector<1x256xf32> to vector<4x256xf32>
    %5 = arith.mulf %2, %4 : vector<4x256xf32>
    %c0_5 = arith.constant 0 : index
    %c0_6 = arith.constant 0 : index
    %6 = vector.load %arg4[%c0_5, %c0_6] : memref<1x256xf32, #tpu.memory_space<vmem>>, vector<1x256xf32>
    %7 = vector.broadcast %6 : vector<1x256xf32> to vector<4x256xf32>
    %8 = arith.addf %5, %7 : vector<4x256xf32>
    %cst_7 = arith.constant 0.000000e+00 : f32
    %9 = vector.broadcast %cst_7 : f32 to vector<4x256xf32>
    %10 = arith.maximumf %8, %9 : vector<4x256xf32>
    %c0_8 = arith.constant 0 : index
    %c0_9 = arith.constant 0 : index
    %11 = vector.load %arg6[%c0_8, %c0_9] : memref<4x256xf32, #tpu.memory_space<vmem>>, vector<4x256xf32>
    tpu.vector_store %arg6[%c0_8, %c0_9], %10 {strides = array<i32>} : memref<4x256xf32, #tpu.memory_space<vmem>>, vector<4x256xf32>,
    return
  }
  func.func @transform_0(%arg0: i32) -> (i32, i32) {
    %c0_i32 = arith.constant 0 : i32
    %c0_i32_0 = arith.constant 0 : i32
    %c0_i32_1 = arith.constant 0 : i32
    return %c0_i32, %c0_i32_0 : i32, i32
  }
  func.func @transform_1(%arg0: i32) -> (i32, i32) {
    %c0_i32 = arith.constant 0 : i32
    %c0_i32_0 = arith.constant 0 : i32
    return %c0_i32, %arg0 : i32, i32
  }
  func.func @transform_2(%arg0: i32) -> (i32, i32) {
    %c0_i32 = arith.constant 0 : i32
    %c0_i32_0 = arith.constant 0 : i32
    return %c0_i32, %arg0 : i32, i32
  }
  func.func @transform_3(%arg0: i32) -> (i32, i32) {
    %c0_i32 = arith.constant 0 : i32
    %c0_i32_0 = arith.constant 0 : i32
    return %c0_i32, %arg0 : i32, i32
  }
  func.func @transform_4(%arg0: i32) -> (i32, i32) {
    %c0_i32 = arith.constant 0 : i32
    %c0_i32_0 = arith.constant 0 : i32
    %c0_i32_1 = arith.constant 0 : i32
    return %c0_i32, %c0_i32_0 : i32, i32
  }
  func.func @transform_5(%arg0: i32) -> (i32, i32) {
    %c0_i32 = arith.constant 0 : i32
    %c0_i32_0 = arith.constant 0 : i32
    return %c0_i32, %arg0 : i32, i32
  }
}

module attributes {stable_mosaic.version = 11 : i64} {
  func.func @_fc_gemm_kernel(%arg0: i32, %arg1: memref<4x2048xbf16, #tpu.memory_space<vmem>>, %arg2: memref<2048x256xbf16, #tpu.memory_space<vmem>>, %arg3: memref<1x256xf32, #tpu.memory_space<vmem>>, %arg4: memref<1x256xf32, #tpu.memory_space<vmem>>, %arg5: memref<1x1xf32, #tpu.memory_space<vmem>>, %arg6: memref<4x256xf32, #tpu.memory_space<vmem>>) attributes {dimension_semantics = [#tpu.dimension_semantics<parallel>], iteration_bounds = array<i64: 2>, scalar_prefetch = 0 : i64, scratch_operands = 0 : i64, tpu.core_type = #tpu.core_type<tc>, window_params = [{pipeline_mode = #tpu.pipeline_mode<synchronous>, transform_indices = @transform_0, window_bounds = array<i64: 4, 2048>}, {transform_indices = @transform_1, window_bounds = array<i64: 2048, 256>}, {transform_indices = @transform_2, window_bounds = array<i64: 1, 256>}, {transform_indices = @transform_3, window_bounds = array<i64: 1, 256>}, {pipeline_mode = #tpu.pipeline_mode<synchronous>, transform_indices = @transform_4, window_bounds = array<i64: 1, 1>}, {transform_indices = @transform_5, window_bounds = array<i64: 4, 256>}]} {
    %c0 = arith.constant 0 : index
    %c0_0 = arith.constant 0 : index
    %0 = vector.load %arg1[%c0, %c0_0] : memref<4x2048xbf16, #tpu.memory_space<vmem>>, vector<4x2048xbf16>
    %c0_1 = arith.constant 0 : index
    %c0_2 = arith.constant 0 : index
    %1 = vector.load %arg2[%c0_1, %c0_2] : memref<2048x256xbf16, #tpu.memory_space<vmem>>, vector<2048x256xbf16>
    %cst = arith.constant dense<0.000000e+00> : vector<4x256xf32>
    %2 = tpu.matmul %0, %1, %cst {dimension_numbers = #tpu.dot_dimension_numbers<[1], [0], [0], [1], [0, 0, 1, 1], [], []>} : vector<4x2048xbf16>, vector<2048x256xbf16>, vector<4x256xf32> -> vector<4x256xf32>
    %c0_3 = arith.constant 0 : index
    %c0_4 = arith.constant 0 : index
    %3 = vector.load %arg3[%c0_3, %c0_4] : memref<1x256xf32, #tpu.memory_space<vmem>>, vector<1x256xf32>
    %4 = vector.broadcast %3 : vector<1x256xf32> to vector<4x256xf32>
    %5 = arith.mulf %2, %4 : vector<4x256xf32>
    %c0_5 = arith.constant 0 : index
    %c0_6 = arith.constant 0 : index
    %6 = vector.load %arg4[%c0_5, %c0_6] : memref<1x256xf32, #tpu.memory_space<vmem>>, vector<1x256xf32>
    %7 = vector.broadcast %6 : vector<1x256xf32> to vector<4x256xf32>
    %8 = arith.addf %5, %7 : vector<4x256xf32>
    %c0_7 = arith.constant 0 : index
    %c0_8 = arith.constant 0 : index
    %9 = vector.load %arg5[%c0_7, %c0_8] : memref<1x1xf32, #tpu.memory_space<vmem>>, vector<1x1xf32>
    %cst_9 = arith.constant 0.000000e+00 : f32
    %10 = vector.broadcast %cst_9 : f32 to vector<4x256xf32>
    %11 = arith.cmpf oge, %8, %10 : vector<4x256xf32>
    %12 = vector.broadcast %9 : vector<1x1xf32> to vector<4x256xf32>
    %13 = arith.mulf %12, %8 : vector<4x256xf32>
    %14 = arith.select %11, %8, %13 : vector<4x256xi1>, vector<4x256xf32>
    %c0_10 = arith.constant 0 : index
    %c0_11 = arith.constant 0 : index
    %15 = vector.load %arg6[%c0_10, %c0_11] : memref<4x256xf32, #tpu.memory_space<vmem>>, vector<4x256xf32>
    tpu.vector_store %arg6[%c0_10, %c0_11], %14 {strides = array<i32>} : memref<4x256xf32, #tpu.memory_space<vmem>>, vector<4x256xf32>,
    return
  }
  func.func @transform_0(%arg0: i32) -> (i32, i32) {
    %c0_i32 = arith.constant 0 : i32
    %c0_i32_0 = arith.constant 0 : i32
    %c0_i32_1 = arith.constant 0 : i32
    return %c0_i32, %c0_i32_0 : i32, i32
  }
  func.func @transform_1(%arg0: i32) -> (i32, i32) {
    %c0_i32 = arith.constant 0 : i32
    %c0_i32_0 = arith.constant 0 : i32
    return %c0_i32, %arg0 : i32, i32
  }
  func.func @transform_2(%arg0: i32) -> (i32, i32) {
    %c0_i32 = arith.constant 0 : i32
    %c0_i32_0 = arith.constant 0 : i32
    return %c0_i32, %arg0 : i32, i32
  }
  func.func @transform_3(%arg0: i32) -> (i32, i32) {
    %c0_i32 = arith.constant 0 : i32
    %c0_i32_0 = arith.constant 0 : i32
    return %c0_i32, %arg0 : i32, i32
  }
  func.func @transform_4(%arg0: i32) -> (i32, i32) {
    %c0_i32 = arith.constant 0 : i32
    %c0_i32_0 = arith.constant 0 : i32
    %c0_i32_1 = arith.constant 0 : i32
    return %c0_i32, %c0_i32_0 : i32, i32
  }
  func.func @transform_5(%arg0: i32) -> (i32, i32) {
    %c0_i32 = arith.constant 0 : i32
    %c0_i32_0 = arith.constant 0 : i32
    return %c0_i32, %arg0 : i32, i32
  }
}

module attributes {stable_mosaic.version = 11 : i64} {
  func.func @_fc_gemm_kernel(%arg0: i32, %arg1: memref<4x512xbf16, #tpu.memory_space<vmem>>, %arg2: memref<512x8xbf16, #tpu.memory_space<vmem>>, %arg3: memref<1x8xf32, #tpu.memory_space<vmem>>, %arg4: memref<1x8xf32, #tpu.memory_space<vmem>>, %arg5: memref<1x1xf32, #tpu.memory_space<vmem>>, %arg6: memref<4x8xf32, #tpu.memory_space<vmem>>) attributes {dimension_semantics = [#tpu.dimension_semantics<parallel>], iteration_bounds = array<i64: 1>, scalar_prefetch = 0 : i64, scratch_operands = 0 : i64, tpu.core_type = #tpu.core_type<tc>, window_params = [{pipeline_mode = #tpu.pipeline_mode<synchronous>, transform_indices = @transform_0, window_bounds = array<i64: 4, 512>}, {transform_indices = @transform_1, window_bounds = array<i64: 512, 8>}, {transform_indices = @transform_2, window_bounds = array<i64: 1, 8>}, {transform_indices = @transform_3, window_bounds = array<i64: 1, 8>}, {pipeline_mode = #tpu.pipeline_mode<synchronous>, transform_indices = @transform_4, window_bounds = array<i64: 1, 1>}, {transform_indices = @transform_5, window_bounds = array<i64: 4, 8>}]} {
    %c0 = arith.constant 0 : index
    %c0_0 = arith.constant 0 : index
    %0 = vector.load %arg1[%c0, %c0_0] : memref<4x512xbf16, #tpu.memory_space<vmem>>, vector<4x512xbf16>
    %c0_1 = arith.constant 0 : index
    %c0_2 = arith.constant 0 : index
    %1 = vector.load %arg2[%c0_1, %c0_2] : memref<512x8xbf16, #tpu.memory_space<vmem>>, vector<512x8xbf16>
    %cst = arith.constant dense<0.000000e+00> : vector<4x8xf32>
    %2 = tpu.matmul %0, %1, %cst {dimension_numbers = #tpu.dot_dimension_numbers<[1], [0], [0], [1], [0, 0, 1, 1], [], []>} : vector<4x512xbf16>, vector<512x8xbf16>, vector<4x8xf32> -> vector<4x8xf32>
    %c0_3 = arith.constant 0 : index
    %c0_4 = arith.constant 0 : index
    %3 = vector.load %arg3[%c0_3, %c0_4] : memref<1x8xf32, #tpu.memory_space<vmem>>, vector<1x8xf32>
    %4 = vector.broadcast %3 : vector<1x8xf32> to vector<4x8xf32>
    %5 = arith.mulf %2, %4 : vector<4x8xf32>
    %c0_5 = arith.constant 0 : index
    %c0_6 = arith.constant 0 : index
    %6 = vector.load %arg4[%c0_5, %c0_6] : memref<1x8xf32, #tpu.memory_space<vmem>>, vector<1x8xf32>
    %7 = vector.broadcast %6 : vector<1x8xf32> to vector<4x8xf32>
    %8 = arith.addf %5, %7 : vector<4x8xf32>
    %c0_7 = arith.constant 0 : index
    %c0_8 = arith.constant 0 : index
    %9 = vector.load %arg6[%c0_7, %c0_8] : memref<4x8xf32, #tpu.memory_space<vmem>>, vector<4x8xf32>
    tpu.vector_store %arg6[%c0_7, %c0_8], %8 {strides = array<i32>} : memref<4x8xf32, #tpu.memory_space<vmem>>, vector<4x8xf32>,
    return
  }
  func.func @transform_0(%arg0: i32) -> (i32, i32) {
    %c0_i32 = arith.constant 0 : i32
    %c0_i32_0 = arith.constant 0 : i32
    %c0_i32_1 = arith.constant 0 : i32
    return %c0_i32, %c0_i32_0 : i32, i32
  }
  func.func @transform_1(%arg0: i32) -> (i32, i32) {
    %c0_i32 = arith.constant 0 : i32
    %c0_i32_0 = arith.constant 0 : i32
    return %c0_i32, %arg0 : i32, i32
  }
  func.func @transform_2(%arg0: i32) -> (i32, i32) {
    %c0_i32 = arith.constant 0 : i32
    %c0_i32_0 = arith.constant 0 : i32
    return %c0_i32, %arg0 : i32, i32
  }
  func.func @transform_3(%arg0: i32) -> (i32, i32) {
    %c0_i32 = arith.constant 0 : i32
    %c0_i32_0 = arith.constant 0 : i32
    return %c0_i32, %arg0 : i32, i32
  }
  func.func @transform_4(%arg0: i32) -> (i32, i32) {
    %c0_i32 = arith.constant 0 : i32
    %c0_i32_0 = arith.constant 0 : i32
    %c0_i32_1 = arith.constant 0 : i32
    return %c0_i32, %c0_i32_0 : i32, i32
  }
  func.func @transform_5(%arg0: i32) -> (i32, i32) {
    %c0_i32 = arith.constant 0 : i32
    %c0_i32_0 = arith.constant 0 : i32
    return %c0_i32, %arg0 : i32, i32
  }
}

</mosaic_0001>

<bundles_post_ra>
// kernel: _lambda_.39
= control target key start
LH: loop header
LB: loop body
LE: loop exit
PB: predicated region body
PF: predicated region fallthrough
CT: control target
= control target key end

     0   :  { %s936_s15 = smov 0   ;;  %s938_s16 = smov 0   ;;  %s1129_s0 = inlined_call_operand.vmem [shape: bf16[8,160], index: 0, kind: input, shape index: {}]   ;;  %s1130_s1 = inlined_call_operand.vmem [shape: bf16[160,4096], index: 1, kind: input, shape index: {}]   ;;  %s1131_s2 = inlined_call_operand.vmem [shape: f32[8,1], index: 2, kind: input, shape index: {}]   ;;  %s1132_s3 = inlined_call_operand.vmem [shape: f32[8,1], index: 3, kind: input, shape index: {}]   ;;  %s1133_s4 = inlined_call_operand.vmem [shape: bf16[8,4096], index: 4, kind: output, shape index: {}]  }
   0x1   :  { %s940_s17 = smov 0  }
   0x2 LB: > { %s736_s18 = sadd.s32 4294967295, %s908_s17   ;;  %s953_s19 = sadd.s32 1, %s908_s17   ;;  %s908_s17 = sphi %s940_s17, %s1136_s17   ;;  %s904_s16 = sphi %s938_s16, %s1135_s16   ;;  %s900_s15 = sphi %s936_s15, %s1134_s15  }
   0x3   : > { %s39_s20 = ssub.s32 %s908_s17, %s953_s19  ;;  %s42_s21 = sadd.s32 1, %s904_s16 }
   0x4   : > { %p40_p0 = scmp.eq.s32.totalorder %s39_s20, 0  ;;  %p49_p1 = scmp.ne.s32.totalorder %s904_s16, %s900_s15 }
   0x5   : > { %p50_p2 = scmp.eq.s32.totalorder %s908_s17, 0  ;;  %p739_p4 = scmp.ge.s32.totalorder %s908_s17, 8 }
   0x6   : > { %s962_s22 = scalar_select %p40_p0, %s904_s16, %s42_s21  }
   0x7   : > { %p51_p3 = por %p50_p2, %p49_p1  ;;  %152 = sbr.rel (%p739_p4) target bundleno = 36 (0x24), region = 28 }
   0xc   : > { %155 = sbr.rel (!%p51_p3) target bundleno = 36 (0x24), region = 32  ;;  %s157_s23 = sand.u32 (%p51_p3), 1, %s904_s16  }
   0xd   : > { %s793_s24 = sshll.u32 (%p51_p3), %s908_s17, 4  ;;  %s796_s25 = smul.u32 (%p51_p3), 320, %s157_s23 }
   0xe   : > { %s970_s28 = scalar_lea.vmem (%p51_p3), %s1130_s1, %s793_s24 }
   0xf   : > { %v175_v0 = vld [vmem:[%s970_s28] sm:$0xff] (%p51_p3)  ;;  %v177_v1 = vld [vmem:[%s970_s28 + $0x8] sm:$0xff] (%p51_p3)  ;;  %s978_s29 = scalar_lea.vmem (%p51_p3), [#allocation2], %s796_s25 }
  0x10   : > { %v179_v2 = vld [vmem:[%s970_s28 + $0x80] sm:$0xff] (%p51_p3)  ;;  %v181_v3 = vld [vmem:[%s970_s28 + $0x88] sm:$0xff] (%p51_p3)  ;;  %176 = vst [vmem:[%s978_s29] sm:$0xff] (%p51_p3), %v175_v0  ;;  %178 = vst [vmem:[%s978_s29 + $0x8] sm:$0xff] (%p51_p3), %v177_v1 }
  0x11   : > { %v183_v4 = vld [vmem:[%s970_s28 + $0x100] sm:$0xff]  ;;  %v185_v5 = vld [vmem:[%s970_s28 + $0x108] sm:$0xff]  ;;  %180 = vst [vmem:[%s978_s29 + $0x10] sm:$0xff] %v179_v2  ;;  %182 = vst [vmem:[%s978_s29 + $0x18] sm:$0xff] %v181_v3 }
  0x12   : > { %184 = vst [vmem:[%s978_s29 + $0x20] sm:$0xff] %v183_v4  ;;  %186 = vst [vmem:[%s978_s29 + $0x28] sm:$0xff] %v185_v5  ;;  %v187_v6 = vld [vmem:[%s970_s28 + $0x180] sm:$0xff]  ;;  %v189_v7 = vld [vmem:[%s970_s28 + $0x188] sm:$0xff] }
  0x13   : > { %v191_v8 = vld [vmem:[%s970_s28 + $0x200] sm:$0xff]  ;;  %188 = vst [vmem:[%s978_s29 + $0x30] sm:$0xff] %v187_v6  ;;  %190 = vst [vmem:[%s978_s29 + $0x38] sm:$0xff] %v189_v7  ;;  %v193_v9 = vld [vmem:[%s970_s28 + $0x208] sm:$0xff] }
  0x14   : > { %192 = vst [vmem:[%s978_s29 + $0x40] sm:$0xff] %v191_v8  ;;  %v195_v10 = vld [vmem:[%s970_s28 + $0x280] sm:$0xff]  ;;  %v197_v11 = vld [vmem:[%s970_s28 + $0x288] sm:$0xff]  ;;  %194 = vst [vmem:[%s978_s29 + $0x48] sm:$0xff] %v193_v9 }
  0x15   : > { %196 = vst [vmem:[%s978_s29 + $0x50] sm:$0xff] %v195_v10  ;;  %198 = vst [vmem:[%s978_s29 + $0x58] sm:$0xff] %v197_v11  ;;  %v199_v12 = vld [vmem:[%s970_s28 + $0x300] sm:$0xff]  ;;  %v201_v13 = vld [vmem:[%s970_s28 + $0x308] sm:$0xff] }
  0x16   : > { %v203_v14 = vld [vmem:[%s970_s28 + $0x380] sm:$0xff]  ;;  %200 = vst [vmem:[%s978_s29 + $0x60] sm:$0xff] %v199_v12  ;;  %202 = vst [vmem:[%s978_s29 + $0x68] sm:$0xff] %v201_v13  ;;  %v205_v15 = vld [vmem:[%s970_s28 + $0x388] sm:$0xff] }
  0x17   : > { %204 = vst [vmem:[%s978_s29 + $0x70] sm:$0xff] %v203_v14  ;;  %v207_v16 = vld [vmem:[%s970_s28 + $0x400] sm:$0xff]  ;;  %v209_v17 = vld [vmem:[%s970_s28 + $0x408] sm:$0xff]  ;;  %206 = vst [vmem:[%s978_s29 + $0x78] sm:$0xff] %v205_v15 }
  0x18   : > { %208 = vst [vmem:[%s978_s29 + $0x80] sm:$0xff] %v207_v16  ;;  %210 = vst [vmem:[%s978_s29 + $0x88] sm:$0xff] %v209_v17  ;;  %v211_v18 = vld [vmem:[%s970_s28 + $0x480] sm:$0xff]  ;;  %v213_v19 = vld [vmem:[%s970_s28 + $0x488] sm:$0xff] }
  0x19   : > { %v215_v20 = vld [vmem:[%s970_s28 + $0x500] sm:$0xff]  ;;  %212 = vst [vmem:[%s978_s29 + $0x90] sm:$0xff] %v211_v18  ;;  %214 = vst [vmem:[%s978_s29 + $0x98] sm:$0xff] %v213_v19  ;;  %v217_v21 = vld [vmem:[%s970_s28 + $0x508] sm:$0xff] }
  0x1a   : > { %216 = vst [vmem:[%s978_s29 + $0xa0] sm:$0xff] %v215_v20  ;;  %v219_v22 = vld [vmem:[%s970_s28 + $0x580] sm:$0xff]  ;;  %v221_v23 = vld [vmem:[%s970_s28 + $0x588] sm:$0xff]  ;;  %218 = vst [vmem:[%s978_s29 + $0xa8] sm:$0xff] %v217_v21 }
  0x1b   : > { %220 = vst [vmem:[%s978_s29 + $0xb0] sm:$0xff] %v219_v22  ;;  %222 = vst [vmem:[%s978_s29 + $0xb8] sm:$0xff] %v221_v23  ;;  %v223_v24 = vld [vmem:[%s970_s28 + $0x600] sm:$0xff]  ;;  %v225_v25 = vld [vmem:[%s970_s28 + $0x608] sm:$0xff] }
  0x1c   : > { %v227_v26 = vld [vmem:[%s970_s28 + $0x680] sm:$0xff]  ;;  %224 = vst [vmem:[%s978_s29 + $0xc0] sm:$0xff] %v223_v24  ;;  %226 = vst [vmem:[%s978_s29 + $0xc8] sm:$0xff] %v225_v25  ;;  %v229_v27 = vld [vmem:[%s970_s28 + $0x688] sm:$0xff] }
  0x1d   : > { %228 = vst [vmem:[%s978_s29 + $0xd0] sm:$0xff] %v227_v26  ;;  %v231_v28 = vld [vmem:[%s970_s28 + $0x700] sm:$0xff]  ;;  %v233_v29 = vld [vmem:[%s970_s28 + $0x708] sm:$0xff]  ;;  %230 = vst [vmem:[%s978_s29 + $0xd8] sm:$0xff] %v229_v27 }
  0x1e   : > { %232 = vst [vmem:[%s978_s29 + $0xe0] sm:$0xff] %v231_v28  ;;  %234 = vst [vmem:[%s978_s29 + $0xe8] sm:$0xff] %v233_v29  ;;  %v235_v30 = vld [vmem:[%s970_s28 + $0x780] sm:$0xff]  ;;  %v237_v31 = vld [vmem:[%s970_s28 + $0x788] sm:$0xff] }
  0x1f   : > { %v239_v32 = vld [vmem:[%s970_s28 + $0x800] sm:$0xff]  ;;  %236 = vst [vmem:[%s978_s29 + $0xf0] sm:$0xff] %v235_v30  ;;  %238 = vst [vmem:[%s978_s29 + $0xf8] sm:$0xff] %v237_v31  ;;  %v241_v33 = vld [vmem:[%s970_s28 + $0x808] sm:$0xff] }
  0x20   : > { %240 = vst [vmem:[%s978_s29 + $0x100] sm:$0xff] %v239_v32  ;;  %v243_v34 = vld [vmem:[%s970_s28 + $0x880] sm:$0xff]  ;;  %v245_v35 = vld [vmem:[%s970_s28 + $0x888] sm:$0xff]  ;;  %242 = vst [vmem:[%s978_s29 + $0x108] sm:$0xff] %v241_v33 }
  0x21   : > { %244 = vst [vmem:[%s978_s29 + $0x110] sm:$0xff] %v243_v34  ;;  %246 = vst [vmem:[%s978_s29 + $0x118] sm:$0xff] %v245_v35  ;;  %v247_v36 = vld [vmem:[%s970_s28 + $0x900] sm:$0xff]  ;;  %v249_v37 = vld [vmem:[%s970_s28 + $0x908] sm:$0xff] }
  0x22   : > { %v251_v38 = vld [vmem:[%s970_s28 + $0x980] sm:$0xff]  ;;  %248 = vst [vmem:[%s978_s29 + $0x120] sm:$0xff] %v247_v36  ;;  %250 = vst [vmem:[%s978_s29 + $0x128] sm:$0xff] %v249_v37  ;;  %v253_v39 = vld [vmem:[%s970_s28 + $0x988] sm:$0xff] }
  0x23   : > { %252 = vst [vmem:[%s978_s29 + $0x130] sm:$0xff] %v251_v38  ;;  %254 = vst [vmem:[%s978_s29 + $0x138] sm:$0xff] %v253_v39 }
  0x24 PF: > { %p742_p5 = scmp.ge.s32.totalorder %s908_s17, 1  ;;  %p259_p6 = scmp.lt.s32.totalorder %s908_s17, 9 }
  0x26   : > { %p260_p7 = pnand %p742_p5, %p259_p6 }
  0x27   : > { %s266_s30 = sand.u32 (!%p260_p7), 1, %s900_s15   ;;  %s743_s13 = sshll.u32 (!%p260_p7), %s736_s18, 2 }
  0x28   : > { %263 = sbr.rel (%p260_p7) target bundleno = 293 (0x125), region = 55  ;;  %p293_p8 = scmp.lt.s32.totalorder (!%p260_p7), %s743_s13, 31 }
  0x29   : > { %s797_s9 = smul.u32 (!%p260_p7), 320, %s266_s30 }
  0x2b   : > { %s1070_s12 = scalar_lea.vmem (!%p260_p7), [#allocation2], %s797_s9 }
  0x2d   : > { %v1060_v40 = vld [vmem:[%s1129_s0] sm:$0xff]  ;;  %vm546_vm0 = vcmask 261120   ;;  %v910_v43 = vmov 0   ;;  %v826_v46 = vld [vmem:[%s1070_s12 + $0xec] ss:$16 sps:$4 sm:$0xff]   ;;  %s1138_s13 = smov (!%p293_p8, %s743_s13), 31 }
  0x2e   : > { %v632_v41 = vld [vmem:[%s1131_s2] sm:$0xff]  ;;  %v746_v42 = vcombine.high %v1060_v40, %v1060_v40  ;;  %823 = vset.pattern.permute.xlu0 %v910_v43  ;;  %v829_v48 = vld [vmem:[%s1070_s12 + $0xe8] ss:$16 sps:$4 sm:$0xff]   ;;  %591 = vmatprep.subr.bf16.mxu1 %v826_v46  ;;  %v832_v50 = vld [vmem:[%s1070_s12 + $0xcc] ss:$16 sps:$4 sm:$0xff]   ;;  %v745_v21 = vcombine.low %v1060_v40, %v1060_v40  ;;  %s744_s14 = sshll.u32 %s1138_s13, 2 }
  0x2f   : > { %635 = vperm.xlu0 %823, %v632_v41   ;;  %v642_v44 = vld [vmem:[%s1132_s3] sm:$0xff]  ;;  %592 = vmatpush1.bf16.msra.mxu1 %v829_v48  ;;  %v835_v52 = vld [vmem:[%s1070_s12 + $0xc8] ss:$16 sps:$4 sm:$0xff]   ;;  %v838_v54 = vld [vmem:[%s1070_s12 + $0xac] ss:$16 sps:$4 sm:$0xff]   ;;  %s296_s18 = scalar_lea.vmem %s1133_s4, %s744_s14 }
  0x30   : > { %787 = vmatprep.mubr.msk.bf16.mxu0 %vm546_vm0, %v746_v42  ;;  %788 = vmatprep.mubr.msk.bf16.mxu1 %vm546_vm0, %v746_v42  ;;  %v824_v45 = vld [vmem:[%s1070_s12 + $0xe4] ss:$16 sps:$4 sm:$0xff]   ;;  %v828_v47 = vld [vmem:[%s1070_s12 + $0xe0] ss:$16 sps:$4 sm:$0xff]   ;;  %v841_v56 = vld [vmem:[%s1070_s12 + $0xa8] ss:$16 sps:$4 sm:$0xff]  }
  0x31   : > { %550 = vmatprep.subr.bf16.mxu0 %v824_v45  ;;  %v830_v49 = vld [vmem:[%s1070_s12 + $0xc4] ss:$16 sps:$4 sm:$0xff]   ;;  %v834_v51 = vld [vmem:[%s1070_s12 + $0xc0] ss:$16 sps:$4 sm:$0xff]   ;;  %593 = vmatprep.subr.bf16.mxu1 %v832_v50  ;;  %v844_v58 = vld [vmem:[%s1070_s12 + $0x8c] ss:$16 sps:$4 sm:$0xff]  }
  0x32   : > { %551 = vmatpush1.bf16.msra.mxu0 %v828_v47  ;;  %v836_v53 = vld [vmem:[%s1070_s12 + $0xa4] ss:$16 sps:$4 sm:$0xff]   ;;  %v840_v55 = vld [vmem:[%s1070_s12 + $0xa0] ss:$16 sps:$4 sm:$0xff]   ;;  %v847_v60 = vld [vmem:[%s1070_s12 + $0x88] ss:$16 sps:$4 sm:$0xff]  }
  0x33   : > { %645 = vperm.xlu0 %823, %v642_v44   ;;  %552 = vmatprep.subr.bf16.mxu0 %v830_v49  ;;  %v842_v57 = vld [vmem:[%s1070_s12 + $0x84] ss:$16 sps:$4 sm:$0xff]   ;;  %v846_v59 = vld [vmem:[%s1070_s12 + $0x80] ss:$16 sps:$4 sm:$0xff]   ;;  %v850_v62 = vld [vmem:[%s1070_s12 + $0x6c] ss:$16 sps:$4 sm:$0xff]  }
  0x34   : > { %594 = vmatpush1.bf16.msra.mxu1 %v835_v52  ;;  %v848_v61 = vld [vmem:[%s1070_s12 + $0x64] ss:$16 sps:$4 sm:$0xff]   ;;  %v852_v63 = vld [vmem:[%s1070_s12 + $0x60] ss:$16 sps:$4 sm:$0xff]   ;;  %v853_v0 = vld [vmem:[%s1070_s12 + $0x68] ss:$16 sps:$4 sm:$0xff]  }
  0x35   : > { %595 = vmatprep.subr.bf16.mxu1 %v838_v54  ;;  %v854_v1 = vld [vmem:[%s1070_s12 + $0x44] ss:$16 sps:$4 sm:$0xff]   ;;  %v856_v2 = vld [vmem:[%s1070_s12 + $0x4c] ss:$16 sps:$4 sm:$0xff]   ;;  %v858_v3 = vld [vmem:[%s1070_s12 + $0x40] ss:$16 sps:$4 sm:$0xff]  }
  0x36   : > { %553 = vmatpush1.bf16.msra.mxu0 %v834_v51  ;;  %v859_v4 = vld [vmem:[%s1070_s12 + $0x48] ss:$16 sps:$4 sm:$0xff]   ;;  %v860_v5 = vld [vmem:[%s1070_s12 + $0x24] ss:$16 sps:$4 sm:$0xff]   ;;  %v862_v6 = vld [vmem:[%s1070_s12 + $0x2c] ss:$16 sps:$4 sm:$0xff]  }
  0x37   : > { %554 = vmatprep.subr.bf16.mxu0 %v836_v53  ;;  %v864_v7 = vld [vmem:[%s1070_s12 + $0x20] ss:$16 sps:$4 sm:$0xff]   ;;  %v865_v8 = vld [vmem:[%s1070_s12 + $0x28] ss:$16 sps:$4 sm:$0xff]   ;;  %v866_v9 = vld [vmem:[%s1070_s12 + $0x4] ss:$16 sps:$4 sm:$0xff]  }
  0x38   : > { %596 = vmatpush1.bf16.msra.mxu1 %v841_v56  ;;  %v868_v10 = vld [vmem:[%s1070_s12 + $0xc] ss:$16 sps:$4 sm:$0xff]   ;;  %v870_v11 = vld [vmem:[%s1070_s12] ss:$16 sps:$4 sm:$0xff]   ;;  %v871_v12 = vld [vmem:[%s1070_s12 + $0x8] ss:$16 sps:$4 sm:$0xff]  }
  0x39   : > { %597 = vmatprep.subr.bf16.mxu1 %v844_v58  ;;  %v872_v13 = vld [vmem:[%s1070_s12 + $0x124] ss:$16 sps:$4 sm:$0xff]   ;;  %v874_v14 = vld [vmem:[%s1070_s12 + $0x12c] ss:$16 sps:$4 sm:$0xff]   ;;  %v876_v15 = vld [vmem:[%s1070_s12 + $0x120] ss:$16 sps:$4 sm:$0xff]  }
  0x3a   : > { %555 = vmatpush1.bf16.msra.mxu0 %v840_v55  ;;  %v877_v16 = vld [vmem:[%s1070_s12 + $0x128] ss:$16 sps:$4 sm:$0xff]   ;;  %v878_v17 = vld [vmem:[%s1070_s12 + $0x104] ss:$16 sps:$4 sm:$0xff]   ;;  %v880_v18 = vld [vmem:[%s1070_s12 + $0x10c] ss:$16 sps:$4 sm:$0xff]  }
  0x3b   : > { %556 = vmatprep.subr.bf16.mxu0 %v842_v57  ;;  %v882_v19 = vld [vmem:[%s1070_s12 + $0x100] ss:$16 sps:$4 sm:$0xff]   ;;  %v883_v20 = vld [vmem:[%s1070_s12 + $0x108] ss:$16 sps:$4 sm:$0xff]  }
  0x3c   : > { %598 = vmatpush1.bf16.msra.mxu1 %v847_v60 }
  0x3d   : > { %599 = vmatprep.subr.bf16.mxu1 %v850_v62 }
  0x3e   : > { %557 = vmatpush1.bf16.msra.mxu0 %v846_v59 }
  0x3f   : > { %558 = vmatprep.subr.bf16.mxu0 %v848_v61 }
  0x40   : > { %600 = vmatpush1.bf16.msra.mxu1 %v853_v0 }
  0x41   : > { %601 = vmatprep.subr.bf16.mxu1 %v856_v2 }
  0x42   : > { %559 = vmatpush1.bf16.msra.mxu0 %v852_v63 }
  0x43   : > { %560 = vmatprep.subr.bf16.mxu0 %v854_v1 }
  0x44   : > { %602 = vmatpush1.bf16.msra.mxu1 %v859_v4 }
  0x45   : > { %603 = vmatprep.subr.bf16.mxu1 %v862_v6 }
  0x46   : > { %561 = vmatpush1.bf16.msra.mxu0 %v858_v3 }
  0x47   : > { %562 = vmatprep.subr.bf16.mxu0 %v860_v5 }
  0x48   : > { %604 = vmatpush1.bf16.msra.mxu1 %v865_v8 }
  0x49   : > { %605 = vmatprep.subr.bf16.mxu1 %v868_v10 }
  0x4a   : > { %563 = vmatpush1.bf16.msra.mxu0 %v864_v7 }
  0x4b   : > { %564 = vmatprep.subr.bf16.mxu0 %v866_v9 }
  0x4c   : > { %606 = vmatpush1.bf16.msra.mxu1 %v871_v12 }
  0x4d   : > { %619 = vmatprep.subr.bf16.mxu1 %v874_v14 }
  0x4e   : > { %565 = vmatpush1.bf16.msra.mxu0 %v870_v11 }
  0x4f   : > { %578 = vmatprep.subr.bf16.mxu0 %v872_v13 }
  0x50   : > { %620 = vmatpush2.bf16.msra.mxu1 %v877_v16 }
  0x51   : > { %621 = vmatprep.subr.bf16.mxu1 %v880_v18 }
  0x52   : > { %579 = vmatpush2.bf16.msra.mxu0 %v876_v15 }
  0x53   : > { %580 = vmatprep.subr.bf16.mxu0 %v878_v17 }
  0x54   : > { %622 = vmatpush2.bf16.msra.mxu1 %v883_v20 }
  0x56   : > { %581 = vmatpush2.bf16.msra.mxu0 %v882_v19 }
  0x57   : > { %624 = vmatmul.mubr.bf16.vlgmr.msra.gmra.mxu1 %v745_v21 }
  0x59   : > { %583 = vmatmul.mubr.bf16.vlgmr.msra.gmra.mxu0 %v745_v21 }
  0xaa   : > { %v636_v22 = vpop.permute.xlu0 %635 }
  0xae   : > { %v646_v25 = vpop.permute.xlu0 %645 }
 0x117   : > { %v625_v24 = vpop.f32.mrf.mxu1 }
 0x118   : > { %v640_v27 = vmul.f32 %v636_v22, %v625_v24 }
 0x119   : > { %v584_v23 = vpop.f32.mrf.mxu0  ;;  %v627_v29 = vpop.f32.mrf.mxu1 }
 0x11a   : > { %v638_v26 = vmul.f32 %v636_v22, %v584_v23  ;;  %v650_v31 = vadd.f32 %v646_v25, %v640_v27  ;;  %v641_v33 = vmul.f32 %v636_v22, %v627_v29 }
 0x11b   : > { %v586_v28 = vpop.f32.mrf.mxu0  ;;  %v629_v35 = vpop.f32.mrf.mxu1 }
 0x11c   : > { %v648_v30 = vadd.f32 %v646_v25, %v638_v26  ;;  %v639_v32 = vmul.f32 %v636_v22, %v586_v28  ;;  %v651_v37 = vadd.f32 %v646_v25, %v641_v33  ;;  %v654_v41 = vmax.f32 %v650_v31, 0.0 }
 0x11d   : > { %v588_v34 = vpop.f32.mrf.mxu0  ;;  %v630_v39 = vpop.f32.mrf.mxu1 }
 0x11e   : > { %v649_v36 = vadd.f32 %v646_v25, %v639_v32  ;;  %v652_v40 = vmax.f32 %v648_v30, 0.0  ;;  %v655_v43 = vmax.f32 %v651_v37, 0.0 }
 0x11f   : > { %v589_v38 = vpop.f32.mrf.mxu0 }
 0x120   : > { %v653_v42 = vmax.f32 %v649_v36, 0.0  ;;  %v795_v45 = vpack.c.bf16 %v655_v43, %v654_v41 }
 0x122   : > { %v794_v44 = vpack.c.bf16 %v653_v42, %v652_v40  ;;  %673 = vst [vmem:[%s296_s18 + $0x8] sm:$0xff] %v795_v45 }
 0x124   : > { %672 = vst [vmem:[%s296_s18] sm:$0xff] %v794_v44 }
 0x125 PF: > { %p11_p9 = scmp.ge.s32.totalorder %s953_s19, 10   ;;  %s1134_s15 = smov %s904_s16 }
 0x126   : > { %s1135_s16 = smov %s962_s22  ;;  %s1136_s17 = smov %s953_s19 }
 0x127   :  { %13 = sbr.rel (!%p11_p9) target bundleno = 2 (0x2), region = 94 }

// kernel: _lambda_.40
= control target key start
LH: loop header
LB: loop body
LE: loop exit
PB: predicated region body
PF: predicated region fallthrough
CT: control target
= control target key end

     0   :  { %s716_s15 = smov 0   ;;  %s718_s16 = smov 0   ;;  %s843_s0 = inlined_call_operand.vmem [shape: bf16[8,80], index: 0, kind: input, shape index: {}]   ;;  %s844_s1 = inlined_call_operand.vmem [shape: bf16[80,1024], index: 1, kind: input, shape index: {}]   ;;  %s845_s2 = inlined_call_operand.vmem [shape: f32[8,1], index: 2, kind: input, shape index: {}]   ;;  %s846_s3 = inlined_call_operand.vmem [shape: f32[8,1], index: 3, kind: input, shape index: {}]   ;;  %s847_s4 = inlined_call_operand.vmem [shape: bf16[8,1024], index: 4, kind: output, shape index: {}]  }
   0x1   :  { %s720_s17 = smov 0  }
   0x2 LB: > { %s570_s18 = sadd.s32 4294967295, %s688_s17   ;;  %s733_s19 = sadd.s32 1, %s688_s17   ;;  %s688_s17 = sphi %s720_s17, %s850_s17   ;;  %s684_s16 = sphi %s718_s16, %s849_s16   ;;  %s680_s15 = sphi %s716_s15, %s848_s15  }
   0x3   : > { %s39_s20 = ssub.s32 %s688_s17, %s733_s19  ;;  %s42_s21 = sadd.s32 1, %s684_s16 }
   0x4   : > { %p40_p0 = scmp.eq.s32.totalorder %s39_s20, 0  ;;  %p49_p1 = scmp.ne.s32.totalorder %s684_s16, %s680_s15 }
   0x5   : > { %p50_p2 = scmp.eq.s32.totalorder %s688_s17, 0  ;;  %p573_p4 = scmp.ge.s32.totalorder %s688_s17, 2 }
   0x6   : > { %s742_s22 = scalar_select %p40_p0, %s684_s16, %s42_s21  }
   0x7   : > { %p51_p3 = por %p50_p2, %p49_p1  ;;  %152 = sbr.rel (%p573_p4) target bundleno = 26 (0x1a), region = 28 }
   0xc   : > { %155 = sbr.rel (!%p51_p3) target bundleno = 26 (0x1a), region = 32  ;;  %s157_s23 = sand.u32 (%p51_p3), 1, %s684_s16  }
   0xd   : > { %s605_s24 = sshll.u32 (%p51_p3), %s688_s17, 4  ;;  %s608_s25 = smul.u32 (%p51_p3), 160, %s157_s23 }
   0xe   : > { %s750_s28 = scalar_lea.vmem (%p51_p3), %s844_s1, %s605_s24 }
   0xf   : > { %v175_v0 = vld [vmem:[%s750_s28] sm:$0xff] (%p51_p3)  ;;  %v177_v1 = vld [vmem:[%s750_s28 + $0x8] sm:$0xff] (%p51_p3)  ;;  %s758_s29 = scalar_lea.vmem (%p51_p3), [#allocation2], %s608_s25 }
  0x10   : > { %v179_v2 = vld [vmem:[%s750_s28 + $0x20] sm:$0xff] (%p51_p3)  ;;  %v181_v3 = vld [vmem:[%s750_s28 + $0x28] sm:$0xff] (%p51_p3)  ;;  %176 = vst [vmem:[%s758_s29] sm:$0xff] (%p51_p3), %v175_v0  ;;  %178 = vst [vmem:[%s758_s29 + $0x8] sm:$0xff] (%p51_p3), %v177_v1 }
  0x11   : > { %v183_v4 = vld [vmem:[%s750_s28 + $0x40] sm:$0xff]  ;;  %v185_v5 = vld [vmem:[%s750_s28 + $0x48] sm:$0xff]  ;;  %180 = vst [vmem:[%s758_s29 + $0x10] sm:$0xff] %v179_v2  ;;  %182 = vst [vmem:[%s758_s29 + $0x18] sm:$0xff] %v181_v3 }
  0x12   : > { %184 = vst [vmem:[%s758_s29 + $0x20] sm:$0xff] %v183_v4  ;;  %186 = vst [vmem:[%s758_s29 + $0x28] sm:$0xff] %v185_v5  ;;  %v187_v6 = vld [vmem:[%s750_s28 + $0x60] sm:$0xff]  ;;  %v189_v7 = vld [vmem:[%s750_s28 + $0x68] sm:$0xff] }
  0x13   : > { %v191_v8 = vld [vmem:[%s750_s28 + $0x80] sm:$0xff]  ;;  %188 = vst [vmem:[%s758_s29 + $0x30] sm:$0xff] %v187_v6  ;;  %190 = vst [vmem:[%s758_s29 + $0x38] sm:$0xff] %v189_v7  ;;  %v193_v9 = vld [vmem:[%s750_s28 + $0x88] sm:$0xff] }
  0x14   : > { %192 = vst [vmem:[%s758_s29 + $0x40] sm:$0xff] %v191_v8  ;;  %v195_v10 = vld [vmem:[%s750_s28 + $0xa0] sm:$0xff]  ;;  %v197_v11 = vld [vmem:[%s750_s28 + $0xa8] sm:$0xff]  ;;  %194 = vst [vmem:[%s758_s29 + $0x48] sm:$0xff] %v193_v9 }
  0x15   : > { %196 = vst [vmem:[%s758_s29 + $0x50] sm:$0xff] %v195_v10  ;;  %198 = vst [vmem:[%s758_s29 + $0x58] sm:$0xff] %v197_v11  ;;  %v199_v12 = vld [vmem:[%s750_s28 + $0xc0] sm:$0xff]  ;;  %v201_v13 = vld [vmem:[%s750_s28 + $0xc8] sm:$0xff] }
  0x16   : > { %v203_v14 = vld [vmem:[%s750_s28 + $0xe0] sm:$0xff]  ;;  %200 = vst [vmem:[%s758_s29 + $0x60] sm:$0xff] %v199_v12  ;;  %202 = vst [vmem:[%s758_s29 + $0x68] sm:$0xff] %v201_v13  ;;  %v205_v15 = vld [vmem:[%s750_s28 + $0xe8] sm:$0xff] }
  0x17   : > { %204 = vst [vmem:[%s758_s29 + $0x70] sm:$0xff] %v203_v14  ;;  %v207_v16 = vld [vmem:[%s750_s28 + $0x100] sm:$0xff]  ;;  %v209_v17 = vld [vmem:[%s750_s28 + $0x108] sm:$0xff]  ;;  %206 = vst [vmem:[%s758_s29 + $0x78] sm:$0xff] %v205_v15 }
  0x18   : > { %208 = vst [vmem:[%s758_s29 + $0x80] sm:$0xff] %v207_v16  ;;  %210 = vst [vmem:[%s758_s29 + $0x88] sm:$0xff] %v209_v17  ;;  %v211_v18 = vld [vmem:[%s750_s28 + $0x120] sm:$0xff]  ;;  %v213_v19 = vld [vmem:[%s750_s28 + $0x128] sm:$0xff] }
  0x19   : > { %212 = vst [vmem:[%s758_s29 + $0x90] sm:$0xff] %v211_v18  ;;  %214 = vst [vmem:[%s758_s29 + $0x98] sm:$0xff] %v213_v19 }
  0x1a PF: > { %p576_p5 = scmp.ge.s32.totalorder %s688_s17, 1  ;;  %p219_p6 = scmp.lt.s32.totalorder %s688_s17, 3 }
  0x1c   : > { %p220_p7 = pnand %p576_p5, %p219_p6 }
  0x1d   : > { %s226_s30 = sand.u32 (!%p220_p7), 1, %s680_s15   ;;  %s577_s13 = sshll.u32 (!%p220_p7), %s570_s18, 2 }
  0x1e   : > { %223 = sbr.rel (%p220_p7) target bundleno = 262 (0x106), region = 55  ;;  %p253_p8 = scmp.lt.s32.totalorder (!%p220_p7), %s577_s13, 7 }
  0x1f   : > { %s609_s7 = smul.u32 (!%p220_p7), 160, %s226_s30 }
  0x21   : > { %s803_s10 = scalar_lea.vmem (!%p220_p7), [#allocation2], %s609_s7 }
  0x23   : > { %v466_v20 = vld [vmem:[%s845_s2] sm:$0xff]  ;;  %v690_v21 = vmov 0   ;;  %v638_v24 = vld [vmem:[%s803_s10 + $0x8c] ss:$16 sps:$4 sm:$0xff]   ;;  %v641_v26 = vld [vmem:[%s803_s10 + $0x88] ss:$16 sps:$4 sm:$0xff]  }
  0x24   : > { %416 = vmatprep.mubr.bf16.mxu0 %v690_v21  ;;  %457 = vmatprep.mubr.bf16.mxu1 %v690_v21  ;;  %v476_v22 = vld [vmem:[%s846_s3] sm:$0xff]  ;;  %v644_v28 = vld [vmem:[%s803_s10 + $0x6c] ss:$16 sps:$4 sm:$0xff]   ;;  %v647_v30 = vld [vmem:[%s803_s10 + $0x68] ss:$16 sps:$4 sm:$0xff]   ;;  %vm380_vm0 = vcmask 654336  }
  0x25   : > { %635 = vset.pattern.permute.xlu0 %v690_v21  ;;  %v636_v23 = vld [vmem:[%s803_s10 + $0x84] ss:$16 sps:$4 sm:$0xff]   ;;  %v640_v25 = vld [vmem:[%s803_s10 + $0x80] ss:$16 sps:$4 sm:$0xff]   ;;  %431 = vmatprep.subr.bf16.mxu1 %v638_v24  ;;  %v650_v32 = vld [vmem:[%s803_s10 + $0x4c] ss:$16 sps:$4 sm:$0xff]  }
  0x26   : > { %469 = vperm.xlu0 %635, %v466_v20   ;;  %390 = vmatprep.subr.bf16.mxu0 %v636_v23  ;;  %v642_v27 = vld [vmem:[%s803_s10 + $0x64] ss:$16 sps:$4 sm:$0xff]   ;;  %v646_v29 = vld [vmem:[%s803_s10 + $0x60] ss:$16 sps:$4 sm:$0xff]   ;;  %v653_v34 = vld [vmem:[%s803_s10 + $0x48] ss:$16 sps:$4 sm:$0xff]  }
  0x27   : > { %391 = vmatpush1.bf16.msra.mxu0 %v640_v25  ;;  %432 = vmatpush1.bf16.msra.mxu1 %v641_v26  ;;  %v648_v31 = vld [vmem:[%s803_s10 + $0x44] ss:$16 sps:$4 sm:$0xff]   ;;  %v652_v33 = vld [vmem:[%s803_s10 + $0x40] ss:$16 sps:$4 sm:$0xff]   ;;  %v656_v36 = vld [vmem:[%s803_s10 + $0x2c] ss:$16 sps:$4 sm:$0xff]  }
  0x28   : > { %392 = vmatprep.subr.bf16.mxu0 %v642_v27  ;;  %433 = vmatprep.subr.bf16.mxu1 %v644_v28  ;;  %v654_v35 = vld [vmem:[%s803_s10 + $0x24] ss:$16 sps:$4 sm:$0xff]   ;;  %v658_v37 = vld [vmem:[%s803_s10 + $0x20] ss:$16 sps:$4 sm:$0xff]   ;;  %v659_v38 = vld [vmem:[%s803_s10 + $0x28] ss:$16 sps:$4 sm:$0xff]  }
  0x29   : > { %v660_v39 = vld [vmem:[%s803_s10 + $0x4] ss:$16 sps:$4 sm:$0xff]   ;;  %v662_v40 = vld [vmem:[%s803_s10 + $0xc] ss:$16 sps:$4 sm:$0xff]   ;;  %v664_v41 = vld [vmem:[%s803_s10] ss:$16 sps:$4 sm:$0xff]  }
  0x2a   : > { %479 = vperm.xlu0 %635, %v476_v22   ;;  %v665_v42 = vld [vmem:[%s803_s10 + $0x8] ss:$16 sps:$4 sm:$0xff]   ;;  %v259_v43 = vld [vmem:[%s843_s0] sm:$0xf]  ;;  %s852_s13 = smov (!%p253_p8, %s577_s13), 7 }
  0x2b   : > { %393 = vmatpush1.bf16.msra.mxu0 %v646_v29  ;;  %434 = vmatpush1.bf16.msra.mxu1 %v647_v30  ;;  %s578_s14 = sshll.u32 %s852_s13, 2 }
  0x2c   : > { %394 = vmatprep.subr.bf16.mxu0 %v648_v31  ;;  %435 = vmatprep.subr.bf16.mxu1 %v650_v32  ;;  %s256_s18 = scalar_lea.vmem %s847_s4, %s578_s14 }
  0x2f   : > { %395 = vmatpush1.bf16.msra.mxu0 %v652_v33  ;;  %436 = vmatpush1.bf16.msra.mxu1 %v653_v34 }
  0x30   : > { %396 = vmatprep.subr.bf16.mxu0 %v654_v35  ;;  %437 = vmatprep.subr.bf16.mxu1 %v656_v36 }
  0x33   : > { %397 = vmatpush1.bf16.msra.mxu0 %v658_v37  ;;  %438 = vmatpush1.bf16.msra.mxu1 %v659_v38 }
  0x34   : > { %398 = vmatprep.subr.bf16.mxu0 %v660_v39  ;;  %439 = vmatprep.subr.bf16.mxu1 %v662_v40 }
  0x37   : > { %399 = vmatpush1.bf16.msra.mxu0 %v664_v41  ;;  %440 = vmatpush1.bf16.msra.mxu1 %v665_v42 }
  0x3a   : > { %599 = vmatmul.mubr.msk.bf16.vlgmr.msra.gmra.mxu0 %vm380_vm0, %v259_v43  ;;  %600 = vmatmul.mubr.msk.bf16.vlgmr.msra.gmra.mxu1 %vm380_vm0, %v259_v43 }
  0xa1   : > { %v470_v44 = vpop.permute.xlu0 %469 }
  0xa5   : > { %v480_v47 = vpop.permute.xlu0 %479 }
  0xfa   : > { %v418_v45 = vpop.f32.mrf.mxu0  ;;  %v459_v46 = vpop.f32.mrf.mxu1 }
  0xfb   : > { %v472_v48 = vmul.f32 %v470_v44, %v418_v45  ;;  %v474_v49 = vmul.f32 %v470_v44, %v459_v46 }
  0xfc   : > { %v420_v50 = vpop.f32.mrf.mxu0  ;;  %v461_v51 = vpop.f32.mrf.mxu1 }
  0xfd   : > { %v482_v52 = vadd.f32 %v480_v47, %v472_v48  ;;  %v484_v53 = vadd.f32 %v480_v47, %v474_v49  ;;  %v473_v54 = vmul.f32 %v470_v44, %v420_v50  ;;  %v475_v55 = vmul.f32 %v470_v44, %v461_v51 }
  0xfe   : > { %v422_v56 = vpop.f32.mrf.mxu0  ;;  %v463_v57 = vpop.f32.mrf.mxu1 }
  0xff   : > { %v483_v58 = vadd.f32 %v480_v47, %v473_v54  ;;  %v485_v59 = vadd.f32 %v480_v47, %v475_v55  ;;  %v486_v62 = vmax.f32 %v482_v52, 0.0  ;;  %v488_v63 = vmax.f32 %v484_v53, 0.0 }
 0x100   : > { %v423_v60 = vpop.f32.mrf.mxu0  ;;  %v464_v61 = vpop.f32.mrf.mxu1 }
 0x101   : > { %v487_v0 = vmax.f32 %v483_v58, 0.0  ;;  %v489_v1 = vmax.f32 %v485_v59, 0.0 }
 0x103   : > { %v606_v2 = vpack.c.bf16 %v487_v0, %v486_v62  ;;  %v607_v3 = vpack.c.bf16 %v489_v1, %v488_v63 }
 0x105   : > { %506 = vst [vmem:[%s256_s18] sm:$0xff] %v606_v2  ;;  %507 = vst [vmem:[%s256_s18 + $0x8] sm:$0xff] %v607_v3 }
 0x106 PF: > { %p11_p9 = scmp.ge.s32.totalorder %s733_s19, 4   ;;  %s848_s15 = smov %s684_s16 }
 0x107   : > { %s849_s16 = smov %s742_s22  ;;  %s850_s17 = smov %s733_s19 }
 0x108   :  { %13 = sbr.rel (!%p11_p9) target bundleno = 2 (0x2), region = 94 }

// kernel: _lambda_.41
= control target key start
LH: loop header
LB: loop body
LE: loop exit
PB: predicated region body
PF: predicated region fallthrough
CT: control target
= control target key end

     0   :  { %s794_s18 = smov 0   ;;  %s796_s19 = smov 0   ;;  %s931_s0 = inlined_call_operand.vmem [shape: bf16[8,80], index: 0, kind: input, shape index: {}]   ;;  %s932_s1 = inlined_call_operand.vmem [shape: bf16[80,1024], index: 1, kind: input, shape index: {}]   ;;  %s933_s2 = inlined_call_operand.vmem [shape: f32[8,1], index: 2, kind: input, shape index: {}]   ;;  %s934_s3 = inlined_call_operand.vmem [shape: f32[8,1], index: 3, kind: input, shape index: {}]   ;;  %s935_s4 = inlined_call_operand.vmem [shape: bf16[8,1024], index: 4, kind: input, shape index: {}]   ;;  %s936_s5 = inlined_call_operand.vmem [shape: bf16[8,1024], index: 5, kind: output, shape index: {}]  }
   0x1   :  { %s798_s20 = smov 0  }
   0x2 LB: > { %s641_s21 = sadd.s32 4294967295, %s761_s20   ;;  %s811_s22 = sadd.s32 1, %s761_s20   ;;  %s761_s20 = sphi %s798_s20, %s939_s20   ;;  %s757_s19 = sphi %s796_s19, %s938_s19   ;;  %s753_s18 = sphi %s794_s18, %s937_s18  }
   0x3   : > { %s40_s23 = ssub.s32 %s761_s20, %s811_s22  ;;  %s43_s24 = sadd.s32 1, %s757_s19 }
   0x4   : > { %p41_p0 = scmp.eq.s32.totalorder %s40_s23, 0  ;;  %p50_p1 = scmp.ne.s32.totalorder %s757_s19, %s753_s18 }
   0x5   : > { %p51_p2 = scmp.eq.s32.totalorder %s761_s20, 0  ;;  %p644_p4 = scmp.ge.s32.totalorder %s761_s20, 2 }
   0x6   : > { %s820_s25 = scalar_select %p41_p0, %s757_s19, %s43_s24  }
   0x7   : > { %p52_p3 = por %p51_p2, %p50_p1  ;;  %179 = sbr.rel (%p644_p4) target bundleno = 26 (0x1a), region = 28 }
   0xc   : > { %182 = sbr.rel (!%p52_p3) target bundleno = 26 (0x1a), region = 32  ;;  %s184_s26 = sand.u32 (%p52_p3), 1, %s757_s19  }
   0xd   : > { %s678_s27 = sshll.u32 (%p52_p3), %s761_s20, 4  ;;  %s681_s28 = smul.u32 (%p52_p3), 160, %s184_s26 }
   0xe   : > { %s828_s6 = scalar_lea.vmem (%p52_p3), %s932_s1, %s678_s27 }
   0xf   : > { %v202_v0 = vld [vmem:[%s828_s6] sm:$0xff] (%p52_p3)  ;;  %v204_v1 = vld [vmem:[%s828_s6 + $0x8] sm:$0xff] (%p52_p3)  ;;  %s836_s7 = scalar_lea.vmem (%p52_p3), [#allocation2], %s681_s28 }
  0x10   : > { %v206_v2 = vld [vmem:[%s828_s6 + $0x20] sm:$0xff] (%p52_p3)  ;;  %v208_v3 = vld [vmem:[%s828_s6 + $0x28] sm:$0xff] (%p52_p3)  ;;  %203 = vst [vmem:[%s836_s7] sm:$0xff] (%p52_p3), %v202_v0  ;;  %205 = vst [vmem:[%s836_s7 + $0x8] sm:$0xff] (%p52_p3), %v204_v1 }
  0x11   : > { %v210_v4 = vld [vmem:[%s828_s6 + $0x40] sm:$0xff]  ;;  %v212_v5 = vld [vmem:[%s828_s6 + $0x48] sm:$0xff]  ;;  %207 = vst [vmem:[%s836_s7 + $0x10] sm:$0xff] %v206_v2  ;;  %209 = vst [vmem:[%s836_s7 + $0x18] sm:$0xff] %v208_v3 }
  0x12   : > { %211 = vst [vmem:[%s836_s7 + $0x20] sm:$0xff] %v210_v4  ;;  %213 = vst [vmem:[%s836_s7 + $0x28] sm:$0xff] %v212_v5  ;;  %v214_v6 = vld [vmem:[%s828_s6 + $0x60] sm:$0xff]  ;;  %v216_v7 = vld [vmem:[%s828_s6 + $0x68] sm:$0xff] }
  0x13   : > { %v218_v8 = vld [vmem:[%s828_s6 + $0x80] sm:$0xff]  ;;  %215 = vst [vmem:[%s836_s7 + $0x30] sm:$0xff] %v214_v6  ;;  %217 = vst [vmem:[%s836_s7 + $0x38] sm:$0xff] %v216_v7  ;;  %v220_v9 = vld [vmem:[%s828_s6 + $0x88] sm:$0xff] }
  0x14   : > { %219 = vst [vmem:[%s836_s7 + $0x40] sm:$0xff] %v218_v8  ;;  %v222_v10 = vld [vmem:[%s828_s6 + $0xa0] sm:$0xff]  ;;  %v224_v11 = vld [vmem:[%s828_s6 + $0xa8] sm:$0xff]  ;;  %221 = vst [vmem:[%s836_s7 + $0x48] sm:$0xff] %v220_v9 }
  0x15   : > { %223 = vst [vmem:[%s836_s7 + $0x50] sm:$0xff] %v222_v10  ;;  %225 = vst [vmem:[%s836_s7 + $0x58] sm:$0xff] %v224_v11  ;;  %v226_v12 = vld [vmem:[%s828_s6 + $0xc0] sm:$0xff]  ;;  %v228_v13 = vld [vmem:[%s828_s6 + $0xc8] sm:$0xff] }
  0x16   : > { %v230_v14 = vld [vmem:[%s828_s6 + $0xe0] sm:$0xff]  ;;  %227 = vst [vmem:[%s836_s7 + $0x60] sm:$0xff] %v226_v12  ;;  %229 = vst [vmem:[%s836_s7 + $0x68] sm:$0xff] %v228_v13  ;;  %v232_v15 = vld [vmem:[%s828_s6 + $0xe8] sm:$0xff] }
  0x17   : > { %231 = vst [vmem:[%s836_s7 + $0x70] sm:$0xff] %v230_v14  ;;  %v234_v16 = vld [vmem:[%s828_s6 + $0x100] sm:$0xff]  ;;  %v236_v17 = vld [vmem:[%s828_s6 + $0x108] sm:$0xff]  ;;  %233 = vst [vmem:[%s836_s7 + $0x78] sm:$0xff] %v232_v15 }
  0x18   : > { %235 = vst [vmem:[%s836_s7 + $0x80] sm:$0xff] %v234_v16  ;;  %237 = vst [vmem:[%s836_s7 + $0x88] sm:$0xff] %v236_v17  ;;  %v238_v18 = vld [vmem:[%s828_s6 + $0x120] sm:$0xff]  ;;  %v240_v19 = vld [vmem:[%s828_s6 + $0x128] sm:$0xff] }
  0x19   : > { %239 = vst [vmem:[%s836_s7 + $0x90] sm:$0xff] %v238_v18  ;;  %241 = vst [vmem:[%s836_s7 + $0x98] sm:$0xff] %v240_v19 }
  0x1a PF: > { %p647_p5 = scmp.ge.s32.totalorder %s761_s20, 1  ;;  %p255_p6 = scmp.lt.s32.totalorder %s761_s20, 3 }
  0x1c   : > { %p256_p7 = pnand %p647_p5, %p255_p6 }
  0x1d   : > { %s262_s8 = sand.u32 (!%p256_p7), 1, %s753_s18   ;;  %s648_s17 = sshll.u32 (!%p256_p7), %s641_s21, 2 }
  0x1e   : > { %259 = sbr.rel (%p256_p7) target bundleno = 264 (0x108), region = 59  ;;  %p296_p8 = scmp.lt.s32.totalorder (!%p256_p7), %s648_s17, 7 }
  0x1f   : > { %s682_s11 = smul.u32 (!%p256_p7), 160, %s262_s8 }
  0x21   : > { %s881_s14 = scalar_lea.vmem (!%p256_p7), [#allocation2], %s682_s11 }
  0x23   : > { %v515_v20 = vld [vmem:[%s933_s2] sm:$0xff]  ;;  %v763_v21 = vmov 0   ;;  %v711_v24 = vld [vmem:[%s881_s14 + $0x8c] ss:$16 sps:$4 sm:$0xff]   ;;  %v714_v26 = vld [vmem:[%s881_s14 + $0x88] ss:$16 sps:$4 sm:$0xff]  }
  0x24   : > { %465 = vmatprep.mubr.bf16.mxu0 %v763_v21  ;;  %506 = vmatprep.mubr.bf16.mxu1 %v763_v21  ;;  %v525_v22 = vld [vmem:[%s934_s3] sm:$0xff]  ;;  %v717_v28 = vld [vmem:[%s881_s14 + $0x6c] ss:$16 sps:$4 sm:$0xff]   ;;  %v720_v30 = vld [vmem:[%s881_s14 + $0x68] ss:$16 sps:$4 sm:$0xff]   ;;  %vm429_vm0 = vcmask 654336  }
  0x25   : > { %708 = vset.pattern.permute.xlu0 %v763_v21  ;;  %v709_v23 = vld [vmem:[%s881_s14 + $0x84] ss:$16 sps:$4 sm:$0xff]   ;;  %v713_v25 = vld [vmem:[%s881_s14 + $0x80] ss:$16 sps:$4 sm:$0xff]   ;;  %480 = vmatprep.subr.bf16.mxu1 %v711_v24  ;;  %v723_v32 = vld [vmem:[%s881_s14 + $0x4c] ss:$16 sps:$4 sm:$0xff]  }
  0x26   : > { %518 = vperm.xlu0 %708, %v515_v20   ;;  %439 = vmatprep.subr.bf16.mxu0 %v709_v23  ;;  %v715_v27 = vld [vmem:[%s881_s14 + $0x64] ss:$16 sps:$4 sm:$0xff]   ;;  %v719_v29 = vld [vmem:[%s881_s14 + $0x60] ss:$16 sps:$4 sm:$0xff]   ;;  %v726_v34 = vld [vmem:[%s881_s14 + $0x48] ss:$16 sps:$4 sm:$0xff]  }
  0x27   : > { %440 = vmatpush1.bf16.msra.mxu0 %v713_v25  ;;  %481 = vmatpush1.bf16.msra.mxu1 %v714_v26  ;;  %v721_v31 = vld [vmem:[%s881_s14 + $0x44] ss:$16 sps:$4 sm:$0xff]   ;;  %v725_v33 = vld [vmem:[%s881_s14 + $0x40] ss:$16 sps:$4 sm:$0xff]   ;;  %v729_v36 = vld [vmem:[%s881_s14 + $0x2c] ss:$16 sps:$4 sm:$0xff]  }
  0x28   : > { %441 = vmatprep.subr.bf16.mxu0 %v715_v27  ;;  %482 = vmatprep.subr.bf16.mxu1 %v717_v28  ;;  %v727_v35 = vld [vmem:[%s881_s14 + $0x24] ss:$16 sps:$4 sm:$0xff]   ;;  %v731_v37 = vld [vmem:[%s881_s14 + $0x20] ss:$16 sps:$4 sm:$0xff]   ;;  %v732_v38 = vld [vmem:[%s881_s14 + $0x28] ss:$16 sps:$4 sm:$0xff]  }
  0x29   : > { %v733_v39 = vld [vmem:[%s881_s14 + $0x4] ss:$16 sps:$4 sm:$0xff]   ;;  %v735_v40 = vld [vmem:[%s881_s14 + $0xc] ss:$16 sps:$4 sm:$0xff]   ;;  %v737_v41 = vld [vmem:[%s881_s14] ss:$16 sps:$4 sm:$0xff]  }
  0x2a   : > { %528 = vperm.xlu0 %708, %v525_v22   ;;  %v738_v42 = vld [vmem:[%s881_s14 + $0x8] ss:$16 sps:$4 sm:$0xff]   ;;  %v308_v43 = vld [vmem:[%s931_s0] sm:$0xf]  ;;  %s941_s17 = smov (!%p296_p8, %s648_s17), 7 }
  0x2b   : > { %442 = vmatpush1.bf16.msra.mxu0 %v719_v29  ;;  %483 = vmatpush1.bf16.msra.mxu1 %v720_v30  ;;  %s649_s18 = sshll.u32 %s941_s17, 2 }
  0x2c   : > { %443 = vmatprep.subr.bf16.mxu0 %v721_v31  ;;  %484 = vmatprep.subr.bf16.mxu1 %v723_v32  ;;  %s299_s26 = scalar_lea.vmem %s935_s4, %s649_s18  ;;  %s305_s27 = scalar_lea.vmem %s936_s5, %s649_s18 }
  0x2d   : > { %v535_v45 = vld [vmem:[%s299_s26] sm:$0xff]  ;;  %v536_v46 = vld [vmem:[%s299_s26 + $0x8] sm:$0xff] }
  0x2e   : > { %v537_v51 = vunpack.c.l.bf16 %v535_v45  ;;  %v539_v53 = vunpack.c.l.bf16 %v536_v46  ;;  %v538_v55 = vunpack.c.h.bf16 %v535_v45  ;;  %v540_v57 = vunpack.c.h.bf16 %v536_v46 }
  0x2f   : > { %444 = vmatpush1.bf16.msra.mxu0 %v725_v33  ;;  %485 = vmatpush1.bf16.msra.mxu1 %v726_v34 }
  0x30   : > { %445 = vmatprep.subr.bf16.mxu0 %v727_v35  ;;  %486 = vmatprep.subr.bf16.mxu1 %v729_v36 }
  0x33   : > { %446 = vmatpush1.bf16.msra.mxu0 %v731_v37  ;;  %487 = vmatpush1.bf16.msra.mxu1 %v732_v38 }
  0x34   : > { %447 = vmatprep.subr.bf16.mxu0 %v733_v39  ;;  %488 = vmatprep.subr.bf16.mxu1 %v735_v40 }
  0x37   : > { %448 = vmatpush1.bf16.msra.mxu0 %v737_v41  ;;  %489 = vmatpush1.bf16.msra.mxu1 %v738_v42 }
  0x3a   : > { %672 = vmatmul.mubr.msk.bf16.vlgmr.msra.gmra.mxu0 %vm429_vm0, %v308_v43  ;;  %673 = vmatmul.mubr.msk.bf16.vlgmr.msra.gmra.mxu1 %vm429_vm0, %v308_v43 }
  0xa1   : > { %v519_v44 = vpop.permute.xlu0 %518 }
  0xa5   : > { %v529_v49 = vpop.permute.xlu0 %528 }
  0xfa   : > { %v467_v47 = vpop.f32.mrf.mxu0  ;;  %v508_v48 = vpop.f32.mrf.mxu1 }
  0xfb   : > { %v521_v50 = vmul.f32 %v519_v44, %v467_v47  ;;  %v523_v52 = vmul.f32 %v519_v44, %v508_v48 }
  0xfc   : > { %v469_v54 = vpop.f32.mrf.mxu0  ;;  %v510_v56 = vpop.f32.mrf.mxu1 }
  0xfd   : > { %v531_v58 = vadd.f32 %v529_v49, %v521_v50  ;;  %v533_v59 = vadd.f32 %v529_v49, %v523_v52  ;;  %v522_v60 = vmul.f32 %v519_v44, %v469_v54  ;;  %v524_v61 = vmul.f32 %v519_v44, %v510_v56 }
  0xfe   : > { %v471_v62 = vpop.f32.mrf.mxu0  ;;  %v512_v63 = vpop.f32.mrf.mxu1 }
  0xff   : > { %v541_v0 = vadd.f32 %v537_v51, %v531_v58  ;;  %v543_v1 = vadd.f32 %v539_v53, %v533_v59  ;;  %v532_v2 = vadd.f32 %v529_v49, %v522_v60  ;;  %v534_v3 = vadd.f32 %v529_v49, %v524_v61 }
 0x100   : > { %v472_v4 = vpop.f32.mrf.mxu0  ;;  %v513_v5 = vpop.f32.mrf.mxu1 }
 0x101   : > { %v542_v6 = vadd.f32 %v538_v55, %v532_v2  ;;  %v544_v7 = vadd.f32 %v540_v57, %v534_v3  ;;  %v545_v8 = vmax.f32 %v541_v0, 0.0  ;;  %v547_v9 = vmax.f32 %v543_v1, 0.0 }
 0x103   : > { %v546_v10 = vmax.f32 %v542_v6, 0.0  ;;  %v548_v11 = vmax.f32 %v544_v7, 0.0 }
 0x105   : > { %v679_v12 = vpack.c.bf16 %v546_v10, %v545_v8  ;;  %v680_v13 = vpack.c.bf16 %v548_v11, %v547_v9 }
 0x107   : > { %565 = vst [vmem:[%s305_s27] sm:$0xff] %v679_v12  ;;  %566 = vst [vmem:[%s305_s27 + $0x8] sm:$0xff] %v680_v13 }
 0x108 PF: > { %p12_p9 = scmp.ge.s32.totalorder %s811_s22, 4   ;;  %s937_s18 = smov %s757_s19 }
 0x109   : > { %s938_s19 = smov %s820_s25  ;;  %s939_s20 = smov %s811_s22 }
 0x10a   :  { %14 = sbr.rel (!%p12_p9) target bundleno = 2 (0x2), region = 101 }

// kernel: _lambda_.46
= control target key start
LH: loop header
LB: loop body
LE: loop exit
PB: predicated region body
PF: predicated region fallthrough
CT: control target
= control target key end

     0   :  { %v221_v1 = vmov 0   ;;  %vm85_vm0 = vcmask 654336   ;;  %s298_s1 = inlined_call_operand.vmem [shape: bf16[80,256], index: 1, kind: input, shape index: {}]   ;;  %s299_s2 = inlined_call_operand.vmem [shape: f32[16,1], index: 2, kind: input, shape index: {}]   ;;  %s300_s0 = inlined_call_operand.vmem [shape: bf16[16,80], index: 0, kind: input, shape index: {}]   ;;  %s301_s3 = inlined_call_operand.vmem [shape: f32[16,1], index: 3, kind: input, shape index: {}]   ;;  %s302_s4 = inlined_call_operand.vmem [shape: bf16[16,256], index: 4, kind: output, shape index: {}]  }
   0x1   :  { %v205_v0 = vld [vmem:[%s298_s1 + $0x44] ss:$8 sps:$4 sm:$0xff]   ;;  %121 = vmatprep.mubr.bf16.mxu0 %v221_v1  ;;  %203 = vset.pattern.permute.xlu0 %v221_v1  ;;  %v207_v2 = vld [vmem:[%s298_s1 + $0x40] ss:$8 sps:$4 sm:$0xff]   ;;  %v208_v3 = vld [vmem:[%s298_s1 + $0x34] ss:$8 sps:$4 sm:$0xff]  }
   0x2   :  { %204 = vset.pattern.permute.xlu1 %v221_v1  ;;  %95 = vmatprep.subr.bf16.mxu0 %v205_v0  ;;  %v210_v4 = vld [vmem:[%s298_s1 + $0x30] ss:$8 sps:$4 sm:$0xff]   ;;  %v211_v5 = vld [vmem:[%s298_s1 + $0x24] ss:$8 sps:$4 sm:$0xff]   ;;  %v213_v6 = vld [vmem:[%s298_s1 + $0x20] ss:$8 sps:$4 sm:$0xff]  }
   0x3   :  { %96 = vmatpush1.bf16.msra.mxu0 %v207_v2  ;;  %v132_v7 = vld [vmem:[%s299_s2] sm:$0xff]  ;;  %v214_v8 = vld [vmem:[%s298_s1 + $0x14] ss:$8 sps:$4 sm:$0xff]   ;;  %v133_v10 = vld [vmem:[%s299_s2 + $0x8] sm:$0xff] }
   0x4   :  { %97 = vmatprep.subr.bf16.mxu0 %v208_v3  ;;  %136 = vperm.xlu0 %203, %v132_v7   ;;  %v148_v9 = vld [vmem:[%s301_s3] sm:$0xff]  ;;  %v149_v11 = vld [vmem:[%s301_s3 + $0x8] sm:$0xff]  ;;  %v216_v12 = vld [vmem:[%s298_s1 + $0x10] ss:$8 sps:$4 sm:$0xff]  }
   0x5   :  { %152 = vperm.xlu1 %204, %v148_v9   ;;  %v217_v13 = vld [vmem:[%s298_s1 + $0x4] ss:$8 sps:$4 sm:$0xff]   ;;  %v219_v14 = vld [vmem:[%s298_s1] ss:$8 sps:$4 sm:$0xff]  }
   0x6   :  { %v220_v15 = vld [vmem:[%s300_s0] sm:$0xff]  }
   0x7   :  { %98 = vmatpush1.bf16.msra.mxu0 %v210_v4 }
   0x8   :  { %99 = vmatprep.subr.bf16.mxu0 %v211_v5  ;;  %141 = vperm.xlu0 %203, %v133_v10  }
   0x9   :  { %157 = vperm.xlu1 %204, %v149_v11  }
   0xb   :  { %100 = vmatpush1.bf16.msra.mxu0 %v213_v6 }
   0xc   :  { %101 = vmatprep.subr.bf16.mxu0 %v214_v8 }
   0xf   :  { %102 = vmatpush1.bf16.msra.mxu0 %v216_v12 }
  0x10   :  { %103 = vmatprep.subr.bf16.mxu0 %v217_v13 }
  0x13   :  { %104 = vmatpush1.bf16.msra.mxu0 %v219_v14 }
  0x16   :  { %197 = vmatmul.mubr.msk.bf16.vlgmr.msra.gmra.mxu0 %vm85_vm0, %v220_v15 }
  0x7f   :  { %v137_v16 = vpop.permute.xlu0 %136 }
  0x80   :  { %v153_v17 = vpop.permute.xlu1 %152 }
  0x83   :  { %v142_v23 = vpop.permute.xlu0 %141 }
  0x84   :  { %v158_v27 = vpop.permute.xlu1 %157 }
  0xd6   :  { %v123_v18 = vpop.f32.mrf.mxu0 }
  0xd7   :  { %v144_v19 = vmul.f32 %v137_v16, %v123_v18 }
  0xd8   :  { %v125_v20 = vpop.f32.mrf.mxu0 }
  0xd9   :  { %v160_v21 = vadd.f32 %v153_v17, %v144_v19  ;;  %v145_v22 = vmul.f32 %v137_v16, %v125_v20 }
  0xda   :  { %v127_v24 = vpop.f32.mrf.mxu0 }
  0xdb   :  { %v161_v25 = vadd.f32 %v153_v17, %v145_v22  ;;  %v146_v26 = vmul.f32 %v142_v23, %v127_v24  ;;  %v164_v29 = vmax.f32 %v160_v21, 0.0 }
  0xdc   :  { %v129_v28 = vpop.f32.mrf.mxu0 }
  0xdd   :  { %v165_v30 = vmax.f32 %v161_v25, 0.0  ;;  %v162_v31 = vadd.f32 %v158_v27, %v146_v26  ;;  %v147_v32 = vmul.f32 %v142_v23, %v129_v28 }
  0xdf   :  { %v200_v33 = vpack.c.bf16 %v165_v30, %v164_v29  ;;  %v163_v34 = vadd.f32 %v158_v27, %v147_v32  ;;  %v166_v35 = vmax.f32 %v162_v31, 0.0 }
  0xe1   :  { %180 = vst [vmem:[%s302_s4] sm:$0xff] %v200_v33  ;;  %v167_v36 = vmax.f32 %v163_v34, 0.0 }
  0xe3   :  { %v201_v37 = vpack.c.bf16 %v167_v36, %v166_v35 }
  0xe5   :  { %181 = vst [vmem:[%s302_s4 + $0x8] sm:$0xff] %v201_v37 }

// kernel: _lambda_.47
= control target key start
LH: loop header
LB: loop body
LE: loop exit
PB: predicated region body
PF: predicated region fallthrough
CT: control target
= control target key end

     0   :  { %v149_v1 = vmov 0   ;;  %vm37_vm0 = vcmask 130048   ;;  %s202_s1 = inlined_call_operand.vmem [shape: bf16[16,256], index: 1, kind: input, shape index: {}]   ;;  %s203_s0 = inlined_call_operand.vmem [shape: bf16[16,16], index: 0, kind: input, shape index: {}]   ;;  %s204_s2 = inlined_call_operand.vmem [shape: f32[16,1], index: 2, kind: input, shape index: {}]   ;;  %s205_s3 = inlined_call_operand.vmem [shape: f32[16,1], index: 3, kind: input, shape index: {}]   ;;  %s206_s4 = inlined_call_operand.vmem [shape: bf16[16,256], index: 4, kind: output, shape index: {}]  }
   0x1   :  { %v145_v0 = vld [vmem:[%s202_s1 + $0x4] ss:$8 sps:$4 sm:$0xff]   ;;  %73 = vmatprep.mubr.bf16.mxu0 %v149_v1  ;;  %143 = vset.pattern.permute.xlu0 %v149_v1  ;;  %v147_v2 = vld [vmem:[%s202_s1] ss:$8 sps:$4 sm:$0xff]  }
   0x2   :  { %144 = vset.pattern.permute.xlu1 %v149_v1  ;;  %55 = vmatprep.subr.bf16.mxu0 %v145_v0  ;;  %v148_v3 = vld [vmem:[%s203_s0] sm:$0xff]   ;;  %v85_v6 = vld [vmem:[%s204_s2 + $0x8] sm:$0xff] }
   0x3   :  { %v84_v4 = vld [vmem:[%s204_s2] sm:$0xff]  ;;  %56 = vmatpush1.bf16.msra.mxu0 %v147_v2  ;;  %v101_v7 = vld [vmem:[%s205_s3 + $0x8] sm:$0xff] }
   0x4   :  { %v100_v5 = vld [vmem:[%s205_s3] sm:$0xff]  ;;  %88 = vperm.xlu0 %143, %v84_v4  }
   0x5   :  { %104 = vperm.xlu1 %144, %v100_v5  }
   0x6   :  { %137 = vmatmul.mubr.msk.bf16.vlgmr.msra.gmra.mxu0 %vm37_vm0, %v148_v3 }
   0x8   :  { %93 = vperm.xlu0 %143, %v85_v6  }
   0x9   :  { %109 = vperm.xlu1 %144, %v101_v7  }
  0x7f   :  { %v89_v8 = vpop.permute.xlu0 %88 }
  0x80   :  { %v105_v11 = vpop.permute.xlu1 %104 }
  0x83   :  { %v94_v14 = vpop.permute.xlu0 %93 }
  0x84   :  { %v110_v22 = vpop.permute.xlu1 %109 }
  0xc6   :  { %v75_v9 = vpop.f32.mrf.mxu0 }
  0xc7   :  { %v96_v10 = vmul.f32 %v89_v8, %v75_v9 }
  0xc8   :  { %v77_v12 = vpop.f32.mrf.mxu0 }
  0xc9   :  { %v97_v13 = vmul.f32 %v89_v8, %v77_v12  ;;  %v112_v16 = vadd.f32 %v105_v11, %v96_v10 }
  0xca   :  { %v79_v15 = vpop.f32.mrf.mxu0 }
  0xcb   :  { %v113_v17 = vadd.f32 %v105_v11, %v97_v13  ;;  %v98_v18 = vmul.f32 %v94_v14, %v79_v15 }
  0xcc   :  { %v81_v19 = vpop.f32.mrf.mxu0 }
  0xcd   :  { %v140_v20 = vpack.c.bf16 %v113_v17, %v112_v16  ;;  %v99_v21 = vmul.f32 %v94_v14, %v81_v19  ;;  %v114_v23 = vadd.f32 %v110_v22, %v98_v18 }
  0xcf   :  { %128 = vst [vmem:[%s206_s4] sm:$0xff] %v140_v20  ;;  %v115_v24 = vadd.f32 %v110_v22, %v99_v21 }
  0xd1   :  { %v141_v25 = vpack.c.bf16 %v115_v24, %v114_v23 }
  0xd3   :  { %129 = vst [vmem:[%s206_s4 + $0x8] sm:$0xff] %v141_v25 }

// kernel: _lambda_.48
= control target key start
LH: loop header
LB: loop body
LE: loop exit
PB: predicated region body
PF: predicated region fallthrough
CT: control target
= control target key end

     0   :  { %v309_v1 = vmov 0   ;;  %vm140_vm0 = vcmask 130048   ;;  %s424_s1 = inlined_call_operand.vmem [shape: bf16[144,256], index: 1, kind: input, shape index: {}]   ;;  %s425_s0 = inlined_call_operand.vmem [shape: bf16[16,144], index: 0, kind: input, shape index: {}]   ;;  %s426_s2 = inlined_call_operand.vmem [shape: f32[16,1], index: 2, kind: input, shape index: {}]   ;;  %s427_s3 = inlined_call_operand.vmem [shape: f32[16,1], index: 3, kind: input, shape index: {}]   ;;  %s428_s4 = inlined_call_operand.vmem [shape: bf16[16,256], index: 4, kind: input, shape index: {}]   ;;  %s429_s5 = inlined_call_operand.vmem [shape: bf16[16,256], index: 5, kind: output, shape index: {}]  }
   0x1   :  { %v279_v0 = vld [vmem:[%s424_s1 + $0x74] ss:$8 sps:$4 sm:$0xff]   ;;  %277 = vset.pattern.permute.xlu0 %v309_v1  ;;  %278 = vset.pattern.permute.xlu1 %v309_v1  ;;  %v281_v2 = vld [vmem:[%s424_s1 + $0x70] ss:$8 sps:$4 sm:$0xff]   ;;  %v282_v3 = vld [vmem:[%s424_s1 + $0x64] ss:$8 sps:$4 sm:$0xff]  }
   0x2   :  { %144 = vmatprep.subr.bf16.mxu0 %v279_v0  ;;  %v284_v4 = vld [vmem:[%s424_s1 + $0x60] ss:$8 sps:$4 sm:$0xff]   ;;  %v285_v5 = vld [vmem:[%s424_s1 + $0x54] ss:$8 sps:$4 sm:$0xff]   ;;  %v287_v6 = vld [vmem:[%s424_s1 + $0x50] ss:$8 sps:$4 sm:$0xff]  }
   0x3   :  { %145 = vmatpush1.bf16.msra.mxu0 %v281_v2  ;;  %v288_v7 = vld [vmem:[%s424_s1 + $0x44] ss:$8 sps:$4 sm:$0xff]   ;;  %v290_v8 = vld [vmem:[%s424_s1 + $0x40] ss:$8 sps:$4 sm:$0xff]   ;;  %v291_v9 = vld [vmem:[%s424_s1 + $0x34] ss:$8 sps:$4 sm:$0xff]  }
   0x4   :  { %146 = vmatprep.subr.bf16.mxu0 %v282_v3  ;;  %v308_v10 = vld [vmem:[%s425_s0 + $0x4] ss:$8 sps:$4 sm:$0xff]   ;;  %v293_v13 = vld [vmem:[%s424_s1 + $0x30] ss:$8 sps:$4 sm:$0xff]   ;;  %v296_v17 = vld [vmem:[%s424_s1 + $0x20] ss:$8 sps:$4 sm:$0xff]  }
   0x5   :  { %v187_v11 = vld [vmem:[%s426_s2] sm:$0xff]  ;;  %271 = vmatprep.mubr.msk.bf16.mxu0 %vm140_vm0, %v308_v10  ;;  %v188_v14 = vld [vmem:[%s426_s2 + $0x8] sm:$0xff]  ;;  %v297_v18 = vld [vmem:[%s424_s1 + $0x14] ss:$8 sps:$4 sm:$0xff]  }
   0x6   :  { %v203_v12 = vld [vmem:[%s427_s3] sm:$0xff]  ;;  %191 = vperm.xlu0 %277, %v187_v11   ;;  %v204_v15 = vld [vmem:[%s427_s3 + $0x8] sm:$0xff]  ;;  %v299_v19 = vld [vmem:[%s424_s1 + $0x10] ss:$8 sps:$4 sm:$0xff]  }
   0x7   :  { %147 = vmatpush1.bf16.msra.mxu0 %v284_v4  ;;  %207 = vperm.xlu1 %278, %v203_v12   ;;  %v294_v16 = vld [vmem:[%s424_s1 + $0x24] ss:$8 sps:$4 sm:$0xff]   ;;  %v302_v21 = vld [vmem:[%s424_s1] ss:$8 sps:$4 sm:$0xff]  }
   0x8   :  { %148 = vmatprep.subr.bf16.mxu0 %v285_v5  ;;  %v300_v20 = vld [vmem:[%s424_s1 + $0x4] ss:$8 sps:$4 sm:$0xff]   ;;  %v305_v23 = vld [vmem:[%s424_s1 + $0x80] ss:$8 sps:$4 sm:$0xff]  }
   0x9   :  { %v303_v22 = vld [vmem:[%s424_s1 + $0x84] ss:$8 sps:$4 sm:$0xff]   ;;  %v306_v24 = vld [vmem:[%s425_s0] ss:$8 sps:$4 sm:$0xff]  }
   0xa   :  { %196 = vperm.xlu0 %277, %v188_v14   ;;  %v219_v26 = vld [vmem:[%s428_s4] sm:$0xff]  ;;  %v220_v32 = vld [vmem:[%s428_s4 + $0x8] sm:$0xff] }
   0xb   :  { %149 = vmatpush1.bf16.msra.mxu0 %v287_v6  ;;  %212 = vperm.xlu1 %278, %v204_v15   ;;  %v221_v30 = vunpack.c.l.bf16 %v219_v26  ;;  %v222_v35 = vunpack.c.h.bf16 %v219_v26  ;;  %v223_v41 = vunpack.c.l.bf16 %v220_v32  ;;  %v224_v47 = vunpack.c.h.bf16 %v220_v32 }
   0xc   :  { %150 = vmatprep.subr.bf16.mxu0 %v288_v7 }
   0xf   :  { %151 = vmatpush1.bf16.msra.mxu0 %v290_v8 }
  0x10   :  { %152 = vmatprep.subr.bf16.mxu0 %v291_v9 }
  0x13   :  { %153 = vmatpush1.bf16.msra.mxu0 %v293_v13 }
  0x14   :  { %154 = vmatprep.subr.bf16.mxu0 %v294_v16 }
  0x17   :  { %155 = vmatpush1.bf16.msra.mxu0 %v296_v17 }
  0x18   :  { %156 = vmatprep.subr.bf16.mxu0 %v297_v18 }
  0x1b   :  { %157 = vmatpush1.bf16.msra.mxu0 %v299_v19 }
  0x1c   :  { %158 = vmatprep.subr.bf16.mxu0 %v300_v20 }
  0x1f   :  { %159 = vmatpush1.bf16.msra.mxu0 %v302_v21 }
  0x20   :  { %174 = vmatprep.subr.bf16.mxu0 %v303_v22 }
  0x23   :  { %175 = vmatpush2.bf16.msra.mxu0 %v305_v23 }
  0x26   :  { %177 = vmatmul.mubr.bf16.vlgmr.msra.gmra.mxu0 %v306_v24 }
  0x81   :  { %v192_v25 = vpop.permute.xlu0 %191 }
  0x82   :  { %v208_v27 = vpop.permute.xlu1 %207 }
  0x85   :  { %v197_v36 = vpop.permute.xlu0 %196 }
  0x86   :  { %v213_v42 = vpop.permute.xlu1 %212 }
  0xe6   :  { %v178_v28 = vpop.f32.mrf.mxu0 }
  0xe7   :  { %v199_v29 = vmul.f32 %v192_v25, %v178_v28 }
  0xe8   :  { %v180_v31 = vpop.f32.mrf.mxu0 }
  0xe9   :  { %v215_v33 = vadd.f32 %v208_v27, %v199_v29  ;;  %v200_v34 = vmul.f32 %v192_v25, %v180_v31 }
  0xea   :  { %v182_v37 = vpop.f32.mrf.mxu0 }
  0xeb   :  { %v225_v38 = vadd.f32 %v221_v30, %v215_v33  ;;  %v216_v39 = vadd.f32 %v208_v27, %v200_v34  ;;  %v201_v40 = vmul.f32 %v197_v36, %v182_v37 }
  0xec   :  { %v184_v43 = vpop.f32.mrf.mxu0 }
  0xed   :  { %v226_v44 = vadd.f32 %v222_v35, %v216_v39  ;;  %v217_v45 = vadd.f32 %v213_v42, %v201_v40  ;;  %v202_v46 = vmul.f32 %v197_v36, %v184_v43  ;;  %v229_v48 = vmax.f32 %v225_v38, 0.0 }
  0xef   :  { %v230_v49 = vmax.f32 %v226_v44, 0.0  ;;  %v227_v50 = vadd.f32 %v223_v41, %v217_v45  ;;  %v218_v51 = vadd.f32 %v213_v42, %v202_v46 }
  0xf1   :  { %v274_v52 = vpack.c.bf16 %v230_v49, %v229_v48  ;;  %v228_v53 = vadd.f32 %v224_v47, %v218_v51  ;;  %v231_v54 = vmax.f32 %v227_v50, 0.0 }
  0xf3   :  { %245 = vst [vmem:[%s429_s5] sm:$0xff] %v274_v52  ;;  %v232_v55 = vmax.f32 %v228_v53, 0.0 }
  0xf5   :  { %v275_v56 = vpack.c.bf16 %v232_v55, %v231_v54 }
  0xf7   :  { %246 = vst [vmem:[%s429_s5 + $0x8] sm:$0xff] %v275_v56 }

// kernel: _lambda_.49
= control target key start
LH: loop header
LB: loop body
LE: loop exit
PB: predicated region body
PF: predicated region fallthrough
CT: control target
= control target key end

     0   :  { %v296_v1 = vmov 0   ;;  %vm137_vm0 = vcmask 130048   ;;  %s400_s1 = inlined_call_operand.vmem [shape: bf16[144,256], index: 1, kind: input, shape index: {}]   ;;  %s401_s0 = inlined_call_operand.vmem [shape: bf16[16,144], index: 0, kind: input, shape index: {}]   ;;  %s402_s2 = inlined_call_operand.vmem [shape: f32[16,1], index: 2, kind: input, shape index: {}]   ;;  %s403_s3 = inlined_call_operand.vmem [shape: f32[16,1], index: 3, kind: input, shape index: {}]   ;;  %s404_s4 = inlined_call_operand.vmem [shape: bf16[16,256], index: 4, kind: output, shape index: {}]  }
   0x1   :  { %v266_v0 = vld [vmem:[%s400_s1 + $0x74] ss:$8 sps:$4 sm:$0xff]   ;;  %264 = vset.pattern.permute.xlu0 %v296_v1  ;;  %265 = vset.pattern.permute.xlu1 %v296_v1  ;;  %v268_v2 = vld [vmem:[%s400_s1 + $0x70] ss:$8 sps:$4 sm:$0xff]   ;;  %v269_v3 = vld [vmem:[%s400_s1 + $0x64] ss:$8 sps:$4 sm:$0xff]  }
   0x2   :  { %141 = vmatprep.subr.bf16.mxu0 %v266_v0  ;;  %v271_v4 = vld [vmem:[%s400_s1 + $0x60] ss:$8 sps:$4 sm:$0xff]   ;;  %v272_v5 = vld [vmem:[%s400_s1 + $0x54] ss:$8 sps:$4 sm:$0xff]   ;;  %v274_v6 = vld [vmem:[%s400_s1 + $0x50] ss:$8 sps:$4 sm:$0xff]  }
   0x3   :  { %142 = vmatpush1.bf16.msra.mxu0 %v268_v2  ;;  %v275_v7 = vld [vmem:[%s400_s1 + $0x44] ss:$8 sps:$4 sm:$0xff]   ;;  %v277_v8 = vld [vmem:[%s400_s1 + $0x40] ss:$8 sps:$4 sm:$0xff]   ;;  %v278_v9 = vld [vmem:[%s400_s1 + $0x34] ss:$8 sps:$4 sm:$0xff]  }
   0x4   :  { %143 = vmatprep.subr.bf16.mxu0 %v269_v3  ;;  %v295_v10 = vld [vmem:[%s401_s0 + $0x4] ss:$8 sps:$4 sm:$0xff]   ;;  %v280_v13 = vld [vmem:[%s400_s1 + $0x30] ss:$8 sps:$4 sm:$0xff]   ;;  %v283_v17 = vld [vmem:[%s400_s1 + $0x20] ss:$8 sps:$4 sm:$0xff]  }
   0x5   :  { %v184_v11 = vld [vmem:[%s402_s2] sm:$0xff]  ;;  %258 = vmatprep.mubr.msk.bf16.mxu0 %vm137_vm0, %v295_v10  ;;  %v185_v14 = vld [vmem:[%s402_s2 + $0x8] sm:$0xff]  ;;  %v284_v18 = vld [vmem:[%s400_s1 + $0x14] ss:$8 sps:$4 sm:$0xff]  }
   0x6   :  { %v200_v12 = vld [vmem:[%s403_s3] sm:$0xff]  ;;  %188 = vperm.xlu0 %264, %v184_v11   ;;  %v201_v15 = vld [vmem:[%s403_s3 + $0x8] sm:$0xff]  ;;  %v286_v19 = vld [vmem:[%s400_s1 + $0x10] ss:$8 sps:$4 sm:$0xff]  }
   0x7   :  { %144 = vmatpush1.bf16.msra.mxu0 %v271_v4  ;;  %204 = vperm.xlu1 %265, %v200_v12   ;;  %v281_v16 = vld [vmem:[%s400_s1 + $0x24] ss:$8 sps:$4 sm:$0xff]   ;;  %v289_v21 = vld [vmem:[%s400_s1] ss:$8 sps:$4 sm:$0xff]  }
   0x8   :  { %145 = vmatprep.subr.bf16.mxu0 %v272_v5  ;;  %v287_v20 = vld [vmem:[%s400_s1 + $0x4] ss:$8 sps:$4 sm:$0xff]   ;;  %v292_v23 = vld [vmem:[%s400_s1 + $0x80] ss:$8 sps:$4 sm:$0xff]  }
   0x9   :  { %v290_v22 = vld [vmem:[%s400_s1 + $0x84] ss:$8 sps:$4 sm:$0xff]   ;;  %v293_v24 = vld [vmem:[%s401_s0] ss:$8 sps:$4 sm:$0xff]  }
   0xa   :  { %193 = vperm.xlu0 %264, %v185_v14  }
   0xb   :  { %146 = vmatpush1.bf16.msra.mxu0 %v274_v6  ;;  %209 = vperm.xlu1 %265, %v201_v15  }
   0xc   :  { %147 = vmatprep.subr.bf16.mxu0 %v275_v7 }
   0xf   :  { %148 = vmatpush1.bf16.msra.mxu0 %v277_v8 }
  0x10   :  { %149 = vmatprep.subr.bf16.mxu0 %v278_v9 }
  0x13   :  { %150 = vmatpush1.bf16.msra.mxu0 %v280_v13 }
  0x14   :  { %151 = vmatprep.subr.bf16.mxu0 %v281_v16 }
  0x17   :  { %152 = vmatpush1.bf16.msra.mxu0 %v283_v17 }
  0x18   :  { %153 = vmatprep.subr.bf16.mxu0 %v284_v18 }
  0x1b   :  { %154 = vmatpush1.bf16.msra.mxu0 %v286_v19 }
  0x1c   :  { %155 = vmatprep.subr.bf16.mxu0 %v287_v20 }
  0x1f   :  { %156 = vmatpush1.bf16.msra.mxu0 %v289_v21 }
  0x20   :  { %171 = vmatprep.subr.bf16.mxu0 %v290_v22 }
  0x23   :  { %172 = vmatpush2.bf16.msra.mxu0 %v292_v23 }
  0x26   :  { %174 = vmatmul.mubr.bf16.vlgmr.msra.gmra.mxu0 %v293_v24 }
  0x81   :  { %v189_v25 = vpop.permute.xlu0 %188 }
  0x82   :  { %v205_v26 = vpop.permute.xlu1 %204 }
  0x85   :  { %v194_v32 = vpop.permute.xlu0 %193 }
  0x86   :  { %v210_v36 = vpop.permute.xlu1 %209 }
  0xe6   :  { %v175_v27 = vpop.f32.mrf.mxu0 }
  0xe7   :  { %v196_v28 = vmul.f32 %v189_v25, %v175_v27 }
  0xe8   :  { %v177_v29 = vpop.f32.mrf.mxu0 }
  0xe9   :  { %v212_v30 = vadd.f32 %v205_v26, %v196_v28  ;;  %v197_v31 = vmul.f32 %v189_v25, %v177_v29 }
  0xea   :  { %v179_v33 = vpop.f32.mrf.mxu0 }
  0xeb   :  { %v213_v34 = vadd.f32 %v205_v26, %v197_v31  ;;  %v198_v35 = vmul.f32 %v194_v32, %v179_v33  ;;  %v216_v38 = vmax.f32 %v212_v30, 0.0 }
  0xec   :  { %v181_v37 = vpop.f32.mrf.mxu0 }
  0xed   :  { %v217_v39 = vmax.f32 %v213_v34, 0.0  ;;  %v214_v40 = vadd.f32 %v210_v36, %v198_v35  ;;  %v199_v41 = vmul.f32 %v194_v32, %v181_v37 }
  0xef   :  { %v261_v42 = vpack.c.bf16 %v217_v39, %v216_v38  ;;  %v215_v43 = vadd.f32 %v210_v36, %v199_v41  ;;  %v218_v44 = vmax.f32 %v214_v40, 0.0 }
  0xf1   :  { %232 = vst [vmem:[%s404_s4] sm:$0xff] %v261_v42  ;;  %v219_v45 = vmax.f32 %v215_v43, 0.0 }
  0xf3   :  { %v262_v46 = vpack.c.bf16 %v219_v45, %v218_v44 }
  0xf5   :  { %233 = vst [vmem:[%s404_s4 + $0x8] sm:$0xff] %v262_v46 }

// kernel: _lambda_.55
= control target key start
LH: loop header
LB: loop body
LE: loop exit
PB: predicated region body
PF: predicated region fallthrough
CT: control target
= control target key end

     0   :  { %v312_v0 = vmov 0   ;;  %vm112_vm0 = vcmask 130048   ;;  %vm244_vm1 = vcmask 519168   ;;  %s433_s1 = inlined_call_operand.vmem [shape: bf16[144,64], index: 1, kind: input, shape index: {}]   ;;  %s434_s0 = inlined_call_operand.vmem [shape: bf16[32,144], index: 0, kind: input, shape index: {}]   ;;  %s435_s2 = inlined_call_operand.vmem [shape: f32[32,1], index: 2, kind: input, shape index: {}]   ;;  %s436_s3 = inlined_call_operand.vmem [shape: f32[32,1], index: 3, kind: input, shape index: {}]   ;;  %s437_s4 = inlined_call_operand.vmem [shape: bf16[32,64], index: 4, kind: output, shape index: {}]  }
   0x1   :  { %119 = vmatprep.subr.bf16.mxu0 %v312_v0  ;;  %276 = vmatprep.subr.bf16.mxu1 %v312_v0  ;;  %v297_v1 = vld [vmem:[%s433_s1 + $0x38] sm:$0xff]   ;;  %v298_v2 = vld [vmem:[%s433_s1 + $0x30] sm:$0xff]   ;;  %v299_v3 = vld [vmem:[%s433_s1 + $0x28] sm:$0xff]  }
   0x2   :  { %296 = vset.pattern.permute.xlu1 %v312_v0  ;;  %295 = vset.pattern.permute.xlu0 %v312_v0  ;;  %v300_v4 = vld [vmem:[%s433_s1 + $0x20] sm:$0xff]   ;;  %v311_v6 = vld [vmem:[%s434_s0 + $0x14] ss:$8 sps:$4 sm:$0xff]   ;;  %v169_v11 = vld [vmem:[%s435_s2 + $0x8] sm:$0xff] }
   0x3   :  { %120 = vmatpush1.bf16.msra.mxu0 %v297_v1  ;;  %285 = vmatpush1.bf16.msra.mxu1 %v297_v1  ;;  %v308_v5 = vld [vmem:[%s434_s0 + $0x4] ss:$8 sps:$4 sm:$0xff]   ;;  %v170_v7 = vld [vmem:[%s435_s2 + $0x10] sm:$0xff]  ;;  %v171_v9 = vld [vmem:[%s435_s2 + $0x18] sm:$0xff] }
   0x4   :  { %121 = vmatprep.subr.bf16.mxu0 %v312_v0  ;;  %277 = vmatprep.subr.bf16.mxu1 %v312_v0  ;;  %v168_v8 = vld [vmem:[%s435_s2] sm:$0xff]  ;;  %v301_v10 = vld [vmem:[%s433_s1 + $0x18] sm:$0xff]   ;;  %v197_v12 = vld [vmem:[%s436_s3 + $0x8] sm:$0xff] }
   0x5   :  { %266 = vmatprep.mubr.msk.bf16.mxu0 %vm112_vm0, %v308_v5  ;;  %184 = vperm.xlu1 %296, %v170_v7   ;;  %v302_v13 = vld [vmem:[%s433_s1 + $0x10] sm:$0xff]   ;;  %v196_v14 = vld [vmem:[%s436_s3] sm:$0xff]  ;;  %v199_v15 = vld [vmem:[%s436_s3 + $0x18] sm:$0xff] }
   0x6   :  { %267 = vmatprep.mubr.msk.bf16.mxu1 %vm112_vm0, %v311_v6  ;;  %174 = vperm.xlu0 %295, %v168_v8   ;;  %v303_v16 = vld [vmem:[%s433_s1 + $0x8] sm:$0xff]   ;;  %v198_v17 = vld [vmem:[%s436_s3 + $0x10] sm:$0xff]  ;;  %v304_v18 = vld [vmem:[%s433_s1] sm:$0xff]  }
   0x7   :  { %122 = vmatpush1.bf16.msra.mxu0 %v298_v2  ;;  %286 = vmatpush1.bf16.msra.mxu1 %v298_v2  ;;  %v305_v19 = vld [vmem:[%s433_s1 + $0x40] sm:$0xff]   ;;  %v309_v21 = vld [vmem:[%s434_s0 + $0x10] ss:$8 sps:$4 sm:$0xff]  }
   0x8   :  { %123 = vmatprep.subr.bf16.mxu0 %v312_v0  ;;  %278 = vmatprep.subr.bf16.mxu1 %v312_v0  ;;  %v306_v20 = vld [vmem:[%s434_s0] ss:$8 sps:$4 sm:$0xff]  }
   0x9   :  { %189 = vperm.xlu1 %296, %v171_v9  }
   0xa   :  { %179 = vperm.xlu0 %295, %v169_v11  }
   0xb   :  { %124 = vmatpush1.bf16.msra.mxu0 %v299_v3  ;;  %287 = vmatpush1.bf16.msra.mxu1 %v299_v3 }
   0xc   :  { %125 = vmatprep.subr.bf16.mxu0 %v312_v0  ;;  %279 = vmatprep.subr.bf16.mxu1 %v312_v0 }
   0xd   :  { %207 = vperm.xlu1 %296, %v197_v12  }
   0xe   :  { %202 = vperm.xlu0 %295, %v196_v14  }
   0xf   :  { %126 = vmatpush1.bf16.msra.mxu0 %v300_v4  ;;  %288 = vmatpush1.bf16.msra.mxu1 %v300_v4 }
  0x10   :  { %127 = vmatprep.subr.bf16.mxu0 %v312_v0  ;;  %280 = vmatprep.subr.bf16.mxu1 %v312_v0 }
  0x11   :  { %217 = vperm.xlu1 %296, %v199_v15  }
  0x12   :  { %212 = vperm.xlu0 %295, %v198_v17  }
  0x13   :  { %128 = vmatpush1.bf16.msra.mxu0 %v301_v10  ;;  %289 = vmatpush1.bf16.msra.mxu1 %v301_v10 }
  0x14   :  { %129 = vmatprep.subr.bf16.mxu0 %v312_v0  ;;  %281 = vmatprep.subr.bf16.mxu1 %v312_v0 }
  0x17   :  { %130 = vmatpush1.bf16.msra.mxu0 %v302_v13  ;;  %290 = vmatpush1.bf16.msra.mxu1 %v302_v13 }
  0x18   :  { %131 = vmatprep.subr.bf16.mxu0 %v312_v0  ;;  %282 = vmatprep.subr.bf16.mxu1 %v312_v0 }
  0x1b   :  { %132 = vmatpush1.bf16.msra.mxu0 %v303_v16  ;;  %291 = vmatpush1.bf16.msra.mxu1 %v303_v16 }
  0x1c   :  { %133 = vmatprep.subr.bf16.mxu0 %v312_v0  ;;  %283 = vmatprep.subr.bf16.mxu1 %v312_v0 }
  0x1f   :  { %134 = vmatpush1.bf16.msra.mxu0 %v304_v18  ;;  %292 = vmatpush1.bf16.msra.mxu1 %v304_v18 }
  0x20   :  { %149 = vmatprep.subr.bf16.mxu0 %v312_v0  ;;  %284 = vmatprep.subr.bf16.mxu1 %v312_v0 }
  0x23   :  { %150 = vmatpush2.bf16.msra.mxu0 %v305_v19  ;;  %293 = vmatpush2.bf16.msra.mxu1 %v305_v19 }
  0x26   :  { %152 = vmatmul.mubr.bf16.vlgmr.msra.gmra.mxu0 %v306_v20  ;;  %160 = vmatmul.mubr.bf16.vlgmr.msra.gmra.mxu1 %v309_v21 }
  0x80   :  { %v185_v23 = vpop.permute.xlu1 %184 }
  0x81   :  { %v175_v22 = vpop.permute.xlu0 %174 }
  0x84   :  { %v190_v25 = vpop.permute.xlu1 %189 }
  0x85   :  { %v180_v24 = vpop.permute.xlu0 %179 }
  0x88   :  { %v208_v27 = vpop.permute.xlu1 %207 }
  0x89   :  { %v203_v26 = vpop.permute.xlu0 %202 }
  0x8c   :  { %v218_v39 = vpop.permute.xlu1 %217 }
  0x8d   :  { %v213_v30 = vpop.permute.xlu0 %212 }
  0xe6   :  { %v153_v28 = vpop.f32.mrf.mxu0  ;;  %v161_v29 = vpop.f32.mrf.mxu1 }
  0xe7   :  { %v192_v31 = vmul.f32 %v175_v22, %v153_v28  ;;  %v194_v32 = vmul.f32 %v185_v23, %v161_v29 }
  0xe8   :  { %v155_v33 = vpop.f32.mrf.mxu0  ;;  %v163_v34 = vpop.f32.mrf.mxu1 }
  0xe9   :  { %v220_v35 = vadd.f32 %v203_v26, %v192_v31  ;;  %v222_v36 = vadd.f32 %v213_v30, %v194_v32 }
  0xea   :  { %v156_v37 = vpop.f32.mrf.mxu0  ;;  %v164_v38 = vpop.f32.mrf.mxu1 }
  0xeb   :  { %v224_v40 = vmax.f32 %v220_v35, 0.0  ;;  %v226_v41 = vmax.f32 %v222_v36, 0.0  ;;  %v193_v42 = vmul.f32 %v180_v24, %v156_v37  ;;  %v195_v43 = vmul.f32 %v190_v25, %v164_v38 }
  0xec   :  { %v158_v44 = vpop.f32.mrf.mxu0  ;;  %v166_v45 = vpop.f32.mrf.mxu1 }
  0xed   :  { %v272_v46 = vpack.c.bf16 %v224_v40, %v224_v40  ;;  %v274_v47 = vpack.c.bf16 %v226_v41, %v226_v41  ;;  %v221_v48 = vadd.f32 %v208_v27, %v193_v42  ;;  %v223_v49 = vadd.f32 %v218_v39, %v195_v43 }
  0xef   :  { %245 = vst.msk [vmem:[%s437_s4] sm:$0xf] %vm244_vm1, %v272_v46  ;;  %247 = vst.msk [vmem:[%s437_s4 + $0x8] sm:$0xf] %vm244_vm1, %v274_v47  ;;  %v225_v50 = vmax.f32 %v221_v48, 0.0  ;;  %v227_v51 = vmax.f32 %v223_v49, 0.0 }
  0xf1   :  { %v273_v52 = vpack.c.bf16 %v225_v50, %v225_v50  ;;  %v275_v53 = vpack.c.bf16 %v227_v51, %v227_v51 }
  0xf3   :  { %246 = vst.msk [vmem:[%s437_s4 + $0x4] sm:$0xf] %vm244_vm1, %v273_v52  ;;  %248 = vst.msk [vmem:[%s437_s4 + $0xc] sm:$0xf] %vm244_vm1, %v275_v53 }

// kernel: _lambda_.56
= control target key start
LH: loop header
LB: loop body
LE: loop exit
PB: predicated region body
PF: predicated region fallthrough
CT: control target
= control target key end

     0   :  { %vm40_vm0 = vcmask 130048   ;;  %v205_v1 = vmov 0   ;;  %vm168_vm1 = vcmask 519168   ;;  %s282_s1 = inlined_call_operand.vmem [shape: bf16[16,64], index: 1, kind: input, shape index: {}]   ;;  %s283_s0 = inlined_call_operand.vmem [shape: bf16[32,16], index: 0, kind: input, shape index: {}]   ;;  %s284_s2 = inlined_call_operand.vmem [shape: f32[32,1], index: 2, kind: input, shape index: {}]   ;;  %s285_s3 = inlined_call_operand.vmem [shape: f32[32,1], index: 3, kind: input, shape index: {}]   ;;  %s286_s4 = inlined_call_operand.vmem [shape: bf16[32,64], index: 4, kind: output, shape index: {}]  }
   0x1   :  { %v202_v0 = vld [vmem:[%s282_s1] sm:$0xff]   ;;  %201 = vset.pattern.permute.xlu1 %v205_v1  ;;  %200 = vset.pattern.permute.xlu0 %v205_v1  ;;  %v204_v3 = vld [vmem:[%s283_s0 + $0x8] sm:$0xff]   ;;  %v98_v4 = vld [vmem:[%s284_s2 + $0x10] sm:$0xff] }
   0x2   :  { %v203_v2 = vld [vmem:[%s283_s0] sm:$0xff]   ;;  %193 = vmatprep.subr.bf16.mxu0 %v202_v0  ;;  %112 = vperm.xlu1 %201, %v98_v4   ;;  %v99_v6 = vld [vmem:[%s284_s2 + $0x18] sm:$0xff]  ;;  %v97_v7 = vld [vmem:[%s284_s2 + $0x8] sm:$0xff] }
   0x3   :  { %194 = vmatpush3.bf16.msra.mxu0 %v202_v0  ;;  %195 = vmatprep.mubr.msk.bf16.mxu0 %vm40_vm0, %v203_v2  ;;  %v96_v5 = vld [vmem:[%s284_s2] sm:$0xff]  ;;  %v125_v8 = vld [vmem:[%s285_s3 + $0x8] sm:$0xff]  ;;  %v127_v10 = vld [vmem:[%s285_s3 + $0x18] sm:$0xff] }
   0x4   :  { %102 = vperm.xlu0 %200, %v96_v5   ;;  %v124_v9 = vld [vmem:[%s285_s3] sm:$0xff]  ;;  %v126_v11 = vld [vmem:[%s285_s3 + $0x10] sm:$0xff] }
   0x6   :  { %196 = vmatmul.mubr.msk.bf16.vlgmr.msra.gmra.mxu0 %vm40_vm0, %v204_v3  ;;  %117 = vperm.xlu1 %201, %v99_v6  }
   0x8   :  { %107 = vperm.xlu0 %200, %v97_v7  }
   0xa   :  { %135 = vperm.xlu1 %201, %v125_v8  }
   0xc   :  { %130 = vperm.xlu0 %200, %v124_v9  }
   0xe   :  { %145 = vperm.xlu1 %201, %v127_v10  }
  0x10   :  { %140 = vperm.xlu0 %200, %v126_v11  }
  0x7d   :  { %v113_v13 = vpop.permute.xlu1 %112 }
  0x7f   :  { %v103_v12 = vpop.permute.xlu0 %102 }
  0x81   :  { %v118_v15 = vpop.permute.xlu1 %117 }
  0x83   :  { %v108_v14 = vpop.permute.xlu0 %107 }
  0x85   :  { %v136_v17 = vpop.permute.xlu1 %135 }
  0x87   :  { %v131_v16 = vpop.permute.xlu0 %130 }
  0x89   :  { %v146_v28 = vpop.permute.xlu1 %145 }
  0x8b   :  { %v141_v20 = vpop.permute.xlu0 %140 }
  0xc6   :  { %v197_v18 = vpop.f32.mrf.mxu0 }
  0xc7   :  { %v122_v19 = vmul.f32 %v197_v18, %v113_v13 }
  0xc8   :  { %v81_v21 = vpop.f32.mrf.mxu0 }
  0xc9   :  { %v150_v22 = vadd.f32 %v141_v20, %v122_v19  ;;  %v120_v23 = vmul.f32 %v103_v12, %v81_v21 }
  0xca   :  { %v198_v24 = vpop.f32.mrf.mxu0 }
  0xcb   :  { %v188_v25 = vpack.c.bf16 %v150_v22, %v150_v22  ;;  %v148_v26 = vadd.f32 %v131_v16, %v120_v23  ;;  %v123_v27 = vmul.f32 %v198_v24, %v118_v15 }
  0xcc   :  { %v84_v29 = vpop.f32.mrf.mxu0 }
  0xcd   :  { %171 = vst.msk [vmem:[%s286_s4 + $0x8] sm:$0xf] %vm168_vm1, %v188_v25  ;;  %v186_v30 = vpack.c.bf16 %v148_v26, %v148_v26  ;;  %v151_v31 = vadd.f32 %v146_v28, %v123_v27  ;;  %v121_v32 = vmul.f32 %v108_v14, %v84_v29 }
  0xcf   :  { %169 = vst.msk [vmem:[%s286_s4] sm:$0xf] %vm168_vm1, %v186_v30  ;;  %v189_v33 = vpack.c.bf16 %v151_v31, %v151_v31  ;;  %v149_v34 = vadd.f32 %v136_v17, %v121_v32 }
  0xd1   :  { %172 = vst.msk [vmem:[%s286_s4 + $0xc] sm:$0xf] %vm168_vm1, %v189_v33  ;;  %v187_v35 = vpack.c.bf16 %v149_v34, %v149_v34 }
  0xd3   :  { %170 = vst.msk [vmem:[%s286_s4 + $0x4] sm:$0xf] %vm168_vm1, %v187_v35 }

// kernel: _lambda_.57
= control target key start
LH: loop header
LB: loop body
LE: loop exit
PB: predicated region body
PF: predicated region fallthrough
CT: control target
= control target key end

     0   :  { %v517_v1 = vmov 0   ;;  %vm203_vm0 = vcmask 261120   ;;  %vm396_vm1 = vcmask 519168   ;;  %s668_s1 = inlined_call_operand.vmem [shape: bf16[288,64], index: 1, kind: input, shape index: {}]   ;;  %s669_s0 = inlined_call_operand.vmem [shape: bf16[32,288], index: 0, kind: input, shape index: {}]   ;;  %s670_s2 = inlined_call_operand.vmem [shape: f32[32,1], index: 2, kind: input, shape index: {}]   ;;  %s671_s3 = inlined_call_operand.vmem [shape: f32[32,1], index: 3, kind: input, shape index: {}]   ;;  %s672_s4 = inlined_call_operand.vmem [shape: bf16[32,64], index: 4, kind: input, shape index: {}]   ;;  %s673_s5 = inlined_call_operand.vmem [shape: bf16[32,64], index: 5, kind: output, shape index: {}]  }
   0x1   :  { %v491_v0 = vld [vmem:[%s668_s1 + $0x78] sm:$0xff]   ;;  %490 = vset.pattern.permute.xlu1 %v517_v1  ;;  %489 = vset.pattern.permute.xlu0 %v517_v1  ;;  %v493_v3 = vld [vmem:[%s668_s1 + $0x70] sm:$0xff]   ;;  %v495_v5 = vld [vmem:[%s668_s1 + $0x68] sm:$0xff]  }
   0x2   :  { %v492_v2 = vld [vmem:[%s668_s1 + $0x38] sm:$0xff]   ;;  %448 = vmatprep.subr.bf16.mxu0 %v491_v0  ;;  %v494_v4 = vld [vmem:[%s668_s1 + $0x30] sm:$0xff]   ;;  %v496_v6 = vld [vmem:[%s668_s1 + $0x28] sm:$0xff]  }
   0x3   :  { %449 = vmatpush3.bf16.msra.mxu0 %v492_v2  ;;  %v497_v7 = vld [vmem:[%s668_s1 + $0x60] sm:$0xff]   ;;  %v499_v9 = vld [vmem:[%s668_s1 + $0x58] sm:$0xff]   ;;  %v505_v10 = vld [vmem:[%s668_s1 + $0x88] sm:$0xff]  }
   0x4   :  { %450 = vmatprep.subr.bf16.mxu0 %v493_v3  ;;  %v498_v8 = vld [vmem:[%s668_s1 + $0x20] sm:$0xff]   ;;  %v500_v11 = vld [vmem:[%s668_s1 + $0x18] sm:$0xff]   ;;  %v501_v12 = vld [vmem:[%s668_s1 + $0x50] sm:$0xff]   ;;  %480 = vmatprep.subr.bf16.mxu1 %v505_v10 }
   0x5   :  { %v502_v13 = vld [vmem:[%s668_s1 + $0x10] sm:$0xff]   ;;  %481 = vmatpush3.bf16.msra.mxu1 %v505_v10  ;;  %v508_v14 = vld [vmem:[%s668_s1 + $0x80] sm:$0xff]   ;;  %v503_v15 = vld [vmem:[%s668_s1 + $0x48] sm:$0xff]  }
   0x6   :  { %482 = vmatprep.subr.bf16.mxu1 %v508_v14  ;;  %v511_v16 = vld [vmem:[%s669_s0 + $0x4] ss:$12 sps:$4 sm:$0xff]   ;;  %v512_v17 = vld [vmem:[%s669_s0 + $0x8] ss:$12 sps:$4 sm:$0xff]   ;;  %v513_v18 = vld [vmem:[%s669_s0 + $0x20] ss:$12 sps:$4 sm:$0xff]  }
   0x7   :  { %451 = vmatpush3.bf16.msra.mxu0 %v494_v4  ;;  %242 = vmatprep.mubr.bf16.mxu0 %v511_v16  ;;  %v310_v19 = vld [vmem:[%s670_s2 + $0x10] sm:$0xff]  ;;  %v504_v20 = vld [vmem:[%s668_s1 + $0x8] sm:$0xff]   ;;  %v308_v21 = vld [vmem:[%s670_s2] sm:$0xff] }
   0x8   :  { %452 = vmatprep.subr.bf16.mxu0 %v495_v5  ;;  %484 = vmatprep.mubr.msk.bf16.mxu1 %vm203_vm0, %v512_v17  ;;  %v506_v22 = vld [vmem:[%s668_s1 + $0x40] sm:$0xff]   ;;  %v311_v23 = vld [vmem:[%s670_s2 + $0x18] sm:$0xff]  ;;  %v309_v24 = vld [vmem:[%s670_s2 + $0x8] sm:$0xff] }
   0x9   :  { %483 = vmatpush3.bf16.msra.mxu1 %v508_v14  ;;  %324 = vperm.xlu1 %490, %v310_v19   ;;  %v507_v25 = vld [vmem:[%s668_s1] sm:$0xff]   ;;  %v337_v26 = vld [vmem:[%s671_s3 + $0x8] sm:$0xff]  ;;  %v339_v30 = vld [vmem:[%s671_s3 + $0x18] sm:$0xff] }
   0xa   :  { %314 = vperm.xlu0 %489, %v308_v21   ;;  %v509_v27 = vld [vmem:[%s669_s0] ss:$12 sps:$4 sm:$0xff]   ;;  %v514_v29 = vld [vmem:[%s669_s0 + $0x1c] ss:$12 sps:$4 sm:$0xff]   ;;  %v338_v31 = vld [vmem:[%s671_s3 + $0x10] sm:$0xff] }
   0xb   :  { %453 = vmatpush3.bf16.msra.mxu0 %v496_v6  ;;  %v336_v28 = vld [vmem:[%s671_s3] sm:$0xff]  ;;  %v447_v60 = vld [vmem:[%s672_s4 + $0x8] sm:$0xff]  }
   0xc   :  { %454 = vmatprep.subr.bf16.mxu0 %v497_v7  ;;  %485 = vmatmul.mubr.msk.bf16.vlgmr.msra.gmra.mxu1 %vm203_vm0, %v513_v18  ;;  %v516_v32 = vld [vmem:[%s669_s0 + $0x18] ss:$12 sps:$4 sm:$0xff]   ;;  %v445_v2 = vunpack.c.l.bf16 %v447_v60 }
   0xd   :  { %329 = vperm.xlu1 %490, %v311_v23   ;;  %v440_v43 = vld [vmem:[%s672_s4] sm:$0xff]  }
   0xe   :  { %319 = vperm.xlu0 %489, %v309_v24   ;;  %v441_v49 = vunpack.c.l.bf16 %v440_v43  ;;  %v442_v58 = vunpack.c.h.bf16 %v440_v43 }
   0xf   :  { %455 = vmatpush3.bf16.msra.mxu0 %v498_v8 }
  0x10   :  { %456 = vmatprep.subr.bf16.mxu0 %v499_v9 }
  0x11   :  { %347 = vperm.xlu1 %490, %v337_v26  }
  0x12   :  { %342 = vperm.xlu0 %489, %v336_v28  }
  0x13   :  { %457 = vmatpush3.bf16.msra.mxu0 %v500_v11 }
  0x14   :  { %458 = vmatprep.subr.bf16.mxu0 %v501_v12 }
  0x15   :  { %357 = vperm.xlu1 %490, %v339_v30  }
  0x16   :  { %352 = vperm.xlu0 %489, %v338_v31  }
  0x17   :  { %459 = vmatpush3.bf16.msra.mxu0 %v502_v13 }
  0x18   :  { %460 = vmatprep.subr.bf16.mxu0 %v503_v15  ;;  %v446_v15 = vunpack.c.h.bf16 %v447_v60 }
  0x1b   :  { %461 = vmatpush3.bf16.msra.mxu0 %v504_v20 }
  0x1c   :  { %462 = vmatprep.subr.bf16.mxu0 %v506_v22 }
  0x1f   :  { %463 = vmatpush3.bf16.msra.mxu0 %v507_v25 }
  0x22   :  { %243 = vmatmul.mubr.bf16.vlgmr.msra.gmra.mxu0 %v509_v27 }
  0x23   :  { %250 = vmatprep.mubr.bf16.mxu0 %v514_v29 }
  0x2a   :  { %251 = vmatmul.mubr.bf16.gmra.mxu0 %v516_v32 }
  0x84   :  { %v325_v36 = vpop.permute.xlu1 %324 }
  0x85   :  { %v315_v34 = vpop.permute.xlu0 %314 }
  0x88   :  { %v330_v44 = vpop.permute.xlu1 %329 }
  0x89   :  { %v320_v38 = vpop.permute.xlu0 %319 }
  0x8c   :  { %v348_v61 = vpop.permute.xlu1 %347 }
  0x8d   :  { %v343_v51 = vpop.permute.xlu0 %342 }
  0x90   :  { %v358_v16 = vpop.permute.xlu1 %357 }
  0x91   :  { %v353_v8 = vpop.permute.xlu0 %352 }
  0xcc   :  { %v486_v33 = vpop.f32.mrf.mxu1 }
  0xce   :  { %v293_v35 = vpop.f32.mrf.mxu1 }
  0xd0   :  { %v487_v40 = vpop.f32.mrf.mxu1 }
  0xd2   :  { %v296_v47 = vpop.f32.mrf.mxu1 }
  0xe2   :  { %v464_v37 = vpop.f32.mrf.mxu0 }
  0xe4   :  { %v465_v39 = vpop.f32.mrf.mxu0 }
  0xe5   :  { %v466_v41 = vadd.f32 %v465_v39, %v464_v37 }
  0xe6   :  { %v467_v42 = vpop.f32.mrf.mxu0 }
  0xe7   :  { %v294_v45 = vadd.f32 %v466_v41, %v293_v35 }
  0xe8   :  { %v468_v46 = vpop.f32.mrf.mxu0 }
  0xe9   :  { %v332_v48 = vmul.f32 %v315_v34, %v294_v45  ;;  %v469_v50 = vadd.f32 %v468_v46, %v467_v42 }
  0xea   :  { %v470_v52 = vpop.f32.mrf.mxu0 }
  0xeb   :  { %v360_v53 = vadd.f32 %v343_v51, %v332_v48  ;;  %v297_v54 = vadd.f32 %v469_v50, %v296_v47 }
  0xec   :  { %v471_v55 = vpop.f32.mrf.mxu0 }
  0xed   :  { %v372_v56 = vadd.f32 %v441_v49, %v360_v53  ;;  %v333_v57 = vmul.f32 %v320_v38, %v297_v54  ;;  %v472_v59 = vadd.f32 %v471_v55, %v470_v52 }
  0xee   :  { %v473_v62 = vpop.f32.mrf.mxu0 }
  0xef   :  { %v376_v63 = vmax.f32 %v372_v56, 0.0  ;;  %v361_v0 = vadd.f32 %v348_v61, %v333_v57  ;;  %v302_v1 = vadd.f32 %v486_v33, %v472_v59 }
  0xf0   :  { %v474_v3 = vpop.f32.mrf.mxu0 }
  0xf1   :  { %v435_v4 = vpack.c.bf16 %v376_v63, %v376_v63  ;;  %v373_v5 = vadd.f32 %v442_v58, %v361_v0  ;;  %v334_v6 = vmul.f32 %v325_v36, %v302_v1  ;;  %v475_v7 = vadd.f32 %v474_v3, %v473_v62 }
  0xf3   :  { %397 = vst.msk [vmem:[%s673_s5] sm:$0xf] %vm396_vm1, %v435_v4  ;;  %v377_v9 = vmax.f32 %v373_v5, 0.0  ;;  %v362_v10 = vadd.f32 %v353_v8, %v334_v6  ;;  %v305_v11 = vadd.f32 %v487_v40, %v475_v7 }
  0xf5   :  { %v436_v12 = vpack.c.bf16 %v377_v9, %v377_v9  ;;  %v374_v13 = vadd.f32 %v445_v2, %v362_v10  ;;  %v335_v14 = vmul.f32 %v330_v44, %v305_v11 }
  0xf7   :  { %398 = vst.msk [vmem:[%s673_s5 + $0x4] sm:$0xf] %vm396_vm1, %v436_v12  ;;  %v378_v17 = vmax.f32 %v374_v13, 0.0  ;;  %v363_v18 = vadd.f32 %v358_v16, %v335_v14 }
  0xf9   :  { %v437_v19 = vpack.c.bf16 %v378_v17, %v378_v17  ;;  %v375_v20 = vadd.f32 %v446_v15, %v363_v18 }
  0xfb   :  { %399 = vst.msk [vmem:[%s673_s5 + $0x8] sm:$0xf] %vm396_vm1, %v437_v19  ;;  %v379_v21 = vmax.f32 %v375_v20, 0.0 }
  0xfd   :  { %v438_v22 = vpack.c.bf16 %v379_v21, %v379_v21 }
  0xff   :  { %400 = vst.msk [vmem:[%s673_s5 + $0xc] sm:$0xf] %vm396_vm1, %v438_v22 }

// kernel: _lambda_.58
= control target key start
LH: loop header
LB: loop body
LE: loop exit
PB: predicated region body
PF: predicated region fallthrough
CT: control target
= control target key end

     0   :  { %v493_v1 = vmov 0   ;;  %vm200_vm0 = vcmask 261120   ;;  %vm381_vm1 = vcmask 519168   ;;  %s633_s1 = inlined_call_operand.vmem [shape: bf16[288,64], index: 1, kind: input, shape index: {}]   ;;  %s634_s0 = inlined_call_operand.vmem [shape: bf16[32,288], index: 0, kind: input, shape index: {}]   ;;  %s635_s2 = inlined_call_operand.vmem [shape: f32[32,1], index: 2, kind: input, shape index: {}]   ;;  %s636_s3 = inlined_call_operand.vmem [shape: f32[32,1], index: 3, kind: input, shape index: {}]   ;;  %s637_s4 = inlined_call_operand.vmem [shape: bf16[32,64], index: 4, kind: output, shape index: {}]  }
   0x1   :  { %v467_v0 = vld [vmem:[%s633_s1 + $0x78] sm:$0xff]   ;;  %466 = vset.pattern.permute.xlu1 %v493_v1  ;;  %465 = vset.pattern.permute.xlu0 %v493_v1  ;;  %v469_v3 = vld [vmem:[%s633_s1 + $0x70] sm:$0xff]   ;;  %v471_v5 = vld [vmem:[%s633_s1 + $0x68] sm:$0xff]  }
   0x2   :  { %v468_v2 = vld [vmem:[%s633_s1 + $0x38] sm:$0xff]   ;;  %424 = vmatprep.subr.bf16.mxu0 %v467_v0  ;;  %v470_v4 = vld [vmem:[%s633_s1 + $0x30] sm:$0xff]   ;;  %v472_v6 = vld [vmem:[%s633_s1 + $0x28] sm:$0xff]  }
   0x3   :  { %425 = vmatpush3.bf16.msra.mxu0 %v468_v2  ;;  %v473_v7 = vld [vmem:[%s633_s1 + $0x60] sm:$0xff]   ;;  %v475_v9 = vld [vmem:[%s633_s1 + $0x58] sm:$0xff]   ;;  %v481_v10 = vld [vmem:[%s633_s1 + $0x88] sm:$0xff]  }
   0x4   :  { %426 = vmatprep.subr.bf16.mxu0 %v469_v3  ;;  %v474_v8 = vld [vmem:[%s633_s1 + $0x20] sm:$0xff]   ;;  %v476_v11 = vld [vmem:[%s633_s1 + $0x18] sm:$0xff]   ;;  %v477_v12 = vld [vmem:[%s633_s1 + $0x50] sm:$0xff]   ;;  %456 = vmatprep.subr.bf16.mxu1 %v481_v10 }
   0x5   :  { %v478_v13 = vld [vmem:[%s633_s1 + $0x10] sm:$0xff]   ;;  %457 = vmatpush3.bf16.msra.mxu1 %v481_v10  ;;  %v484_v14 = vld [vmem:[%s633_s1 + $0x80] sm:$0xff]   ;;  %v479_v15 = vld [vmem:[%s633_s1 + $0x48] sm:$0xff]  }
   0x6   :  { %458 = vmatprep.subr.bf16.mxu1 %v484_v14  ;;  %v487_v16 = vld [vmem:[%s634_s0 + $0x4] ss:$12 sps:$4 sm:$0xff]   ;;  %v488_v17 = vld [vmem:[%s634_s0 + $0x8] ss:$12 sps:$4 sm:$0xff]   ;;  %v489_v18 = vld [vmem:[%s634_s0 + $0x20] ss:$12 sps:$4 sm:$0xff]  }
   0x7   :  { %427 = vmatpush3.bf16.msra.mxu0 %v470_v4  ;;  %239 = vmatprep.mubr.bf16.mxu0 %v487_v16  ;;  %v307_v19 = vld [vmem:[%s635_s2 + $0x10] sm:$0xff]  ;;  %v480_v20 = vld [vmem:[%s633_s1 + $0x8] sm:$0xff]   ;;  %v305_v21 = vld [vmem:[%s635_s2] sm:$0xff] }
   0x8   :  { %428 = vmatprep.subr.bf16.mxu0 %v471_v5  ;;  %460 = vmatprep.mubr.msk.bf16.mxu1 %vm200_vm0, %v488_v17  ;;  %v482_v22 = vld [vmem:[%s633_s1 + $0x40] sm:$0xff]   ;;  %v308_v23 = vld [vmem:[%s635_s2 + $0x18] sm:$0xff]  ;;  %v306_v24 = vld [vmem:[%s635_s2 + $0x8] sm:$0xff] }
   0x9   :  { %459 = vmatpush3.bf16.msra.mxu1 %v484_v14  ;;  %321 = vperm.xlu1 %466, %v307_v19   ;;  %v483_v25 = vld [vmem:[%s633_s1] sm:$0xff]   ;;  %v334_v26 = vld [vmem:[%s636_s3 + $0x8] sm:$0xff]  ;;  %v336_v30 = vld [vmem:[%s636_s3 + $0x18] sm:$0xff] }
   0xa   :  { %311 = vperm.xlu0 %465, %v305_v21   ;;  %v485_v27 = vld [vmem:[%s634_s0] ss:$12 sps:$4 sm:$0xff]   ;;  %v490_v29 = vld [vmem:[%s634_s0 + $0x1c] ss:$12 sps:$4 sm:$0xff]   ;;  %v335_v31 = vld [vmem:[%s636_s3 + $0x10] sm:$0xff] }
   0xb   :  { %429 = vmatpush3.bf16.msra.mxu0 %v472_v6  ;;  %v333_v28 = vld [vmem:[%s636_s3] sm:$0xff] }
   0xc   :  { %430 = vmatprep.subr.bf16.mxu0 %v473_v7  ;;  %461 = vmatmul.mubr.msk.bf16.vlgmr.msra.gmra.mxu1 %vm200_vm0, %v489_v18  ;;  %v492_v32 = vld [vmem:[%s634_s0 + $0x18] ss:$12 sps:$4 sm:$0xff]  }
   0xd   :  { %326 = vperm.xlu1 %466, %v308_v23  }
   0xe   :  { %316 = vperm.xlu0 %465, %v306_v24  }
   0xf   :  { %431 = vmatpush3.bf16.msra.mxu0 %v474_v8 }
  0x10   :  { %432 = vmatprep.subr.bf16.mxu0 %v475_v9 }
  0x11   :  { %344 = vperm.xlu1 %466, %v334_v26  }
  0x12   :  { %339 = vperm.xlu0 %465, %v333_v28  }
  0x13   :  { %433 = vmatpush3.bf16.msra.mxu0 %v476_v11 }
  0x14   :  { %434 = vmatprep.subr.bf16.mxu0 %v477_v12 }
  0x15   :  { %354 = vperm.xlu1 %466, %v336_v30  }
  0x16   :  { %349 = vperm.xlu0 %465, %v335_v31  }
  0x17   :  { %435 = vmatpush3.bf16.msra.mxu0 %v478_v13 }
  0x18   :  { %436 = vmatprep.subr.bf16.mxu0 %v479_v15 }
  0x1b   :  { %437 = vmatpush3.bf16.msra.mxu0 %v480_v20 }
  0x1c   :  { %438 = vmatprep.subr.bf16.mxu0 %v482_v22 }
  0x1f   :  { %439 = vmatpush3.bf16.msra.mxu0 %v483_v25 }
  0x22   :  { %240 = vmatmul.mubr.bf16.vlgmr.msra.gmra.mxu0 %v485_v27 }
  0x23   :  { %247 = vmatprep.mubr.bf16.mxu0 %v490_v29 }
  0x2a   :  { %248 = vmatmul.mubr.bf16.gmra.mxu0 %v492_v32 }
  0x84   :  { %v322_v36 = vpop.permute.xlu1 %321 }
  0x85   :  { %v312_v34 = vpop.permute.xlu0 %311 }
  0x88   :  { %v327_v43 = vpop.permute.xlu1 %326 }
  0x89   :  { %v317_v38 = vpop.permute.xlu0 %316 }
  0x8c   :  { %v345_v57 = vpop.permute.xlu1 %344 }
  0x8d   :  { %v340_v49 = vpop.permute.xlu0 %339 }
  0x90   :  { %v355_v8 = vpop.permute.xlu1 %354 }
  0x91   :  { %v350_v2 = vpop.permute.xlu0 %349 }
  0xcc   :  { %v462_v33 = vpop.f32.mrf.mxu1 }
  0xce   :  { %v290_v35 = vpop.f32.mrf.mxu1 }
  0xd0   :  { %v463_v40 = vpop.f32.mrf.mxu1 }
  0xd2   :  { %v293_v46 = vpop.f32.mrf.mxu1 }
  0xe2   :  { %v440_v37 = vpop.f32.mrf.mxu0 }
  0xe4   :  { %v441_v39 = vpop.f32.mrf.mxu0 }
  0xe5   :  { %v442_v41 = vadd.f32 %v441_v39, %v440_v37 }
  0xe6   :  { %v443_v42 = vpop.f32.mrf.mxu0 }
  0xe7   :  { %v291_v44 = vadd.f32 %v442_v41, %v290_v35 }
  0xe8   :  { %v444_v45 = vpop.f32.mrf.mxu0 }
  0xe9   :  { %v329_v47 = vmul.f32 %v312_v34, %v291_v44  ;;  %v445_v48 = vadd.f32 %v444_v45, %v443_v42 }
  0xea   :  { %v446_v50 = vpop.f32.mrf.mxu0 }
  0xeb   :  { %v357_v51 = vadd.f32 %v340_v49, %v329_v47  ;;  %v294_v52 = vadd.f32 %v445_v48, %v293_v46 }
  0xec   :  { %v447_v53 = vpop.f32.mrf.mxu0 }
  0xed   :  { %v361_v54 = vmax.f32 %v357_v51, 0.0  ;;  %v330_v55 = vmul.f32 %v317_v38, %v294_v52  ;;  %v448_v56 = vadd.f32 %v447_v53, %v446_v50 }
  0xee   :  { %v449_v58 = vpop.f32.mrf.mxu0 }
  0xef   :  { %v420_v59 = vpack.c.bf16 %v361_v54, %v361_v54  ;;  %v358_v60 = vadd.f32 %v345_v57, %v330_v55  ;;  %v299_v61 = vadd.f32 %v462_v33, %v448_v56 }
  0xf0   :  { %v450_v62 = vpop.f32.mrf.mxu0 }
  0xf1   :  { %382 = vst.msk [vmem:[%s637_s4] sm:$0xf] %vm381_vm1, %v420_v59  ;;  %v362_v63 = vmax.f32 %v358_v60, 0.0  ;;  %v331_v0 = vmul.f32 %v322_v36, %v299_v61  ;;  %v451_v1 = vadd.f32 %v450_v62, %v449_v58 }
  0xf3   :  { %v421_v3 = vpack.c.bf16 %v362_v63, %v362_v63  ;;  %v359_v4 = vadd.f32 %v350_v2, %v331_v0  ;;  %v302_v5 = vadd.f32 %v463_v40, %v451_v1 }
  0xf5   :  { %383 = vst.msk [vmem:[%s637_s4 + $0x4] sm:$0xf] %vm381_vm1, %v421_v3  ;;  %v363_v6 = vmax.f32 %v359_v4, 0.0  ;;  %v332_v7 = vmul.f32 %v327_v43, %v302_v5 }
  0xf7   :  { %v422_v9 = vpack.c.bf16 %v363_v6, %v363_v6  ;;  %v360_v10 = vadd.f32 %v355_v8, %v332_v7 }
  0xf9   :  { %384 = vst.msk [vmem:[%s637_s4 + $0x8] sm:$0xf] %vm381_vm1, %v422_v9  ;;  %v364_v11 = vmax.f32 %v360_v10, 0.0 }
  0xfb   :  { %v423_v12 = vpack.c.bf16 %v364_v11, %v364_v11 }
  0xfd   :  { %385 = vst.msk [vmem:[%s637_s4 + $0xc] sm:$0xf] %vm381_vm1, %v423_v12 }

// kernel: _lambda_.68
= control target key start
LH: loop header
LB: loop body
LE: loop exit
PB: predicated region body
PF: predicated region fallthrough
CT: control target
= control target key end

     0   :  { %v707_v1 = vmov 0   ;;  %vm238_vm0 = vcmask 261120   ;;  %vm533_vm1 = vcmask 125952   ;;  %s916_s1 = inlined_call_operand.vmem [shape: bf16[288,16], index: 1, kind: input, shape index: {}]   ;;  %s917_s0 = inlined_call_operand.vmem [shape: bf16[64,288], index: 0, kind: input, shape index: {}]   ;;  %s918_s2 = inlined_call_operand.vmem [shape: f32[64,1], index: 2, kind: input, shape index: {}]   ;;  %s919_s3 = inlined_call_operand.vmem [shape: f32[64,1], index: 3, kind: input, shape index: {}]   ;;  %s920_s4 = inlined_call_operand.vmem [shape: bf16[64,16], index: 4, kind: output, shape index: {}]  }
   0x1   :  { %v673_v0 = vld [vmem:[%s916_s1 + $0x78] sm:$0xff]   ;;  %672 = vset.pattern.permute.xlu1 %v707_v1  ;;  %671 = vset.pattern.permute.xlu0 %v707_v1  ;;  %v675_v3 = vld [vmem:[%s916_s1 + $0x70] sm:$0xff]   ;;  %v677_v5 = vld [vmem:[%s916_s1 + $0x68] sm:$0xff]  }
   0x2   :  { %v674_v2 = vld [vmem:[%s916_s1 + $0x38] sm:$0xff]   ;;  %596 = vmatprep.subr.bf16.mxu0 %v673_v0  ;;  %654 = vmatprep.subr.bf16.mxu1 %v673_v0  ;;  %v676_v4 = vld [vmem:[%s916_s1 + $0x30] sm:$0xff]   ;;  %v678_v6 = vld [vmem:[%s916_s1 + $0x28] sm:$0xff]  }
   0x3   :  { %597 = vmatpush3.bf16.msra.mxu0 %v674_v2  ;;  %662 = vmatpush3.bf16.msra.mxu1 %v674_v2  ;;  %v679_v7 = vld [vmem:[%s916_s1 + $0x60] sm:$0xff]   ;;  %v681_v9 = vld [vmem:[%s916_s1 + $0x58] sm:$0xff]   ;;  %v683_v11 = vld [vmem:[%s916_s1 + $0x50] sm:$0xff]  }
   0x4   :  { %598 = vmatprep.subr.bf16.mxu0 %v675_v3  ;;  %655 = vmatprep.subr.bf16.mxu1 %v675_v3  ;;  %v680_v8 = vld [vmem:[%s916_s1 + $0x20] sm:$0xff]   ;;  %v682_v10 = vld [vmem:[%s916_s1 + $0x18] sm:$0xff]   ;;  %v684_v14 = vld [vmem:[%s916_s1 + $0x10] sm:$0xff]  }
   0x5   :  { %v691_v12 = vld [vmem:[%s917_s0 + $0x4] ss:$12 sps:$4 sm:$0xff]   ;;  %v694_v13 = vld [vmem:[%s917_s0 + $0x4c] ss:$12 sps:$4 sm:$0xff]   ;;  %v692_v23 = vld [vmem:[%s917_s0 + $0x48] ss:$12 sps:$4 sm:$0xff]  }
   0x6   :  { %v685_v15 = vld [vmem:[%s916_s1 + $0x48] sm:$0xff]   ;;  %283 = vmatprep.mubr.bf16.mxu0 %v691_v12  ;;  %307 = vmatprep.mubr.bf16.mxu1 %v694_v13  ;;  %v687_v17 = vld [vmem:[%s916_s1 + $0x40] sm:$0xff]   ;;  %v383_v19 = vld [vmem:[%s918_s2 + $0x10] sm:$0xff] }
   0x7   :  { %599 = vmatpush3.bf16.msra.mxu0 %v676_v4  ;;  %663 = vmatpush3.bf16.msra.mxu1 %v676_v4  ;;  %v686_v16 = vld [vmem:[%s916_s1 + $0x8] sm:$0xff]   ;;  %v688_v18 = vld [vmem:[%s916_s1] sm:$0xff]   ;;  %v384_v24 = vld [vmem:[%s918_s2 + $0x18] sm:$0xff] }
   0x8   :  { %600 = vmatprep.subr.bf16.mxu0 %v677_v5  ;;  %656 = vmatprep.subr.bf16.mxu1 %v677_v5  ;;  %v381_v20 = vld [vmem:[%s918_s2] sm:$0xff]  ;;  %v695_v21 = vld [vmem:[%s916_s1 + $0x88] sm:$0xff]   ;;  %v388_v33 = vld [vmem:[%s918_s2 + $0x38] sm:$0xff] }
   0x9   :  { %v689_v22 = vld [vmem:[%s917_s0] ss:$12 sps:$4 sm:$0xff]   ;;  %401 = vperm.xlu1 %672, %v383_v19   ;;  %391 = vperm.xlu0 %671, %v381_v20   ;;  %v697_v26 = vld [vmem:[%s917_s0 + $0x1c] ss:$12 sps:$4 sm:$0xff]   ;;  %v700_v31 = vld [vmem:[%s917_s0 + $0x18] ss:$12 sps:$4 sm:$0xff]  }
   0xa   :  { %v382_v25 = vld [vmem:[%s918_s2 + $0x8] sm:$0xff]  ;;  %v696_v27 = vld [vmem:[%s916_s1 + $0x80] sm:$0xff]   ;;  %v387_v34 = vld [vmem:[%s918_s2 + $0x30] sm:$0xff] }
   0xb   :  { %601 = vmatpush3.bf16.msra.mxu0 %v678_v6  ;;  %664 = vmatpush3.bf16.msra.mxu1 %v678_v6  ;;  %v699_v28 = vld [vmem:[%s917_s0 + $0x8] ss:$12 sps:$4 sm:$0xff]   ;;  %v385_v30 = vld [vmem:[%s918_s2 + $0x20] sm:$0xff]  ;;  %v705_v39 = vld [vmem:[%s917_s0 + $0x30] ss:$12 sps:$4 sm:$0xff]  }
   0xc   :  { %602 = vmatprep.subr.bf16.mxu0 %v679_v7  ;;  %657 = vmatprep.subr.bf16.mxu1 %v679_v7  ;;  %v386_v29 = vld [vmem:[%s918_s2 + $0x28] sm:$0xff]  ;;  %v702_v35 = vld [vmem:[%s917_s0 + $0x34] ss:$12 sps:$4 sm:$0xff]   ;;  %v704_v36 = vld [vmem:[%s917_s0 + $0x38] ss:$12 sps:$4 sm:$0xff]  }
   0xd   :  { %406 = vperm.xlu1 %672, %v384_v24   ;;  %396 = vperm.xlu0 %671, %v382_v25   ;;  %v701_v32 = vld [vmem:[%s917_s0 + $0x20] ss:$12 sps:$4 sm:$0xff]   ;;  %v706_v40 = vld [vmem:[%s917_s0 + $0x50] ss:$12 sps:$4 sm:$0xff]  }
   0xe   :  { %v438_v37 = vld [vmem:[%s919_s3 + $0x8] sm:$0xff]  ;;  %v437_v38 = vld [vmem:[%s919_s3] sm:$0xff]  ;;  %v440_v41 = vld [vmem:[%s919_s3 + $0x18] sm:$0xff] }
   0xf   :  { %603 = vmatpush3.bf16.msra.mxu0 %v680_v8  ;;  %665 = vmatpush3.bf16.msra.mxu1 %v680_v8  ;;  %v439_v42 = vld [vmem:[%s919_s3 + $0x10] sm:$0xff]  ;;  %v442_v43 = vld [vmem:[%s919_s3 + $0x28] sm:$0xff]  ;;  %v441_v44 = vld [vmem:[%s919_s3 + $0x20] sm:$0xff] }
  0x10   :  { %604 = vmatprep.subr.bf16.mxu0 %v681_v9  ;;  %658 = vmatprep.subr.bf16.mxu1 %v681_v9  ;;  %v444_v45 = vld [vmem:[%s919_s3 + $0x38] sm:$0xff]  ;;  %v443_v46 = vld [vmem:[%s919_s3 + $0x30] sm:$0xff] }
  0x11   :  { %416 = vperm.xlu1 %672, %v386_v29   ;;  %411 = vperm.xlu0 %671, %v385_v30  }
  0x13   :  { %605 = vmatpush3.bf16.msra.mxu0 %v682_v10  ;;  %666 = vmatpush3.bf16.msra.mxu1 %v682_v10 }
  0x14   :  { %606 = vmatprep.subr.bf16.mxu0 %v683_v11  ;;  %659 = vmatprep.subr.bf16.mxu1 %v683_v11 }
  0x15   :  { %426 = vperm.xlu1 %672, %v388_v33   ;;  %421 = vperm.xlu0 %671, %v387_v34  }
  0x17   :  { %607 = vmatpush3.bf16.msra.mxu0 %v684_v14  ;;  %667 = vmatpush3.bf16.msra.mxu1 %v684_v14 }
  0x18   :  { %608 = vmatprep.subr.bf16.mxu0 %v685_v15  ;;  %660 = vmatprep.subr.bf16.mxu1 %v685_v15 }
  0x19   :  { %452 = vperm.xlu1 %672, %v438_v37   ;;  %447 = vperm.xlu0 %671, %v437_v38  }
  0x1b   :  { %609 = vmatpush3.bf16.msra.mxu0 %v686_v16  ;;  %668 = vmatpush3.bf16.msra.mxu1 %v686_v16 }
  0x1c   :  { %610 = vmatprep.subr.bf16.mxu0 %v687_v17  ;;  %661 = vmatprep.subr.bf16.mxu1 %v687_v17 }
  0x1d   :  { %462 = vperm.xlu1 %672, %v440_v41   ;;  %457 = vperm.xlu0 %671, %v439_v42  }
  0x1f   :  { %611 = vmatpush3.bf16.msra.mxu0 %v688_v18  ;;  %669 = vmatpush3.bf16.msra.mxu1 %v688_v18 }
  0x20   :  { %642 = vmatprep.subr.bf16.mxu1 %v695_v21 }
  0x21   :  { %472 = vperm.xlu1 %672, %v442_v43   ;;  %467 = vperm.xlu0 %671, %v441_v44  }
  0x22   :  { %284 = vmatmul.mubr.bf16.vlgmr.msra.gmra.mxu0 %v689_v22  ;;  %308 = vmatmul.mubr.bf16.vlgmr.msra.gmra.mxu1 %v692_v23 }
  0x23   :  { %643 = vmatpush3.bf16.msra.mxu1 %v695_v21  ;;  %291 = vmatprep.mubr.bf16.mxu0 %v697_v26 }
  0x24   :  { %644 = vmatprep.subr.bf16.mxu1 %v696_v27  ;;  %646 = vmatprep.mubr.msk.bf16.mxu1 %vm238_vm0, %v699_v28 }
  0x25   :  { %482 = vperm.xlu1 %672, %v444_v45   ;;  %477 = vperm.xlu0 %671, %v443_v46  }
  0x27   :  { %645 = vmatpush3.bf16.msra.mxu1 %v696_v27 }
  0x2a   :  { %292 = vmatmul.mubr.bf16.gmra.mxu0 %v700_v31  ;;  %647 = vmatmul.mubr.msk.bf16.vlgmr.msra.gmra.mxu1 %vm238_vm0, %v701_v32 }
  0x2b   :  { %299 = vmatprep.mubr.bf16.mxu0 %v702_v35  ;;  %650 = vmatprep.mubr.msk.bf16.mxu1 %vm238_vm0, %v704_v36 }
  0x32   :  { %300 = vmatmul.mubr.bf16.gmra.mxu0 %v705_v39  ;;  %651 = vmatmul.mubr.msk.bf16.gmra.mxu1 %vm238_vm0, %v706_v40 }
  0x84   :  { %v392_v47 = vpop.permute.xlu0 %391  ;;  %v402_v48 = vpop.permute.xlu1 %401 }
  0x88   :  { %v397_v49 = vpop.permute.xlu0 %396  ;;  %v407_v50 = vpop.permute.xlu1 %406 }
  0x8c   :  { %v875_v51 = vpop.permute.xlu0 %411  ;;  %v877_v52 = vpop.permute.xlu1 %416 }
  0x90   :  { %v422_v53 = vpop.permute.xlu0 %421  ;;  %v879_v54 = vpop.permute.xlu1 %426 }
  0x94   :  { %v448_v59 = vpop.permute.xlu0 %447  ;;  %v453_v62 = vpop.permute.xlu1 %452 }
  0x98   :  { %v458_v3 = vpop.permute.xlu0 %457  ;;  %v463_v7 = vpop.permute.xlu1 %462 }
  0x9c   :  { %v468_v17 = vpop.permute.xlu0 %467  ;;  %v473_v25 = vpop.permute.xlu1 %472 }
  0xa0   :  { %v478_v42 = vpop.permute.xlu0 %477 }
  0xe2   :  { %v612_v55 = vpop.f32.mrf.mxu0  ;;  %v630_v56 = vpop.f32.mrf.mxu1 }
  0xe4   :  { %v613_v57 = vpop.f32.mrf.mxu0  ;;  %v631_v58 = vpop.f32.mrf.mxu1 }
  0xe5   :  { %v614_v4 = vadd.f32 %v613_v57, %v612_v55  ;;  %v632_v22 = vadd.f32 %v631_v58, %v630_v56  ;;  %v483_v57 = vpop.permute.xlu1 %482 }
  0xe6   :  { %v615_v60 = vpop.f32.mrf.mxu0  ;;  %v633_v61 = vpop.f32.mrf.mxu1 }
  0xe8   :  { %v616_v63 = vpop.f32.mrf.mxu0  ;;  %v634_v0 = vpop.f32.mrf.mxu1 }
  0xe9   :  { %v617_v12 = vadd.f32 %v616_v63, %v615_v60  ;;  %v635_v30 = vadd.f32 %v634_v0, %v633_v61 }
  0xea   :  { %v618_v1 = vpop.f32.mrf.mxu0  ;;  %v648_v2 = vpop.f32.mrf.mxu1 }
  0xec   :  { %v619_v5 = vpop.f32.mrf.mxu0  ;;  %v350_v6 = vpop.f32.mrf.mxu1 }
  0xed   :  { %v620_v8 = vadd.f32 %v619_v5, %v618_v1  ;;  %v351_v9 = vadd.f32 %v614_v4, %v350_v6 }
  0xee   :  { %v621_v10 = vpop.f32.mrf.mxu0  ;;  %v649_v11 = vpop.f32.mrf.mxu1 }
  0xef   :  { %v359_v13 = vadd.f32 %v648_v2, %v620_v8  ;;  %v429_v14 = vmul.f32 %v392_v47, %v351_v9 }
  0xf0   :  { %v622_v15 = vpop.f32.mrf.mxu0  ;;  %v353_v16 = vpop.f32.mrf.mxu1 }
  0xf1   :  { %v431_v18 = vmul.f32 %v402_v48, %v359_v13  ;;  %v485_v19 = vadd.f32 %v448_v59, %v429_v14  ;;  %v623_v20 = vadd.f32 %v622_v15, %v621_v10  ;;  %v354_v21 = vadd.f32 %v617_v12, %v353_v16 }
  0xf2   :  { %v624_v23 = vpop.f32.mrf.mxu0  ;;  %v652_v24 = vpop.f32.mrf.mxu1 }
  0xf3   :  { %v487_v26 = vadd.f32 %v458_v3, %v431_v18  ;;  %v493_v27 = vmax.f32 %v485_v19, 0.0  ;;  %v362_v28 = vadd.f32 %v649_v11, %v623_v20  ;;  %v430_v29 = vmul.f32 %v397_v49, %v354_v21 }
  0xf4   :  { %v375_v31 = vadd.f32 %v652_v24, %v632_v22  ;;  %v625_v32 = vpop.f32.mrf.mxu0  ;;  %v366_v33 = vpop.f32.mrf.mxu1 }
  0xf5   :  { %v495_v34 = vmax.f32 %v487_v26, 0.0  ;;  %v588_v35 = vpack.c.bf16 %v493_v27, %v493_v27  ;;  %v432_v36 = vmul.f32 %v407_v50, %v362_v28  ;;  %v486_v37 = vadd.f32 %v453_v62, %v430_v29 }
  0xf6   :  { %v435_v38 = vmul.f32 %v422_v53, %v375_v31  ;;  %v626_v39 = vadd.f32 %v625_v32, %v624_v23  ;;  %v627_v40 = vpop.f32.mrf.mxu0  ;;  %v653_v41 = vpop.f32.mrf.mxu1 }
  0xf7   :  { %v590_v43 = vpack.c.bf16 %v495_v34, %v495_v34  ;;  %534 = vst.msk [vmem:[%s920_s4] sm:$0xf] %vm533_vm1, %v588_v35  ;;  %v488_v44 = vadd.f32 %v463_v7, %v432_v36  ;;  %v494_v45 = vmax.f32 %v486_v37, 0.0  ;;  %v378_v46 = vadd.f32 %v653_v41, %v635_v30 }
  0xf8   :  { %v491_v47 = vadd.f32 %v478_v42, %v435_v38  ;;  %v367_v48 = vadd.f32 %v626_v39, %v366_v33  ;;  %v628_v49 = vpop.f32.mrf.mxu0  ;;  %v369_v60 = vpop.f32.mrf.mxu1 }
  0xf9   :  { %536 = vst.msk [vmem:[%s920_s4 + $0x8] sm:$0xf] %vm533_vm1, %v590_v43  ;;  %v496_v50 = vmax.f32 %v488_v44, 0.0  ;;  %v589_v53 = vpack.c.bf16 %v494_v45, %v494_v45  ;;  %v436_v55 = vmul.f32 %v879_v54, %v378_v46  ;;  %v629_v56 = vadd.f32 %v628_v49, %v627_v40 }
  0xfa   :  { %v499_v58 = vmax.f32 %v491_v47, 0.0  ;;  %v433_v59 = vmul.f32 %v875_v51, %v367_v48 }
  0xfb   :  { %v591_v61 = vpack.c.bf16 %v496_v50, %v496_v50  ;;  %535 = vst.msk [vmem:[%s920_s4 + $0x4] sm:$0xf] %vm533_vm1, %v589_v53  ;;  %v492_v62 = vadd.f32 %v483_v57, %v436_v55  ;;  %v370_v63 = vadd.f32 %v629_v56, %v369_v60 }
  0xfc   :  { %v594_v0 = vpack.c.bf16 %v499_v58, %v499_v58  ;;  %v489_v1 = vadd.f32 %v468_v17, %v433_v59 }
  0xfd   :  { %537 = vst.msk [vmem:[%s920_s4 + $0xc] sm:$0xf] %vm533_vm1, %v591_v61  ;;  %v500_v54 = vmax.f32 %v492_v62, 0.0  ;;  %v434_v2 = vmul.f32 %v877_v52, %v370_v63 }
  0xfe   :  { %540 = vst.msk [vmem:[%s920_s4 + $0x18] sm:$0xf] %vm533_vm1, %v594_v0  ;;  %v497_v51 = vmax.f32 %v489_v1, 0.0 }
  0xff   :  { %v595_v3 = vpack.c.bf16 %v500_v54, %v500_v54  ;;  %v490_v4 = vadd.f32 %v473_v25, %v434_v2 }
 0x100   :  { %v592_v5 = vpack.c.bf16 %v497_v51, %v497_v51 }
 0x101   :  { %541 = vst.msk [vmem:[%s920_s4 + $0x1c] sm:$0xf] %vm533_vm1, %v595_v3  ;;  %v498_v6 = vmax.f32 %v490_v4, 0.0 }
 0x102   :  { %538 = vst.msk [vmem:[%s920_s4 + $0x10] sm:$0xf] %vm533_vm1, %v592_v5 }
 0x103   :  { %v593_v52 = vpack.c.bf16 %v498_v6, %v498_v6 }
 0x105   :  { %539 = vst.msk [vmem:[%s920_s4 + $0x14] sm:$0xf] %vm533_vm1, %v593_v52 }

// kernel: _lambda_.69
= control target key start
LH: loop header
LB: loop body
LE: loop exit
PB: predicated region body
PF: predicated region fallthrough
CT: control target
= control target key end

     0   :  { %v354_v1 = vmov 0   ;;  %vm62_vm0 = vcmask 261120   ;;  %vm284_vm1 = vcmask 125952   ;;  %s482_s1 = inlined_call_operand.vmem [shape: bf16[32,16], index: 1, kind: input, shape index: {}]   ;;  %s483_s0 = inlined_call_operand.vmem [shape: bf16[64,32], index: 0, kind: input, shape index: {}]   ;;  %s484_s2 = inlined_call_operand.vmem [shape: f32[64,1], index: 2, kind: input, shape index: {}]   ;;  %s485_s3 = inlined_call_operand.vmem [shape: f32[64,1], index: 3, kind: input, shape index: {}]   ;;  %s486_s4 = inlined_call_operand.vmem [shape: bf16[64,16], index: 4, kind: output, shape index: {}]  }
   0x1   :  { %v348_v0 = vld [vmem:[%s482_s1 + $0x8] sm:$0xff]   ;;  %347 = vset.pattern.permute.xlu1 %v354_v1  ;;  %346 = vset.pattern.permute.xlu0 %v354_v1  ;;  %v349_v2 = vld [vmem:[%s482_s1] sm:$0xff]   ;;  %v351_v4 = vld [vmem:[%s483_s0 + $0x10] sm:$0xff]  }
   0x2   :  { %329 = vmatprep.subr.bf16.mxu0 %v348_v0  ;;  %341 = vmatprep.subr.bf16.mxu1 %v348_v0  ;;  %v350_v3 = vld [vmem:[%s483_s0] sm:$0xff]   ;;  %v352_v5 = vld [vmem:[%s483_s0 + $0x8] sm:$0xff]   ;;  %v353_v6 = vld [vmem:[%s483_s0 + $0x18] sm:$0xff]  }
   0x3   :  { %330 = vmatpush3.bf16.msra.mxu0 %v348_v0  ;;  %343 = vmatpush3.bf16.msra.mxu1 %v348_v0  ;;  %v142_v7 = vld [vmem:[%s484_s2 + $0x10] sm:$0xff]  ;;  %v140_v8 = vld [vmem:[%s484_s2] sm:$0xff]  ;;  %v143_v9 = vld [vmem:[%s484_s2 + $0x18] sm:$0xff] }
   0x4   :  { %331 = vmatprep.subr.bf16.mxu0 %v349_v2  ;;  %342 = vmatprep.subr.bf16.mxu1 %v349_v2  ;;  %v141_v10 = vld [vmem:[%s484_s2 + $0x8] sm:$0xff]  ;;  %v144_v12 = vld [vmem:[%s484_s2 + $0x20] sm:$0xff]  ;;  %v147_v13 = vld [vmem:[%s484_s2 + $0x38] sm:$0xff] }
   0x5   :  { %333 = vmatprep.mubr.msk.bf16.mxu0 %vm62_vm0, %v350_v3  ;;  %337 = vmatprep.mubr.msk.bf16.mxu1 %vm62_vm0, %v351_v4  ;;  %v145_v11 = vld [vmem:[%s484_s2 + $0x28] sm:$0xff]  ;;  %v146_v14 = vld [vmem:[%s484_s2 + $0x30] sm:$0xff]  ;;  %v196_v16 = vld [vmem:[%s485_s3] sm:$0xff] }
   0x6   :  { %160 = vperm.xlu1 %347, %v142_v7   ;;  %150 = vperm.xlu0 %346, %v140_v8   ;;  %v197_v15 = vld [vmem:[%s485_s3 + $0x8] sm:$0xff]  ;;  %v199_v17 = vld [vmem:[%s485_s3 + $0x18] sm:$0xff]  ;;  %v198_v18 = vld [vmem:[%s485_s3 + $0x10] sm:$0xff] }
   0x7   :  { %332 = vmatpush3.bf16.msra.mxu0 %v349_v2  ;;  %344 = vmatpush3.bf16.msra.mxu1 %v349_v2  ;;  %v201_v19 = vld [vmem:[%s485_s3 + $0x28] sm:$0xff]  ;;  %v200_v20 = vld [vmem:[%s485_s3 + $0x20] sm:$0xff]  ;;  %v203_v21 = vld [vmem:[%s485_s3 + $0x38] sm:$0xff] }
   0x8   :  { %v202_v22 = vld [vmem:[%s485_s3 + $0x30] sm:$0xff] }
   0xa   :  { %334 = vmatmul.mubr.msk.bf16.vlgmr.msra.gmra.mxu0 %vm62_vm0, %v352_v5  ;;  %338 = vmatmul.mubr.msk.bf16.vlgmr.msra.gmra.mxu1 %vm62_vm0, %v353_v6 }
   0xb   :  { %165 = vperm.xlu1 %347, %v143_v9   ;;  %155 = vperm.xlu0 %346, %v141_v10  }
   0xf   :  { %175 = vperm.xlu1 %347, %v145_v11   ;;  %170 = vperm.xlu0 %346, %v144_v12  }
  0x13   :  { %185 = vperm.xlu1 %347, %v147_v13   ;;  %180 = vperm.xlu0 %346, %v146_v14  }
  0x17   :  { %211 = vperm.xlu1 %347, %v197_v15   ;;  %206 = vperm.xlu0 %346, %v196_v16  }
  0x1b   :  { %221 = vperm.xlu1 %347, %v199_v17   ;;  %216 = vperm.xlu0 %346, %v198_v18  }
  0x1f   :  { %231 = vperm.xlu1 %347, %v201_v19   ;;  %226 = vperm.xlu0 %346, %v200_v20  }
  0x23   :  { %241 = vperm.xlu1 %347, %v203_v21   ;;  %236 = vperm.xlu0 %346, %v202_v22  }
  0x81   :  { %v151_v23 = vpop.permute.xlu0 %150  ;;  %v161_v24 = vpop.permute.xlu1 %160 }
  0x86   :  { %v156_v25 = vpop.permute.xlu0 %155  ;;  %v166_v26 = vpop.permute.xlu1 %165 }
  0x8a   :  { %v171_v27 = vpop.permute.xlu0 %170  ;;  %v176_v28 = vpop.permute.xlu1 %175 }
  0x8e   :  { %v181_v29 = vpop.permute.xlu0 %180  ;;  %v186_v30 = vpop.permute.xlu1 %185 }
  0x92   :  { %v207_v31 = vpop.permute.xlu0 %206  ;;  %v212_v32 = vpop.permute.xlu1 %211 }
  0x96   :  { %v217_v33 = vpop.permute.xlu0 %216  ;;  %v222_v34 = vpop.permute.xlu1 %221 }
  0x9a   :  { %v227_v35 = vpop.permute.xlu0 %226  ;;  %v232_v38 = vpop.permute.xlu1 %231 }
  0x9e   :  { %v237_v39 = vpop.permute.xlu0 %236  ;;  %v242_v58 = vpop.permute.xlu1 %241 }
  0xca   :  { %v335_v36 = vpop.f32.mrf.mxu0  ;;  %v339_v37 = vpop.f32.mrf.mxu1 }
  0xcb   :  { %v190_v40 = vmul.f32 %v335_v36, %v161_v24  ;;  %v194_v41 = vmul.f32 %v339_v37, %v181_v29 }
  0xcc   :  { %v109_v42 = vpop.f32.mrf.mxu0  ;;  %v125_v43 = vpop.f32.mrf.mxu1 }
  0xcd   :  { %v246_v44 = vadd.f32 %v217_v33, %v190_v40  ;;  %v250_v45 = vadd.f32 %v237_v39, %v194_v41  ;;  %v188_v46 = vmul.f32 %v151_v23, %v109_v42  ;;  %v192_v47 = vmul.f32 %v171_v27, %v125_v43 }
  0xce   :  { %v336_v48 = vpop.f32.mrf.mxu0  ;;  %v340_v49 = vpop.f32.mrf.mxu1 }
  0xcf   :  { %v317_v50 = vpack.c.bf16 %v246_v44, %v246_v44  ;;  %v321_v51 = vpack.c.bf16 %v250_v45, %v250_v45  ;;  %v244_v52 = vadd.f32 %v207_v31, %v188_v46  ;;  %v248_v53 = vadd.f32 %v227_v35, %v192_v47 }
  0xd0   :  { %v191_v54 = vmul.f32 %v336_v48, %v166_v26  ;;  %v195_v55 = vmul.f32 %v340_v49, %v186_v30  ;;  %v112_v56 = vpop.f32.mrf.mxu0  ;;  %v128_v57 = vpop.f32.mrf.mxu1 }
  0xd1   :  { %287 = vst.msk [vmem:[%s486_s4 + $0x8] sm:$0xf] %vm284_vm1, %v317_v50  ;;  %291 = vst.msk [vmem:[%s486_s4 + $0x18] sm:$0xf] %vm284_vm1, %v321_v51  ;;  %v315_v59 = vpack.c.bf16 %v244_v52, %v244_v52  ;;  %v319_v60 = vpack.c.bf16 %v248_v53, %v248_v53  ;;  %v189_v61 = vmul.f32 %v156_v25, %v112_v56 }
  0xd2   :  { %v193_v62 = vmul.f32 %v176_v28, %v128_v57  ;;  %v247_v63 = vadd.f32 %v222_v34, %v191_v54  ;;  %v251_v0 = vadd.f32 %v242_v58, %v195_v55 }
  0xd3   :  { %285 = vst.msk [vmem:[%s486_s4] sm:$0xf] %vm284_vm1, %v315_v59  ;;  %289 = vst.msk [vmem:[%s486_s4 + $0x10] sm:$0xf] %vm284_vm1, %v319_v60  ;;  %v245_v1 = vadd.f32 %v212_v32, %v189_v61 }
  0xd4   :  { %v249_v2 = vadd.f32 %v232_v38, %v193_v62  ;;  %v318_v3 = vpack.c.bf16 %v247_v63, %v247_v63  ;;  %v322_v4 = vpack.c.bf16 %v251_v0, %v251_v0 }
  0xd5   :  { %v316_v5 = vpack.c.bf16 %v245_v1, %v245_v1 }
  0xd6   :  { %v320_v6 = vpack.c.bf16 %v249_v2, %v249_v2  ;;  %288 = vst.msk [vmem:[%s486_s4 + $0xc] sm:$0xf] %vm284_vm1, %v318_v3  ;;  %292 = vst.msk [vmem:[%s486_s4 + $0x1c] sm:$0xf] %vm284_vm1, %v322_v4 }
  0xd7   :  { %286 = vst.msk [vmem:[%s486_s4 + $0x4] sm:$0xf] %vm284_vm1, %v316_v5 }
  0xd8   :  { %290 = vst.msk [vmem:[%s486_s4 + $0x14] sm:$0xf] %vm284_vm1, %v320_v6 }

// kernel: _lambda_.71
= control target key start
LH: loop header
LB: loop body
LE: loop exit
PB: predicated region body
PF: predicated region fallthrough
CT: control target
= control target key end

     0   :  { %v1058_v1 = vmov 0   ;;  %vm430_vm0 = vcmask 523264   ;;  %vm790_vm1 = vcmask 125952   ;;  %s1363_s1 = inlined_call_operand.vmem [shape: bf16[576,16], index: 1, kind: input, shape index: {}]   ;;  %s1364_s0 = inlined_call_operand.vmem [shape: bf16[64,576], index: 0, kind: input, shape index: {}]   ;;  %s1365_s2 = inlined_call_operand.vmem [shape: f32[64,1], index: 2, kind: input, shape index: {}]   ;;  %s1366_s3 = inlined_call_operand.vmem [shape: f32[64,1], index: 3, kind: input, shape index: {}]   ;;  %s1367_s4 = inlined_call_operand.vmem [shape: bf16[64,16], index: 4, kind: output, shape index: {}]  }
   0x1   :  { %v994_v0 = vld [vmem:[%s1363_s1 + $0x78] sm:$0xff]   ;;  %993 = vset.pattern.permute.xlu1 %v1058_v1  ;;  %992 = vset.pattern.permute.xlu0 %v1058_v1  ;;  %v998_v5 = vld [vmem:[%s1363_s1 + $0x70] sm:$0xff]   ;;  %v1002_v9 = vld [vmem:[%s1363_s1 + $0x68] sm:$0xff]  }
   0x2   :  { %v995_v2 = vld [vmem:[%s1363_s1 + $0xf8] sm:$0xff]   ;;  %879 = vmatprep.subr.bf16.mxu0 %v994_v0  ;;  %v999_v6 = vld [vmem:[%s1363_s1 + $0xf0] sm:$0xff]   ;;  %v1003_v10 = vld [vmem:[%s1363_s1 + $0xe8] sm:$0xff]  }
   0x3   :  { %v996_v3 = vld [vmem:[%s1363_s1 + $0x38] sm:$0xff]   ;;  %919 = vmatprep.subr.bf16.mxu1 %v995_v2  ;;  %v1000_v7 = vld [vmem:[%s1363_s1 + $0x30] sm:$0xff]   ;;  %v1004_v11 = vld [vmem:[%s1363_s1 + $0x28] sm:$0xff]  }
   0x4   :  { %v997_v4 = vld [vmem:[%s1363_s1 + $0xb8] sm:$0xff]   ;;  %880 = vmatpush3.bf16.msra.mxu0 %v996_v3  ;;  %v1001_v8 = vld [vmem:[%s1363_s1 + $0xb0] sm:$0xff]   ;;  %v1005_v12 = vld [vmem:[%s1363_s1 + $0xa8] sm:$0xff]  }
   0x5   :  { %920 = vmatpush3.bf16.msra.mxu1 %v997_v4  ;;  %881 = vmatprep.subr.bf16.mxu0 %v998_v5  ;;  %v1006_v13 = vld [vmem:[%s1363_s1 + $0x60] sm:$0xff]   ;;  %v1010_v17 = vld [vmem:[%s1363_s1 + $0x58] sm:$0xff]   ;;  %v1014_v21 = vld [vmem:[%s1363_s1 + $0x50] sm:$0xff]  }
   0x6   :  { %921 = vmatprep.subr.bf16.mxu1 %v999_v6  ;;  %v1007_v14 = vld [vmem:[%s1363_s1 + $0xe0] sm:$0xff]   ;;  %v1011_v18 = vld [vmem:[%s1363_s1 + $0xd8] sm:$0xff]   ;;  %v1015_v22 = vld [vmem:[%s1363_s1 + $0xd0] sm:$0xff]  }
   0x7   :  { %v1008_v15 = vld [vmem:[%s1363_s1 + $0x20] sm:$0xff]   ;;  %v1012_v19 = vld [vmem:[%s1363_s1 + $0x18] sm:$0xff]   ;;  %v1016_v23 = vld [vmem:[%s1363_s1 + $0x10] sm:$0xff]  }
   0x8   :  { %882 = vmatpush3.bf16.msra.mxu0 %v1000_v7  ;;  %v1009_v16 = vld [vmem:[%s1363_s1 + $0xa0] sm:$0xff]   ;;  %v1013_v20 = vld [vmem:[%s1363_s1 + $0x98] sm:$0xff]   ;;  %v1017_v24 = vld [vmem:[%s1363_s1 + $0x90] sm:$0xff]  }
   0x9   :  { %922 = vmatpush3.bf16.msra.mxu1 %v1001_v8  ;;  %883 = vmatprep.subr.bf16.mxu0 %v1002_v9  ;;  %v1018_v25 = vld [vmem:[%s1363_s1 + $0x48] sm:$0xff]   ;;  %v1022_v29 = vld [vmem:[%s1363_s1 + $0x40] sm:$0xff]   ;;  %v1032_v37 = vld [vmem:[%s1363_s1 + $0x118] sm:$0xff]  }
   0xa   :  { %923 = vmatprep.subr.bf16.mxu1 %v1003_v10  ;;  %v1019_v26 = vld [vmem:[%s1363_s1 + $0xc8] sm:$0xff]   ;;  %v1023_v30 = vld [vmem:[%s1363_s1 + $0xc0] sm:$0xff]   ;;  %v1039_v40 = vld [vmem:[%s1363_s1 + $0x110] sm:$0xff]  }
   0xb   :  { %v1020_v27 = vld [vmem:[%s1363_s1 + $0x8] sm:$0xff]   ;;  %v1024_v31 = vld [vmem:[%s1363_s1] sm:$0xff]   ;;  %v1042_v44 = vld [vmem:[%s1364_s0 + $0x5c] ss:$20 sps:$4 sm:$0xff]  }
   0xc   :  { %884 = vmatpush3.bf16.msra.mxu0 %v1004_v11  ;;  %v1021_v28 = vld [vmem:[%s1363_s1 + $0x88] sm:$0xff]   ;;  %v1025_v32 = vld [vmem:[%s1363_s1 + $0x80] sm:$0xff]   ;;  %v1047_v49 = vld [vmem:[%s1364_s0 + $0x7c] ss:$20 sps:$4 sm:$0xff]  }
   0xd   :  { %924 = vmatpush3.bf16.msra.mxu1 %v1005_v12  ;;  %885 = vmatprep.subr.bf16.mxu0 %v1006_v13  ;;  %v1026_v33 = vld [vmem:[%s1364_s0] ss:$20 sps:$4 sm:$0xff]   ;;  %v1028_v34 = vld [vmem:[%s1364_s0 + $0x4] ss:$20 sps:$4 sm:$0xff]   ;;  %v1029_v35 = vld [vmem:[%s1364_s0 + $0x8] ss:$20 sps:$4 sm:$0xff]  }
   0xe   :  { %925 = vmatprep.subr.bf16.mxu1 %v1007_v14  ;;  %v1031_v36 = vld [vmem:[%s1364_s0 + $0xc] ss:$20 sps:$4 sm:$0xff]   ;;  %475 = vmatprep.mubr.bf16.mxu0 %v1028_v34  ;;  %v1035_v39 = vld [vmem:[%s1364_s0 + $0x34] ss:$20 sps:$4 sm:$0xff]   ;;  %v1038_v42 = vld [vmem:[%s1364_s0 + $0x30] ss:$20 sps:$4 sm:$0xff]  }
   0xf   :  { %540 = vmatprep.mubr.bf16.mxu1 %v1031_v36  ;;  %v1033_v38 = vld [vmem:[%s1364_s0 + $0x2c] ss:$20 sps:$4 sm:$0xff]   ;;  %v1037_v41 = vld [vmem:[%s1364_s0 + $0x28] ss:$20 sps:$4 sm:$0xff]   ;;  %v1044_v47 = vld [vmem:[%s1364_s0 + $0x50] ss:$20 sps:$4 sm:$0xff]  }
  0x10   :  { %886 = vmatpush3.bf16.msra.mxu0 %v1008_v15  ;;  %v1040_v43 = vld [vmem:[%s1364_s0 + $0x54] ss:$20 sps:$4 sm:$0xff]   ;;  %v1053_v46 = vld [vmem:[%s1363_s1 + $0x100] sm:$0xff]   ;;  %v1045_v48 = vld [vmem:[%s1364_s0 + $0x58] ss:$20 sps:$4 sm:$0xff]  }
  0x11   :  { %926 = vmatpush3.bf16.msra.mxu1 %v1009_v16  ;;  %887 = vmatprep.subr.bf16.mxu0 %v1010_v17  ;;  %v1046_v45 = vld [vmem:[%s1363_s1 + $0x108] sm:$0xff]   ;;  %v1049_v50 = vld [vmem:[%s1364_s0 + $0x84] ss:$20 sps:$4 sm:$0xff]   ;;  %v640_v51 = vld [vmem:[%s1365_s2 + $0x10] sm:$0xff] }
  0x12   :  { %927 = vmatprep.subr.bf16.mxu1 %v1011_v18  ;;  %v638_v52 = vld [vmem:[%s1365_s2] sm:$0xff]  ;;  %658 = vperm.xlu1 %993, %v640_v51   ;;  %v641_v53 = vld [vmem:[%s1365_s2 + $0x18] sm:$0xff]  ;;  %v639_v54 = vld [vmem:[%s1365_s2 + $0x8] sm:$0xff] }
  0x13   :  { %648 = vperm.xlu0 %992, %v638_v52   ;;  %v1051_v55 = vld [vmem:[%s1364_s0 + $0x78] ss:$20 sps:$4 sm:$0xff]   ;;  %v1052_v56 = vld [vmem:[%s1364_s0 + $0x80] ss:$20 sps:$4 sm:$0xff]   ;;  %v1054_v57 = vld [vmem:[%s1364_s0 + $0x10] ss:$20 sps:$4 sm:$0xff]  }
  0x14   :  { %888 = vmatpush3.bf16.msra.mxu0 %v1012_v19  ;;  %v643_v58 = vld [vmem:[%s1365_s2 + $0x28] sm:$0xff]  ;;  %v1055_v59 = vld [vmem:[%s1364_s0 + $0x60] ss:$20 sps:$4 sm:$0xff]   ;;  %v645_v61 = vld [vmem:[%s1365_s2 + $0x38] sm:$0xff] }
  0x15   :  { %928 = vmatpush3.bf16.msra.mxu1 %v1013_v20  ;;  %889 = vmatprep.subr.bf16.mxu0 %v1014_v21  ;;  %v642_v60 = vld [vmem:[%s1365_s2 + $0x20] sm:$0xff]  ;;  %v644_v62 = vld [vmem:[%s1365_s2 + $0x30] sm:$0xff]  ;;  %v1056_v63 = vld [vmem:[%s1364_s0 + $0x38] ss:$20 sps:$4 sm:$0xff]  }
  0x16   :  { %929 = vmatprep.subr.bf16.mxu1 %v1015_v22  ;;  %663 = vperm.xlu1 %993, %v641_v53   ;;  %v1057_v0 = vld [vmem:[%s1364_s0 + $0x88] ss:$20 sps:$4 sm:$0xff]   ;;  %v694_v2 = vld [vmem:[%s1366_s3] sm:$0xff]  ;;  %v696_v4 = vld [vmem:[%s1366_s3 + $0x10] sm:$0xff] }
  0x17   :  { %653 = vperm.xlu0 %992, %v639_v54   ;;  %v695_v1 = vld [vmem:[%s1366_s3 + $0x8] sm:$0xff]  ;;  %v697_v3 = vld [vmem:[%s1366_s3 + $0x18] sm:$0xff]  ;;  %v698_v6 = vld [vmem:[%s1366_s3 + $0x20] sm:$0xff] }
  0x18   :  { %890 = vmatpush3.bf16.msra.mxu0 %v1016_v23  ;;  %v699_v5 = vld [vmem:[%s1366_s3 + $0x28] sm:$0xff]  ;;  %v701_v7 = vld [vmem:[%s1366_s3 + $0x38] sm:$0xff]  ;;  %v700_v8 = vld [vmem:[%s1366_s3 + $0x30] sm:$0xff] }
  0x19   :  { %930 = vmatpush3.bf16.msra.mxu1 %v1017_v24  ;;  %891 = vmatprep.subr.bf16.mxu0 %v1018_v25 }
  0x1a   :  { %931 = vmatprep.subr.bf16.mxu1 %v1019_v26  ;;  %673 = vperm.xlu1 %993, %v643_v58  }
  0x1b   :  { %668 = vperm.xlu0 %992, %v642_v60  }
  0x1c   :  { %892 = vmatpush3.bf16.msra.mxu0 %v1020_v27 }
  0x1d   :  { %932 = vmatpush3.bf16.msra.mxu1 %v1021_v28  ;;  %893 = vmatprep.subr.bf16.mxu0 %v1022_v29 }
  0x1e   :  { %933 = vmatprep.subr.bf16.mxu1 %v1023_v30  ;;  %683 = vperm.xlu1 %993, %v645_v61  }
  0x1f   :  { %678 = vperm.xlu0 %992, %v644_v62  }
  0x20   :  { %894 = vmatpush3.bf16.msra.mxu0 %v1024_v31 }
  0x21   :  { %934 = vmatpush3.bf16.msra.mxu1 %v1025_v32  ;;  %967 = vmatprep.subr.bf16.mxu0 %v1032_v37 }
  0x22   :  { %983 = vmatprep.subr.bf16.mxu1 %v1032_v37  ;;  %709 = vperm.xlu1 %993, %v695_v1  }
  0x23   :  { %476 = vmatmul.mubr.bf16.vlgmr.msra.gmra.mxu0 %v1026_v33  ;;  %704 = vperm.xlu0 %992, %v694_v2  }
  0x24   :  { %541 = vmatmul.mubr.bf16.vlgmr.msra.gmra.mxu1 %v1029_v35  ;;  %968 = vmatpush3.bf16.msra.mxu0 %v1032_v37 }
  0x25   :  { %987 = vmatpush3.bf16.msra.mxu1 %v1032_v37  ;;  %483 = vmatprep.mubr.bf16.mxu0 %v1033_v38 }
  0x26   :  { %548 = vmatprep.mubr.bf16.mxu1 %v1035_v39  ;;  %969 = vmatprep.subr.bf16.mxu0 %v1039_v40 }
  0x27   :  { %984 = vmatprep.subr.bf16.mxu1 %v1039_v40  ;;  %719 = vperm.xlu1 %993, %v697_v3  }
  0x28   :  { %970 = vmatpush3.bf16.msra.mxu0 %v1039_v40  ;;  %714 = vperm.xlu0 %992, %v696_v4  }
  0x29   :  { %988 = vmatpush3.bf16.msra.mxu1 %v1039_v40  ;;  %971 = vmatprep.subr.bf16.mxu0 %v1046_v45 }
  0x2a   :  { %985 = vmatprep.subr.bf16.mxu1 %v1046_v45 }
  0x2b   :  { %484 = vmatmul.mubr.bf16.gmra.mxu0 %v1037_v41  ;;  %729 = vperm.xlu1 %993, %v699_v5  }
  0x2c   :  { %549 = vmatmul.mubr.bf16.gmra.mxu1 %v1038_v42  ;;  %491 = vmatprep.mubr.bf16.mxu0 %v1040_v43 }
  0x2d   :  { %556 = vmatprep.mubr.bf16.mxu1 %v1042_v44  ;;  %972 = vmatpush3.bf16.msra.mxu0 %v1046_v45 }
  0x2e   :  { %989 = vmatpush3.bf16.msra.mxu1 %v1046_v45  ;;  %973 = vmatprep.subr.bf16.mxu0 %v1053_v46 }
  0x2f   :  { %986 = vmatprep.subr.bf16.mxu1 %v1053_v46  ;;  %724 = vperm.xlu0 %992, %v698_v6  }
  0x30   :  { %739 = vperm.xlu1 %993, %v701_v7  }
  0x31   :  { %974 = vmatpush3.bf16.msra.mxu0 %v1053_v46 }
  0x32   :  { %990 = vmatpush3.bf16.msra.mxu1 %v1053_v46 }
  0x33   :  { %492 = vmatmul.mubr.bf16.gmra.mxu0 %v1044_v47  ;;  %734 = vperm.xlu0 %992, %v700_v8  }
  0x34   :  { %557 = vmatmul.mubr.bf16.gmra.mxu1 %v1045_v48  ;;  %499 = vmatprep.mubr.bf16.mxu0 %v1047_v49 }
  0x35   :  { %564 = vmatprep.mubr.bf16.mxu1 %v1049_v50 }
  0x3b   :  { %500 = vmatmul.mubr.bf16.gmra.mxu0 %v1051_v55 }
  0x3c   :  { %565 = vmatmul.mubr.bf16.gmra.mxu1 %v1052_v56  ;;  %975 = vmatprep.mubr.msk.bf16.mxu0 %vm430_vm0, %v1054_v57 }
  0x3d   :  { %979 = vmatprep.mubr.msk.bf16.mxu1 %vm430_vm0, %v1055_v59 }
  0x43   :  { %976 = vmatmul.mubr.msk.bf16.vlgmr.msra.gmra.mxu0 %vm430_vm0, %v1056_v63 }
  0x44   :  { %980 = vmatmul.mubr.msk.bf16.vlgmr.msra.gmra.mxu1 %vm430_vm0, %v1057_v0 }
  0x8d   :  { %v1306_v10 = vpop.permute.xlu1 %658 }
  0x8e   :  { %v1304_v9 = vpop.permute.xlu0 %648 }
  0x91   :  { %v1310_v17 = vpop.permute.xlu1 %663 }
  0x92   :  { %v1308_v12 = vpop.permute.xlu0 %653 }
  0x95   :  { %v1314_v25 = vpop.permute.xlu1 %673 }
  0x96   :  { %v1312_v20 = vpop.permute.xlu0 %668 }
  0x99   :  { %v1316_v33 = vpop.permute.xlu1 %683 }
  0x9a   :  { %v679_v28 = vpop.permute.xlu0 %678 }
  0x9d   :  { %v1320_v41 = vpop.permute.xlu1 %709 }
  0x9e   :  { %v1318_v36 = vpop.permute.xlu0 %704 }
  0xa2   :  { %v720_v55 = vpop.permute.xlu1 %719 }
  0xa3   :  { %v715_v44 = vpop.permute.xlu0 %714 }
  0xaa   :  { %v725_v60 = vpop.permute.xlu0 %724 }
  0xe3   :  { %v895_v11 = vpop.f32.mrf.mxu0 }
  0xe4   :  { %v935_v13 = vpop.f32.mrf.mxu1 }
  0xe5   :  { %v896_v14 = vpop.f32.mrf.mxu0 }
  0xe6   :  { %v936_v15 = vpop.f32.mrf.mxu1  ;;  %v897_v53 = vadd.f32 %v896_v14, %v895_v11 }
  0xe7   :  { %v898_v16 = vpop.f32.mrf.mxu0  ;;  %v937_v54 = vadd.f32 %v936_v15, %v935_v13 }
  0xe8   :  { %v938_v18 = vpop.f32.mrf.mxu1 }
  0xe9   :  { %v899_v19 = vpop.f32.mrf.mxu0  ;;  %v543_v11 = vadd.f32 %v937_v54, %v897_v53 }
  0xea   :  { %v939_v21 = vpop.f32.mrf.mxu1  ;;  %v900_v5 = vadd.f32 %v899_v19, %v898_v16 }
  0xeb   :  { %v901_v22 = vpop.f32.mrf.mxu0  ;;  %v940_v6 = vadd.f32 %v939_v21, %v938_v18  ;;  %v735_v18 = vpop.permute.xlu0 %734 }
  0xec   :  { %v941_v23 = vpop.f32.mrf.mxu1 }
  0xed   :  { %v902_v24 = vpop.f32.mrf.mxu0 }
  0xee   :  { %v942_v26 = vpop.f32.mrf.mxu1  ;;  %v903_v47 = vadd.f32 %v902_v24, %v901_v22  ;;  %v730_v24 = vpop.permute.xlu1 %729 }
  0xef   :  { %v904_v27 = vpop.f32.mrf.mxu0  ;;  %v943_v48 = vadd.f32 %v942_v26, %v941_v23 }
  0xf0   :  { %v944_v29 = vpop.f32.mrf.mxu1 }
  0xf1   :  { %v905_v30 = vpop.f32.mrf.mxu0  ;;  %v551_v0 = vadd.f32 %v943_v48, %v903_v47 }
  0xf2   :  { %v945_v31 = vpop.f32.mrf.mxu1  ;;  %v906_v61 = vadd.f32 %v905_v30, %v904_v27 }
  0xf3   :  { %v907_v32 = vpop.f32.mrf.mxu0  ;;  %v946_v62 = vadd.f32 %v945_v31, %v944_v29 }
  0xf4   :  { %v947_v34 = vpop.f32.mrf.mxu1 }
  0xf5   :  { %v908_v35 = vpop.f32.mrf.mxu0  ;;  %v554_v30 = vadd.f32 %v946_v62, %v906_v61 }
  0xf6   :  { %v948_v37 = vpop.f32.mrf.mxu1  ;;  %v909_v57 = vadd.f32 %v908_v35, %v907_v32 }
  0xf7   :  { %v910_v38 = vpop.f32.mrf.mxu0  ;;  %v949_v58 = vadd.f32 %v948_v37, %v947_v34 }
  0xf8   :  { %v950_v39 = vpop.f32.mrf.mxu1 }
  0xf9   :  { %v911_v40 = vpop.f32.mrf.mxu0  ;;  %v559_v23 = vadd.f32 %v949_v58, %v909_v57 }
  0xfa   :  { %v951_v42 = vpop.f32.mrf.mxu1  ;;  %v912_v13 = vadd.f32 %v911_v40, %v910_v38  ;;  %v546_v38 = vadd.f32 %v940_v6, %v900_v5 }
  0xfb   :  { %v913_v43 = vpop.f32.mrf.mxu0  ;;  %v952_v14 = vadd.f32 %v951_v42, %v950_v39 }
  0xfc   :  { %v953_v45 = vpop.f32.mrf.mxu1 }
  0xfd   :  { %v914_v46 = vpop.f32.mrf.mxu0 }
  0xfe   :  { %v954_v49 = vpop.f32.mrf.mxu1  ;;  %v915_v50 = vadd.f32 %v914_v46, %v913_v43  ;;  %v562_v43 = vadd.f32 %v952_v14, %v912_v13 }
  0xff   :  { %v955_v51 = vadd.f32 %v954_v49, %v953_v45  ;;  %v916_v52 = vpop.f32.mrf.mxu0 }
 0x100   :  { %v956_v56 = vpop.f32.mrf.mxu1 }
 0x101   :  { %v917_v59 = vpop.f32.mrf.mxu0  ;;  %v567_v4 = vadd.f32 %v955_v51, %v915_v50  ;;  %v740_v51 = vpop.permute.xlu1 %739 }
 0x102   :  { %v957_v63 = vpop.f32.mrf.mxu1  ;;  %v918_v1 = vadd.f32 %v917_v59, %v916_v52 }
 0x103   :  { %v958_v2 = vadd.f32 %v957_v63, %v956_v56  ;;  %v977_v3 = vpop.f32.mrf.mxu0 }
 0x104   :  { %v616_v7 = vadd.f32 %v977_v3, %v551_v0  ;;  %v981_v8 = vpop.f32.mrf.mxu1 }
 0x105   :  { %v632_v15 = vadd.f32 %v981_v8, %v567_v4  ;;  %v607_v22 = vpop.f32.mrf.mxu0  ;;  %v570_v16 = vadd.f32 %v958_v2, %v918_v1 }
 0x106   :  { %v688_v26 = vmul.f32 %v1306_v10, %v616_v7  ;;  %v608_v27 = vadd.f32 %v607_v22, %v543_v11  ;;  %v623_v29 = vpop.f32.mrf.mxu1 }
 0x107   :  { %v692_v31 = vmul.f32 %v679_v28, %v632_v15  ;;  %v624_v32 = vadd.f32 %v623_v29, %v559_v23  ;;  %v978_v34 = vpop.f32.mrf.mxu0 }
 0x108   :  { %v744_v19 = vadd.f32 %v715_v44, %v688_v26  ;;  %v686_v21 = vmul.f32 %v1304_v9, %v608_v27  ;;  %v619_v35 = vadd.f32 %v978_v34, %v554_v30  ;;  %v982_v37 = vpop.f32.mrf.mxu1 }
 0x109   :  { %v748_v39 = vadd.f32 %v735_v18, %v692_v31  ;;  %v690_v40 = vmul.f32 %v1312_v20, %v624_v32  ;;  %v635_v42 = vadd.f32 %v982_v37, %v570_v16  ;;  %v610_v10 = vpop.f32.mrf.mxu0 }
 0x10a   :  { %v752_v45 = vmax.f32 %v744_v19, 0.0  ;;  %v742_v46 = vadd.f32 %v1318_v36, %v686_v21  ;;  %v689_v28 = vmul.f32 %v1310_v17, %v619_v35  ;;  %v611_v47 = vadd.f32 %v610_v10, %v546_v38  ;;  %v626_v48 = vpop.f32.mrf.mxu1 }
 0x10b   :  { %v756_v49 = vmax.f32 %v748_v39, 0.0  ;;  %v746_v44 = vadd.f32 %v725_v60, %v690_v40  ;;  %v693_v9 = vmul.f32 %v1316_v33, %v635_v42  ;;  %v627_v50 = vadd.f32 %v626_v48, %v562_v43 }
 0x10c   :  { %v873_v52 = vpack.c.bf16 %v752_v45, %v752_v45  ;;  %v750_v53 = vmax.f32 %v742_v46, 0.0  ;;  %v745_v54 = vadd.f32 %v720_v55, %v689_v28  ;;  %v687_v20 = vmul.f32 %v1308_v12, %v611_v47 }
 0x10d   :  { %v877_v56 = vpack.c.bf16 %v756_v49, %v756_v49  ;;  %v754_v57 = vmax.f32 %v746_v44, 0.0  ;;  %v749_v58 = vadd.f32 %v740_v51, %v693_v9  ;;  %v691_v36 = vmul.f32 %v1314_v25, %v627_v50 }
 0x10e   :  { %793 = vst.msk [vmem:[%s1367_s4 + $0x8] sm:$0xf] %vm790_vm1, %v873_v52  ;;  %v871_v17 = vpack.c.bf16 %v750_v53, %v750_v53  ;;  %v753_v59 = vmax.f32 %v745_v54, 0.0  ;;  %v743_v33 = vadd.f32 %v1320_v41, %v687_v20 }
 0x10f   :  { %797 = vst.msk [vmem:[%s1367_s4 + $0x18] sm:$0xf] %vm790_vm1, %v877_v56  ;;  %v875_v12 = vpack.c.bf16 %v754_v57, %v754_v57  ;;  %v757_v55 = vmax.f32 %v749_v58, 0.0  ;;  %v747_v60 = vadd.f32 %v730_v24, %v691_v36 }
 0x110   :  { %791 = vst.msk [vmem:[%s1367_s4] sm:$0xf] %vm790_vm1, %v871_v17  ;;  %v874_v25 = vpack.c.bf16 %v753_v59, %v753_v59  ;;  %v751_v61 = vmax.f32 %v743_v33, 0.0 }
 0x111   :  { %795 = vst.msk [vmem:[%s1367_s4 + $0x10] sm:$0xf] %vm790_vm1, %v875_v12  ;;  %v878_v41 = vpack.c.bf16 %v757_v55, %v757_v55  ;;  %v755_v62 = vmax.f32 %v747_v60, 0.0 }
 0x112   :  { %794 = vst.msk [vmem:[%s1367_s4 + $0xc] sm:$0xf] %vm790_vm1, %v874_v25  ;;  %v872_v63 = vpack.c.bf16 %v751_v61, %v751_v61 }
 0x113   :  { %798 = vst.msk [vmem:[%s1367_s4 + $0x1c] sm:$0xf] %vm790_vm1, %v878_v41  ;;  %v876_v0 = vpack.c.bf16 %v755_v62, %v755_v62 }
 0x114   :  { %792 = vst.msk [vmem:[%s1367_s4 + $0x4] sm:$0xf] %vm790_vm1, %v872_v63 }
 0x115   :  { %796 = vst.msk [vmem:[%s1367_s4 + $0x14] sm:$0xf] %vm790_vm1, %v876_v0 }

// kernel: _lambda_.70
= control target key start
LH: loop header
LB: loop body
LE: loop exit
PB: predicated region body
PF: predicated region fallthrough
CT: control target
= control target key end

     0   :  { %v1104_v1 = vmov 0   ;;  %vm433_vm0 = vcmask 523264   ;;  %vm817_vm1 = vcmask 125952   ;;  %s1454_s1 = inlined_call_operand.vmem [shape: bf16[576,16], index: 1, kind: input, shape index: {}]   ;;  %s1455_s0 = inlined_call_operand.vmem [shape: bf16[64,576], index: 0, kind: input, shape index: {}]   ;;  %s1456_s2 = inlined_call_operand.vmem [shape: f32[64,1], index: 2, kind: input, shape index: {}]   ;;  %s1457_s3 = inlined_call_operand.vmem [shape: f32[64,1], index: 3, kind: input, shape index: {}]   ;;  %s1458_s4 = inlined_call_operand.vmem [shape: bf16[64,16], index: 4, kind: input, shape index: {}]   ;;  %s1459_s5 = inlined_call_operand.vmem [shape: bf16[64,16], index: 5, kind: output, shape index: {}]  }
   0x1   :  { %v1040_v0 = vld [vmem:[%s1454_s1 + $0x78] sm:$0xff]   ;;  %1039 = vset.pattern.permute.xlu1 %v1104_v1  ;;  %1038 = vset.pattern.permute.xlu0 %v1104_v1  ;;  %v1044_v5 = vld [vmem:[%s1454_s1 + $0x70] sm:$0xff]   ;;  %v1048_v9 = vld [vmem:[%s1454_s1 + $0x68] sm:$0xff]  }
   0x2   :  { %v1041_v2 = vld [vmem:[%s1454_s1 + $0xf8] sm:$0xff]   ;;  %925 = vmatprep.subr.bf16.mxu0 %v1040_v0  ;;  %v1045_v6 = vld [vmem:[%s1454_s1 + $0xf0] sm:$0xff]   ;;  %v1049_v10 = vld [vmem:[%s1454_s1 + $0xe8] sm:$0xff]  }
   0x3   :  { %v1042_v3 = vld [vmem:[%s1454_s1 + $0x38] sm:$0xff]   ;;  %965 = vmatprep.subr.bf16.mxu1 %v1041_v2  ;;  %v1046_v7 = vld [vmem:[%s1454_s1 + $0x30] sm:$0xff]   ;;  %v1050_v11 = vld [vmem:[%s1454_s1 + $0x28] sm:$0xff]  }
   0x4   :  { %v1043_v4 = vld [vmem:[%s1454_s1 + $0xb8] sm:$0xff]   ;;  %926 = vmatpush3.bf16.msra.mxu0 %v1042_v3  ;;  %v1047_v8 = vld [vmem:[%s1454_s1 + $0xb0] sm:$0xff]   ;;  %v1051_v12 = vld [vmem:[%s1454_s1 + $0xa8] sm:$0xff]  }
   0x5   :  { %966 = vmatpush3.bf16.msra.mxu1 %v1043_v4  ;;  %927 = vmatprep.subr.bf16.mxu0 %v1044_v5  ;;  %v1052_v13 = vld [vmem:[%s1454_s1 + $0x60] sm:$0xff]   ;;  %v1056_v17 = vld [vmem:[%s1454_s1 + $0x58] sm:$0xff]   ;;  %v1060_v21 = vld [vmem:[%s1454_s1 + $0x50] sm:$0xff]  }
   0x6   :  { %967 = vmatprep.subr.bf16.mxu1 %v1045_v6  ;;  %v1053_v14 = vld [vmem:[%s1454_s1 + $0xe0] sm:$0xff]   ;;  %v1057_v18 = vld [vmem:[%s1454_s1 + $0xd8] sm:$0xff]   ;;  %v1061_v22 = vld [vmem:[%s1454_s1 + $0xd0] sm:$0xff]  }
   0x7   :  { %v1054_v15 = vld [vmem:[%s1454_s1 + $0x20] sm:$0xff]   ;;  %v1058_v19 = vld [vmem:[%s1454_s1 + $0x18] sm:$0xff]   ;;  %v1062_v23 = vld [vmem:[%s1454_s1 + $0x10] sm:$0xff]  }
   0x8   :  { %928 = vmatpush3.bf16.msra.mxu0 %v1046_v7  ;;  %v1055_v16 = vld [vmem:[%s1454_s1 + $0xa0] sm:$0xff]   ;;  %v1059_v20 = vld [vmem:[%s1454_s1 + $0x98] sm:$0xff]   ;;  %v1063_v24 = vld [vmem:[%s1454_s1 + $0x90] sm:$0xff]  }
   0x9   :  { %968 = vmatpush3.bf16.msra.mxu1 %v1047_v8  ;;  %929 = vmatprep.subr.bf16.mxu0 %v1048_v9  ;;  %v1064_v25 = vld [vmem:[%s1454_s1 + $0x48] sm:$0xff]   ;;  %v1068_v29 = vld [vmem:[%s1454_s1 + $0x40] sm:$0xff]   ;;  %v1078_v37 = vld [vmem:[%s1454_s1 + $0x118] sm:$0xff]  }
   0xa   :  { %969 = vmatprep.subr.bf16.mxu1 %v1049_v10  ;;  %v1065_v26 = vld [vmem:[%s1454_s1 + $0xc8] sm:$0xff]   ;;  %v1069_v30 = vld [vmem:[%s1454_s1 + $0xc0] sm:$0xff]   ;;  %v1085_v40 = vld [vmem:[%s1454_s1 + $0x110] sm:$0xff]  }
   0xb   :  { %v1066_v27 = vld [vmem:[%s1454_s1 + $0x8] sm:$0xff]   ;;  %v1070_v31 = vld [vmem:[%s1454_s1] sm:$0xff]   ;;  %v1088_v44 = vld [vmem:[%s1455_s0 + $0x5c] ss:$20 sps:$4 sm:$0xff]  }
   0xc   :  { %930 = vmatpush3.bf16.msra.mxu0 %v1050_v11  ;;  %v1067_v28 = vld [vmem:[%s1454_s1 + $0x88] sm:$0xff]   ;;  %v1071_v32 = vld [vmem:[%s1454_s1 + $0x80] sm:$0xff]   ;;  %v1093_v49 = vld [vmem:[%s1455_s0 + $0x7c] ss:$20 sps:$4 sm:$0xff]  }
   0xd   :  { %970 = vmatpush3.bf16.msra.mxu1 %v1051_v12  ;;  %931 = vmatprep.subr.bf16.mxu0 %v1052_v13  ;;  %v1072_v33 = vld [vmem:[%s1455_s0] ss:$20 sps:$4 sm:$0xff]   ;;  %v1074_v34 = vld [vmem:[%s1455_s0 + $0x4] ss:$20 sps:$4 sm:$0xff]   ;;  %v1075_v35 = vld [vmem:[%s1455_s0 + $0x8] ss:$20 sps:$4 sm:$0xff]  }
   0xe   :  { %971 = vmatprep.subr.bf16.mxu1 %v1053_v14  ;;  %v1077_v36 = vld [vmem:[%s1455_s0 + $0xc] ss:$20 sps:$4 sm:$0xff]   ;;  %478 = vmatprep.mubr.bf16.mxu0 %v1074_v34  ;;  %v1081_v39 = vld [vmem:[%s1455_s0 + $0x34] ss:$20 sps:$4 sm:$0xff]   ;;  %v1084_v42 = vld [vmem:[%s1455_s0 + $0x30] ss:$20 sps:$4 sm:$0xff]  }
   0xf   :  { %543 = vmatprep.mubr.bf16.mxu1 %v1077_v36  ;;  %v1079_v38 = vld [vmem:[%s1455_s0 + $0x2c] ss:$20 sps:$4 sm:$0xff]   ;;  %v1083_v41 = vld [vmem:[%s1455_s0 + $0x28] ss:$20 sps:$4 sm:$0xff]   ;;  %v1090_v47 = vld [vmem:[%s1455_s0 + $0x50] ss:$20 sps:$4 sm:$0xff]  }
  0x10   :  { %932 = vmatpush3.bf16.msra.mxu0 %v1054_v15  ;;  %v1086_v43 = vld [vmem:[%s1455_s0 + $0x54] ss:$20 sps:$4 sm:$0xff]   ;;  %v1099_v46 = vld [vmem:[%s1454_s1 + $0x100] sm:$0xff]   ;;  %v1091_v48 = vld [vmem:[%s1455_s0 + $0x58] ss:$20 sps:$4 sm:$0xff]  }
  0x11   :  { %972 = vmatpush3.bf16.msra.mxu1 %v1055_v16  ;;  %933 = vmatprep.subr.bf16.mxu0 %v1056_v17  ;;  %v1092_v45 = vld [vmem:[%s1454_s1 + $0x108] sm:$0xff]   ;;  %v1095_v50 = vld [vmem:[%s1455_s0 + $0x84] ss:$20 sps:$4 sm:$0xff]   ;;  %v643_v51 = vld [vmem:[%s1456_s2 + $0x10] sm:$0xff] }
  0x12   :  { %973 = vmatprep.subr.bf16.mxu1 %v1057_v18  ;;  %v641_v52 = vld [vmem:[%s1456_s2] sm:$0xff]  ;;  %661 = vperm.xlu1 %1039, %v643_v51   ;;  %v644_v53 = vld [vmem:[%s1456_s2 + $0x18] sm:$0xff]  ;;  %v642_v54 = vld [vmem:[%s1456_s2 + $0x8] sm:$0xff] }
  0x13   :  { %651 = vperm.xlu0 %1038, %v641_v52   ;;  %v1097_v55 = vld [vmem:[%s1455_s0 + $0x78] ss:$20 sps:$4 sm:$0xff]   ;;  %v1098_v56 = vld [vmem:[%s1455_s0 + $0x80] ss:$20 sps:$4 sm:$0xff]   ;;  %v1100_v57 = vld [vmem:[%s1455_s0 + $0x10] ss:$20 sps:$4 sm:$0xff]  }
  0x14   :  { %934 = vmatpush3.bf16.msra.mxu0 %v1058_v19  ;;  %v646_v58 = vld [vmem:[%s1456_s2 + $0x28] sm:$0xff]  ;;  %v1101_v59 = vld [vmem:[%s1455_s0 + $0x60] ss:$20 sps:$4 sm:$0xff]   ;;  %v648_v61 = vld [vmem:[%s1456_s2 + $0x38] sm:$0xff] }
  0x15   :  { %974 = vmatpush3.bf16.msra.mxu1 %v1059_v20  ;;  %935 = vmatprep.subr.bf16.mxu0 %v1060_v21  ;;  %v645_v60 = vld [vmem:[%s1456_s2 + $0x20] sm:$0xff]  ;;  %v647_v62 = vld [vmem:[%s1456_s2 + $0x30] sm:$0xff]  ;;  %v1102_v63 = vld [vmem:[%s1455_s0 + $0x38] ss:$20 sps:$4 sm:$0xff]  }
  0x16   :  { %975 = vmatprep.subr.bf16.mxu1 %v1061_v22  ;;  %666 = vperm.xlu1 %1039, %v644_v53   ;;  %v1103_v0 = vld [vmem:[%s1455_s0 + $0x88] ss:$20 sps:$4 sm:$0xff]   ;;  %v697_v2 = vld [vmem:[%s1457_s3] sm:$0xff]  ;;  %v699_v4 = vld [vmem:[%s1457_s3 + $0x10] sm:$0xff] }
  0x17   :  { %656 = vperm.xlu0 %1038, %v642_v54   ;;  %v698_v1 = vld [vmem:[%s1457_s3 + $0x8] sm:$0xff]  ;;  %v700_v3 = vld [vmem:[%s1457_s3 + $0x18] sm:$0xff]  ;;  %v701_v6 = vld [vmem:[%s1457_s3 + $0x20] sm:$0xff] }
  0x18   :  { %936 = vmatpush3.bf16.msra.mxu0 %v1062_v23  ;;  %v702_v5 = vld [vmem:[%s1457_s3 + $0x28] sm:$0xff]  ;;  %v704_v7 = vld [vmem:[%s1457_s3 + $0x38] sm:$0xff]  ;;  %v703_v8 = vld [vmem:[%s1457_s3 + $0x30] sm:$0xff] }
  0x19   :  { %976 = vmatpush3.bf16.msra.mxu1 %v1063_v24  ;;  %937 = vmatprep.subr.bf16.mxu0 %v1064_v25  ;;  %v1392_v52 = vld [vmem:[%s1458_s4] sm:$0xff]   ;;  %v1397_v53 = vld [vmem:[%s1458_s4 + $0x10] sm:$0xff]  }
  0x1a   :  { %977 = vmatprep.subr.bf16.mxu1 %v1065_v26  ;;  %676 = vperm.xlu1 %1039, %v646_v58  }
  0x1b   :  { %671 = vperm.xlu0 %1038, %v645_v60  }
  0x1c   :  { %938 = vmatpush3.bf16.msra.mxu0 %v1066_v27 }
  0x1d   :  { %978 = vmatpush3.bf16.msra.mxu1 %v1067_v28  ;;  %939 = vmatprep.subr.bf16.mxu0 %v1068_v29 }
  0x1e   :  { %979 = vmatprep.subr.bf16.mxu1 %v1069_v30  ;;  %686 = vperm.xlu1 %1039, %v648_v61  }
  0x1f   :  { %681 = vperm.xlu0 %1038, %v647_v62  }
  0x20   :  { %940 = vmatpush3.bf16.msra.mxu0 %v1070_v31 }
  0x21   :  { %980 = vmatpush3.bf16.msra.mxu1 %v1071_v32  ;;  %1013 = vmatprep.subr.bf16.mxu0 %v1078_v37 }
  0x22   :  { %1029 = vmatprep.subr.bf16.mxu1 %v1078_v37  ;;  %712 = vperm.xlu1 %1039, %v698_v1  }
  0x23   :  { %479 = vmatmul.mubr.bf16.vlgmr.msra.gmra.mxu0 %v1072_v33  ;;  %707 = vperm.xlu0 %1038, %v697_v2   ;;  %v908_v2 = vunpack.c.l.bf16 %v1392_v52 }
  0x24   :  { %544 = vmatmul.mubr.bf16.vlgmr.msra.gmra.mxu1 %v1075_v35  ;;  %1014 = vmatpush3.bf16.msra.mxu0 %v1078_v37 }
  0x25   :  { %1033 = vmatpush3.bf16.msra.mxu1 %v1078_v37  ;;  %486 = vmatprep.mubr.bf16.mxu0 %v1079_v38 }
  0x26   :  { %551 = vmatprep.mubr.bf16.mxu1 %v1081_v39  ;;  %1015 = vmatprep.subr.bf16.mxu0 %v1085_v40 }
  0x27   :  { %1030 = vmatprep.subr.bf16.mxu1 %v1085_v40  ;;  %722 = vperm.xlu1 %1039, %v700_v3   ;;  %v916_v3 = vunpack.c.l.bf16 %v1397_v53 }
  0x28   :  { %1016 = vmatpush3.bf16.msra.mxu0 %v1085_v40  ;;  %717 = vperm.xlu0 %1038, %v699_v4  }
  0x29   :  { %1034 = vmatpush3.bf16.msra.mxu1 %v1085_v40  ;;  %1017 = vmatprep.subr.bf16.mxu0 %v1092_v45 }
  0x2a   :  { %1031 = vmatprep.subr.bf16.mxu1 %v1092_v45 }
  0x2b   :  { %487 = vmatmul.mubr.bf16.gmra.mxu0 %v1083_v41  ;;  %732 = vperm.xlu1 %1039, %v702_v5  }
  0x2c   :  { %552 = vmatmul.mubr.bf16.gmra.mxu1 %v1084_v42  ;;  %494 = vmatprep.mubr.bf16.mxu0 %v1086_v43 }
  0x2d   :  { %559 = vmatprep.mubr.bf16.mxu1 %v1088_v44  ;;  %1018 = vmatpush3.bf16.msra.mxu0 %v1092_v45 }
  0x2e   :  { %1035 = vmatpush3.bf16.msra.mxu1 %v1092_v45  ;;  %1019 = vmatprep.subr.bf16.mxu0 %v1099_v46 }
  0x2f   :  { %1032 = vmatprep.subr.bf16.mxu1 %v1099_v46  ;;  %727 = vperm.xlu0 %1038, %v701_v6  }
  0x30   :  { %742 = vperm.xlu1 %1039, %v704_v7  }
  0x31   :  { %1020 = vmatpush3.bf16.msra.mxu0 %v1099_v46 }
  0x32   :  { %1036 = vmatpush3.bf16.msra.mxu1 %v1099_v46 }
  0x33   :  { %495 = vmatmul.mubr.bf16.gmra.mxu0 %v1090_v47  ;;  %737 = vperm.xlu0 %1038, %v703_v8   ;;  %v1382_v47 = vld [vmem:[%s1458_s4 + $0x8] sm:$0xff]  }
  0x34   :  { %560 = vmatmul.mubr.bf16.gmra.mxu1 %v1091_v48  ;;  %502 = vmatprep.mubr.bf16.mxu0 %v1093_v49  ;;  %v1387_v48 = vld [vmem:[%s1458_s4 + $0x18] sm:$0xff]   ;;  %v912_v61 = vunpack.c.l.bf16 %v1382_v47 }
  0x35   :  { %567 = vmatprep.mubr.bf16.mxu1 %v1095_v50  ;;  %v920_v62 = vunpack.c.l.bf16 %v1387_v48 }
  0x3b   :  { %503 = vmatmul.mubr.bf16.gmra.mxu0 %v1097_v55 }
  0x3c   :  { %568 = vmatmul.mubr.bf16.gmra.mxu1 %v1098_v56  ;;  %1021 = vmatprep.mubr.msk.bf16.mxu0 %vm433_vm0, %v1100_v57 }
  0x3d   :  { %1025 = vmatprep.mubr.msk.bf16.mxu1 %vm433_vm0, %v1101_v59 }
  0x43   :  { %1022 = vmatmul.mubr.msk.bf16.vlgmr.msra.gmra.mxu0 %vm433_vm0, %v1102_v63 }
  0x44   :  { %1026 = vmatmul.mubr.msk.bf16.vlgmr.msra.gmra.mxu1 %vm433_vm0, %v1103_v0 }
  0x8d   :  { %v1357_v10 = vpop.permute.xlu1 %661 }
  0x8e   :  { %v1355_v9 = vpop.permute.xlu0 %651 }
  0x91   :  { %v1363_v17 = vpop.permute.xlu1 %666 }
  0x92   :  { %v1359_v12 = vpop.permute.xlu0 %656 }
  0x95   :  { %v1369_v25 = vpop.permute.xlu1 %676 }
  0x96   :  { %v1367_v20 = vpop.permute.xlu0 %671 }
  0x99   :  { %v1373_v33 = vpop.permute.xlu1 %686 }
  0x9a   :  { %v1371_v28 = vpop.permute.xlu0 %681 }
  0x9d   :  { %v1377_v41 = vpop.permute.xlu1 %712 }
  0x9e   :  { %v1375_v36 = vpop.permute.xlu0 %707 }
  0xa2   :  { %v1399_v59 = vpop.permute.xlu1 %722 }
  0xa3   :  { %v718_v44 = vpop.permute.xlu0 %717 }
  0xaa   :  { %v728_v4 = vpop.permute.xlu0 %727 }
  0xe3   :  { %v941_v11 = vpop.f32.mrf.mxu0 }
  0xe4   :  { %v981_v13 = vpop.f32.mrf.mxu1 }
  0xe5   :  { %v942_v14 = vpop.f32.mrf.mxu0 }
  0xe6   :  { %v982_v15 = vpop.f32.mrf.mxu1  ;;  %v943_v57 = vadd.f32 %v942_v14, %v941_v11  ;;  %v913_v11 = vunpack.c.h.bf16 %v1382_v47 }
  0xe7   :  { %v1361_v16 = vpop.f32.mrf.mxu0  ;;  %v983_v58 = vadd.f32 %v982_v15, %v981_v13 }
  0xe8   :  { %v1365_v18 = vpop.f32.mrf.mxu1 }
  0xe9   :  { %v945_v19 = vpop.f32.mrf.mxu0 }
  0xea   :  { %v985_v21 = vpop.f32.mrf.mxu1 }
  0xeb   :  { %v947_v22 = vpop.f32.mrf.mxu0 }
  0xec   :  { %v987_v23 = vpop.f32.mrf.mxu1 }
  0xed   :  { %v948_v24 = vpop.f32.mrf.mxu0 }
  0xee   :  { %v988_v26 = vpop.f32.mrf.mxu1  ;;  %v949_v49 = vadd.f32 %v948_v24, %v947_v22  ;;  %v946_v24 = vadd.f32 %v945_v19, %v1361_v16 }
  0xef   :  { %v950_v27 = vpop.f32.mrf.mxu0  ;;  %v989_v50 = vadd.f32 %v988_v26, %v987_v23  ;;  %v921_v23 = vunpack.c.h.bf16 %v1387_v48  ;;  %v986_v26 = vadd.f32 %v985_v21, %v1365_v18  ;;  %v909_v48 = vunpack.c.h.bf16 %v1392_v52 }
  0xf0   :  { %v990_v29 = vpop.f32.mrf.mxu1 }
  0xf1   :  { %v951_v30 = vpop.f32.mrf.mxu0  ;;  %v554_v8 = vadd.f32 %v989_v50, %v949_v49 }
  0xf2   :  { %v991_v31 = vpop.f32.mrf.mxu1  ;;  %v952_v5 = vadd.f32 %v951_v30, %v950_v27 }
  0xf3   :  { %v953_v32 = vpop.f32.mrf.mxu0  ;;  %v992_v6 = vadd.f32 %v991_v31, %v990_v29 }
  0xf4   :  { %v993_v34 = vpop.f32.mrf.mxu1 }
  0xf5   :  { %v954_v35 = vpop.f32.mrf.mxu0  ;;  %v557_v49 = vadd.f32 %v992_v6, %v952_v5 }
  0xf6   :  { %v994_v37 = vpop.f32.mrf.mxu1  ;;  %v955_v63 = vadd.f32 %v954_v35, %v953_v32  ;;  %v546_v35 = vadd.f32 %v983_v58, %v943_v57 }
  0xf7   :  { %v956_v38 = vpop.f32.mrf.mxu0  ;;  %v995_v0 = vadd.f32 %v994_v37, %v993_v34 }
  0xf8   :  { %v996_v39 = vpop.f32.mrf.mxu1 }
  0xf9   :  { %v957_v40 = vpop.f32.mrf.mxu0  ;;  %v562_v31 = vadd.f32 %v995_v0, %v955_v63 }
  0xfa   :  { %v997_v42 = vpop.f32.mrf.mxu1  ;;  %v958_v37 = vadd.f32 %v957_v40, %v956_v38  ;;  %v917_v38 = vunpack.c.h.bf16 %v1397_v53 }
  0xfb   :  { %v959_v43 = vpop.f32.mrf.mxu0  ;;  %v998_v27 = vadd.f32 %v997_v42, %v996_v39  ;;  %v738_v39 = vpop.permute.xlu0 %737 }
  0xfc   :  { %v999_v45 = vpop.f32.mrf.mxu1 }
  0xfd   :  { %v960_v46 = vpop.f32.mrf.mxu0  ;;  %v565_v52 = vadd.f32 %v998_v27, %v958_v37 }
  0xfe   :  { %v1000_v51 = vpop.f32.mrf.mxu1  ;;  %v961_v54 = vadd.f32 %v960_v46, %v959_v43  ;;  %v733_v43 = vpop.permute.xlu1 %732 }
  0xff   :  { %v1001_v55 = vadd.f32 %v1000_v51, %v999_v45  ;;  %v962_v56 = vpop.f32.mrf.mxu0 }
 0x100   :  { %v1002_v60 = vpop.f32.mrf.mxu1 }
 0x101   :  { %v963_v1 = vpop.f32.mrf.mxu0  ;;  %v570_v22 = vadd.f32 %v1001_v55, %v961_v54  ;;  %v549_v54 = vadd.f32 %v986_v26, %v946_v24 }
 0x102   :  { %v1003_v7 = vpop.f32.mrf.mxu1  ;;  %v964_v13 = vadd.f32 %v963_v1, %v962_v56  ;;  %v743_v5 = vpop.permute.xlu1 %742 }
 0x103   :  { %v1004_v14 = vadd.f32 %v1003_v7, %v1002_v60  ;;  %v1023_v15 = vpop.f32.mrf.mxu0 }
 0x104   :  { %v619_v32 = vadd.f32 %v1023_v15, %v554_v8  ;;  %v1027_v34 = vpop.f32.mrf.mxu1 }
 0x105   :  { %v635_v29 = vadd.f32 %v1027_v34, %v570_v22  ;;  %v610_v30 = vpop.f32.mrf.mxu0  ;;  %v573_v21 = vadd.f32 %v1004_v14, %v964_v13 }
 0x106   :  { %v691_v45 = vmul.f32 %v1357_v10, %v619_v32  ;;  %v611_v46 = vadd.f32 %v610_v30, %v546_v35  ;;  %v626_v47 = vpop.f32.mrf.mxu1 }
 0x107   :  { %v695_v16 = vmul.f32 %v1371_v28, %v635_v29  ;;  %v627_v18 = vadd.f32 %v626_v47, %v562_v31  ;;  %v1024_v19 = vpop.f32.mrf.mxu0 }
 0x108   :  { %v747_v40 = vadd.f32 %v718_v44, %v691_v45  ;;  %v689_v42 = vmul.f32 %v1355_v9, %v611_v46  ;;  %v622_v50 = vadd.f32 %v1024_v19, %v557_v49  ;;  %v1028_v51 = vpop.f32.mrf.mxu1 }
 0x109   :  { %v751_v10 = vadd.f32 %v738_v39, %v695_v16  ;;  %v693_v55 = vmul.f32 %v1367_v20, %v627_v18  ;;  %v638_v56 = vadd.f32 %v1028_v51, %v573_v21  ;;  %v613_v57 = vpop.f32.mrf.mxu0 }
 0x10a   :  { %v771_v58 = vadd.f32 %v912_v61, %v747_v40  ;;  %v745_v28 = vadd.f32 %v1375_v36, %v689_v42  ;;  %v692_v60 = vmul.f32 %v1363_v17, %v622_v50  ;;  %v614_v63 = vadd.f32 %v613_v57, %v549_v54  ;;  %v629_v53 = vpop.f32.mrf.mxu1 }
 0x10b   :  { %v775_v0 = vadd.f32 %v920_v62, %v751_v10  ;;  %v749_v44 = vadd.f32 %v728_v4, %v693_v55  ;;  %v696_v9 = vmul.f32 %v1373_v33, %v638_v56  ;;  %v630_v1 = vadd.f32 %v629_v53, %v565_v52 }
 0x10c   :  { %v779_v6 = vmax.f32 %v771_v58, 0.0  ;;  %v769_v7 = vadd.f32 %v908_v2, %v745_v28  ;;  %v748_v20 = vadd.f32 %v1399_v59, %v692_v60  ;;  %v690_v8 = vmul.f32 %v1359_v12, %v614_v63 }
 0x10d   :  { %v783_v13 = vmax.f32 %v775_v0, 0.0  ;;  %v773_v61 = vadd.f32 %v916_v3, %v749_v44  ;;  %v752_v14 = vadd.f32 %v743_v5, %v696_v9  ;;  %v694_v36 = vmul.f32 %v1369_v25, %v630_v1 }
 0x10e   :  { %v900_v17 = vpack.c.bf16 %v779_v6, %v779_v6  ;;  %v777_v15 = vmax.f32 %v769_v7, 0.0  ;;  %v772_v22 = vadd.f32 %v913_v11, %v748_v20  ;;  %v746_v62 = vadd.f32 %v1377_v41, %v690_v8 }
 0x10f   :  { %v904_v4 = vpack.c.bf16 %v783_v13, %v783_v13  ;;  %v781_v33 = vmax.f32 %v773_v61, 0.0  ;;  %v776_v24 = vadd.f32 %v921_v23, %v752_v14  ;;  %v750_v26 = vadd.f32 %v733_v43, %v694_v36 }
 0x110   :  { %820 = vst.msk [vmem:[%s1459_s5 + $0x8] sm:$0xf] %vm817_vm1, %v900_v17  ;;  %v898_v12 = vpack.c.bf16 %v777_v15, %v777_v15  ;;  %v780_v59 = vmax.f32 %v772_v22, 0.0  ;;  %v770_v2 = vadd.f32 %v909_v48, %v746_v62 }
 0x111   :  { %824 = vst.msk [vmem:[%s1459_s5 + $0x18] sm:$0xf] %vm817_vm1, %v904_v4  ;;  %v902_v25 = vpack.c.bf16 %v781_v33, %v781_v33  ;;  %v784_v3 = vmax.f32 %v776_v24, 0.0  ;;  %v774_v41 = vadd.f32 %v917_v38, %v750_v26 }
 0x112   :  { %818 = vst.msk [vmem:[%s1459_s5] sm:$0xf] %vm817_vm1, %v898_v12  ;;  %v901_v11 = vpack.c.bf16 %v780_v59, %v780_v59  ;;  %v778_v23 = vmax.f32 %v770_v2, 0.0 }
 0x113   :  { %822 = vst.msk [vmem:[%s1459_s5 + $0x10] sm:$0xf] %vm817_vm1, %v902_v25  ;;  %v905_v32 = vpack.c.bf16 %v784_v3, %v784_v3  ;;  %v782_v34 = vmax.f32 %v774_v41, 0.0 }
 0x114   :  { %821 = vst.msk [vmem:[%s1459_s5 + $0xc] sm:$0xf] %vm817_vm1, %v901_v11  ;;  %v899_v35 = vpack.c.bf16 %v778_v23, %v778_v23 }
 0x115   :  { %825 = vst.msk [vmem:[%s1459_s5 + $0x1c] sm:$0xf] %vm817_vm1, %v905_v32  ;;  %v903_v37 = vpack.c.bf16 %v782_v34, %v782_v34 }
 0x116   :  { %819 = vst.msk [vmem:[%s1459_s5 + $0x4] sm:$0xf] %vm817_vm1, %v899_v35 }
 0x117   :  { %823 = vst.msk [vmem:[%s1459_s5 + $0x14] sm:$0xf] %vm817_vm1, %v903_v37 }

// kernel: _lambda_.75
= control target key start
LH: loop header
LB: loop body
LE: loop exit
PB: predicated region body
PF: predicated region fallthrough
CT: control target
= control target key end

     0   :  { %s658_s18 = smov 0   ;;  %s660_s19 = smov 0   ;;  %s719_s0 = inlined_call_operand.vmem [shape: bf16[4,64], index: 0, kind: input, shape index: {}]   ;;  %s720_s1 = inlined_call_operand.vmem [shape: bf16[64,2048], index: 1, kind: input, shape index: {}]   ;;  %s721_s2 = inlined_call_operand.vmem [shape: f32[1,2048], index: 2, kind: input, shape index: {}]   ;;  %s722_s3 = inlined_call_operand.vmem [shape: f32[1,2048], index: 3, kind: input, shape index: {}]   ;;  %s723_s4 = inlined_call_operand.<no memory space> [shape: f32[1,1], index: 4, kind: input, shape index: {}]   ;;  %s724_s5 = inlined_call_operand.vmem [shape: f32[4,2048], index: 5, kind: output, shape index: {}]  }
   0x1   :  { %s662_s20 = smov 0  }
   0x2 LB: > { %s541_s4 = sadd.s32 4294967295, %s625_s20   ;;  %s675_s21 = sadd.s32 1, %s625_s20   ;;  %s625_s20 = sphi %s662_s20, %s727_s20   ;;  %s621_s19 = sphi %s660_s19, %s726_s19   ;;  %s617_s18 = sphi %s658_s18, %s725_s18  }
   0x3   : > { %s42_s22 = ssub.s32 %s625_s20, %s675_s21  ;;  %s45_s23 = sadd.s32 1, %s621_s19 }
   0x4   : > { %p43_p0 = scmp.eq.s32.totalorder %s42_s22, 0  ;;  %p52_p1 = scmp.ne.s32.totalorder %s621_s19, %s617_s18 }
   0x5   : > { %p53_p2 = scmp.eq.s32.totalorder %s625_s20, 0  ;;  %p544_p4 = scmp.ge.s32.totalorder %s625_s20, 8 }
   0x6   : > { %s684_s24 = scalar_select %p43_p0, %s621_s19, %s45_s23  }
   0x7   : > { %p54_p3 = por %p53_p2, %p52_p1  ;;  %183 = sbr.rel (%p544_p4) target bundleno = 24 (0x18), region = 24 }
   0xc   : > { %186 = sbr.rel (!%p54_p3) target bundleno = 24 (0x18), region = 28  ;;  %s188_s25 = sand.u32 (%p54_p3), 1, %s621_s19  }
   0xd   : > { %s565_s26 = sshll.u32 (%p54_p3), %s625_s20, 3  ;;  %s545_s27 = sshll.u32 (%p54_p3), %s188_s25, 6 }
   0xe   : > { %s193_s30 = scalar_lea.vmem (%p54_p3), %s720_s1, %s565_s26  ;;  %s190_s6 = scalar_lea.vmem (%p54_p3), [#allocation3], %s545_s27 }
   0xf   : > { %v236_v0 = vld [vmem:[%s193_s30] sm:$0xff] (%p54_p3) }
  0x10   : > { %v238_v1 = vld [vmem:[%s193_s30 + $0x40] sm:$0xff] (%p54_p3)  ;;  %237 = vst [vmem:[%s190_s6] sm:$0xff] (%p54_p3), %v236_v0 }
  0x11   : > { %v240_v2 = vld [vmem:[%s193_s30 + $0x80] sm:$0xff]  ;;  %239 = vst [vmem:[%s190_s6 + $0x8] sm:$0xff] %v238_v1 }
  0x12   : > { %241 = vst [vmem:[%s190_s6 + $0x10] sm:$0xff] %v240_v2  ;;  %v242_v3 = vld [vmem:[%s193_s30 + $0xc0] sm:$0xff] }
  0x13   : > { %v244_v4 = vld [vmem:[%s193_s30 + $0x100] sm:$0xff]  ;;  %243 = vst [vmem:[%s190_s6 + $0x18] sm:$0xff] %v242_v3 }
  0x14   : > { %v246_v5 = vld [vmem:[%s193_s30 + $0x140] sm:$0xff]  ;;  %245 = vst [vmem:[%s190_s6 + $0x20] sm:$0xff] %v244_v4 }
  0x15   : > { %247 = vst [vmem:[%s190_s6 + $0x28] sm:$0xff] %v246_v5  ;;  %v248_v6 = vld [vmem:[%s193_s30 + $0x180] sm:$0xff] }
  0x16   : > { %v250_v7 = vld [vmem:[%s193_s30 + $0x1c0] sm:$0xff]  ;;  %249 = vst [vmem:[%s190_s6 + $0x30] sm:$0xff] %v248_v6 }
  0x17   : > { %251 = vst [vmem:[%s190_s6 + $0x38] sm:$0xff] %v250_v7 }
  0x18 PF: > { %p548_p5 = scmp.ge.s32.totalorder %s625_s20, 1  ;;  %p272_p6 = scmp.lt.s32.totalorder %s625_s20, 9 }
  0x1a   : > { %p273_p7 = pnand %p548_p5, %p272_p6 }
  0x1b   : > { %s279_s7 = sand.u32 (!%p273_p7), 1, %s617_s18   ;;  %s550_s12 = sshll.u32 (!%p273_p7), %s541_s4, 1 }
  0x1c   : > { %276 = sbr.rel (%p273_p7) target bundleno = 254 (0xfe), region = 74  ;;  %s549_s8 = sshll.u32 (!%p273_p7), %s279_s7, 6 }
  0x1d   : > { %s281_s9 = scalar_lea.vmem (!%p273_p7), [#allocation3], %s549_s8  ;;  %p316_p8 = scmp.lt.s32.totalorder (!%p273_p7), %s550_s12, 15 }
  0x21   : > { %v627_v8 = vmov 0   ;;  %v591_v9 = vld [vmem:[%s281_s9 + $0x34] ss:$8 sps:$4 sm:$0xff]   ;;  %v593_v10 = vld [vmem:[%s281_s9 + $0x30] ss:$8 sps:$4 sm:$0xff]   ;;  %vm381_vm0 = vcmask 523264   ;;  %v428_v18 = vlaneseq }
  0x22   : > { %417 = vmatprep.mubr.bf16.mxu0 %v627_v8  ;;  %393 = vmatprep.subr.bf16.mxu0 %v591_v9  ;;  %v594_v11 = vld [vmem:[%s281_s9 + $0x24] ss:$8 sps:$4 sm:$0xff]   ;;  %v596_v12 = vld [vmem:[%s281_s9 + $0x20] ss:$8 sps:$4 sm:$0xff]   ;;  %v597_v13 = vld [vmem:[%s281_s9 + $0x14] ss:$8 sps:$4 sm:$0xff]  }
  0x23   : > { %394 = vmatpush1.bf16.msra.mxu0 %v593_v10  ;;  %v599_v14 = vld [vmem:[%s281_s9 + $0x10] ss:$8 sps:$4 sm:$0xff]   ;;  %v600_v15 = vld [vmem:[%s281_s9 + $0x4] ss:$8 sps:$4 sm:$0xff]   ;;  %v602_v16 = vld [vmem:[%s281_s9] ss:$8 sps:$4 sm:$0xff]  }
  0x24   : > { %395 = vmatprep.subr.bf16.mxu0 %v594_v11  ;;  %v332_v17 = vld [vmem:[%s719_s0] sm:$0x3]  ;;  %s729_s12 = smov (!%p316_p8, %s550_s12), 15  ;;  %v429_v19 = vshrl.u32 %v428_v18, 7 }
  0x25   : > { %s318_s15 = scalar_lea.vmem %s721_s2, %s729_s12  ;;  %s323_s18 = scalar_lea.vmem %s722_s3, %s729_s12 }
  0x26   : > { %v430_v20 = vsub.s32 0, %v429_v19  ;;  %v426_v21 = vld [vmem:[%s318_s15] sm:$0x3]  ;;  %v434_v22 = vsub.s32 1, %v429_v19  ;;  %s553_s20 = sshll.u32 %s729_s12, 2 }
  0x27   : > { %396 = vmatpush1.bf16.msra.mxu0 %v596_v12  ;;  %v440_v23 = vld [vmem:[%s323_s18] sm:$0x3]  ;;  %s329_s23 = scalar_lea.vmem %s724_s5, %s553_s20 }
  0x28   : > { %397 = vmatprep.subr.bf16.mxu0 %v597_v13  ;;  %v431_v24 = vrot.slane %v426_v21, %v430_v20  ;;  %v445_v25 = vrot.slane %v440_v23, %v430_v20  ;;  %v435_v26 = vrot.slane %v426_v21, %v434_v22  ;;  %v449_v29 = vrot.slane %v440_v23, %v434_v22 }
  0x2b   : > { %398 = vmatpush1.bf16.msra.mxu0 %v599_v14 }
  0x2c   : > { %399 = vmatprep.subr.bf16.mxu0 %v600_v15 }
  0x2f   : > { %400 = vmatpush1.bf16.msra.mxu0 %v602_v16 }
  0x32   : > { %562 = vmatmul.mubr.msk.bf16.vlgmr.msra.gmra.mxu0 %vm381_vm0, %v332_v17 }
  0xf2   : > { %v419_v27 = vpop.f32.mrf.mxu0 }
  0xf3   : > { %v438_v28 = vmul.f32 %v431_v24, %v419_v27 }
  0xf4   : > { %v421_v30 = vpop.f32.mrf.mxu0 }
  0xf5   : > { %v452_v31 = vadd.f32 %v445_v25, %v438_v28  ;;  %v439_v32 = vmul.f32 %v435_v26, %v421_v30 }
  0xf6   : > { %v423_v33 = vpop.f32.mrf.mxu0 }
  0xf7   : > { %v453_v34 = vadd.f32 %v449_v29, %v439_v32  ;;  %v454_v36 = vmax.f32 %v452_v31, 0.0 }
  0xf8   : > { %v424_v35 = vpop.f32.mrf.mxu0 }
  0xf9   : > { %v455_v37 = vmax.f32 %v453_v34, 0.0 }
  0xfb   : > { %v458_v38 = vcombine.low %v454_v36, %v455_v37 }
  0xfd   : > { %460 = vst [vmem:[%s329_s23] sm:$0xff] %v458_v38 }
  0xfe PF: > { %p14_p9 = scmp.ge.s32.totalorder %s675_s21, 10   ;;  %s725_s18 = smov %s621_s19 }
  0xff   : > { %s726_s19 = smov %s684_s24  ;;  %s727_s20 = smov %s675_s21 }
 0x100   :  { %16 = sbr.rel (!%p14_p9) target bundleno = 2 (0x2), region = 119 }

// kernel: _lambda_.77
= control target key start
LH: loop header
LB: loop body
LE: loop exit
PB: predicated region body
PF: predicated region fallthrough
CT: control target
= control target key end

     0   :  { %v516_v22 = vmov 1983009808   ;;  %v93_v24 = vlaneseq  ;;  %vm398_vm0 = vcmask 60416   ;;  %s655_s1 = inlined_call_operand.vmem [shape: bf16[512,8], index: 1, kind: input, shape index: {}]   ;;  %s656_s4 = inlined_call_operand.<no memory space> [shape: f32[1,1], index: 4, kind: input, shape index: {}]   ;;  %s657_s0 = inlined_call_operand.vmem [shape: bf16[4,512], index: 0, kind: input, shape index: {}]   ;;  %s658_s2 = inlined_call_operand.vmem [shape: f32[1,8], index: 2, kind: input, shape index: {}]   ;;  %s659_s3 = inlined_call_operand.vmem [shape: f32[1,8], index: 3, kind: input, shape index: {}]   ;;  %s660_s5 = inlined_call_operand.vmem [shape: f32[4,8], index: 5, kind: output, shape index: {}]  }
   0x1   :  { %v483_v0 = vld [vmem:[%s655_s1 + $0x78] sm:$0xff]   ;;  %v487_v4 = vld [vmem:[%s655_s1 + $0x70] sm:$0xff]   ;;  %v491_v8 = vld [vmem:[%s655_s1 + $0x68] sm:$0xff]   ;;  %v91_v23 = vunpack.c.l.s4 %v516_v22 }
   0x2   :  { %v484_v1 = vld [vmem:[%s655_s1 + $0xf8] sm:$0xff]   ;;  %438 = vmatprep.subr.bf16.mxu0 %v483_v0  ;;  %v488_v5 = vld [vmem:[%s655_s1 + $0xf0] sm:$0xff]   ;;  %v492_v9 = vld [vmem:[%s655_s1 + $0xe8] sm:$0xff]   ;;  %v94_v30 = vshrl.u32 %v93_v24, 7 }
   0x3   :  { %v485_v2 = vld [vmem:[%s655_s1 + $0x38] sm:$0xff]   ;;  %460 = vmatprep.subr.bf16.mxu1 %v484_v1  ;;  %v489_v6 = vld [vmem:[%s655_s1 + $0x30] sm:$0xff]   ;;  %v493_v10 = vld [vmem:[%s655_s1 + $0x28] sm:$0xff]   ;;  %v92_v29 = vunpack.c.0.s8 %v91_v23 }
   0x4   :  { %v486_v3 = vld [vmem:[%s655_s1 + $0xb8] sm:$0xff]   ;;  %439 = vmatpush3.bf16.msra.mxu0 %v485_v2  ;;  %v490_v7 = vld [vmem:[%s655_s1 + $0xb0] sm:$0xff]   ;;  %v494_v11 = vld [vmem:[%s655_s1 + $0xa8] sm:$0xff]  }
   0x5   :  { %461 = vmatpush3.bf16.msra.mxu1 %v486_v3  ;;  %440 = vmatprep.subr.bf16.mxu0 %v487_v4  ;;  %v495_v12 = vld [vmem:[%s655_s1 + $0x60] sm:$0xff]   ;;  %v499_v16 = vld [vmem:[%s655_s1 + $0x58] sm:$0xff]   ;;  %v503_v20 = vld [vmem:[%s655_s1 + $0x50] sm:$0xff]   ;;  %v95_v35 = vsub.s32 %v92_v29, %v94_v30 }
   0x6   :  { %462 = vmatprep.subr.bf16.mxu1 %v488_v5  ;;  %v496_v13 = vld [vmem:[%s655_s1 + $0xe0] sm:$0xff]   ;;  %v500_v17 = vld [vmem:[%s655_s1 + $0xd8] sm:$0xff]   ;;  %v504_v21 = vld [vmem:[%s655_s1 + $0xd0] sm:$0xff]  }
   0x7   :  { %v497_v14 = vld [vmem:[%s655_s1 + $0x20] sm:$0xff]   ;;  %v501_v18 = vld [vmem:[%s655_s1 + $0x18] sm:$0xff]   ;;  %v505_v25 = vld [vmem:[%s655_s1 + $0x10] sm:$0xff]  }
   0x8   :  { %441 = vmatpush3.bf16.msra.mxu0 %v489_v6  ;;  %v498_v15 = vld [vmem:[%s655_s1 + $0xa0] sm:$0xff]   ;;  %v502_v19 = vld [vmem:[%s655_s1 + $0x98] sm:$0xff]   ;;  %v506_v26 = vld [vmem:[%s655_s1 + $0x90] sm:$0xff]  }
   0x9   :  { %463 = vmatpush3.bf16.msra.mxu1 %v490_v7  ;;  %442 = vmatprep.subr.bf16.mxu0 %v491_v8  ;;  %v507_v27 = vld [vmem:[%s655_s1 + $0x48] sm:$0xff]   ;;  %v511_v33 = vld [vmem:[%s655_s1 + $0x40] sm:$0xff]  }
   0xa   :  { %464 = vmatprep.subr.bf16.mxu1 %v492_v9  ;;  %v508_v28 = vld [vmem:[%s655_s1 + $0xc8] sm:$0xff]   ;;  %v512_v34 = vld [vmem:[%s655_s1 + $0xc0] sm:$0xff]  }
   0xb   :  { %v509_v31 = vld [vmem:[%s655_s1 + $0x8] sm:$0xff]   ;;  %v513_v36 = vld [vmem:[%s655_s1] sm:$0xff]  }
   0xc   :  { %443 = vmatpush3.bf16.msra.mxu0 %v493_v10  ;;  %v510_v32 = vld [vmem:[%s655_s1 + $0x88] sm:$0xff]   ;;  %v514_v37 = vld [vmem:[%s655_s1 + $0x80] sm:$0xff]  }
   0xd   :  { %465 = vmatpush3.bf16.msra.mxu1 %v494_v11  ;;  %444 = vmatprep.subr.bf16.mxu0 %v495_v12  ;;  %v23_v38 = vld [vmem:[%s657_s0] sm:$0xff] }
   0xe   :  { %466 = vmatprep.subr.bf16.mxu1 %v496_v13  ;;  %v96_v39 = vrot.slane %v23_v38, %v95_v35  ;;  %v89_v40 = vcombine.high %v23_v38, %v23_v38  ;;  %v436_v51 = vld [vmem:[%s658_s2] ss:$0 sm:$0xff] }
   0xf   :  { %v437_v55 = vld [vmem:[%s659_s3] ss:$0 sm:$0xff] }
  0x10   :  { %445 = vmatpush3.bf16.msra.mxu0 %v497_v14  ;;  %v104_v41 = vcombine.high %v96_v39, %v96_v39  ;;  %v103_v42 = vrot.slane %v89_v40, %v95_v35 }
  0x11   :  { %467 = vmatpush3.bf16.msra.mxu1 %v498_v15  ;;  %446 = vmatprep.subr.bf16.mxu0 %v499_v16 }
  0x12   :  { %468 = vmatprep.subr.bf16.mxu1 %v500_v17  ;;  %334 = vmatprep.mubr.bf16.mxu0 %v104_v41  ;;  %v105_v43 = vcombine.high %v103_v42, %v103_v42 }
  0x14   :  { %447 = vmatpush3.bf16.msra.mxu0 %v501_v18  ;;  %374 = vmatprep.mubr.bf16.mxu1 %v105_v43 }
  0x15   :  { %469 = vmatpush3.bf16.msra.mxu1 %v502_v19  ;;  %448 = vmatprep.subr.bf16.mxu0 %v503_v20 }
  0x16   :  { %470 = vmatprep.subr.bf16.mxu1 %v504_v21 }
  0x18   :  { %449 = vmatpush3.bf16.msra.mxu0 %v505_v25 }
  0x19   :  { %471 = vmatpush3.bf16.msra.mxu1 %v506_v26  ;;  %450 = vmatprep.subr.bf16.mxu0 %v507_v27 }
  0x1a   :  { %472 = vmatprep.subr.bf16.mxu1 %v508_v28 }
  0x1c   :  { %451 = vmatpush3.bf16.msra.mxu0 %v509_v31 }
  0x1d   :  { %473 = vmatpush3.bf16.msra.mxu1 %v510_v32  ;;  %452 = vmatprep.subr.bf16.mxu0 %v511_v33 }
  0x1e   :  { %474 = vmatprep.subr.bf16.mxu1 %v512_v34 }
  0x20   :  { %453 = vmatpush3.bf16.msra.mxu0 %v513_v36 }
  0x21   :  { %475 = vmatpush3.bf16.msra.mxu1 %v514_v37 }
  0x23   :  { %335 = vmatmul.mubr.bf16.vlgmr.msra.gmra.mxu0 %v96_v39 }
  0x24   :  { %375 = vmatmul.mubr.bf16.vlgmr.msra.gmra.mxu1 %v103_v42 }
  0xe3   :  { %v454_v44 = vpop.f32.mrf.mxu0 }
  0xe4   :  { %v476_v45 = vpop.f32.mrf.mxu1 }
  0xe5   :  { %v455_v46 = vpop.f32.mrf.mxu0 }
  0xe6   :  { %v456_v47 = vadd.f32 %v455_v46, %v454_v44  ;;  %v477_v48 = vpop.f32.mrf.mxu1 }
  0xe7   :  { %v457_v49 = vpop.f32.mrf.mxu0  ;;  %v478_v50 = vadd.f32 %v477_v48, %v476_v45 }
  0xe8   :  { %v479_v52 = vpop.f32.mrf.mxu1 }
  0xe9   :  { %v458_v53 = vpop.f32.mrf.mxu0  ;;  %v377_v54 = vadd.f32 %v478_v50, %v456_v47 }
  0xea   :  { %v480_v56 = vpop.f32.mrf.mxu1 }
  0xeb   :  { %v389_v57 = vmul.f32 %v436_v51, %v377_v54 }
  0xed   :  { %v397_v58 = vadd.f32 %v437_v55, %v389_v57 }
  0xef   :  { %399 = vst.msk [vmem:[%s660_s5] sm:$0xf] %vm398_vm0, %v397_v58 }

// kernel: _lambda_.76
= control target key start
LH: loop header
LB: loop body
LE: loop exit
PB: predicated region body
PF: predicated region fallthrough
CT: control target
= control target key end

     0   :  { %s5059_s0 = inlined_call_operand.vmem [shape: bf16[4,2048], index: 0, kind: input, shape index: {}]   ;;  %s5060_s1 = inlined_call_operand.vmem [shape: bf16[2048,512], index: 1, kind: input, shape index: {}]   ;;  %s5061_s2 = inlined_call_operand.vmem [shape: f32[1,512], index: 2, kind: input, shape index: {}]   ;;  %s5062_s3 = inlined_call_operand.vmem [shape: f32[1,512], index: 3, kind: input, shape index: {}]   ;;  %s5063_s4 = inlined_call_operand.<no memory space> [shape: f32[1,1], index: 4, kind: input, shape index: {}]   ;;  %s5064_s5 = inlined_call_operand.vmem [shape: f32[4,512], index: 5, kind: output, shape index: {}]  }
   0x1   :  { %v10_v0 = vstv %s5063_s4 }
   0x2   :  { %11 = vst [vmem:[#allocation2] sm:$0x1] %v10_v0 }
   0x3   :  { %s4155_s20 = smov 0   ;;  %s4157_s21 = smov 0  }
   0x4   :  { %s4159_s22 = smov 0  }
   0x5 LB: > { %s3408_s4 = sadd.s32 4294967295, %s4118_s22   ;;  %s4172_s23 = sadd.s32 1, %s4118_s22   ;;  %s4118_s22 = sphi %s4159_s22, %s5067_s22   ;;  %s4114_s21 = sphi %s4157_s21, %s5066_s21   ;;  %s4110_s20 = sphi %s4155_s20, %s5065_s20  }
   0x6   : > { %s42_s24 = ssub.s32 %s4118_s22, %s4172_s23  ;;  %s45_s25 = sadd.s32 1, %s4114_s21 }
   0x7   : > { %p43_p0 = scmp.eq.s32.totalorder %s42_s24, 0  ;;  %p52_p1 = scmp.ne.s32.totalorder %s4114_s21, %s4110_s20 }
   0x8   : > { %p53_p2 = scmp.eq.s32.totalorder %s4118_s22, 0  ;;  %p3411_p4 = scmp.ge.s32.totalorder %s4118_s22, 2 }
   0x9   : > { %s4181_s26 = scalar_select %p43_p0, %s4114_s21, %s45_s25  }
   0xa   : > { %p54_p3 = por %p53_p2, %p52_p1  ;;  %183 = sbr.rel (%p3411_p4) target bundleno = 147 (0x93), region = 24 }
   0xf   : > { %186 = sbr.rel (!%p54_p3) target bundleno = 147 (0x93), region = 28  ;;  %s188_s27 = sand.u32 (%p54_p3), 1, %s4114_s21  }
  0x10   : > { %s3680_s28 = sshll.u32 (%p54_p3), %s4118_s22, 3  ;;  %s3412_s29 = sshll.u32 (%p54_p3), %s188_s27, 11 }
  0x11   : > { %s4189_s7 = scalar_lea.vmem (%p54_p3), %s5060_s1, %s3680_s28  ;;  %s4194_s8 = scalar_lea.vmem (%p54_p3), [#allocation3], %s3412_s29 }
  0x12   : > { %v732_v1 = vld [vmem:[%s4189_s7] sm:$0xff] (%p54_p3)  ;;  %v734_v2 = vld [vmem:[%s4189_s7 + $0x10] sm:$0xff] (%p54_p3) }
  0x13   : > { %v736_v3 = vld [vmem:[%s4189_s7 + $0x20] sm:$0xff] (%p54_p3)  ;;  %733 = vst [vmem:[%s4194_s8] sm:$0xff] (%p54_p3), %v732_v1  ;;  %735 = vst [vmem:[%s4194_s8 + $0x8] sm:$0xff] (%p54_p3), %v734_v2  ;;  %v738_v4 = vld [vmem:[%s4189_s7 + $0x30] sm:$0xff] (%p54_p3) }
  0x14   : > { %737 = vst [vmem:[%s4194_s8 + $0x10] sm:$0xff] %v736_v3  ;;  %v740_v5 = vld [vmem:[%s4189_s7 + $0x40] sm:$0xff]  ;;  %v742_v6 = vld [vmem:[%s4189_s7 + $0x50] sm:$0xff]  ;;  %739 = vst [vmem:[%s4194_s8 + $0x18] sm:$0xff] %v738_v4 }
  0x15   : > { %741 = vst [vmem:[%s4194_s8 + $0x20] sm:$0xff] %v740_v5  ;;  %743 = vst [vmem:[%s4194_s8 + $0x28] sm:$0xff] %v742_v6  ;;  %v744_v7 = vld [vmem:[%s4189_s7 + $0x60] sm:$0xff]  ;;  %v746_v8 = vld [vmem:[%s4189_s7 + $0x70] sm:$0xff] }
  0x16   : > { %v748_v9 = vld [vmem:[%s4189_s7 + $0x80] sm:$0xff]  ;;  %745 = vst [vmem:[%s4194_s8 + $0x30] sm:$0xff] %v744_v7  ;;  %747 = vst [vmem:[%s4194_s8 + $0x38] sm:$0xff] %v746_v8  ;;  %v750_v10 = vld [vmem:[%s4189_s7 + $0x90] sm:$0xff] }
  0x17   : > { %749 = vst [vmem:[%s4194_s8 + $0x40] sm:$0xff] %v748_v9  ;;  %v752_v11 = vld [vmem:[%s4189_s7 + $0xa0] sm:$0xff]  ;;  %v754_v12 = vld [vmem:[%s4189_s7 + $0xb0] sm:$0xff]  ;;  %751 = vst [vmem:[%s4194_s8 + $0x48] sm:$0xff] %v750_v10 }
  0x18   : > { %753 = vst [vmem:[%s4194_s8 + $0x50] sm:$0xff] %v752_v11  ;;  %755 = vst [vmem:[%s4194_s8 + $0x58] sm:$0xff] %v754_v12  ;;  %v756_v13 = vld [vmem:[%s4189_s7 + $0xc0] sm:$0xff]  ;;  %v758_v14 = vld [vmem:[%s4189_s7 + $0xd0] sm:$0xff] }
  0x19   : > { %v760_v15 = vld [vmem:[%s4189_s7 + $0xe0] sm:$0xff]  ;;  %757 = vst [vmem:[%s4194_s8 + $0x60] sm:$0xff] %v756_v13  ;;  %759 = vst [vmem:[%s4194_s8 + $0x68] sm:$0xff] %v758_v14  ;;  %v762_v16 = vld [vmem:[%s4189_s7 + $0xf0] sm:$0xff] }
  0x1a   : > { %761 = vst [vmem:[%s4194_s8 + $0x70] sm:$0xff] %v760_v15  ;;  %v764_v17 = vld [vmem:[%s4189_s7 + $0x100] sm:$0xff]  ;;  %v766_v18 = vld [vmem:[%s4189_s7 + $0x110] sm:$0xff]  ;;  %763 = vst [vmem:[%s4194_s8 + $0x78] sm:$0xff] %v762_v16 }
  0x1b   : > { %765 = vst [vmem:[%s4194_s8 + $0x80] sm:$0xff] %v764_v17  ;;  %767 = vst [vmem:[%s4194_s8 + $0x88] sm:$0xff] %v766_v18  ;;  %v768_v19 = vld [vmem:[%s4189_s7 + $0x120] sm:$0xff]  ;;  %v770_v20 = vld [vmem:[%s4189_s7 + $0x130] sm:$0xff] }
  0x1c   : > { %v772_v21 = vld [vmem:[%s4189_s7 + $0x140] sm:$0xff]  ;;  %769 = vst [vmem:[%s4194_s8 + $0x90] sm:$0xff] %v768_v19  ;;  %771 = vst [vmem:[%s4194_s8 + $0x98] sm:$0xff] %v770_v20  ;;  %v774_v22 = vld [vmem:[%s4189_s7 + $0x150] sm:$0xff] }
  0x1d   : > { %773 = vst [vmem:[%s4194_s8 + $0xa0] sm:$0xff] %v772_v21  ;;  %v776_v23 = vld [vmem:[%s4189_s7 + $0x160] sm:$0xff]  ;;  %v778_v24 = vld [vmem:[%s4189_s7 + $0x170] sm:$0xff]  ;;  %775 = vst [vmem:[%s4194_s8 + $0xa8] sm:$0xff] %v774_v22 }
  0x1e   : > { %777 = vst [vmem:[%s4194_s8 + $0xb0] sm:$0xff] %v776_v23  ;;  %779 = vst [vmem:[%s4194_s8 + $0xb8] sm:$0xff] %v778_v24  ;;  %v780_v25 = vld [vmem:[%s4189_s7 + $0x180] sm:$0xff]  ;;  %v782_v26 = vld [vmem:[%s4189_s7 + $0x190] sm:$0xff] }
  0x1f   : > { %v784_v27 = vld [vmem:[%s4189_s7 + $0x1a0] sm:$0xff]  ;;  %781 = vst [vmem:[%s4194_s8 + $0xc0] sm:$0xff] %v780_v25  ;;  %783 = vst [vmem:[%s4194_s8 + $0xc8] sm:$0xff] %v782_v26  ;;  %v786_v28 = vld [vmem:[%s4189_s7 + $0x1b0] sm:$0xff] }
  0x20   : > { %785 = vst [vmem:[%s4194_s8 + $0xd0] sm:$0xff] %v784_v27  ;;  %v788_v29 = vld [vmem:[%s4189_s7 + $0x1c0] sm:$0xff]  ;;  %v790_v30 = vld [vmem:[%s4189_s7 + $0x1d0] sm:$0xff]  ;;  %787 = vst [vmem:[%s4194_s8 + $0xd8] sm:$0xff] %v786_v28 }
  0x21   : > { %789 = vst [vmem:[%s4194_s8 + $0xe0] sm:$0xff] %v788_v29  ;;  %791 = vst [vmem:[%s4194_s8 + $0xe8] sm:$0xff] %v790_v30  ;;  %v792_v31 = vld [vmem:[%s4189_s7 + $0x1e0] sm:$0xff]  ;;  %v794_v32 = vld [vmem:[%s4189_s7 + $0x1f0] sm:$0xff] }
  0x22   : > { %v796_v33 = vld [vmem:[%s4189_s7 + $0x200] sm:$0xff]  ;;  %793 = vst [vmem:[%s4194_s8 + $0xf0] sm:$0xff] %v792_v31  ;;  %795 = vst [vmem:[%s4194_s8 + $0xf8] sm:$0xff] %v794_v32  ;;  %v798_v34 = vld [vmem:[%s4189_s7 + $0x210] sm:$0xff] }
  0x23   : > { %797 = vst [vmem:[%s4194_s8 + $0x100] sm:$0xff] %v796_v33  ;;  %v800_v35 = vld [vmem:[%s4189_s7 + $0x220] sm:$0xff]  ;;  %v802_v36 = vld [vmem:[%s4189_s7 + $0x230] sm:$0xff]  ;;  %799 = vst [vmem:[%s4194_s8 + $0x108] sm:$0xff] %v798_v34 }
  0x24   : > { %801 = vst [vmem:[%s4194_s8 + $0x110] sm:$0xff] %v800_v35  ;;  %803 = vst [vmem:[%s4194_s8 + $0x118] sm:$0xff] %v802_v36  ;;  %v804_v37 = vld [vmem:[%s4189_s7 + $0x240] sm:$0xff]  ;;  %v806_v38 = vld [vmem:[%s4189_s7 + $0x250] sm:$0xff] }
  0x25   : > { %v808_v39 = vld [vmem:[%s4189_s7 + $0x260] sm:$0xff]  ;;  %805 = vst [vmem:[%s4194_s8 + $0x120] sm:$0xff] %v804_v37  ;;  %807 = vst [vmem:[%s4194_s8 + $0x128] sm:$0xff] %v806_v38  ;;  %v810_v40 = vld [vmem:[%s4189_s7 + $0x270] sm:$0xff] }
  0x26   : > { %809 = vst [vmem:[%s4194_s8 + $0x130] sm:$0xff] %v808_v39  ;;  %v812_v41 = vld [vmem:[%s4189_s7 + $0x280] sm:$0xff]  ;;  %v814_v42 = vld [vmem:[%s4189_s7 + $0x290] sm:$0xff]  ;;  %811 = vst [vmem:[%s4194_s8 + $0x138] sm:$0xff] %v810_v40 }
  0x27   : > { %813 = vst [vmem:[%s4194_s8 + $0x140] sm:$0xff] %v812_v41  ;;  %815 = vst [vmem:[%s4194_s8 + $0x148] sm:$0xff] %v814_v42  ;;  %v816_v43 = vld [vmem:[%s4189_s7 + $0x2a0] sm:$0xff]  ;;  %v818_v44 = vld [vmem:[%s4189_s7 + $0x2b0] sm:$0xff] }
  0x28   : > { %v820_v45 = vld [vmem:[%s4189_s7 + $0x2c0] sm:$0xff]  ;;  %817 = vst [vmem:[%s4194_s8 + $0x150] sm:$0xff] %v816_v43  ;;  %819 = vst [vmem:[%s4194_s8 + $0x158] sm:$0xff] %v818_v44  ;;  %v822_v46 = vld [vmem:[%s4189_s7 + $0x2d0] sm:$0xff] }
  0x29   : > { %821 = vst [vmem:[%s4194_s8 + $0x160] sm:$0xff] %v820_v45  ;;  %v824_v47 = vld [vmem:[%s4189_s7 + $0x2e0] sm:$0xff]  ;;  %v826_v48 = vld [vmem:[%s4189_s7 + $0x2f0] sm:$0xff]  ;;  %823 = vst [vmem:[%s4194_s8 + $0x168] sm:$0xff] %v822_v46 }
  0x2a   : > { %825 = vst [vmem:[%s4194_s8 + $0x170] sm:$0xff] %v824_v47  ;;  %827 = vst [vmem:[%s4194_s8 + $0x178] sm:$0xff] %v826_v48  ;;  %v828_v49 = vld [vmem:[%s4189_s7 + $0x300] sm:$0xff]  ;;  %v830_v50 = vld [vmem:[%s4189_s7 + $0x310] sm:$0xff] }
  0x2b   : > { %v832_v51 = vld [vmem:[%s4189_s7 + $0x320] sm:$0xff]  ;;  %829 = vst [vmem:[%s4194_s8 + $0x180] sm:$0xff] %v828_v49  ;;  %831 = vst [vmem:[%s4194_s8 + $0x188] sm:$0xff] %v830_v50  ;;  %v834_v52 = vld [vmem:[%s4189_s7 + $0x330] sm:$0xff] }
  0x2c   : > { %833 = vst [vmem:[%s4194_s8 + $0x190] sm:$0xff] %v832_v51  ;;  %v836_v53 = vld [vmem:[%s4189_s7 + $0x340] sm:$0xff]  ;;  %v838_v54 = vld [vmem:[%s4189_s7 + $0x350] sm:$0xff]  ;;  %835 = vst [vmem:[%s4194_s8 + $0x198] sm:$0xff] %v834_v52 }
  0x2d   : > { %837 = vst [vmem:[%s4194_s8 + $0x1a0] sm:$0xff] %v836_v53  ;;  %839 = vst [vmem:[%s4194_s8 + $0x1a8] sm:$0xff] %v838_v54  ;;  %v840_v55 = vld [vmem:[%s4189_s7 + $0x360] sm:$0xff]  ;;  %v842_v56 = vld [vmem:[%s4189_s7 + $0x370] sm:$0xff] }
  0x2e   : > { %v844_v57 = vld [vmem:[%s4189_s7 + $0x380] sm:$0xff]  ;;  %841 = vst [vmem:[%s4194_s8 + $0x1b0] sm:$0xff] %v840_v55  ;;  %843 = vst [vmem:[%s4194_s8 + $0x1b8] sm:$0xff] %v842_v56  ;;  %v846_v58 = vld [vmem:[%s4189_s7 + $0x390] sm:$0xff] }
  0x2f   : > { %845 = vst [vmem:[%s4194_s8 + $0x1c0] sm:$0xff] %v844_v57  ;;  %v848_v59 = vld [vmem:[%s4189_s7 + $0x3a0] sm:$0xff]  ;;  %v850_v60 = vld [vmem:[%s4189_s7 + $0x3b0] sm:$0xff]  ;;  %847 = vst [vmem:[%s4194_s8 + $0x1c8] sm:$0xff] %v846_v58 }
  0x30   : > { %849 = vst [vmem:[%s4194_s8 + $0x1d0] sm:$0xff] %v848_v59  ;;  %851 = vst [vmem:[%s4194_s8 + $0x1d8] sm:$0xff] %v850_v60  ;;  %v852_v61 = vld [vmem:[%s4189_s7 + $0x3c0] sm:$0xff]  ;;  %v854_v62 = vld [vmem:[%s4189_s7 + $0x3d0] sm:$0xff] }
  0x31   : > { %v856_v63 = vld [vmem:[%s4189_s7 + $0x3e0] sm:$0xff]  ;;  %853 = vst [vmem:[%s4194_s8 + $0x1e0] sm:$0xff] %v852_v61  ;;  %855 = vst [vmem:[%s4194_s8 + $0x1e8] sm:$0xff] %v854_v62  ;;  %v858_v0 = vld [vmem:[%s4189_s7 + $0x3f0] sm:$0xff] }
  0x32   : > { %857 = vst [vmem:[%s4194_s8 + $0x1f0] sm:$0xff] %v856_v63  ;;  %v860_v1 = vld [vmem:[%s4189_s7 + $0x400] sm:$0xff]  ;;  %v862_v2 = vld [vmem:[%s4189_s7 + $0x410] sm:$0xff]  ;;  %859 = vst [vmem:[%s4194_s8 + $0x1f8] sm:$0xff] %v858_v0 }
  0x33   : > { %861 = vst [vmem:[%s4194_s8 + $0x200] sm:$0xff] %v860_v1  ;;  %863 = vst [vmem:[%s4194_s8 + $0x208] sm:$0xff] %v862_v2  ;;  %v864_v3 = vld [vmem:[%s4189_s7 + $0x420] sm:$0xff]  ;;  %v866_v4 = vld [vmem:[%s4189_s7 + $0x430] sm:$0xff] }
  0x34   : > { %v868_v5 = vld [vmem:[%s4189_s7 + $0x440] sm:$0xff]  ;;  %865 = vst [vmem:[%s4194_s8 + $0x210] sm:$0xff] %v864_v3  ;;  %867 = vst [vmem:[%s4194_s8 + $0x218] sm:$0xff] %v866_v4  ;;  %v870_v6 = vld [vmem:[%s4189_s7 + $0x450] sm:$0xff] }
  0x35   : > { %869 = vst [vmem:[%s4194_s8 + $0x220] sm:$0xff] %v868_v5  ;;  %v872_v7 = vld [vmem:[%s4189_s7 + $0x460] sm:$0xff]  ;;  %v874_v8 = vld [vmem:[%s4189_s7 + $0x470] sm:$0xff]  ;;  %871 = vst [vmem:[%s4194_s8 + $0x228] sm:$0xff] %v870_v6 }
  0x36   : > { %873 = vst [vmem:[%s4194_s8 + $0x230] sm:$0xff] %v872_v7  ;;  %875 = vst [vmem:[%s4194_s8 + $0x238] sm:$0xff] %v874_v8  ;;  %v876_v9 = vld [vmem:[%s4189_s7 + $0x480] sm:$0xff]  ;;  %v878_v10 = vld [vmem:[%s4189_s7 + $0x490] sm:$0xff] }
  0x37   : > { %v880_v11 = vld [vmem:[%s4189_s7 + $0x4a0] sm:$0xff]  ;;  %877 = vst [vmem:[%s4194_s8 + $0x240] sm:$0xff] %v876_v9  ;;  %879 = vst [vmem:[%s4194_s8 + $0x248] sm:$0xff] %v878_v10  ;;  %v882_v12 = vld [vmem:[%s4189_s7 + $0x4b0] sm:$0xff] }
  0x38   : > { %881 = vst [vmem:[%s4194_s8 + $0x250] sm:$0xff] %v880_v11  ;;  %v884_v13 = vld [vmem:[%s4189_s7 + $0x4c0] sm:$0xff]  ;;  %v886_v14 = vld [vmem:[%s4189_s7 + $0x4d0] sm:$0xff]  ;;  %883 = vst [vmem:[%s4194_s8 + $0x258] sm:$0xff] %v882_v12 }
  0x39   : > { %885 = vst [vmem:[%s4194_s8 + $0x260] sm:$0xff] %v884_v13  ;;  %887 = vst [vmem:[%s4194_s8 + $0x268] sm:$0xff] %v886_v14  ;;  %v888_v15 = vld [vmem:[%s4189_s7 + $0x4e0] sm:$0xff]  ;;  %v890_v16 = vld [vmem:[%s4189_s7 + $0x4f0] sm:$0xff] }
  0x3a   : > { %v892_v17 = vld [vmem:[%s4189_s7 + $0x500] sm:$0xff]  ;;  %889 = vst [vmem:[%s4194_s8 + $0x270] sm:$0xff] %v888_v15  ;;  %891 = vst [vmem:[%s4194_s8 + $0x278] sm:$0xff] %v890_v16  ;;  %v894_v18 = vld [vmem:[%s4189_s7 + $0x510] sm:$0xff] }
  0x3b   : > { %893 = vst [vmem:[%s4194_s8 + $0x280] sm:$0xff] %v892_v17  ;;  %v896_v19 = vld [vmem:[%s4189_s7 + $0x520] sm:$0xff]  ;;  %v898_v20 = vld [vmem:[%s4189_s7 + $0x530] sm:$0xff]  ;;  %895 = vst [vmem:[%s4194_s8 + $0x288] sm:$0xff] %v894_v18 }
  0x3c   : > { %897 = vst [vmem:[%s4194_s8 + $0x290] sm:$0xff] %v896_v19  ;;  %899 = vst [vmem:[%s4194_s8 + $0x298] sm:$0xff] %v898_v20  ;;  %v900_v21 = vld [vmem:[%s4189_s7 + $0x540] sm:$0xff]  ;;  %v902_v22 = vld [vmem:[%s4189_s7 + $0x550] sm:$0xff] }
  0x3d   : > { %v904_v23 = vld [vmem:[%s4189_s7 + $0x560] sm:$0xff]  ;;  %901 = vst [vmem:[%s4194_s8 + $0x2a0] sm:$0xff] %v900_v21  ;;  %903 = vst [vmem:[%s4194_s8 + $0x2a8] sm:$0xff] %v902_v22  ;;  %v906_v24 = vld [vmem:[%s4189_s7 + $0x570] sm:$0xff] }
  0x3e   : > { %905 = vst [vmem:[%s4194_s8 + $0x2b0] sm:$0xff] %v904_v23  ;;  %v908_v25 = vld [vmem:[%s4189_s7 + $0x580] sm:$0xff]  ;;  %v910_v26 = vld [vmem:[%s4189_s7 + $0x590] sm:$0xff]  ;;  %907 = vst [vmem:[%s4194_s8 + $0x2b8] sm:$0xff] %v906_v24 }
  0x3f   : > { %909 = vst [vmem:[%s4194_s8 + $0x2c0] sm:$0xff] %v908_v25  ;;  %911 = vst [vmem:[%s4194_s8 + $0x2c8] sm:$0xff] %v910_v26  ;;  %v912_v27 = vld [vmem:[%s4189_s7 + $0x5a0] sm:$0xff]  ;;  %v914_v28 = vld [vmem:[%s4189_s7 + $0x5b0] sm:$0xff] }
  0x40   : > { %v916_v29 = vld [vmem:[%s4189_s7 + $0x5c0] sm:$0xff]  ;;  %913 = vst [vmem:[%s4194_s8 + $0x2d0] sm:$0xff] %v912_v27  ;;  %915 = vst [vmem:[%s4194_s8 + $0x2d8] sm:$0xff] %v914_v28  ;;  %v918_v30 = vld [vmem:[%s4189_s7 + $0x5d0] sm:$0xff] }
  0x41   : > { %917 = vst [vmem:[%s4194_s8 + $0x2e0] sm:$0xff] %v916_v29  ;;  %v920_v31 = vld [vmem:[%s4189_s7 + $0x5e0] sm:$0xff]  ;;  %v922_v32 = vld [vmem:[%s4189_s7 + $0x5f0] sm:$0xff]  ;;  %919 = vst [vmem:[%s4194_s8 + $0x2e8] sm:$0xff] %v918_v30 }
  0x42   : > { %921 = vst [vmem:[%s4194_s8 + $0x2f0] sm:$0xff] %v920_v31  ;;  %923 = vst [vmem:[%s4194_s8 + $0x2f8] sm:$0xff] %v922_v32  ;;  %v924_v33 = vld [vmem:[%s4189_s7 + $0x600] sm:$0xff]  ;;  %v926_v34 = vld [vmem:[%s4189_s7 + $0x610] sm:$0xff] }
  0x43   : > { %v928_v35 = vld [vmem:[%s4189_s7 + $0x620] sm:$0xff]  ;;  %925 = vst [vmem:[%s4194_s8 + $0x300] sm:$0xff] %v924_v33  ;;  %927 = vst [vmem:[%s4194_s8 + $0x308] sm:$0xff] %v926_v34  ;;  %v930_v36 = vld [vmem:[%s4189_s7 + $0x630] sm:$0xff] }
  0x44   : > { %929 = vst [vmem:[%s4194_s8 + $0x310] sm:$0xff] %v928_v35  ;;  %v932_v37 = vld [vmem:[%s4189_s7 + $0x640] sm:$0xff]  ;;  %v934_v38 = vld [vmem:[%s4189_s7 + $0x650] sm:$0xff]  ;;  %931 = vst [vmem:[%s4194_s8 + $0x318] sm:$0xff] %v930_v36 }
  0x45   : > { %933 = vst [vmem:[%s4194_s8 + $0x320] sm:$0xff] %v932_v37  ;;  %935 = vst [vmem:[%s4194_s8 + $0x328] sm:$0xff] %v934_v38  ;;  %v936_v39 = vld [vmem:[%s4189_s7 + $0x660] sm:$0xff]  ;;  %v938_v40 = vld [vmem:[%s4189_s7 + $0x670] sm:$0xff] }
  0x46   : > { %v940_v41 = vld [vmem:[%s4189_s7 + $0x680] sm:$0xff]  ;;  %937 = vst [vmem:[%s4194_s8 + $0x330] sm:$0xff] %v936_v39  ;;  %939 = vst [vmem:[%s4194_s8 + $0x338] sm:$0xff] %v938_v40  ;;  %v942_v42 = vld [vmem:[%s4189_s7 + $0x690] sm:$0xff] }
  0x47   : > { %941 = vst [vmem:[%s4194_s8 + $0x340] sm:$0xff] %v940_v41  ;;  %v944_v43 = vld [vmem:[%s4189_s7 + $0x6a0] sm:$0xff]  ;;  %v946_v44 = vld [vmem:[%s4189_s7 + $0x6b0] sm:$0xff]  ;;  %943 = vst [vmem:[%s4194_s8 + $0x348] sm:$0xff] %v942_v42 }
  0x48   : > { %945 = vst [vmem:[%s4194_s8 + $0x350] sm:$0xff] %v944_v43  ;;  %947 = vst [vmem:[%s4194_s8 + $0x358] sm:$0xff] %v946_v44  ;;  %v948_v45 = vld [vmem:[%s4189_s7 + $0x6c0] sm:$0xff]  ;;  %v950_v46 = vld [vmem:[%s4189_s7 + $0x6d0] sm:$0xff] }
  0x49   : > { %v952_v47 = vld [vmem:[%s4189_s7 + $0x6e0] sm:$0xff]  ;;  %949 = vst [vmem:[%s4194_s8 + $0x360] sm:$0xff] %v948_v45  ;;  %951 = vst [vmem:[%s4194_s8 + $0x368] sm:$0xff] %v950_v46  ;;  %v954_v48 = vld [vmem:[%s4189_s7 + $0x6f0] sm:$0xff] }
  0x4a   : > { %953 = vst [vmem:[%s4194_s8 + $0x370] sm:$0xff] %v952_v47  ;;  %v956_v49 = vld [vmem:[%s4189_s7 + $0x700] sm:$0xff]  ;;  %v958_v50 = vld [vmem:[%s4189_s7 + $0x710] sm:$0xff]  ;;  %955 = vst [vmem:[%s4194_s8 + $0x378] sm:$0xff] %v954_v48 }
  0x4b   : > { %957 = vst [vmem:[%s4194_s8 + $0x380] sm:$0xff] %v956_v49  ;;  %959 = vst [vmem:[%s4194_s8 + $0x388] sm:$0xff] %v958_v50  ;;  %v960_v51 = vld [vmem:[%s4189_s7 + $0x720] sm:$0xff]  ;;  %v962_v52 = vld [vmem:[%s4189_s7 + $0x730] sm:$0xff] }
  0x4c   : > { %v964_v53 = vld [vmem:[%s4189_s7 + $0x740] sm:$0xff]  ;;  %961 = vst [vmem:[%s4194_s8 + $0x390] sm:$0xff] %v960_v51  ;;  %963 = vst [vmem:[%s4194_s8 + $0x398] sm:$0xff] %v962_v52  ;;  %v966_v54 = vld [vmem:[%s4189_s7 + $0x750] sm:$0xff] }
  0x4d   : > { %965 = vst [vmem:[%s4194_s8 + $0x3a0] sm:$0xff] %v964_v53  ;;  %v968_v55 = vld [vmem:[%s4189_s7 + $0x760] sm:$0xff]  ;;  %v970_v56 = vld [vmem:[%s4189_s7 + $0x770] sm:$0xff]  ;;  %967 = vst [vmem:[%s4194_s8 + $0x3a8] sm:$0xff] %v966_v54 }
  0x4e   : > { %969 = vst [vmem:[%s4194_s8 + $0x3b0] sm:$0xff] %v968_v55  ;;  %971 = vst [vmem:[%s4194_s8 + $0x3b8] sm:$0xff] %v970_v56  ;;  %v972_v57 = vld [vmem:[%s4189_s7 + $0x780] sm:$0xff]  ;;  %v974_v58 = vld [vmem:[%s4189_s7 + $0x790] sm:$0xff] }
  0x4f   : > { %v976_v59 = vld [vmem:[%s4189_s7 + $0x7a0] sm:$0xff]  ;;  %973 = vst [vmem:[%s4194_s8 + $0x3c0] sm:$0xff] %v972_v57  ;;  %975 = vst [vmem:[%s4194_s8 + $0x3c8] sm:$0xff] %v974_v58  ;;  %v978_v60 = vld [vmem:[%s4189_s7 + $0x7b0] sm:$0xff] }
  0x50   : > { %977 = vst [vmem:[%s4194_s8 + $0x3d0] sm:$0xff] %v976_v59  ;;  %v980_v61 = vld [vmem:[%s4189_s7 + $0x7c0] sm:$0xff]  ;;  %v982_v62 = vld [vmem:[%s4189_s7 + $0x7d0] sm:$0xff]  ;;  %979 = vst [vmem:[%s4194_s8 + $0x3d8] sm:$0xff] %v978_v60 }
  0x51   : > { %981 = vst [vmem:[%s4194_s8 + $0x3e0] sm:$0xff] %v980_v61  ;;  %983 = vst [vmem:[%s4194_s8 + $0x3e8] sm:$0xff] %v982_v62  ;;  %v984_v63 = vld [vmem:[%s4189_s7 + $0x7e0] sm:$0xff]  ;;  %v986_v0 = vld [vmem:[%s4189_s7 + $0x7f0] sm:$0xff] }
  0x52   : > { %v988_v1 = vld [vmem:[%s4189_s7 + $0x800] sm:$0xff]  ;;  %985 = vst [vmem:[%s4194_s8 + $0x3f0] sm:$0xff] %v984_v63  ;;  %987 = vst [vmem:[%s4194_s8 + $0x3f8] sm:$0xff] %v986_v0  ;;  %v990_v2 = vld [vmem:[%s4189_s7 + $0x810] sm:$0xff] }
  0x53   : > { %989 = vst [vmem:[%s4194_s8 + $0x400] sm:$0xff] %v988_v1  ;;  %v992_v3 = vld [vmem:[%s4189_s7 + $0x820] sm:$0xff]  ;;  %v994_v4 = vld [vmem:[%s4189_s7 + $0x830] sm:$0xff]  ;;  %991 = vst [vmem:[%s4194_s8 + $0x408] sm:$0xff] %v990_v2 }
  0x54   : > { %993 = vst [vmem:[%s4194_s8 + $0x410] sm:$0xff] %v992_v3  ;;  %995 = vst [vmem:[%s4194_s8 + $0x418] sm:$0xff] %v994_v4  ;;  %v996_v5 = vld [vmem:[%s4189_s7 + $0x840] sm:$0xff]  ;;  %v998_v6 = vld [vmem:[%s4189_s7 + $0x850] sm:$0xff] }
  0x55   : > { %v1000_v7 = vld [vmem:[%s4189_s7 + $0x860] sm:$0xff]  ;;  %997 = vst [vmem:[%s4194_s8 + $0x420] sm:$0xff] %v996_v5  ;;  %999 = vst [vmem:[%s4194_s8 + $0x428] sm:$0xff] %v998_v6  ;;  %v1002_v8 = vld [vmem:[%s4189_s7 + $0x870] sm:$0xff] }
  0x56   : > { %1001 = vst [vmem:[%s4194_s8 + $0x430] sm:$0xff] %v1000_v7  ;;  %v1004_v9 = vld [vmem:[%s4189_s7 + $0x880] sm:$0xff]  ;;  %v1006_v10 = vld [vmem:[%s4189_s7 + $0x890] sm:$0xff]  ;;  %1003 = vst [vmem:[%s4194_s8 + $0x438] sm:$0xff] %v1002_v8 }
  0x57   : > { %1005 = vst [vmem:[%s4194_s8 + $0x440] sm:$0xff] %v1004_v9  ;;  %1007 = vst [vmem:[%s4194_s8 + $0x448] sm:$0xff] %v1006_v10  ;;  %v1008_v11 = vld [vmem:[%s4189_s7 + $0x8a0] sm:$0xff]  ;;  %v1010_v12 = vld [vmem:[%s4189_s7 + $0x8b0] sm:$0xff] }
  0x58   : > { %v1012_v13 = vld [vmem:[%s4189_s7 + $0x8c0] sm:$0xff]  ;;  %1009 = vst [vmem:[%s4194_s8 + $0x450] sm:$0xff] %v1008_v11  ;;  %1011 = vst [vmem:[%s4194_s8 + $0x458] sm:$0xff] %v1010_v12  ;;  %v1014_v14 = vld [vmem:[%s4189_s7 + $0x8d0] sm:$0xff] }
  0x59   : > { %1013 = vst [vmem:[%s4194_s8 + $0x460] sm:$0xff] %v1012_v13  ;;  %v1016_v15 = vld [vmem:[%s4189_s7 + $0x8e0] sm:$0xff]  ;;  %v1018_v16 = vld [vmem:[%s4189_s7 + $0x8f0] sm:$0xff]  ;;  %1015 = vst [vmem:[%s4194_s8 + $0x468] sm:$0xff] %v1014_v14 }
  0x5a   : > { %1017 = vst [vmem:[%s4194_s8 + $0x470] sm:$0xff] %v1016_v15  ;;  %1019 = vst [vmem:[%s4194_s8 + $0x478] sm:$0xff] %v1018_v16  ;;  %v1020_v17 = vld [vmem:[%s4189_s7 + $0x900] sm:$0xff]  ;;  %v1022_v18 = vld [vmem:[%s4189_s7 + $0x910] sm:$0xff] }
  0x5b   : > { %v1024_v19 = vld [vmem:[%s4189_s7 + $0x920] sm:$0xff]  ;;  %1021 = vst [vmem:[%s4194_s8 + $0x480] sm:$0xff] %v1020_v17  ;;  %1023 = vst [vmem:[%s4194_s8 + $0x488] sm:$0xff] %v1022_v18  ;;  %v1026_v20 = vld [vmem:[%s4189_s7 + $0x930] sm:$0xff] }
  0x5c   : > { %1025 = vst [vmem:[%s4194_s8 + $0x490] sm:$0xff] %v1024_v19  ;;  %v1028_v21 = vld [vmem:[%s4189_s7 + $0x940] sm:$0xff]  ;;  %v1030_v22 = vld [vmem:[%s4189_s7 + $0x950] sm:$0xff]  ;;  %1027 = vst [vmem:[%s4194_s8 + $0x498] sm:$0xff] %v1026_v20 }
  0x5d   : > { %1029 = vst [vmem:[%s4194_s8 + $0x4a0] sm:$0xff] %v1028_v21  ;;  %1031 = vst [vmem:[%s4194_s8 + $0x4a8] sm:$0xff] %v1030_v22  ;;  %v1032_v23 = vld [vmem:[%s4189_s7 + $0x960] sm:$0xff]  ;;  %v1034_v24 = vld [vmem:[%s4189_s7 + $0x970] sm:$0xff] }
  0x5e   : > { %v1036_v25 = vld [vmem:[%s4189_s7 + $0x980] sm:$0xff]  ;;  %1033 = vst [vmem:[%s4194_s8 + $0x4b0] sm:$0xff] %v1032_v23  ;;  %1035 = vst [vmem:[%s4194_s8 + $0x4b8] sm:$0xff] %v1034_v24  ;;  %v1038_v26 = vld [vmem:[%s4189_s7 + $0x990] sm:$0xff] }
  0x5f   : > { %1037 = vst [vmem:[%s4194_s8 + $0x4c0] sm:$0xff] %v1036_v25  ;;  %v1040_v27 = vld [vmem:[%s4189_s7 + $0x9a0] sm:$0xff]  ;;  %v1042_v28 = vld [vmem:[%s4189_s7 + $0x9b0] sm:$0xff]  ;;  %1039 = vst [vmem:[%s4194_s8 + $0x4c8] sm:$0xff] %v1038_v26 }
  0x60   : > { %1041 = vst [vmem:[%s4194_s8 + $0x4d0] sm:$0xff] %v1040_v27  ;;  %1043 = vst [vmem:[%s4194_s8 + $0x4d8] sm:$0xff] %v1042_v28  ;;  %v1044_v29 = vld [vmem:[%s4189_s7 + $0x9c0] sm:$0xff]  ;;  %v1046_v30 = vld [vmem:[%s4189_s7 + $0x9d0] sm:$0xff] }
  0x61   : > { %v1048_v31 = vld [vmem:[%s4189_s7 + $0x9e0] sm:$0xff]  ;;  %1045 = vst [vmem:[%s4194_s8 + $0x4e0] sm:$0xff] %v1044_v29  ;;  %1047 = vst [vmem:[%s4194_s8 + $0x4e8] sm:$0xff] %v1046_v30  ;;  %v1050_v32 = vld [vmem:[%s4189_s7 + $0x9f0] sm:$0xff] }
  0x62   : > { %1049 = vst [vmem:[%s4194_s8 + $0x4f0] sm:$0xff] %v1048_v31  ;;  %v1052_v33 = vld [vmem:[%s4189_s7 + $0xa00] sm:$0xff]  ;;  %v1054_v34 = vld [vmem:[%s4189_s7 + $0xa10] sm:$0xff]  ;;  %1051 = vst [vmem:[%s4194_s8 + $0x4f8] sm:$0xff] %v1050_v32 }
  0x63   : > { %1053 = vst [vmem:[%s4194_s8 + $0x500] sm:$0xff] %v1052_v33  ;;  %1055 = vst [vmem:[%s4194_s8 + $0x508] sm:$0xff] %v1054_v34  ;;  %v1056_v35 = vld [vmem:[%s4189_s7 + $0xa20] sm:$0xff]  ;;  %v1058_v36 = vld [vmem:[%s4189_s7 + $0xa30] sm:$0xff] }
  0x64   : > { %v1060_v37 = vld [vmem:[%s4189_s7 + $0xa40] sm:$0xff]  ;;  %1057 = vst [vmem:[%s4194_s8 + $0x510] sm:$0xff] %v1056_v35  ;;  %1059 = vst [vmem:[%s4194_s8 + $0x518] sm:$0xff] %v1058_v36  ;;  %v1062_v38 = vld [vmem:[%s4189_s7 + $0xa50] sm:$0xff] }
  0x65   : > { %1061 = vst [vmem:[%s4194_s8 + $0x520] sm:$0xff] %v1060_v37  ;;  %v1064_v39 = vld [vmem:[%s4189_s7 + $0xa60] sm:$0xff]  ;;  %v1066_v40 = vld [vmem:[%s4189_s7 + $0xa70] sm:$0xff]  ;;  %1063 = vst [vmem:[%s4194_s8 + $0x528] sm:$0xff] %v1062_v38 }
  0x66   : > { %1065 = vst [vmem:[%s4194_s8 + $0x530] sm:$0xff] %v1064_v39  ;;  %1067 = vst [vmem:[%s4194_s8 + $0x538] sm:$0xff] %v1066_v40  ;;  %v1068_v41 = vld [vmem:[%s4189_s7 + $0xa80] sm:$0xff]  ;;  %v1070_v42 = vld [vmem:[%s4189_s7 + $0xa90] sm:$0xff] }
  0x67   : > { %v1072_v43 = vld [vmem:[%s4189_s7 + $0xaa0] sm:$0xff]  ;;  %1069 = vst [vmem:[%s4194_s8 + $0x540] sm:$0xff] %v1068_v41  ;;  %1071 = vst [vmem:[%s4194_s8 + $0x548] sm:$0xff] %v1070_v42  ;;  %v1074_v44 = vld [vmem:[%s4189_s7 + $0xab0] sm:$0xff] }
  0x68   : > { %1073 = vst [vmem:[%s4194_s8 + $0x550] sm:$0xff] %v1072_v43  ;;  %v1076_v45 = vld [vmem:[%s4189_s7 + $0xac0] sm:$0xff]  ;;  %v1078_v46 = vld [vmem:[%s4189_s7 + $0xad0] sm:$0xff]  ;;  %1075 = vst [vmem:[%s4194_s8 + $0x558] sm:$0xff] %v1074_v44 }
  0x69   : > { %1077 = vst [vmem:[%s4194_s8 + $0x560] sm:$0xff] %v1076_v45  ;;  %1079 = vst [vmem:[%s4194_s8 + $0x568] sm:$0xff] %v1078_v46  ;;  %v1080_v47 = vld [vmem:[%s4189_s7 + $0xae0] sm:$0xff]  ;;  %v1082_v48 = vld [vmem:[%s4189_s7 + $0xaf0] sm:$0xff] }
  0x6a   : > { %v1084_v49 = vld [vmem:[%s4189_s7 + $0xb00] sm:$0xff]  ;;  %1081 = vst [vmem:[%s4194_s8 + $0x570] sm:$0xff] %v1080_v47  ;;  %1083 = vst [vmem:[%s4194_s8 + $0x578] sm:$0xff] %v1082_v48  ;;  %v1086_v50 = vld [vmem:[%s4189_s7 + $0xb10] sm:$0xff] }
  0x6b   : > { %1085 = vst [vmem:[%s4194_s8 + $0x580] sm:$0xff] %v1084_v49  ;;  %v1088_v51 = vld [vmem:[%s4189_s7 + $0xb20] sm:$0xff]  ;;  %v1090_v52 = vld [vmem:[%s4189_s7 + $0xb30] sm:$0xff]  ;;  %1087 = vst [vmem:[%s4194_s8 + $0x588] sm:$0xff] %v1086_v50 }
  0x6c   : > { %1089 = vst [vmem:[%s4194_s8 + $0x590] sm:$0xff] %v1088_v51  ;;  %1091 = vst [vmem:[%s4194_s8 + $0x598] sm:$0xff] %v1090_v52  ;;  %v1092_v53 = vld [vmem:[%s4189_s7 + $0xb40] sm:$0xff]  ;;  %v1094_v54 = vld [vmem:[%s4189_s7 + $0xb50] sm:$0xff] }
  0x6d   : > { %v1096_v55 = vld [vmem:[%s4189_s7 + $0xb60] sm:$0xff]  ;;  %1093 = vst [vmem:[%s4194_s8 + $0x5a0] sm:$0xff] %v1092_v53  ;;  %1095 = vst [vmem:[%s4194_s8 + $0x5a8] sm:$0xff] %v1094_v54  ;;  %v1098_v56 = vld [vmem:[%s4189_s7 + $0xb70] sm:$0xff] }
  0x6e   : > { %1097 = vst [vmem:[%s4194_s8 + $0x5b0] sm:$0xff] %v1096_v55  ;;  %v1100_v57 = vld [vmem:[%s4189_s7 + $0xb80] sm:$0xff]  ;;  %v1102_v58 = vld [vmem:[%s4189_s7 + $0xb90] sm:$0xff]  ;;  %1099 = vst [vmem:[%s4194_s8 + $0x5b8] sm:$0xff] %v1098_v56 }
  0x6f   : > { %1101 = vst [vmem:[%s4194_s8 + $0x5c0] sm:$0xff] %v1100_v57  ;;  %1103 = vst [vmem:[%s4194_s8 + $0x5c8] sm:$0xff] %v1102_v58  ;;  %v1104_v59 = vld [vmem:[%s4189_s7 + $0xba0] sm:$0xff]  ;;  %v1106_v60 = vld [vmem:[%s4189_s7 + $0xbb0] sm:$0xff] }
  0x70   : > { %v1108_v61 = vld [vmem:[%s4189_s7 + $0xbc0] sm:$0xff]  ;;  %1105 = vst [vmem:[%s4194_s8 + $0x5d0] sm:$0xff] %v1104_v59  ;;  %1107 = vst [vmem:[%s4194_s8 + $0x5d8] sm:$0xff] %v1106_v60  ;;  %v1110_v62 = vld [vmem:[%s4189_s7 + $0xbd0] sm:$0xff] }
  0x71   : > { %1109 = vst [vmem:[%s4194_s8 + $0x5e0] sm:$0xff] %v1108_v61  ;;  %v1112_v63 = vld [vmem:[%s4189_s7 + $0xbe0] sm:$0xff]  ;;  %v1114_v0 = vld [vmem:[%s4189_s7 + $0xbf0] sm:$0xff]  ;;  %1111 = vst [vmem:[%s4194_s8 + $0x5e8] sm:$0xff] %v1110_v62 }
  0x72   : > { %1113 = vst [vmem:[%s4194_s8 + $0x5f0] sm:$0xff] %v1112_v63  ;;  %1115 = vst [vmem:[%s4194_s8 + $0x5f8] sm:$0xff] %v1114_v0  ;;  %v1116_v1 = vld [vmem:[%s4189_s7 + $0xc00] sm:$0xff]  ;;  %v1118_v2 = vld [vmem:[%s4189_s7 + $0xc10] sm:$0xff] }
  0x73   : > { %v1120_v3 = vld [vmem:[%s4189_s7 + $0xc20] sm:$0xff]  ;;  %1117 = vst [vmem:[%s4194_s8 + $0x600] sm:$0xff] %v1116_v1  ;;  %1119 = vst [vmem:[%s4194_s8 + $0x608] sm:$0xff] %v1118_v2  ;;  %v1122_v4 = vld [vmem:[%s4189_s7 + $0xc30] sm:$0xff] }
  0x74   : > { %1121 = vst [vmem:[%s4194_s8 + $0x610] sm:$0xff] %v1120_v3  ;;  %v1124_v5 = vld [vmem:[%s4189_s7 + $0xc40] sm:$0xff]  ;;  %v1126_v6 = vld [vmem:[%s4189_s7 + $0xc50] sm:$0xff]  ;;  %1123 = vst [vmem:[%s4194_s8 + $0x618] sm:$0xff] %v1122_v4 }
  0x75   : > { %1125 = vst [vmem:[%s4194_s8 + $0x620] sm:$0xff] %v1124_v5  ;;  %1127 = vst [vmem:[%s4194_s8 + $0x628] sm:$0xff] %v1126_v6  ;;  %v1128_v7 = vld [vmem:[%s4189_s7 + $0xc60] sm:$0xff]  ;;  %v1130_v8 = vld [vmem:[%s4189_s7 + $0xc70] sm:$0xff] }
  0x76   : > { %v1132_v9 = vld [vmem:[%s4189_s7 + $0xc80] sm:$0xff]  ;;  %1129 = vst [vmem:[%s4194_s8 + $0x630] sm:$0xff] %v1128_v7  ;;  %1131 = vst [vmem:[%s4194_s8 + $0x638] sm:$0xff] %v1130_v8  ;;  %v1134_v10 = vld [vmem:[%s4189_s7 + $0xc90] sm:$0xff] }
  0x77   : > { %1133 = vst [vmem:[%s4194_s8 + $0x640] sm:$0xff] %v1132_v9  ;;  %v1136_v11 = vld [vmem:[%s4189_s7 + $0xca0] sm:$0xff]  ;;  %v1138_v12 = vld [vmem:[%s4189_s7 + $0xcb0] sm:$0xff]  ;;  %1135 = vst [vmem:[%s4194_s8 + $0x648] sm:$0xff] %v1134_v10 }
  0x78   : > { %1137 = vst [vmem:[%s4194_s8 + $0x650] sm:$0xff] %v1136_v11  ;;  %1139 = vst [vmem:[%s4194_s8 + $0x658] sm:$0xff] %v1138_v12  ;;  %v1140_v13 = vld [vmem:[%s4189_s7 + $0xcc0] sm:$0xff]  ;;  %v1142_v14 = vld [vmem:[%s4189_s7 + $0xcd0] sm:$0xff] }
  0x79   : > { %v1144_v15 = vld [vmem:[%s4189_s7 + $0xce0] sm:$0xff]  ;;  %1141 = vst [vmem:[%s4194_s8 + $0x660] sm:$0xff] %v1140_v13  ;;  %1143 = vst [vmem:[%s4194_s8 + $0x668] sm:$0xff] %v1142_v14  ;;  %v1146_v16 = vld [vmem:[%s4189_s7 + $0xcf0] sm:$0xff] }
  0x7a   : > { %1145 = vst [vmem:[%s4194_s8 + $0x670] sm:$0xff] %v1144_v15  ;;  %v1148_v17 = vld [vmem:[%s4189_s7 + $0xd00] sm:$0xff]  ;;  %v1150_v18 = vld [vmem:[%s4189_s7 + $0xd10] sm:$0xff]  ;;  %1147 = vst [vmem:[%s4194_s8 + $0x678] sm:$0xff] %v1146_v16 }
  0x7b   : > { %1149 = vst [vmem:[%s4194_s8 + $0x680] sm:$0xff] %v1148_v17  ;;  %1151 = vst [vmem:[%s4194_s8 + $0x688] sm:$0xff] %v1150_v18  ;;  %v1152_v19 = vld [vmem:[%s4189_s7 + $0xd20] sm:$0xff]  ;;  %v1154_v20 = vld [vmem:[%s4189_s7 + $0xd30] sm:$0xff] }
  0x7c   : > { %v1156_v21 = vld [vmem:[%s4189_s7 + $0xd40] sm:$0xff]  ;;  %1153 = vst [vmem:[%s4194_s8 + $0x690] sm:$0xff] %v1152_v19  ;;  %1155 = vst [vmem:[%s4194_s8 + $0x698] sm:$0xff] %v1154_v20  ;;  %v1158_v22 = vld [vmem:[%s4189_s7 + $0xd50] sm:$0xff] }
  0x7d   : > { %1157 = vst [vmem:[%s4194_s8 + $0x6a0] sm:$0xff] %v1156_v21  ;;  %v1160_v23 = vld [vmem:[%s4189_s7 + $0xd60] sm:$0xff]  ;;  %v1162_v24 = vld [vmem:[%s4189_s7 + $0xd70] sm:$0xff]  ;;  %1159 = vst [vmem:[%s4194_s8 + $0x6a8] sm:$0xff] %v1158_v22 }
  0x7e   : > { %1161 = vst [vmem:[%s4194_s8 + $0x6b0] sm:$0xff] %v1160_v23  ;;  %1163 = vst [vmem:[%s4194_s8 + $0x6b8] sm:$0xff] %v1162_v24  ;;  %v1164_v25 = vld [vmem:[%s4189_s7 + $0xd80] sm:$0xff]  ;;  %v1166_v26 = vld [vmem:[%s4189_s7 + $0xd90] sm:$0xff] }
  0x7f   : > { %v1168_v27 = vld [vmem:[%s4189_s7 + $0xda0] sm:$0xff]  ;;  %1165 = vst [vmem:[%s4194_s8 + $0x6c0] sm:$0xff] %v1164_v25  ;;  %1167 = vst [vmem:[%s4194_s8 + $0x6c8] sm:$0xff] %v1166_v26  ;;  %v1170_v28 = vld [vmem:[%s4189_s7 + $0xdb0] sm:$0xff] }
  0x80   : > { %1169 = vst [vmem:[%s4194_s8 + $0x6d0] sm:$0xff] %v1168_v27  ;;  %v1172_v29 = vld [vmem:[%s4189_s7 + $0xdc0] sm:$0xff]  ;;  %v1174_v30 = vld [vmem:[%s4189_s7 + $0xdd0] sm:$0xff]  ;;  %1171 = vst [vmem:[%s4194_s8 + $0x6d8] sm:$0xff] %v1170_v28 }
  0x81   : > { %1173 = vst [vmem:[%s4194_s8 + $0x6e0] sm:$0xff] %v1172_v29  ;;  %1175 = vst [vmem:[%s4194_s8 + $0x6e8] sm:$0xff] %v1174_v30  ;;  %v1176_v31 = vld [vmem:[%s4189_s7 + $0xde0] sm:$0xff]  ;;  %v1178_v32 = vld [vmem:[%s4189_s7 + $0xdf0] sm:$0xff] }
  0x82   : > { %v1180_v33 = vld [vmem:[%s4189_s7 + $0xe00] sm:$0xff]  ;;  %1177 = vst [vmem:[%s4194_s8 + $0x6f0] sm:$0xff] %v1176_v31  ;;  %1179 = vst [vmem:[%s4194_s8 + $0x6f8] sm:$0xff] %v1178_v32  ;;  %v1182_v34 = vld [vmem:[%s4189_s7 + $0xe10] sm:$0xff] }
  0x83   : > { %1181 = vst [vmem:[%s4194_s8 + $0x700] sm:$0xff] %v1180_v33  ;;  %v1184_v35 = vld [vmem:[%s4189_s7 + $0xe20] sm:$0xff]  ;;  %v1186_v36 = vld [vmem:[%s4189_s7 + $0xe30] sm:$0xff]  ;;  %1183 = vst [vmem:[%s4194_s8 + $0x708] sm:$0xff] %v1182_v34 }
  0x84   : > { %1185 = vst [vmem:[%s4194_s8 + $0x710] sm:$0xff] %v1184_v35  ;;  %1187 = vst [vmem:[%s4194_s8 + $0x718] sm:$0xff] %v1186_v36  ;;  %v1188_v37 = vld [vmem:[%s4189_s7 + $0xe40] sm:$0xff]  ;;  %v1190_v38 = vld [vmem:[%s4189_s7 + $0xe50] sm:$0xff] }
  0x85   : > { %v1192_v39 = vld [vmem:[%s4189_s7 + $0xe60] sm:$0xff]  ;;  %1189 = vst [vmem:[%s4194_s8 + $0x720] sm:$0xff] %v1188_v37  ;;  %1191 = vst [vmem:[%s4194_s8 + $0x728] sm:$0xff] %v1190_v38  ;;  %v1194_v40 = vld [vmem:[%s4189_s7 + $0xe70] sm:$0xff] }
  0x86   : > { %1193 = vst [vmem:[%s4194_s8 + $0x730] sm:$0xff] %v1192_v39  ;;  %v1196_v41 = vld [vmem:[%s4189_s7 + $0xe80] sm:$0xff]  ;;  %v1198_v42 = vld [vmem:[%s4189_s7 + $0xe90] sm:$0xff]  ;;  %1195 = vst [vmem:[%s4194_s8 + $0x738] sm:$0xff] %v1194_v40 }
  0x87   : > { %1197 = vst [vmem:[%s4194_s8 + $0x740] sm:$0xff] %v1196_v41  ;;  %1199 = vst [vmem:[%s4194_s8 + $0x748] sm:$0xff] %v1198_v42  ;;  %v1200_v43 = vld [vmem:[%s4189_s7 + $0xea0] sm:$0xff]  ;;  %v1202_v44 = vld [vmem:[%s4189_s7 + $0xeb0] sm:$0xff] }
  0x88   : > { %v1204_v45 = vld [vmem:[%s4189_s7 + $0xec0] sm:$0xff]  ;;  %1201 = vst [vmem:[%s4194_s8 + $0x750] sm:$0xff] %v1200_v43  ;;  %1203 = vst [vmem:[%s4194_s8 + $0x758] sm:$0xff] %v1202_v44  ;;  %v1206_v46 = vld [vmem:[%s4189_s7 + $0xed0] sm:$0xff] }
  0x89   : > { %1205 = vst [vmem:[%s4194_s8 + $0x760] sm:$0xff] %v1204_v45  ;;  %v1208_v47 = vld [vmem:[%s4189_s7 + $0xee0] sm:$0xff]  ;;  %v1210_v48 = vld [vmem:[%s4189_s7 + $0xef0] sm:$0xff]  ;;  %1207 = vst [vmem:[%s4194_s8 + $0x768] sm:$0xff] %v1206_v46 }
  0x8a   : > { %1209 = vst [vmem:[%s4194_s8 + $0x770] sm:$0xff] %v1208_v47  ;;  %1211 = vst [vmem:[%s4194_s8 + $0x778] sm:$0xff] %v1210_v48  ;;  %v1212_v49 = vld [vmem:[%s4189_s7 + $0xf00] sm:$0xff]  ;;  %v1214_v50 = vld [vmem:[%s4189_s7 + $0xf10] sm:$0xff] }
  0x8b   : > { %v1216_v51 = vld [vmem:[%s4189_s7 + $0xf20] sm:$0xff]  ;;  %1213 = vst [vmem:[%s4194_s8 + $0x780] sm:$0xff] %v1212_v49  ;;  %1215 = vst [vmem:[%s4194_s8 + $0x788] sm:$0xff] %v1214_v50  ;;  %v1218_v52 = vld [vmem:[%s4189_s7 + $0xf30] sm:$0xff] }
  0x8c   : > { %1217 = vst [vmem:[%s4194_s8 + $0x790] sm:$0xff] %v1216_v51  ;;  %v1220_v53 = vld [vmem:[%s4189_s7 + $0xf40] sm:$0xff]  ;;  %v1222_v54 = vld [vmem:[%s4189_s7 + $0xf50] sm:$0xff]  ;;  %1219 = vst [vmem:[%s4194_s8 + $0x798] sm:$0xff] %v1218_v52 }
  0x8d   : > { %1221 = vst [vmem:[%s4194_s8 + $0x7a0] sm:$0xff] %v1220_v53  ;;  %1223 = vst [vmem:[%s4194_s8 + $0x7a8] sm:$0xff] %v1222_v54  ;;  %v1224_v55 = vld [vmem:[%s4189_s7 + $0xf60] sm:$0xff]  ;;  %v1226_v56 = vld [vmem:[%s4189_s7 + $0xf70] sm:$0xff] }
  0x8e   : > { %v1228_v57 = vld [vmem:[%s4189_s7 + $0xf80] sm:$0xff]  ;;  %1225 = vst [vmem:[%s4194_s8 + $0x7b0] sm:$0xff] %v1224_v55  ;;  %1227 = vst [vmem:[%s4194_s8 + $0x7b8] sm:$0xff] %v1226_v56  ;;  %v1230_v58 = vld [vmem:[%s4189_s7 + $0xf90] sm:$0xff] }
  0x8f   : > { %1229 = vst [vmem:[%s4194_s8 + $0x7c0] sm:$0xff] %v1228_v57  ;;  %v1232_v59 = vld [vmem:[%s4189_s7 + $0xfa0] sm:$0xff]  ;;  %v1234_v60 = vld [vmem:[%s4189_s7 + $0xfb0] sm:$0xff]  ;;  %1231 = vst [vmem:[%s4194_s8 + $0x7c8] sm:$0xff] %v1230_v58 }
  0x90   : > { %1233 = vst [vmem:[%s4194_s8 + $0x7d0] sm:$0xff] %v1232_v59  ;;  %1235 = vst [vmem:[%s4194_s8 + $0x7d8] sm:$0xff] %v1234_v60  ;;  %v1236_v61 = vld [vmem:[%s4189_s7 + $0xfc0] sm:$0xff]  ;;  %v1238_v62 = vld [vmem:[%s4189_s7 + $0xfd0] sm:$0xff] }
  0x91   : > { %v1240_v63 = vld [vmem:[%s4189_s7 + $0xfe0] sm:$0xff]  ;;  %1237 = vst [vmem:[%s4194_s8 + $0x7e0] sm:$0xff] %v1236_v61  ;;  %1239 = vst [vmem:[%s4194_s8 + $0x7e8] sm:$0xff] %v1238_v62  ;;  %v1242_v0 = vld [vmem:[%s4189_s7 + $0xff0] sm:$0xff] }
  0x92   : > { %1241 = vst [vmem:[%s4194_s8 + $0x7f0] sm:$0xff] %v1240_v63  ;;  %1243 = vst [vmem:[%s4194_s8 + $0x7f8] sm:$0xff] %v1242_v0 }
  0x93 PF: > { %p3415_p5 = scmp.ge.s32.totalorder %s4118_s22, 1  ;;  %p1264_p6 = scmp.lt.s32.totalorder %s4118_s22, 3 }
  0x95   : > { %p1265_p7 = pnand %p3415_p5, %p1264_p6 }
  0x96   : > { %s1271_s9 = sand.u32 (!%p1265_p7), 1, %s4110_s20   ;;  %s3417_s20 = sshll.u32 (!%p1265_p7), %s3408_s4, 1 }
  0x97   : > { %1268 = sbr.rel (%p1265_p7) target bundleno = 624 (0x270), region = 74  ;;  %s3416_s12 = sshll.u32 (!%p1265_p7), %s1271_s9, 11 }
  0x98   : > { %s4713_s13 = scalar_lea.vmem (!%p1265_p7), [#allocation3], %s3416_s12  ;;  %p1308_p8 = scmp.lt.s32.totalorder (!%p1265_p7), %s3417_s20, 3 }
  0x9c   : > { %v1323_v1 = vld [vmem:[%s5059_s0] sm:$0xff]  ;;  %v1591_v2 = vlaneseq  ;;  %v4120_v3 = vmov 1983009808   ;;  %v3712_v10 = vld [vmem:[%s4713_s13 + $0x70] ss:$8 sps:$4 sm:$0xff]   ;;  %s5069_s20 = smov (!%p1308_p8, %s3417_s20), 3 }
  0x9d   : > { %v1589_v4 = vunpack.c.l.s4 %v4120_v3  ;;  %v3708_v6 = vld [vmem:[%s4713_s13 + $0x74] ss:$8 sps:$4 sm:$0xff]   ;;  %v1587_v8 = vcombine.high %v1323_v1, %v1323_v1  ;;  %v3713_v11 = vld [vmem:[%s4713_s13 + $0x170] ss:$8 sps:$4 sm:$0xff]   ;;  %v3714_v13 = vld [vmem:[%s4713_s13 + $0x64] ss:$8 sps:$4 sm:$0xff]   ;;  %s1310_s27 = scalar_lea.vmem %s5061_s2, %s5069_s20  ;;  %s1315_s30 = scalar_lea.vmem %s5062_s3, %s5069_s20 }
  0x9e   : > { %v4711_v5 = vshrl.u32 %v1591_v2, 7  ;;  %v3710_v9 = vld [vmem:[%s4713_s13 + $0x174] ss:$8 sps:$4 sm:$0xff]   ;;  %2951 = vmatprep.subr.bf16.mxu0 %v3708_v6  ;;  %v3716_v14 = vld [vmem:[%s4713_s13 + $0x164] ss:$8 sps:$4 sm:$0xff]   ;;  %s3420_s22 = sshll.u32 %s5069_s20, 2 }
  0x9f   : > { %v1590_v7 = vunpack.c.0.s8 %v1589_v4  ;;  %2992 = vmatprep.subr.bf16.mxu1 %v3710_v9  ;;  %2952 = vmatpush1.bf16.msra.mxu0 %v3712_v10  ;;  %v3718_v15 = vld [vmem:[%s4713_s13 + $0x60] ss:$8 sps:$4 sm:$0xff]   ;;  %v3720_v19 = vld [vmem:[%s4713_s13 + $0x54] ss:$8 sps:$4 sm:$0xff]   ;;  %v3724_v23 = vld [vmem:[%s4713_s13 + $0x50] ss:$8 sps:$4 sm:$0xff]   ;;  %s1321_s7 = scalar_lea.vmem %s5064_s5, %s3420_s22 }
  0xa0   : > { %2993 = vmatpush1.bf16.msra.mxu1 %v3713_v11  ;;  %2953 = vmatprep.subr.bf16.mxu0 %v3714_v13  ;;  %v3719_v18 = vld [vmem:[%s4713_s13 + $0x160] ss:$8 sps:$4 sm:$0xff]   ;;  %v3722_v22 = vld [vmem:[%s4713_s13 + $0x154] ss:$8 sps:$4 sm:$0xff]   ;;  %v3725_v24 = vld [vmem:[%s4713_s13 + $0x150] ss:$8 sps:$4 sm:$0xff]  }
  0xa1   : > { %v4720_v12 = vsub.s32 %v1590_v7, %v4711_v5  ;;  %2994 = vmatprep.subr.bf16.mxu1 %v3716_v14  ;;  %v3726_v25 = vld [vmem:[%s4713_s13 + $0x44] ss:$8 sps:$4 sm:$0xff]   ;;  %v3730_v27 = vld [vmem:[%s4713_s13 + $0x40] ss:$8 sps:$4 sm:$0xff]   ;;  %v3732_v29 = vld [vmem:[%s4713_s13 + $0x34] ss:$8 sps:$4 sm:$0xff]  }
  0xa2   : > { %v3728_v26 = vld [vmem:[%s4713_s13 + $0x144] ss:$8 sps:$4 sm:$0xff]   ;;  %v3731_v28 = vld [vmem:[%s4713_s13 + $0x140] ss:$8 sps:$4 sm:$0xff]   ;;  %v3734_v30 = vld [vmem:[%s4713_s13 + $0x134] ss:$8 sps:$4 sm:$0xff]  }
  0xa3   : > { %v4726_v16 = vrot.slane %v1323_v1, %v4720_v12  ;;  %v4729_v17 = vrot.slane %v1587_v8, %v4720_v12  ;;  %2954 = vmatpush1.bf16.msra.mxu0 %v3718_v15  ;;  %v3736_v31 = vld [vmem:[%s4713_s13 + $0x30] ss:$8 sps:$4 sm:$0xff]   ;;  %v3738_v33 = vld [vmem:[%s4713_s13 + $0x24] ss:$8 sps:$4 sm:$0xff]   ;;  %v3742_v35 = vld [vmem:[%s4713_s13 + $0x20] ss:$8 sps:$4 sm:$0xff]  }
  0xa4   : > { %2995 = vmatpush1.bf16.msra.mxu1 %v3719_v18  ;;  %2955 = vmatprep.subr.bf16.mxu0 %v3720_v19  ;;  %v3737_v32 = vld [vmem:[%s4713_s13 + $0x130] ss:$8 sps:$4 sm:$0xff]   ;;  %v3740_v34 = vld [vmem:[%s4713_s13 + $0x124] ss:$8 sps:$4 sm:$0xff]   ;;  %v3743_v36 = vld [vmem:[%s4713_s13 + $0x120] ss:$8 sps:$4 sm:$0xff]  }
  0xa5   : > { %v1602_v20 = vcombine.high %v4726_v16, %v4726_v16  ;;  %v1603_v21 = vcombine.high %v4729_v17, %v4729_v17  ;;  %2996 = vmatprep.subr.bf16.mxu1 %v3722_v22  ;;  %v3744_v37 = vld [vmem:[%s4713_s13 + $0x14] ss:$8 sps:$4 sm:$0xff]   ;;  %v3748_v39 = vld [vmem:[%s4713_s13 + $0x10] ss:$8 sps:$4 sm:$0xff]   ;;  %v3750_v41 = vld [vmem:[%s4713_s13 + $0x4] ss:$8 sps:$4 sm:$0xff]  }
  0xa6   : > { %v3746_v38 = vld [vmem:[%s4713_s13 + $0x114] ss:$8 sps:$4 sm:$0xff]   ;;  %v3749_v40 = vld [vmem:[%s4713_s13 + $0x110] ss:$8 sps:$4 sm:$0xff]   ;;  %v3752_v42 = vld [vmem:[%s4713_s13 + $0x104] ss:$8 sps:$4 sm:$0xff]  }
  0xa7   : > { %2983 = vmatprep.mubr.bf16.mxu0 %v1602_v20  ;;  %3024 = vmatprep.mubr.bf16.mxu1 %v1603_v21  ;;  %v3754_v43 = vld [vmem:[%s4713_s13] ss:$8 sps:$4 sm:$0xff]   ;;  %v3756_v45 = vld [vmem:[%s4713_s13 + $0xf4] ss:$8 sps:$4 sm:$0xff]   ;;  %v3760_v47 = vld [vmem:[%s4713_s13 + $0xf0] ss:$8 sps:$4 sm:$0xff]  }
  0xa8   : > { %2956 = vmatpush1.bf16.msra.mxu0 %v3724_v23  ;;  %2997 = vmatpush1.bf16.msra.mxu1 %v3725_v24  ;;  %v3755_v44 = vld [vmem:[%s4713_s13 + $0x100] ss:$8 sps:$4 sm:$0xff]   ;;  %v3758_v46 = vld [vmem:[%s4713_s13 + $0x1f4] ss:$8 sps:$4 sm:$0xff]   ;;  %v3761_v48 = vld [vmem:[%s4713_s13 + $0x1f0] ss:$8 sps:$4 sm:$0xff]  }
  0xa9   : > { %2957 = vmatprep.subr.bf16.mxu0 %v3726_v25  ;;  %2998 = vmatprep.subr.bf16.mxu1 %v3728_v26  ;;  %v3762_v49 = vld [vmem:[%s4713_s13 + $0xe4] ss:$8 sps:$4 sm:$0xff]   ;;  %v3766_v51 = vld [vmem:[%s4713_s13 + $0xe0] ss:$8 sps:$4 sm:$0xff]   ;;  %v3768_v53 = vld [vmem:[%s4713_s13 + $0xd4] ss:$8 sps:$4 sm:$0xff]  }
  0xaa   : > { %v3764_v50 = vld [vmem:[%s4713_s13 + $0x1e4] ss:$8 sps:$4 sm:$0xff]   ;;  %v3767_v52 = vld [vmem:[%s4713_s13 + $0x1e0] ss:$8 sps:$4 sm:$0xff]   ;;  %v3770_v54 = vld [vmem:[%s4713_s13 + $0x1d4] ss:$8 sps:$4 sm:$0xff]  }
  0xab   : > { %v3772_v55 = vld [vmem:[%s4713_s13 + $0xd0] ss:$8 sps:$4 sm:$0xff]   ;;  %v3774_v57 = vld [vmem:[%s4713_s13 + $0xc4] ss:$8 sps:$4 sm:$0xff]   ;;  %v3778_v59 = vld [vmem:[%s4713_s13 + $0xc0] ss:$8 sps:$4 sm:$0xff]  }
  0xac   : > { %2958 = vmatpush1.bf16.msra.mxu0 %v3730_v27  ;;  %2999 = vmatpush1.bf16.msra.mxu1 %v3731_v28  ;;  %v3773_v56 = vld [vmem:[%s4713_s13 + $0x1d0] ss:$8 sps:$4 sm:$0xff]   ;;  %v3776_v58 = vld [vmem:[%s4713_s13 + $0x1c4] ss:$8 sps:$4 sm:$0xff]   ;;  %v3779_v60 = vld [vmem:[%s4713_s13 + $0x1c0] ss:$8 sps:$4 sm:$0xff]  }
  0xad   : > { %2959 = vmatprep.subr.bf16.mxu0 %v3732_v29  ;;  %3000 = vmatprep.subr.bf16.mxu1 %v3734_v30  ;;  %v3780_v61 = vld [vmem:[%s4713_s13 + $0xb4] ss:$8 sps:$4 sm:$0xff]   ;;  %v3784_v63 = vld [vmem:[%s4713_s13 + $0xb0] ss:$8 sps:$4 sm:$0xff]   ;;  %v3786_v1 = vld [vmem:[%s4713_s13 + $0xa4] ss:$8 sps:$4 sm:$0xff]  }
  0xae   : > { %v3782_v62 = vld [vmem:[%s4713_s13 + $0x1b4] ss:$8 sps:$4 sm:$0xff]   ;;  %v3785_v0 = vld [vmem:[%s4713_s13 + $0x1b0] ss:$8 sps:$4 sm:$0xff]   ;;  %v3788_v2 = vld [vmem:[%s4713_s13 + $0x1a4] ss:$8 sps:$4 sm:$0xff]  }
  0xaf   : > { %v3790_v3 = vld [vmem:[%s4713_s13 + $0xa0] ss:$8 sps:$4 sm:$0xff]   ;;  %v3792_v6 = vld [vmem:[%s4713_s13 + $0x94] ss:$8 sps:$4 sm:$0xff]   ;;  %v3796_v9 = vld [vmem:[%s4713_s13 + $0x90] ss:$8 sps:$4 sm:$0xff]  }
  0xb0   : > { %2960 = vmatpush1.bf16.msra.mxu0 %v3736_v31  ;;  %3001 = vmatpush1.bf16.msra.mxu1 %v3737_v32  ;;  %v3791_v4 = vld [vmem:[%s4713_s13 + $0x1a0] ss:$8 sps:$4 sm:$0xff]   ;;  %v3794_v7 = vld [vmem:[%s4713_s13 + $0x194] ss:$8 sps:$4 sm:$0xff]   ;;  %v3797_v10 = vld [vmem:[%s4713_s13 + $0x190] ss:$8 sps:$4 sm:$0xff]  }
  0xb1   : > { %2961 = vmatprep.subr.bf16.mxu0 %v3738_v33  ;;  %3002 = vmatprep.subr.bf16.mxu1 %v3740_v34  ;;  %v1324_v8 = vld [vmem:[%s5059_s0 + $0x8] sm:$0xff]  ;;  %v3807_v19 = vld [vmem:[%s4713_s13 + $0x274] ss:$8 sps:$4 sm:$0xff]   ;;  %v3805_v23 = vld [vmem:[%s4713_s13 + $0x270] ss:$8 sps:$4 sm:$0xff]  }
  0xb2   : > { %v3798_v11 = vld [vmem:[%s4713_s13 + $0x84] ss:$8 sps:$4 sm:$0xff]   ;;  %v1604_v14 = vcombine.high %v1324_v8, %v1324_v8  ;;  %v3802_v15 = vld [vmem:[%s4713_s13 + $0x80] ss:$8 sps:$4 sm:$0xff]   ;;  %v3810_v20 = vld [vmem:[%s4713_s13 + $0x374] ss:$8 sps:$4 sm:$0xff]   ;;  %v4798_v21 = vrot.slane %v1324_v8, %v4720_v12 }
  0xb3   : > { %v3800_v13 = vld [vmem:[%s4713_s13 + $0x184] ss:$8 sps:$4 sm:$0xff]   ;;  %v3803_v18 = vld [vmem:[%s4713_s13 + $0x180] ss:$8 sps:$4 sm:$0xff]   ;;  %v3808_v24 = vld [vmem:[%s4713_s13 + $0x370] ss:$8 sps:$4 sm:$0xff]  }
  0xb4   : > { %2962 = vmatpush1.bf16.msra.mxu0 %v3742_v35  ;;  %3003 = vmatpush1.bf16.msra.mxu1 %v3743_v36  ;;  %v4801_v22 = vrot.slane %v1604_v14, %v4720_v12  ;;  %v3813_v25 = vld [vmem:[%s4713_s13 + $0x264] ss:$8 sps:$4 sm:$0xff]   ;;  %v1619_v27 = vcombine.high %v4798_v21, %v4798_v21  ;;  %v3811_v29 = vld [vmem:[%s4713_s13 + $0x260] ss:$8 sps:$4 sm:$0xff]   ;;  %v3819_v31 = vld [vmem:[%s4713_s13 + $0x254] ss:$8 sps:$4 sm:$0xff]  }
  0xb5   : > { %2963 = vmatprep.subr.bf16.mxu0 %v3744_v37  ;;  %3004 = vmatprep.subr.bf16.mxu1 %v3746_v38  ;;  %v3816_v26 = vld [vmem:[%s4713_s13 + $0x364] ss:$8 sps:$4 sm:$0xff]   ;;  %v3814_v30 = vld [vmem:[%s4713_s13 + $0x360] ss:$8 sps:$4 sm:$0xff]   ;;  %v3822_v32 = vld [vmem:[%s4713_s13 + $0x354] ss:$8 sps:$4 sm:$0xff]  }
  0xb6   : > { %v1620_v28 = vcombine.high %v4801_v22, %v4801_v22  ;;  %v3817_v33 = vld [vmem:[%s4713_s13 + $0x250] ss:$8 sps:$4 sm:$0xff]   ;;  %v3828_v34 = vld [vmem:[%s4713_s13 + $0x344] ss:$8 sps:$4 sm:$0xff]   ;;  %v3823_v35 = vld [vmem:[%s4713_s13 + $0x240] ss:$8 sps:$4 sm:$0xff]  }
  0xb7   : > { %v3826_v36 = vld [vmem:[%s4713_s13 + $0x340] ss:$8 sps:$4 sm:$0xff]   ;;  %v3831_v37 = vld [vmem:[%s4713_s13 + $0x234] ss:$8 sps:$4 sm:$0xff]   ;;  %v3877_v8 = vld [vmem:[%s4713_s13 + $0x2b0] ss:$8 sps:$4 sm:$0xff]  }
  0xb8   : > { %2964 = vmatpush1.bf16.msra.mxu0 %v3748_v39  ;;  %3005 = vmatpush1.bf16.msra.mxu1 %v3749_v40  ;;  %v3834_v38 = vld [vmem:[%s4713_s13 + $0x334] ss:$8 sps:$4 sm:$0xff]   ;;  %v3829_v39 = vld [vmem:[%s4713_s13 + $0x230] ss:$8 sps:$4 sm:$0xff]   ;;  %v3886_v14 = vld [vmem:[%s4713_s13 + $0x3a0] ss:$8 sps:$4 sm:$0xff]  }
  0xb9   : > { %2965 = vmatprep.subr.bf16.mxu0 %v3750_v41  ;;  %3006 = vmatprep.subr.bf16.mxu1 %v3752_v42  ;;  %v3832_v40 = vld [vmem:[%s4713_s13 + $0x330] ss:$8 sps:$4 sm:$0xff]   ;;  %v3837_v41 = vld [vmem:[%s4713_s13 + $0x224] ss:$8 sps:$4 sm:$0xff]  }
  0xba   : > { %v3840_v42 = vld [vmem:[%s4713_s13 + $0x324] ss:$8 sps:$4 sm:$0xff]  }
  0xbc   : > { %2966 = vmatpush1.bf16.msra.mxu0 %v3754_v43  ;;  %3007 = vmatpush1.bf16.msra.mxu1 %v3755_v44  ;;  %v3835_v43 = vld [vmem:[%s4713_s13 + $0x220] ss:$8 sps:$4 sm:$0xff]  }
  0xbd   : > { %2967 = vmatprep.subr.bf16.mxu0 %v3756_v45  ;;  %3008 = vmatprep.subr.bf16.mxu1 %v3758_v46  ;;  %v3838_v44 = vld [vmem:[%s4713_s13 + $0x320] ss:$8 sps:$4 sm:$0xff]   ;;  %v3843_v45 = vld [vmem:[%s4713_s13 + $0x214] ss:$8 sps:$4 sm:$0xff]  }
  0xbe   : > { %v3846_v46 = vld [vmem:[%s4713_s13 + $0x314] ss:$8 sps:$4 sm:$0xff]  }
  0xc0   : > { %2968 = vmatpush2.bf16.msra.mxu0 %v3760_v47  ;;  %3009 = vmatpush2.bf16.msra.mxu1 %v3761_v48  ;;  %v3841_v47 = vld [vmem:[%s4713_s13 + $0x210] ss:$8 sps:$4 sm:$0xff]  }
  0xc1   : > { %2969 = vmatprep.subr.bf16.mxu0 %v3762_v49  ;;  %3010 = vmatprep.subr.bf16.mxu1 %v3764_v50  ;;  %v3844_v48 = vld [vmem:[%s4713_s13 + $0x310] ss:$8 sps:$4 sm:$0xff]   ;;  %v3849_v49 = vld [vmem:[%s4713_s13 + $0x204] ss:$8 sps:$4 sm:$0xff]  }
  0xc2   : > { %v3852_v50 = vld [vmem:[%s4713_s13 + $0x304] ss:$8 sps:$4 sm:$0xff]  }
  0xc4   : > { %2970 = vmatpush2.bf16.msra.mxu0 %v3766_v51  ;;  %3011 = vmatpush2.bf16.msra.mxu1 %v3767_v52  ;;  %v3847_v51 = vld [vmem:[%s4713_s13 + $0x200] ss:$8 sps:$4 sm:$0xff]  }
  0xc5   : > { %2971 = vmatprep.subr.bf16.mxu0 %v3768_v53  ;;  %3012 = vmatprep.subr.bf16.mxu1 %v3770_v54  ;;  %v3850_v52 = vld [vmem:[%s4713_s13 + $0x300] ss:$8 sps:$4 sm:$0xff]   ;;  %v3855_v53 = vld [vmem:[%s4713_s13 + $0x2f4] ss:$8 sps:$4 sm:$0xff]  }
  0xc6   : > { %v3858_v54 = vld [vmem:[%s4713_s13 + $0x3f4] ss:$8 sps:$4 sm:$0xff]  }
  0xc8   : > { %2972 = vmatpush2.bf16.msra.mxu0 %v3772_v55  ;;  %3013 = vmatpush2.bf16.msra.mxu1 %v3773_v56  ;;  %v3853_v55 = vld [vmem:[%s4713_s13 + $0x2f0] ss:$8 sps:$4 sm:$0xff]  }
  0xc9   : > { %2973 = vmatprep.subr.bf16.mxu0 %v3774_v57  ;;  %3014 = vmatprep.subr.bf16.mxu1 %v3776_v58  ;;  %v3856_v56 = vld [vmem:[%s4713_s13 + $0x3f0] ss:$8 sps:$4 sm:$0xff]   ;;  %v3861_v57 = vld [vmem:[%s4713_s13 + $0x2e4] ss:$8 sps:$4 sm:$0xff]  }
  0xca   : > { %v3864_v58 = vld [vmem:[%s4713_s13 + $0x3e4] ss:$8 sps:$4 sm:$0xff]  }
  0xcc   : > { %2974 = vmatpush2.bf16.msra.mxu0 %v3778_v59  ;;  %3015 = vmatpush2.bf16.msra.mxu1 %v3779_v60  ;;  %v3859_v59 = vld [vmem:[%s4713_s13 + $0x2e0] ss:$8 sps:$4 sm:$0xff]  }
  0xcd   : > { %2975 = vmatprep.subr.bf16.mxu0 %v3780_v61  ;;  %3016 = vmatprep.subr.bf16.mxu1 %v3782_v62  ;;  %v3862_v60 = vld [vmem:[%s4713_s13 + $0x3e0] ss:$8 sps:$4 sm:$0xff]   ;;  %v3867_v61 = vld [vmem:[%s4713_s13 + $0x2d4] ss:$8 sps:$4 sm:$0xff]  }
  0xce   : > { %v3870_v62 = vld [vmem:[%s4713_s13 + $0x3d4] ss:$8 sps:$4 sm:$0xff]  }
  0xd0   : > { %2976 = vmatpush2.bf16.msra.mxu0 %v3784_v63  ;;  %3017 = vmatpush2.bf16.msra.mxu1 %v3785_v0  ;;  %v3865_v63 = vld [vmem:[%s4713_s13 + $0x2d0] ss:$8 sps:$4 sm:$0xff]  }
  0xd1   : > { %2977 = vmatprep.subr.bf16.mxu0 %v3786_v1  ;;  %3018 = vmatprep.subr.bf16.mxu1 %v3788_v2  ;;  %v3868_v0 = vld [vmem:[%s4713_s13 + $0x3d0] ss:$8 sps:$4 sm:$0xff]   ;;  %v3873_v1 = vld [vmem:[%s4713_s13 + $0x2c4] ss:$8 sps:$4 sm:$0xff]  }
  0xd2   : > { %v3876_v2 = vld [vmem:[%s4713_s13 + $0x3c4] ss:$8 sps:$4 sm:$0xff]  }
  0xd4   : > { %2978 = vmatpush2.bf16.msra.mxu0 %v3790_v3  ;;  %3019 = vmatpush2.bf16.msra.mxu1 %v3791_v4  ;;  %v3871_v3 = vld [vmem:[%s4713_s13 + $0x2c0] ss:$8 sps:$4 sm:$0xff]  }
  0xd5   : > { %2979 = vmatprep.subr.bf16.mxu0 %v3792_v6  ;;  %3020 = vmatprep.subr.bf16.mxu1 %v3794_v7  ;;  %v3874_v4 = vld [vmem:[%s4713_s13 + $0x3c0] ss:$8 sps:$4 sm:$0xff]   ;;  %v3879_v6 = vld [vmem:[%s4713_s13 + $0x2b4] ss:$8 sps:$4 sm:$0xff]  }
  0xd6   : > { %v3882_v7 = vld [vmem:[%s4713_s13 + $0x3b4] ss:$8 sps:$4 sm:$0xff]  }
  0xd8   : > { %2980 = vmatpush2.bf16.msra.mxu0 %v3796_v9  ;;  %3021 = vmatpush2.bf16.msra.mxu1 %v3797_v10  ;;  %v3880_v9 = vld [vmem:[%s4713_s13 + $0x3b0] ss:$8 sps:$4 sm:$0xff]   ;;  %v3885_v10 = vld [vmem:[%s4713_s13 + $0x2a4] ss:$8 sps:$4 sm:$0xff]  }
  0xd9   : > { %2981 = vmatprep.subr.bf16.mxu0 %v3798_v11  ;;  %3022 = vmatprep.subr.bf16.mxu1 %v3800_v13  ;;  %v3888_v11 = vld [vmem:[%s4713_s13 + $0x3a4] ss:$8 sps:$4 sm:$0xff]   ;;  %v3883_v13 = vld [vmem:[%s4713_s13 + $0x2a0] ss:$8 sps:$4 sm:$0xff]  }
  0xdc   : > { %2982 = vmatpush2.bf16.msra.mxu0 %v3802_v15  ;;  %3023 = vmatpush2.bf16.msra.mxu1 %v3803_v18  ;;  %v3891_v15 = vld [vmem:[%s4713_s13 + $0x294] ss:$8 sps:$4 sm:$0xff]  }
  0xdd   : > { %3033 = vmatprep.subr.bf16.mxu0 %v3807_v19  ;;  %3074 = vmatprep.subr.bf16.mxu1 %v3810_v20  ;;  %v3894_v18 = vld [vmem:[%s4713_s13 + $0x394] ss:$8 sps:$4 sm:$0xff]   ;;  %v3889_v19 = vld [vmem:[%s4713_s13 + $0x290] ss:$8 sps:$4 sm:$0xff]  }
  0xde   : > { %v3892_v20 = vld [vmem:[%s4713_s13 + $0x390] ss:$8 sps:$4 sm:$0xff]  }
  0xdf   : > { %2984 = vmatmul.mubr.bf16.vlgmr.msra.gmra.mxu0 %v4726_v16  ;;  %3025 = vmatmul.mubr.bf16.vlgmr.msra.gmra.mxu1 %v4729_v17  ;;  %v3820_v16 = vld [vmem:[%s4713_s13 + $0x350] ss:$8 sps:$4 sm:$0xff]   ;;  %v3825_v17 = vld [vmem:[%s4713_s13 + $0x244] ss:$8 sps:$4 sm:$0xff]  }
  0xe0   : > { %3034 = vmatpush1.bf16.msra.mxu0 %v3805_v23  ;;  %3075 = vmatpush1.bf16.msra.mxu1 %v3808_v24  ;;  %v3897_v23 = vld [vmem:[%s4713_s13 + $0x284] ss:$8 sps:$4 sm:$0xff]  }
  0xe1   : > { %3035 = vmatprep.subr.bf16.mxu0 %v3813_v25  ;;  %3076 = vmatprep.subr.bf16.mxu1 %v3816_v26  ;;  %v3900_v24 = vld [vmem:[%s4713_s13 + $0x384] ss:$8 sps:$4 sm:$0xff]   ;;  %v3895_v25 = vld [vmem:[%s4713_s13 + $0x280] ss:$8 sps:$4 sm:$0xff]  }
  0xe2   : > { %3065 = vmatprep.mubr.bf16.mxu0 %v1619_v27  ;;  %3106 = vmatprep.mubr.bf16.mxu1 %v1620_v28  ;;  %v3898_v26 = vld [vmem:[%s4713_s13 + $0x380] ss:$8 sps:$4 sm:$0xff]   ;;  %v3904_v27 = vld [vmem:[%s4713_s13 + $0x474] ss:$8 sps:$4 sm:$0xff]  }
  0xe3   : > { %v3907_v28 = vld [vmem:[%s4713_s13 + $0x574] ss:$8 sps:$4 sm:$0xff]  }
  0xe4   : > { %3036 = vmatpush1.bf16.msra.mxu0 %v3811_v29  ;;  %3077 = vmatpush1.bf16.msra.mxu1 %v3814_v30  ;;  %v3902_v29 = vld [vmem:[%s4713_s13 + $0x470] ss:$8 sps:$4 sm:$0xff]  }
  0xe5   : > { %3037 = vmatprep.subr.bf16.mxu0 %v3819_v31  ;;  %3078 = vmatprep.subr.bf16.mxu1 %v3822_v32  ;;  %v3905_v30 = vld [vmem:[%s4713_s13 + $0x570] ss:$8 sps:$4 sm:$0xff]   ;;  %v3910_v32 = vld [vmem:[%s4713_s13 + $0x464] ss:$8 sps:$4 sm:$0xff]  }
  0xe6   : > { %v1325_v31 = vld [vmem:[%s5059_s0 + $0x10] sm:$0xff] }
  0xe8   : > { %3038 = vmatpush1.bf16.msra.mxu0 %v3817_v33  ;;  %3079 = vmatpush1.bf16.msra.mxu1 %v3820_v16  ;;  %v3913_v33 = vld [vmem:[%s4713_s13 + $0x564] ss:$8 sps:$4 sm:$0xff]   ;;  %v4881_v16 = vrot.slane %v1325_v31, %v4720_v12 }
  0xe9   : > { %3039 = vmatprep.subr.bf16.mxu0 %v3825_v17  ;;  %3080 = vmatprep.subr.bf16.mxu1 %v3828_v34  ;;  %v1621_v17 = vcombine.high %v1325_v31, %v1325_v31  ;;  %v3908_v34 = vld [vmem:[%s4713_s13 + $0x460] ss:$8 sps:$4 sm:$0xff]   ;;  %v3989_v31 = vld [vmem:[%s4713_s13 + $0x590] ss:$8 sps:$4 sm:$0xff]  }
  0xec   : > { %3040 = vmatpush1.bf16.msra.mxu0 %v3823_v35  ;;  %3081 = vmatpush1.bf16.msra.mxu1 %v3826_v36  ;;  %v1636_v35 = vcombine.high %v4881_v16, %v4881_v16  ;;  %v4889_v36 = vrot.slane %v1621_v17, %v4720_v12 }
  0xed   : > { %3041 = vmatprep.subr.bf16.mxu0 %v3831_v37  ;;  %3082 = vmatprep.subr.bf16.mxu1 %v3834_v38  ;;  %v3911_v37 = vld [vmem:[%s4713_s13 + $0x560] ss:$8 sps:$4 sm:$0xff]   ;;  %v3916_v38 = vld [vmem:[%s4713_s13 + $0x454] ss:$8 sps:$4 sm:$0xff]  }
  0xf0   : > { %3042 = vmatpush1.bf16.msra.mxu0 %v3829_v39  ;;  %3083 = vmatpush1.bf16.msra.mxu1 %v3832_v40  ;;  %v3914_v39 = vld [vmem:[%s4713_s13 + $0x450] ss:$8 sps:$4 sm:$0xff]  }
  0xf1   : > { %3043 = vmatprep.subr.bf16.mxu0 %v3837_v41  ;;  %3084 = vmatprep.subr.bf16.mxu1 %v3840_v42  ;;  %v3917_v40 = vld [vmem:[%s4713_s13 + $0x550] ss:$8 sps:$4 sm:$0xff]   ;;  %v3922_v41 = vld [vmem:[%s4713_s13 + $0x444] ss:$8 sps:$4 sm:$0xff]  }
  0xf2   : > { %v3925_v42 = vld [vmem:[%s4713_s13 + $0x544] ss:$8 sps:$4 sm:$0xff]  }
  0xf4   : > { %3044 = vmatpush1.bf16.msra.mxu0 %v3835_v43  ;;  %3085 = vmatpush1.bf16.msra.mxu1 %v3838_v44  ;;  %v3920_v43 = vld [vmem:[%s4713_s13 + $0x440] ss:$8 sps:$4 sm:$0xff]  }
  0xf5   : > { %3045 = vmatprep.subr.bf16.mxu0 %v3843_v45  ;;  %3086 = vmatprep.subr.bf16.mxu1 %v3846_v46  ;;  %v3923_v44 = vld [vmem:[%s4713_s13 + $0x540] ss:$8 sps:$4 sm:$0xff]   ;;  %v3928_v45 = vld [vmem:[%s4713_s13 + $0x434] ss:$8 sps:$4 sm:$0xff]  }
  0xf6   : > { %v3931_v46 = vld [vmem:[%s4713_s13 + $0x534] ss:$8 sps:$4 sm:$0xff]  }
  0xf8   : > { %3046 = vmatpush1.bf16.msra.mxu0 %v3841_v47  ;;  %3087 = vmatpush1.bf16.msra.mxu1 %v3844_v48  ;;  %v3926_v47 = vld [vmem:[%s4713_s13 + $0x430] ss:$8 sps:$4 sm:$0xff]  }
  0xf9   : > { %3047 = vmatprep.subr.bf16.mxu0 %v3849_v49  ;;  %3088 = vmatprep.subr.bf16.mxu1 %v3852_v50  ;;  %v3929_v48 = vld [vmem:[%s4713_s13 + $0x530] ss:$8 sps:$4 sm:$0xff]   ;;  %v3934_v49 = vld [vmem:[%s4713_s13 + $0x424] ss:$8 sps:$4 sm:$0xff]  }
  0xfa   : > { %v3937_v50 = vld [vmem:[%s4713_s13 + $0x524] ss:$8 sps:$4 sm:$0xff]  }
  0xfc   : > { %3048 = vmatpush1.bf16.msra.mxu0 %v3847_v51  ;;  %3089 = vmatpush1.bf16.msra.mxu1 %v3850_v52  ;;  %v3932_v51 = vld [vmem:[%s4713_s13 + $0x420] ss:$8 sps:$4 sm:$0xff]  }
  0xfd   : > { %3049 = vmatprep.subr.bf16.mxu0 %v3855_v53  ;;  %3090 = vmatprep.subr.bf16.mxu1 %v3858_v54  ;;  %v3935_v52 = vld [vmem:[%s4713_s13 + $0x520] ss:$8 sps:$4 sm:$0xff]   ;;  %v3940_v53 = vld [vmem:[%s4713_s13 + $0x414] ss:$8 sps:$4 sm:$0xff]  }
  0xfe   : > { %v3943_v54 = vld [vmem:[%s4713_s13 + $0x514] ss:$8 sps:$4 sm:$0xff]  }
 0x100   : > { %3050 = vmatpush2.bf16.msra.mxu0 %v3853_v55  ;;  %3091 = vmatpush2.bf16.msra.mxu1 %v3856_v56  ;;  %v3938_v55 = vld [vmem:[%s4713_s13 + $0x410] ss:$8 sps:$4 sm:$0xff]  }
 0x101   : > { %3051 = vmatprep.subr.bf16.mxu0 %v3861_v57  ;;  %3092 = vmatprep.subr.bf16.mxu1 %v3864_v58  ;;  %v3941_v56 = vld [vmem:[%s4713_s13 + $0x510] ss:$8 sps:$4 sm:$0xff]   ;;  %v3946_v57 = vld [vmem:[%s4713_s13 + $0x404] ss:$8 sps:$4 sm:$0xff]  }
 0x102   : > { %v3949_v58 = vld [vmem:[%s4713_s13 + $0x504] ss:$8 sps:$4 sm:$0xff]  }
 0x104   : > { %3052 = vmatpush2.bf16.msra.mxu0 %v3859_v59  ;;  %3093 = vmatpush2.bf16.msra.mxu1 %v3862_v60  ;;  %v3944_v59 = vld [vmem:[%s4713_s13 + $0x400] ss:$8 sps:$4 sm:$0xff]  }
 0x105   : > { %3053 = vmatprep.subr.bf16.mxu0 %v3867_v61  ;;  %3094 = vmatprep.subr.bf16.mxu1 %v3870_v62  ;;  %v3947_v60 = vld [vmem:[%s4713_s13 + $0x500] ss:$8 sps:$4 sm:$0xff]   ;;  %v3952_v61 = vld [vmem:[%s4713_s13 + $0x4f4] ss:$8 sps:$4 sm:$0xff]  }
 0x106   : > { %v3955_v62 = vld [vmem:[%s4713_s13 + $0x5f4] ss:$8 sps:$4 sm:$0xff]  }
 0x108   : > { %3054 = vmatpush2.bf16.msra.mxu0 %v3865_v63  ;;  %3095 = vmatpush2.bf16.msra.mxu1 %v3868_v0  ;;  %v3950_v63 = vld [vmem:[%s4713_s13 + $0x4f0] ss:$8 sps:$4 sm:$0xff]  }
 0x109   : > { %3055 = vmatprep.subr.bf16.mxu0 %v3873_v1  ;;  %3096 = vmatprep.subr.bf16.mxu1 %v3876_v2  ;;  %v3953_v0 = vld [vmem:[%s4713_s13 + $0x5f0] ss:$8 sps:$4 sm:$0xff]   ;;  %v3958_v1 = vld [vmem:[%s4713_s13 + $0x4e4] ss:$8 sps:$4 sm:$0xff]  }
 0x10a   : > { %v3961_v2 = vld [vmem:[%s4713_s13 + $0x5e4] ss:$8 sps:$4 sm:$0xff]  }
 0x10c   : > { %3056 = vmatpush2.bf16.msra.mxu0 %v3871_v3  ;;  %3097 = vmatpush2.bf16.msra.mxu1 %v3874_v4  ;;  %v3956_v3 = vld [vmem:[%s4713_s13 + $0x4e0] ss:$8 sps:$4 sm:$0xff]  }
 0x10d   : > { %3057 = vmatprep.subr.bf16.mxu0 %v3879_v6  ;;  %3098 = vmatprep.subr.bf16.mxu1 %v3882_v7  ;;  %v3959_v4 = vld [vmem:[%s4713_s13 + $0x5e0] ss:$8 sps:$4 sm:$0xff]   ;;  %v3964_v6 = vld [vmem:[%s4713_s13 + $0x4d4] ss:$8 sps:$4 sm:$0xff]  }
 0x10e   : > { %v3967_v7 = vld [vmem:[%s4713_s13 + $0x5d4] ss:$8 sps:$4 sm:$0xff]  }
 0x110   : > { %3058 = vmatpush2.bf16.msra.mxu0 %v3877_v8  ;;  %3099 = vmatpush2.bf16.msra.mxu1 %v3880_v9  ;;  %v3962_v8 = vld [vmem:[%s4713_s13 + $0x4d0] ss:$8 sps:$4 sm:$0xff]  }
 0x111   : > { %3059 = vmatprep.subr.bf16.mxu0 %v3885_v10  ;;  %3100 = vmatprep.subr.bf16.mxu1 %v3888_v11  ;;  %v3965_v9 = vld [vmem:[%s4713_s13 + $0x5d0] ss:$8 sps:$4 sm:$0xff]   ;;  %v3970_v10 = vld [vmem:[%s4713_s13 + $0x4c4] ss:$8 sps:$4 sm:$0xff]  }
 0x112   : > { %v3973_v11 = vld [vmem:[%s4713_s13 + $0x5c4] ss:$8 sps:$4 sm:$0xff]  }
 0x114   : > { %3060 = vmatpush2.bf16.msra.mxu0 %v3883_v13  ;;  %3101 = vmatpush2.bf16.msra.mxu1 %v3886_v14  ;;  %v3968_v13 = vld [vmem:[%s4713_s13 + $0x4c0] ss:$8 sps:$4 sm:$0xff]  }
 0x115   : > { %3061 = vmatprep.subr.bf16.mxu0 %v3891_v15  ;;  %3102 = vmatprep.subr.bf16.mxu1 %v3894_v18  ;;  %v3971_v14 = vld [vmem:[%s4713_s13 + $0x5c0] ss:$8 sps:$4 sm:$0xff]   ;;  %v3976_v15 = vld [vmem:[%s4713_s13 + $0x4b4] ss:$8 sps:$4 sm:$0xff]  }
 0x116   : > { %v3979_v18 = vld [vmem:[%s4713_s13 + $0x5b4] ss:$8 sps:$4 sm:$0xff]  }
 0x118   : > { %3062 = vmatpush2.bf16.msra.mxu0 %v3889_v19  ;;  %3103 = vmatpush2.bf16.msra.mxu1 %v3892_v20  ;;  %v3974_v19 = vld [vmem:[%s4713_s13 + $0x4b0] ss:$8 sps:$4 sm:$0xff]  }
 0x119   : > { %3063 = vmatprep.subr.bf16.mxu0 %v3897_v23  ;;  %3104 = vmatprep.subr.bf16.mxu1 %v3900_v24  ;;  %v3977_v20 = vld [vmem:[%s4713_s13 + $0x5b0] ss:$8 sps:$4 sm:$0xff]   ;;  %v3982_v23 = vld [vmem:[%s4713_s13 + $0x4a4] ss:$8 sps:$4 sm:$0xff]  }
 0x11a   : > { %v3985_v24 = vld [vmem:[%s4713_s13 + $0x5a4] ss:$8 sps:$4 sm:$0xff]  }
 0x11c   : > { %3064 = vmatpush2.bf16.msra.mxu0 %v3895_v25  ;;  %3105 = vmatpush2.bf16.msra.mxu1 %v3898_v26  ;;  %v3980_v25 = vld [vmem:[%s4713_s13 + $0x4a0] ss:$8 sps:$4 sm:$0xff]  }
 0x11d   : > { %3115 = vmatprep.subr.bf16.mxu0 %v3904_v27  ;;  %3156 = vmatprep.subr.bf16.mxu1 %v3907_v28  ;;  %v3983_v26 = vld [vmem:[%s4713_s13 + $0x5a0] ss:$8 sps:$4 sm:$0xff]   ;;  %v3988_v27 = vld [vmem:[%s4713_s13 + $0x494] ss:$8 sps:$4 sm:$0xff]  }
 0x11e   : > { %v3991_v28 = vld [vmem:[%s4713_s13 + $0x594] ss:$8 sps:$4 sm:$0xff]  }
 0x11f   : > { %3066 = vmatmul.mubr.bf16.vlgmr.msra.gmra.mxu0 %v4798_v21  ;;  %3107 = vmatmul.mubr.bf16.vlgmr.msra.gmra.mxu1 %v4801_v22  ;;  %v3919_v21 = vld [vmem:[%s4713_s13 + $0x554] ss:$8 sps:$4 sm:$0xff]   ;;  %v1637_v22 = vcombine.high %v4889_v36, %v4889_v36 }
 0x120   : > { %3116 = vmatpush1.bf16.msra.mxu0 %v3902_v29  ;;  %3157 = vmatpush1.bf16.msra.mxu1 %v3905_v30  ;;  %v1326_v29 = vld [vmem:[%s5059_s0 + $0x18] sm:$0xff] }
 0x121   : > { %3117 = vmatprep.subr.bf16.mxu0 %v3910_v32  ;;  %3158 = vmatprep.subr.bf16.mxu1 %v3913_v33  ;;  %v3986_v30 = vld [vmem:[%s4713_s13 + $0x490] ss:$8 sps:$4 sm:$0xff]   ;;  %v3994_v32 = vld [vmem:[%s4713_s13 + $0x484] ss:$8 sps:$4 sm:$0xff]   ;;  %v1638_v17 = vcombine.high %v1326_v29, %v1326_v29 }
 0x122   : > { %3147 = vmatprep.mubr.bf16.mxu0 %v1636_v35  ;;  %3188 = vmatprep.mubr.bf16.mxu1 %v1637_v22  ;;  %v3997_v33 = vld [vmem:[%s4713_s13 + $0x584] ss:$8 sps:$4 sm:$0xff]   ;;  %v3995_v35 = vld [vmem:[%s4713_s13 + $0x580] ss:$8 sps:$4 sm:$0xff]  }
 0x123   : > { %v4959_v22 = vrot.slane %v1638_v17, %v4720_v12  ;;  %v4077_v17 = vld [vmem:[%s4713_s13 + $0x6a0] ss:$8 sps:$4 sm:$0xff]  }
 0x124   : > { %3118 = vmatpush1.bf16.msra.mxu0 %v3908_v34  ;;  %3159 = vmatpush1.bf16.msra.mxu1 %v3911_v37  ;;  %v3992_v34 = vld [vmem:[%s4713_s13 + $0x480] ss:$8 sps:$4 sm:$0xff]   ;;  %v4001_v37 = vld [vmem:[%s4713_s13 + $0x674] ss:$8 sps:$4 sm:$0xff]  }
 0x125   : > { %3119 = vmatprep.subr.bf16.mxu0 %v3916_v38  ;;  %3160 = vmatprep.subr.bf16.mxu1 %v3919_v21  ;;  %v4004_v38 = vld [vmem:[%s4713_s13 + $0x774] ss:$8 sps:$4 sm:$0xff]   ;;  %v4956_v21 = vrot.slane %v1326_v29, %v4720_v12  ;;  %v4005_v12 = vld [vmem:[%s4713_s13 + $0x660] ss:$8 sps:$4 sm:$0xff]  }
 0x126   : > { %v4076_v29 = vld [vmem:[%s4713_s13 + $0x7b4] ss:$8 sps:$4 sm:$0xff]  }
 0x128   : > { %3120 = vmatpush1.bf16.msra.mxu0 %v3914_v39  ;;  %3161 = vmatpush1.bf16.msra.mxu1 %v3917_v40  ;;  %v3999_v39 = vld [vmem:[%s4713_s13 + $0x670] ss:$8 sps:$4 sm:$0xff]  }
 0x129   : > { %3121 = vmatprep.subr.bf16.mxu0 %v3922_v41  ;;  %3162 = vmatprep.subr.bf16.mxu1 %v3925_v42  ;;  %v4002_v40 = vld [vmem:[%s4713_s13 + $0x770] ss:$8 sps:$4 sm:$0xff]   ;;  %v4007_v41 = vld [vmem:[%s4713_s13 + $0x664] ss:$8 sps:$4 sm:$0xff]  }
 0x12a   : > { %v4010_v42 = vld [vmem:[%s4713_s13 + $0x764] ss:$8 sps:$4 sm:$0xff]  }
 0x12c   : > { %3122 = vmatpush1.bf16.msra.mxu0 %v3920_v43  ;;  %3163 = vmatpush1.bf16.msra.mxu1 %v3923_v44  ;;  %v1653_v43 = vcombine.high %v4956_v21, %v4956_v21  ;;  %v1654_v44 = vcombine.high %v4959_v22, %v4959_v22 }
 0x12d   : > { %3123 = vmatprep.subr.bf16.mxu0 %v3928_v45  ;;  %3164 = vmatprep.subr.bf16.mxu1 %v3931_v46  ;;  %v4008_v45 = vld [vmem:[%s4713_s13 + $0x760] ss:$8 sps:$4 sm:$0xff]   ;;  %v4013_v46 = vld [vmem:[%s4713_s13 + $0x654] ss:$8 sps:$4 sm:$0xff]  }
 0x130   : > { %3124 = vmatpush1.bf16.msra.mxu0 %v3926_v47  ;;  %3165 = vmatpush1.bf16.msra.mxu1 %v3929_v48  ;;  %v4016_v47 = vld [vmem:[%s4713_s13 + $0x754] ss:$8 sps:$4 sm:$0xff]   ;;  %v4011_v48 = vld [vmem:[%s4713_s13 + $0x650] ss:$8 sps:$4 sm:$0xff]  }
 0x131   : > { %3125 = vmatprep.subr.bf16.mxu0 %v3934_v49  ;;  %3166 = vmatprep.subr.bf16.mxu1 %v3937_v50  ;;  %v4022_v49 = vld [vmem:[%s4713_s13 + $0x744] ss:$8 sps:$4 sm:$0xff]   ;;  %v3677_v50 = vld [vmem:[#allocation2] ss:$0 sm:$0xff] }
 0x134   : > { %3126 = vmatpush1.bf16.msra.mxu0 %v3932_v51  ;;  %3167 = vmatpush1.bf16.msra.mxu1 %v3935_v52  ;;  %v4121_v51 = vmov 0   ;;  %v4017_v52 = vld [vmem:[%s4713_s13 + $0x640] ss:$8 sps:$4 sm:$0xff]  }
 0x135   : > { %3127 = vmatprep.subr.bf16.mxu0 %v3940_v53  ;;  %3168 = vmatprep.subr.bf16.mxu1 %v3943_v54  ;;  %v4020_v53 = vld [vmem:[%s4713_s13 + $0x740] ss:$8 sps:$4 sm:$0xff]   ;;  %v4025_v54 = vld [vmem:[%s4713_s13 + $0x634] ss:$8 sps:$4 sm:$0xff]  }
 0x136   : > { %3707 = vset.pattern.permute.xlu0 %v4121_v51 }
 0x137   : > { %3316 = vperm.xlu0 %3707, %v3677_v50  }
 0x138   : > { %3128 = vmatpush1.bf16.msra.mxu0 %v3938_v55  ;;  %3169 = vmatpush1.bf16.msra.mxu1 %v3941_v56  ;;  %v4028_v55 = vld [vmem:[%s4713_s13 + $0x734] ss:$8 sps:$4 sm:$0xff]   ;;  %v4023_v56 = vld [vmem:[%s4713_s13 + $0x630] ss:$8 sps:$4 sm:$0xff]  }
 0x139   : > { %3129 = vmatprep.subr.bf16.mxu0 %v3946_v57  ;;  %3170 = vmatprep.subr.bf16.mxu1 %v3949_v58  ;;  %v4026_v57 = vld [vmem:[%s4713_s13 + $0x730] ss:$8 sps:$4 sm:$0xff]   ;;  %v4031_v58 = vld [vmem:[%s4713_s13 + $0x624] ss:$8 sps:$4 sm:$0xff]  }
 0x13c   : > { %3130 = vmatpush1.bf16.msra.mxu0 %v3944_v59  ;;  %3171 = vmatpush1.bf16.msra.mxu1 %v3947_v60  ;;  %v4034_v59 = vld [vmem:[%s4713_s13 + $0x724] ss:$8 sps:$4 sm:$0xff]   ;;  %v4029_v60 = vld [vmem:[%s4713_s13 + $0x620] ss:$8 sps:$4 sm:$0xff]  }
 0x13d   : > { %3131 = vmatprep.subr.bf16.mxu0 %v3952_v61  ;;  %3172 = vmatprep.subr.bf16.mxu1 %v3955_v62  ;;  %v4032_v61 = vld [vmem:[%s4713_s13 + $0x720] ss:$8 sps:$4 sm:$0xff]   ;;  %v4037_v62 = vld [vmem:[%s4713_s13 + $0x614] ss:$8 sps:$4 sm:$0xff]  }
 0x140   : > { %3132 = vmatpush2.bf16.msra.mxu0 %v3950_v63  ;;  %3173 = vmatpush2.bf16.msra.mxu1 %v3953_v0  ;;  %v4040_v63 = vld [vmem:[%s4713_s13 + $0x714] ss:$8 sps:$4 sm:$0xff]   ;;  %v4035_v0 = vld [vmem:[%s4713_s13 + $0x610] ss:$8 sps:$4 sm:$0xff]  }
 0x141   : > { %3133 = vmatprep.subr.bf16.mxu0 %v3958_v1  ;;  %3174 = vmatprep.subr.bf16.mxu1 %v3961_v2  ;;  %v4038_v1 = vld [vmem:[%s4713_s13 + $0x710] ss:$8 sps:$4 sm:$0xff]   ;;  %v4043_v2 = vld [vmem:[%s4713_s13 + $0x604] ss:$8 sps:$4 sm:$0xff]  }
 0x144   : > { %3134 = vmatpush2.bf16.msra.mxu0 %v3956_v3  ;;  %3175 = vmatpush2.bf16.msra.mxu1 %v3959_v4  ;;  %v4046_v3 = vld [vmem:[%s4713_s13 + $0x704] ss:$8 sps:$4 sm:$0xff]   ;;  %v4041_v4 = vld [vmem:[%s4713_s13 + $0x600] ss:$8 sps:$4 sm:$0xff]  }
 0x145   : > { %3135 = vmatprep.subr.bf16.mxu0 %v3964_v6  ;;  %3176 = vmatprep.subr.bf16.mxu1 %v3967_v7  ;;  %v4044_v6 = vld [vmem:[%s4713_s13 + $0x700] ss:$8 sps:$4 sm:$0xff]   ;;  %v4049_v7 = vld [vmem:[%s4713_s13 + $0x6f4] ss:$8 sps:$4 sm:$0xff]  }
 0x148   : > { %3136 = vmatpush2.bf16.msra.mxu0 %v3962_v8  ;;  %3177 = vmatpush2.bf16.msra.mxu1 %v3965_v9  ;;  %v4052_v8 = vld [vmem:[%s4713_s13 + $0x7f4] ss:$8 sps:$4 sm:$0xff]   ;;  %v4047_v9 = vld [vmem:[%s4713_s13 + $0x6f0] ss:$8 sps:$4 sm:$0xff]  }
 0x149   : > { %3137 = vmatprep.subr.bf16.mxu0 %v3970_v10  ;;  %3178 = vmatprep.subr.bf16.mxu1 %v3973_v11  ;;  %v4050_v10 = vld [vmem:[%s4713_s13 + $0x7f0] ss:$8 sps:$4 sm:$0xff]   ;;  %v4055_v11 = vld [vmem:[%s4713_s13 + $0x6e4] ss:$8 sps:$4 sm:$0xff]  }
 0x14c   : > { %3138 = vmatpush2.bf16.msra.mxu0 %v3968_v13  ;;  %3179 = vmatpush2.bf16.msra.mxu1 %v3971_v14  ;;  %v4058_v13 = vld [vmem:[%s4713_s13 + $0x7e4] ss:$8 sps:$4 sm:$0xff]   ;;  %v4053_v14 = vld [vmem:[%s4713_s13 + $0x6e0] ss:$8 sps:$4 sm:$0xff]  }
 0x14d   : > { %3139 = vmatprep.subr.bf16.mxu0 %v3976_v15  ;;  %3180 = vmatprep.subr.bf16.mxu1 %v3979_v18  ;;  %v4056_v15 = vld [vmem:[%s4713_s13 + $0x7e0] ss:$8 sps:$4 sm:$0xff]   ;;  %v4061_v18 = vld [vmem:[%s4713_s13 + $0x6d4] ss:$8 sps:$4 sm:$0xff]  }
 0x150   : > { %3140 = vmatpush2.bf16.msra.mxu0 %v3974_v19  ;;  %3181 = vmatpush2.bf16.msra.mxu1 %v3977_v20  ;;  %v4064_v19 = vld [vmem:[%s4713_s13 + $0x7d4] ss:$8 sps:$4 sm:$0xff]   ;;  %v4059_v20 = vld [vmem:[%s4713_s13 + $0x6d0] ss:$8 sps:$4 sm:$0xff]  }
 0x151   : > { %3141 = vmatprep.subr.bf16.mxu0 %v3982_v23  ;;  %3182 = vmatprep.subr.bf16.mxu1 %v3985_v24  ;;  %v4062_v23 = vld [vmem:[%s4713_s13 + $0x7d0] ss:$8 sps:$4 sm:$0xff]   ;;  %v4067_v24 = vld [vmem:[%s4713_s13 + $0x6c4] ss:$8 sps:$4 sm:$0xff]  }
 0x154   : > { %3142 = vmatpush2.bf16.msra.mxu0 %v3980_v25  ;;  %3183 = vmatpush2.bf16.msra.mxu1 %v3983_v26  ;;  %v4070_v25 = vld [vmem:[%s4713_s13 + $0x7c4] ss:$8 sps:$4 sm:$0xff]   ;;  %v4065_v26 = vld [vmem:[%s4713_s13 + $0x6c0] ss:$8 sps:$4 sm:$0xff]  }
 0x155   : > { %3143 = vmatprep.subr.bf16.mxu0 %v3988_v27  ;;  %3184 = vmatprep.subr.bf16.mxu1 %v3991_v28  ;;  %v4068_v27 = vld [vmem:[%s4713_s13 + $0x7c0] ss:$8 sps:$4 sm:$0xff]   ;;  %v4073_v28 = vld [vmem:[%s4713_s13 + $0x6b4] ss:$8 sps:$4 sm:$0xff]  }
 0x158   : > { %3144 = vmatpush2.bf16.msra.mxu0 %v3986_v30  ;;  %3185 = vmatpush2.bf16.msra.mxu1 %v3989_v31  ;;  %v4071_v30 = vld [vmem:[%s4713_s13 + $0x6b0] ss:$8 sps:$4 sm:$0xff]  }
 0x159   : > { %3145 = vmatprep.subr.bf16.mxu0 %v3994_v32  ;;  %3186 = vmatprep.subr.bf16.mxu1 %v3997_v33  ;;  %v4074_v31 = vld [vmem:[%s4713_s13 + $0x7b0] ss:$8 sps:$4 sm:$0xff]   ;;  %v4079_v32 = vld [vmem:[%s4713_s13 + $0x6a4] ss:$8 sps:$4 sm:$0xff]  }
 0x15a   : > { %v4082_v33 = vld [vmem:[%s4713_s13 + $0x7a4] ss:$8 sps:$4 sm:$0xff]  }
 0x15c   : > { %3146 = vmatpush2.bf16.msra.mxu0 %v3992_v34  ;;  %3187 = vmatpush2.bf16.msra.mxu1 %v3995_v35  ;;  %v4080_v34 = vld [vmem:[%s4713_s13 + $0x7a0] ss:$8 sps:$4 sm:$0xff]   ;;  %v4085_v35 = vld [vmem:[%s4713_s13 + $0x694] ss:$8 sps:$4 sm:$0xff]  }
 0x15d   : > { %3197 = vmatprep.subr.bf16.mxu0 %v4001_v37  ;;  %3238 = vmatprep.subr.bf16.mxu1 %v4004_v38  ;;  %v4088_v37 = vld [vmem:[%s4713_s13 + $0x794] ss:$8 sps:$4 sm:$0xff]   ;;  %v4083_v38 = vld [vmem:[%s4713_s13 + $0x690] ss:$8 sps:$4 sm:$0xff]  }
 0x15f   : > { %3148 = vmatmul.mubr.bf16.vlgmr.msra.gmra.mxu0 %v4881_v16  ;;  %3189 = vmatmul.mubr.bf16.vlgmr.msra.gmra.mxu1 %v4889_v36  ;;  %v4014_v16 = vld [vmem:[%s4713_s13 + $0x750] ss:$8 sps:$4 sm:$0xff]   ;;  %v4019_v36 = vld [vmem:[%s4713_s13 + $0x644] ss:$8 sps:$4 sm:$0xff]  }
 0x160   : > { %3198 = vmatpush1.bf16.msra.mxu0 %v3999_v39  ;;  %3239 = vmatpush1.bf16.msra.mxu1 %v4002_v40  ;;  %v4086_v39 = vld [vmem:[%s4713_s13 + $0x790] ss:$8 sps:$4 sm:$0xff]   ;;  %v4091_v40 = vld [vmem:[%s4713_s13 + $0x684] ss:$8 sps:$4 sm:$0xff]  }
 0x161   : > { %3199 = vmatprep.subr.bf16.mxu0 %v4007_v41  ;;  %3240 = vmatprep.subr.bf16.mxu1 %v4010_v42  ;;  %v4094_v41 = vld [vmem:[%s4713_s13 + $0x784] ss:$8 sps:$4 sm:$0xff]   ;;  %v4089_v42 = vld [vmem:[%s4713_s13 + $0x680] ss:$8 sps:$4 sm:$0xff]  }
 0x162   : > { %3229 = vmatprep.mubr.bf16.mxu0 %v1653_v43  ;;  %3270 = vmatprep.mubr.bf16.mxu1 %v1654_v44  ;;  %v4092_v43 = vld [vmem:[%s4713_s13 + $0x780] ss:$8 sps:$4 sm:$0xff]  }
 0x164   : > { %3200 = vmatpush1.bf16.msra.mxu0 %v4005_v12  ;;  %3241 = vmatpush1.bf16.msra.mxu1 %v4008_v45 }
 0x165   : > { %3201 = vmatprep.subr.bf16.mxu0 %v4013_v46  ;;  %3242 = vmatprep.subr.bf16.mxu1 %v4016_v47 }
 0x168   : > { %3202 = vmatpush1.bf16.msra.mxu0 %v4011_v48  ;;  %3243 = vmatpush1.bf16.msra.mxu1 %v4014_v16 }
 0x169   : > { %3203 = vmatprep.subr.bf16.mxu0 %v4019_v36  ;;  %3244 = vmatprep.subr.bf16.mxu1 %v4022_v49 }
 0x16c   : > { %3204 = vmatpush1.bf16.msra.mxu0 %v4017_v52  ;;  %3245 = vmatpush1.bf16.msra.mxu1 %v4020_v53 }
 0x16d   : > { %3205 = vmatprep.subr.bf16.mxu0 %v4025_v54  ;;  %3246 = vmatprep.subr.bf16.mxu1 %v4028_v55 }
 0x170   : > { %3206 = vmatpush1.bf16.msra.mxu0 %v4023_v56  ;;  %3247 = vmatpush1.bf16.msra.mxu1 %v4026_v57 }
 0x171   : > { %3207 = vmatprep.subr.bf16.mxu0 %v4031_v58  ;;  %3248 = vmatprep.subr.bf16.mxu1 %v4034_v59 }
 0x174   : > { %3208 = vmatpush1.bf16.msra.mxu0 %v4029_v60  ;;  %3249 = vmatpush1.bf16.msra.mxu1 %v4032_v61 }
 0x175   : > { %3209 = vmatprep.subr.bf16.mxu0 %v4037_v62  ;;  %3250 = vmatprep.subr.bf16.mxu1 %v4040_v63 }
 0x178   : > { %3210 = vmatpush1.bf16.msra.mxu0 %v4035_v0  ;;  %3251 = vmatpush1.bf16.msra.mxu1 %v4038_v1 }
 0x179   : > { %3211 = vmatprep.subr.bf16.mxu0 %v4043_v2  ;;  %3252 = vmatprep.subr.bf16.mxu1 %v4046_v3 }
 0x17c   : > { %3212 = vmatpush1.bf16.msra.mxu0 %v4041_v4  ;;  %3253 = vmatpush1.bf16.msra.mxu1 %v4044_v6 }
 0x17d   : > { %3213 = vmatprep.subr.bf16.mxu0 %v4049_v7  ;;  %3254 = vmatprep.subr.bf16.mxu1 %v4052_v8 }
 0x180   : > { %3214 = vmatpush2.bf16.msra.mxu0 %v4047_v9  ;;  %3255 = vmatpush2.bf16.msra.mxu1 %v4050_v10  ;;  %v3283_v9 = vsub.s32 0, %v4711_v5  ;;  %v3279_v10 = vld [vmem:[%s1310_s27] sm:$0x3] }
 0x181   : > { %3215 = vmatprep.subr.bf16.mxu0 %v4055_v11  ;;  %3256 = vmatprep.subr.bf16.mxu1 %v4058_v13  ;;  %v3287_v11 = vsub.s32 1, %v4711_v5 }
 0x184   : > { %3216 = vmatpush2.bf16.msra.mxu0 %v4053_v14  ;;  %3257 = vmatpush2.bf16.msra.mxu1 %v4056_v15  ;;  %v3293_v15 = vld [vmem:[%s1315_s30] sm:$0x3] }
 0x185   : > { %3217 = vmatprep.subr.bf16.mxu0 %v4061_v18  ;;  %3258 = vmatprep.subr.bf16.mxu1 %v4064_v19 }
 0x188   : > { %3218 = vmatpush2.bf16.msra.mxu0 %v4059_v20  ;;  %3259 = vmatpush2.bf16.msra.mxu1 %v4062_v23  ;;  %v3284_v20 = vrot.slane %v3279_v10, %v3283_v9 }
 0x189   : > { %3219 = vmatprep.subr.bf16.mxu0 %v4067_v24  ;;  %3260 = vmatprep.subr.bf16.mxu1 %v4070_v25 }
 0x18c   : > { %3220 = vmatpush2.bf16.msra.mxu0 %v4065_v26  ;;  %3261 = vmatpush2.bf16.msra.mxu1 %v4068_v27  ;;  %v3298_v26 = vrot.slane %v3293_v15, %v3283_v9 }
 0x18d   : > { %3221 = vmatprep.subr.bf16.mxu0 %v4073_v28  ;;  %3262 = vmatprep.subr.bf16.mxu1 %v4076_v29  ;;  %v3288_v28 = vrot.slane %v3279_v10, %v3287_v11 }
 0x190   : > { %3222 = vmatpush2.bf16.msra.mxu0 %v4071_v30  ;;  %3263 = vmatpush2.bf16.msra.mxu1 %v4074_v31 }
 0x191   : > { %3223 = vmatprep.subr.bf16.mxu0 %v4079_v32  ;;  %3264 = vmatprep.subr.bf16.mxu1 %v4082_v33  ;;  %v3302_v33 = vrot.slane %v3293_v15, %v3287_v11 }
 0x194   : > { %3224 = vmatpush2.bf16.msra.mxu0 %v4077_v17  ;;  %3265 = vmatpush2.bf16.msra.mxu1 %v4080_v34 }
 0x195   : > { %3225 = vmatprep.subr.bf16.mxu0 %v4085_v35  ;;  %3266 = vmatprep.subr.bf16.mxu1 %v4088_v37 }
 0x198   : > { %3226 = vmatpush2.bf16.msra.mxu0 %v4083_v38  ;;  %3267 = vmatpush2.bf16.msra.mxu1 %v4086_v39 }
 0x199   : > { %3227 = vmatprep.subr.bf16.mxu0 %v4091_v40  ;;  %3268 = vmatprep.subr.bf16.mxu1 %v4094_v41 }
 0x19c   : > { %3228 = vmatpush2.bf16.msra.mxu0 %v4089_v42  ;;  %3269 = vmatpush2.bf16.msra.mxu1 %v4092_v43 }
 0x19f   : > { %v2985_v44 = vpop.f32.mrf.mxu0  ;;  %v3026_v12 = vpop.f32.mrf.mxu1  ;;  %3230 = vmatmul.mubr.bf16.vlgmr.msra.gmra.mxu0 %v4956_v21  ;;  %3271 = vmatmul.mubr.bf16.vlgmr.msra.gmra.mxu1 %v4959_v22 }
 0x1a0   : > { %v3027_v45 = vadd.f32 %v3026_v12, %v2985_v44 }
 0x1a1   : > { %v2987_v46 = vpop.f32.mrf.mxu0  ;;  %v3028_v47 = vpop.f32.mrf.mxu1 }
 0x1a2   : > { %v3029_v48 = vadd.f32 %v3028_v47, %v2987_v46 }
 0x1a3   : > { %v2989_v16 = vpop.f32.mrf.mxu0  ;;  %v3030_v36 = vpop.f32.mrf.mxu1 }
 0x1a5   : > { %v2990_v49 = vpop.f32.mrf.mxu0  ;;  %v3031_v50 = vpop.f32.mrf.mxu1 }
 0x1b2   : > { %v3317_v17 = vpop.permute.xlu0 %3316 }
 0x1df   : > { %v3067_v51 = vpop.f32.mrf.mxu0  ;;  %v3108_v52 = vpop.f32.mrf.mxu1 }
 0x1e0   : > { %v3068_v53 = vadd.f32 %v3067_v51, %v3027_v45 }
 0x1e1   : > { %v3069_v54 = vpop.f32.mrf.mxu0  ;;  %v3110_v55 = vpop.f32.mrf.mxu1 }
 0x1e2   : > { %v3109_v56 = vadd.f32 %v3108_v52, %v3068_v53  ;;  %v3070_v57 = vadd.f32 %v3069_v54, %v3029_v48 }
 0x1e3   : > { %v3071_v58 = vpop.f32.mrf.mxu0  ;;  %v3112_v21 = vpop.f32.mrf.mxu1 }
 0x1e4   : > { %v3111_v59 = vadd.f32 %v3110_v55, %v3070_v57 }
 0x1e5   : > { %v3072_v22 = vpop.f32.mrf.mxu0  ;;  %v3113_v60 = vpop.f32.mrf.mxu1 }
 0x21f   : > { %v3149_v61 = vpop.f32.mrf.mxu0  ;;  %v3190_v62 = vpop.f32.mrf.mxu1 }
 0x220   : > { %v3150_v63 = vadd.f32 %v3149_v61, %v3109_v56 }
 0x221   : > { %v3151_v0 = vpop.f32.mrf.mxu0  ;;  %v3192_v1 = vpop.f32.mrf.mxu1 }
 0x222   : > { %v3191_v2 = vadd.f32 %v3190_v62, %v3150_v63  ;;  %v3152_v8 = vadd.f32 %v3151_v0, %v3111_v59 }
 0x223   : > { %v3153_v3 = vpop.f32.mrf.mxu0  ;;  %v3194_v4 = vpop.f32.mrf.mxu1 }
 0x224   : > { %v3193_v18 = vadd.f32 %v3192_v1, %v3152_v8 }
 0x225   : > { %v3154_v6 = vpop.f32.mrf.mxu0  ;;  %v3195_v7 = vpop.f32.mrf.mxu1 }
 0x25f   : > { %v3231_v13 = vpop.f32.mrf.mxu0  ;;  %v3272_v14 = vpop.f32.mrf.mxu1 }
 0x260   : > { %v3232_v19 = vadd.f32 %v3231_v13, %v3191_v2 }
 0x261   : > { %v3233_v23 = vpop.f32.mrf.mxu0  ;;  %v3274_v24 = vpop.f32.mrf.mxu1 }
 0x262   : > { %v3273_v25 = vadd.f32 %v3272_v14, %v3232_v19  ;;  %v3234_v27 = vadd.f32 %v3233_v23, %v3193_v18 }
 0x263   : > { %v3235_v29 = vpop.f32.mrf.mxu0  ;;  %v3276_v30 = vpop.f32.mrf.mxu1 }
 0x264   : > { %v3291_v31 = vmul.f32 %v3284_v20, %v3273_v25  ;;  %v3275_v32 = vadd.f32 %v3274_v24, %v3234_v27 }
 0x265   : > { %v3236_v5 = vpop.f32.mrf.mxu0  ;;  %v3277_v34 = vpop.f32.mrf.mxu1 }
 0x266   : > { %v3305_v35 = vadd.f32 %v3298_v26, %v3291_v31  ;;  %v3292_v37 = vmul.f32 %v3288_v28, %v3275_v32 }
 0x268   : > { %v3306_v38 = vadd.f32 %v3302_v33, %v3292_v37  ;;  %v3319_v39 = vmul.f32 %v3317_v17, %v3305_v35  ;;  %vm3308_vm0 = vcmp.ge.f32.partialorder %v3305_v35, 0.0 }
 0x26a   : > { %vm3309_vm1 = vcmp.ge.f32.partialorder %v3306_v38, 0.0  ;;  %v3320_v40 = vmul.f32 %v3317_v17, %v3306_v38  ;;  %v3321_v41 = vsel %vm3308_vm0, %v3305_v35, %v3319_v39 }
 0x26c   : > { %v3322_v42 = vsel %vm3309_vm1, %v3306_v38, %v3320_v40 }
 0x26d   : > { %v3325_v43 = vcombine.low %v3321_v41, %v3322_v42 }
 0x26f   : > { %3327 = vst [vmem:[%s1321_s7] sm:$0xff] %v3325_v43 }
 0x270 PF: > { %p14_p9 = scmp.ge.s32.totalorder %s4172_s23, 4   ;;  %s5065_s20 = smov %s4114_s21 }
 0x271   : > { %s5066_s21 = smov %s4181_s26  ;;  %s5067_s22 = smov %s4172_s23 }
 0x272   :  { %16 = sbr.rel (!%p14_p9) target bundleno = 5 (0x5), region = 119 }

</bundles_post_ra>
